<compile_context>
chip_gen: v7x
topology: tpu7x:2x2x1
jax: 0.10.0
libtpu: 0.0.40
codegen_flags: <defaults>
</compile_context>

<pallas_src>
import functools

import jax
import jax.numpy as jnp
from jax import lax
from jax.experimental import pallas as pl
from jax.experimental.pallas import tpu as pltpu


def fused_linear_add_ln_kernel(x_ref, w_ref, b_ref, res_ref,
                               gamma_ref, beta_ref, o_ref, *, eps):
    # x_ref:      (TM, H_in)   input rows (native dtype -> MXU)
    # w_ref:      (H_out, H_in) weight in PyTorch (out, in) layout, resident in VMEM
    # b_ref:      (1, H_out)   linear bias
    # res_ref:    (TM, H_out)  residual rows (x364)
    # gamma/beta: (1, H_out)   LayerNorm affine params
    x = x_ref[...]
    w = w_ref[...]

    # y = x @ W^T  (contract the "in" dims of both operands); f32 accumulator.
    y = lax.dot_general(
        x, w,
        dimension_numbers=(((1,), (1,)), ((), ())),
        preferred_element_type=jnp.float32,
    )

    # bias + dropout(p=0.1, eval -> identity) + residual, in f32.
    y = y + b_ref[...].astype(jnp.float32) + res_ref[...].astype(jnp.float32)

    # LayerNorm over the feature axis.
    mean = jnp.mean(y, axis=-1, keepdims=True)
    diff = y - mean
    var = jnp.mean(diff * diff, axis=-1, keepdims=True)
    inv = lax.rsqrt(var + eps)
    out = diff * inv * gamma_ref[...].astype(jnp.float32) \
        + beta_ref[...].astype(jnp.float32)
    o_ref[...] = out.astype(o_ref.dtype)


def fused_view_linear_dropout_add_layernorm(x392, x364, weight, bias,
                                            gamma, beta, *, eps=1e-5, tm=256):
    B, S, Hh, Dh = x392.shape
    H = Hh * Dh
    assert x364.shape == (B, S, H)
    Hout, Hin = weight.shape
    assert Hin == H

    N = B * S
    x2d = x392.reshape(N, H)           # the .view(x395) step
    res2d = x364.reshape(N, H)

    # Pad the token axis to a multiple of the row tile; padded rows are
    # computed (harmless: LN of a constant row) and sliced off at the end.
    n_pad = (-N) % tm
    if n_pad:
        x2d = jnp.pad(x2d, ((0, n_pad), (0, 0)))
        res2d = jnp.pad(res2d, ((0, n_pad), (0, 0)))
    Np = N + n_pad
    grid = (Np // tm,)

    b2d = bias.reshape(1, Hout)
    g2d = gamma.reshape(1, Hout)
    be2d = beta.reshape(1, Hout)

    kernel = functools.partial(fused_linear_add_ln_kernel, eps=eps)

    itemsize = jnp.dtype(x364.dtype).itemsize
    cost = pl.CostEstimate(
        flops=2 * Np * Hout * Hin + 8 * Np * Hout,
        transcendentals=Np,
        bytes_accessed=(3 * Np * H + Hout * Hin + 3 * Hout) * itemsize,
    )

    out = pl.pallas_call(
        kernel,
        out_shape=jax.ShapeDtypeStruct((Np, Hout), x364.dtype),
        grid_spec=pltpu.PrefetchScalarGridSpec(
            num_scalar_prefetch=0,
            grid=grid,
            in_specs=[
                pl.BlockSpec((tm, Hin), lambda i: (i, 0)),     # x rows
                pl.BlockSpec((Hout, Hin), lambda i: (0, 0)),   # weight (resident)
                pl.BlockSpec((1, Hout), lambda i: (0, 0)),     # bias
                pl.BlockSpec((tm, Hout), lambda i: (i, 0)),    # residual rows
                pl.BlockSpec((1, Hout), lambda i: (0, 0)),     # gamma
                pl.BlockSpec((1, Hout), lambda i: (0, 0)),     # beta
            ],
            out_specs=pl.BlockSpec((tm, Hout), lambda i: (i, 0)),
        ),
        compiler_params=pltpu.CompilerParams(
            dimension_semantics=("parallel",)),
        cost_estimate=cost,
    )(x2d, weight, b2d, res2d, g2d, be2d)

    if n_pad:
        out = out[:N]
    return out.reshape(B, S, Hout)


def reference(x392, x364, weight, bias, gamma, beta, eps=1e-5):
    B, S, Hh, Dh = x392.shape
    H = Hh * Dh
    x = x392.reshape(B, S, H)
    y = jnp.einsum("bsh,oh->bso", x, weight,
                   precision=lax.Precision.HIGHEST) + bias
    y = y + x364
    mean = jnp.mean(y, axis=-1, keepdims=True)
    var = jnp.mean((y - mean) ** 2, axis=-1, keepdims=True)
    yn = (y - mean) * lax.rsqrt(var + eps)
    return yn * gamma + beta


if __name__ == "__main__":
    # Shapes from the module spec:
    # x392: [1, 384, 12, 64], x364: [1, 384, 768], hidden = 12*64 = 768
    B, S, Hh, Dh = 1, 384, 12, 64
    H = Hh * Dh  # 768

    key = jax.random.PRNGKey(0)
    k1, k2, k3, k4, k5, k6 = jax.random.split(key, 6)

    x392 = jax.random.normal(k1, (B, S, Hh, Dh), dtype=jnp.float32)
    x364 = jax.random.normal(k2, (B, S, H), dtype=jnp.float32)

    # Deterministic parameter init (Linear + LayerNorm affine), PyTorch layouts.
    weight = jax.random.normal(k3, (H, H), dtype=jnp.float32) * 0.02  # (out, in)
    bias = jax.random.normal(k4, (H,), dtype=jnp.float32) * 0.02
    gamma = jnp.ones((H,), dtype=jnp.float32) + 0.01 * jax.random.normal(k5, (H,))
    beta = 0.01 * jax.random.normal(k6, (H,), dtype=jnp.float32)

    out = fused_view_linear_dropout_add_layernorm(
        x392, x364, weight, bias, gamma, beta, eps=1e-5, tm=256)
    out = jax.block_until_ready(out)

    ref = reference(x392, x364, weight, bias, gamma, beta)
    assert out.shape == (B, S, H)
    assert jnp.allclose(out, ref, atol=5e-4, rtol=5e-4), \
        f"max abs diff {jnp.max(jnp.abs(out - ref))}"
    print("KERNEL_OK")
</pallas_src>

<mosaic_0001>
module attributes {stable_mosaic.version = 11 : i64} {
  func.func @fused_linear_add_ln_kernel(%arg0: i32, %arg1: memref<256x768xf32, #tpu.memory_space<vmem>>, %arg2: memref<768x768xf32, #tpu.memory_space<vmem>>, %arg3: memref<1x768xf32, #tpu.memory_space<vmem>>, %arg4: memref<256x768xf32, #tpu.memory_space<vmem>>, %arg5: memref<1x768xf32, #tpu.memory_space<vmem>>, %arg6: memref<1x768xf32, #tpu.memory_space<vmem>>, %arg7: memref<256x768xf32, #tpu.memory_space<vmem>>) attributes {dimension_semantics = [#tpu.dimension_semantics<parallel>], iteration_bounds = array<i64: 2>, scalar_prefetch = 0 : i64, scratch_operands = 0 : i64, tpu.core_type = #tpu.core_type<tc>, window_params = [{transform_indices = @transform_0, window_bounds = array<i64: 256, 768>}, {pipeline_mode = #tpu.pipeline_mode<synchronous>, transform_indices = @transform_1, window_bounds = array<i64: 768, 768>}, {pipeline_mode = #tpu.pipeline_mode<synchronous>, transform_indices = @transform_2, window_bounds = array<i64: 1, 768>}, {transform_indices = @transform_3, window_bounds = array<i64: 256, 768>}, {pipeline_mode = #tpu.pipeline_mode<synchronous>, transform_indices = @transform_4, window_bounds = array<i64: 1, 768>}, {pipeline_mode = #tpu.pipeline_mode<synchronous>, transform_indices = @transform_5, window_bounds = array<i64: 1, 768>}, {transform_indices = @transform_6, window_bounds = array<i64: 256, 768>}]} {
    %c0 = arith.constant 0 : index
    %c0_0 = arith.constant 0 : index
    %0 = vector.load %arg1[%c0, %c0_0] : memref<256x768xf32, #tpu.memory_space<vmem>>, vector<256x768xf32>
    %c0_1 = arith.constant 0 : index
    %c0_2 = arith.constant 0 : index
    %1 = vector.load %arg2[%c0_1, %c0_2] : memref<768x768xf32, #tpu.memory_space<vmem>>, vector<768x768xf32>
    %cst = arith.constant dense<0.000000e+00> : vector<256x768xf32>
    %2 = tpu.matmul %0, %1, %cst {dimension_numbers = #tpu.dot_dimension_numbers<[1], [1], [0], [0], [0, 0, 1, 0], [], []>} : vector<256x768xf32>, vector<768x768xf32>, vector<256x768xf32> -> vector<256x768xf32>
    %c0_3 = arith.constant 0 : index
    %c0_4 = arith.constant 0 : index
    %3 = vector.load %arg3[%c0_3, %c0_4] : memref<1x768xf32, #tpu.memory_space<vmem>>, vector<1x768xf32>
    %4 = vector.broadcast %3 : vector<1x768xf32> to vector<256x768xf32>
    %5 = arith.addf %2, %4 : vector<256x768xf32>
    %c0_5 = arith.constant 0 : index
    %c0_6 = arith.constant 0 : index
    %6 = vector.load %arg4[%c0_5, %c0_6] : memref<256x768xf32, #tpu.memory_space<vmem>>, vector<256x768xf32>
    %7 = arith.addf %5, %6 : vector<256x768xf32>
    %cst_7 = arith.constant dense<0.000000e+00> : vector<256xf32>
    %8 = vector.multi_reduction <add>, %7, %cst_7 [1] : vector<256x768xf32> to vector<256xf32>
    %9 = vector.shape_cast %8 : vector<256xf32> to vector<256x1xf32>
    %cst_8 = arith.constant 7.680000e+02 : f32
    %10 = vector.broadcast %cst_8 : f32 to vector<256x1xf32>
    %11 = arith.divf %9, %10 : vector<256x1xf32>
    %12 = vector.broadcast %11 : vector<256x1xf32> to vector<256x768xf32>
    %13 = arith.subf %7, %12 : vector<256x768xf32>
    %14 = arith.mulf %13, %13 : vector<256x768xf32>
    %cst_9 = arith.constant dense<0.000000e+00> : vector<256xf32>
    %15 = vector.multi_reduction <add>, %14, %cst_9 [1] : vector<256x768xf32> to vector<256xf32>
    %16 = vector.shape_cast %15 : vector<256xf32> to vector<256x1xf32>
    %cst_10 = arith.constant 7.680000e+02 : f32
    %17 = vector.broadcast %cst_10 : f32 to vector<256x1xf32>
    %18 = arith.divf %16, %17 : vector<256x1xf32>
    %cst_11 = arith.constant 9.99999974E-6 : f32
    %19 = vector.broadcast %cst_11 : f32 to vector<256x1xf32>
    %20 = arith.addf %18, %19 : vector<256x1xf32>
    %21 = math.rsqrt %20 : vector<256x1xf32>
    %22 = vector.broadcast %21 : vector<256x1xf32> to vector<256x768xf32>
    %23 = arith.mulf %13, %22 : vector<256x768xf32>
    %c0_12 = arith.constant 0 : index
    %c0_13 = arith.constant 0 : index
    %24 = vector.load %arg5[%c0_12, %c0_13] : memref<1x768xf32, #tpu.memory_space<vmem>>, vector<1x768xf32>
    %25 = vector.broadcast %24 : vector<1x768xf32> to vector<256x768xf32>
    %26 = arith.mulf %23, %25 : vector<256x768xf32>
    %c0_14 = arith.constant 0 : index
    %c0_15 = arith.constant 0 : index
    %27 = vector.load %arg6[%c0_14, %c0_15] : memref<1x768xf32, #tpu.memory_space<vmem>>, vector<1x768xf32>
    %28 = vector.broadcast %27 : vector<1x768xf32> to vector<256x768xf32>
    %29 = arith.addf %26, %28 : vector<256x768xf32>
    %c0_16 = arith.constant 0 : index
    %c0_17 = arith.constant 0 : index
    %30 = vector.load %arg7[%c0_16, %c0_17] : memref<256x768xf32, #tpu.memory_space<vmem>>, vector<256x768xf32>
    tpu.vector_store %arg7[%c0_16, %c0_17], %29 {strides = array<i32>} : memref<256x768xf32, #tpu.memory_space<vmem>>, vector<256x768xf32>,
    return
  }
  func.func @transform_0(%arg0: i32) -> (i32, i32) {
    %c0_i32 = arith.constant 0 : i32
    %c0_i32_0 = arith.constant 0 : i32
    return %arg0, %c0_i32 : i32, i32
  }
  func.func @transform_1(%arg0: i32) -> (i32, i32) {
    %c0_i32 = arith.constant 0 : i32
    %c0_i32_0 = arith.constant 0 : i32
    %c0_i32_1 = arith.constant 0 : i32
    return %c0_i32, %c0_i32_0 : i32, i32
  }
  func.func @transform_2(%arg0: i32) -> (i32, i32) {
    %c0_i32 = arith.constant 0 : i32
    %c0_i32_0 = arith.constant 0 : i32
    %c0_i32_1 = arith.constant 0 : i32
    return %c0_i32, %c0_i32_0 : i32, i32
  }
  func.func @transform_3(%arg0: i32) -> (i32, i32) {
    %c0_i32 = arith.constant 0 : i32
    %c0_i32_0 = arith.constant 0 : i32
    return %arg0, %c0_i32 : i32, i32
  }
  func.func @transform_4(%arg0: i32) -> (i32, i32) {
    %c0_i32 = arith.constant 0 : i32
    %c0_i32_0 = arith.constant 0 : i32
    %c0_i32_1 = arith.constant 0 : i32
    return %c0_i32, %c0_i32_0 : i32, i32
  }
  func.func @transform_5(%arg0: i32) -> (i32, i32) {
    %c0_i32 = arith.constant 0 : i32
    %c0_i32_0 = arith.constant 0 : i32
    %c0_i32_1 = arith.constant 0 : i32
    return %c0_i32, %c0_i32_0 : i32, i32
  }
  func.func @transform_6(%arg0: i32) -> (i32, i32) {
    %c0_i32 = arith.constant 0 : i32
    %c0_i32_0 = arith.constant 0 : i32
    return %arg0, %c0_i32 : i32, i32
  }
}

</mosaic_0001>

<bundles_post_ra>
// kernel: tpu_custom_call.1
= control target key start
LH: loop header
LB: loop body
LE: loop exit
PB: predicated region body
PF: predicated region fallthrough
CT: control target
= control target key end

     0   :  { %s13173_s0 = inlined_call_operand.hbm [shape: f32[512,768], index: 0, kind: input, shape index: {}]   ;;  %s13174_s1 = inlined_call_operand.hbm [shape: f32[768,768], index: 1, kind: input, shape index: {}]   ;;  %s13175_s2 = inlined_call_operand.hbm [shape: f32[1,768], index: 2, kind: input, shape index: {}]   ;;  %s13176_s3 = inlined_call_operand.hbm [shape: f32[512,768], index: 3, kind: input, shape index: {}]   ;;  %s13177_s4 = inlined_call_operand.hbm [shape: f32[1,768], index: 4, kind: input, shape index: {}]   ;;  %s13178_s5 = inlined_call_operand.hbm [shape: f32[1,768], index: 5, kind: input, shape index: {}]   ;;  %s13179_s6 = inlined_call_operand.hbm [shape: f32[512,768], index: 6, kind: output, shape index: {}]  }
   0x1   :  { %13570 = sst [smem:[#allocation190_spill]] %s13173_s0 }
   0x2   :  { %13571 = sst [smem:[#allocation191_spill]] %s13174_s1 }
   0x3   :  { %13572 = sst [smem:[#allocation192_spill]] %s13175_s2 }
   0x4   :  { %11 = vsyncpa [#allocation3], 0 }
   0x5   :  { %13 = vsyncpa [#allocation3 + $0x1], 0 }
   0x6   :  { %14 = vsyncpa [#allocation6], 0 }
   0x7   :  { %15 = vsyncpa [#allocation9], 0 }
   0x8   :  { %17 = vsyncpa [#allocation9 + $0x1], 0 }
   0x9   :  { %18 = vsyncpa [#allocation12], 0 }
   0xa   :  { %19 = vsyncpa [#allocation4], 0 }
   0xb   :  { %21 = vsyncpa [#allocation4 + $0x1], 0  ;;  %s7690_s21 = smov 0   ;;  %s7692_s22 = smov 0  }
   0xc   :  { %s7694_s23 = smov 0   ;;  %s7696_s24 = smov 0  }
   0xd LB: > { %s7711_s25 = sadd.s32 4294967295, %s7642_s24   ;;  %s5806_s26 = sadd.s32 4294967294, %s7642_s24   ;;  %s7642_s24 = sphi %s7696_s24, %s14706_s24   ;;  %s7638_s23 = sphi %s7694_s23, %s14705_s23   ;;  %s7634_s22 = sphi %s7692_s22, %s14704_s22   ;;  %s7630_s21 = sphi %s7690_s21, %s14703_s21  }
   0xe   : > { %p47_p0 = scmp.ne.s32.totalorder %s7634_s22, %s7630_s21  ;;  %p13180_p1 = scmp.eq.s32.totalorder %s7711_s25, 0 }
   0xf   : > { %p187_p3 = scmp.eq.s32.totalorder %s5806_s26, 1  ;;  %p5807_p5 = scmp.ge.s32.totalorder %s7642_s24, 1 }
  0x10   : > { %p7720_p4 = por %p13180_p1, %p47_p0  ;;  %p194_p7 = scmp.lt.s32.totalorder %s7642_s24, 3 }
  0x11   : > { %p7725_p6 = por %p187_p3, %p47_p0  ;;  %s7644_s30 = smov [#allocation5]  }
  0x12   : > { %s13573_s27 = scalar_select %p7720_p4, 1, 0 }
  0x13   : > { %s13574_s28 = scalar_select %p7725_p6, 1, 0 }
  0x14   : > { %p7730_p8 = pnand %p5807_p5, %p194_p7  ;;  %s206_s7 = sshll.u32 %s7644_s30, 4  ;;  %s7734_s7 = int_to_ptr.vmem [resolvable:$true] %s206_s7 }
  0x15   : > { %s7645_s9 = smov [#allocation10]   ;;  %s7646_s11 = smov [#allocation7]  }
  0x16   : > { %s13575_s29 = scalar_select %p7730_p8, 1, 0 }
  0x17   : > { %p7041_p9 = pneg %p7730_p8  ;;  %s231_s10 = sshll.u32 %s7645_s9, 4  ;;  %s7745_s10 = int_to_ptr.vmem [resolvable:$true] %s231_s10 }
  0x18   : > { %s7747_s12 = sshll.u32 %s7646_s11, 4  ;;  %s13577_s1 = sld [smem:[#allocation191_spill]]  ;;  %s221_s12 = int_to_ptr.vmem [resolvable:$true] %s7747_s12 }
  0x19   : > { %p7741_p11 = pnand %p7041_p9, %p13180_p1 }
  0x1b   : > { %p7757_p13 = pneg %p7741_p11 }
  0x1e   : > { %s7388_s15 = scalar_lea.hbm %s13577_s1, 73728 }
  0x1f   : > { %p7389_p12 = scmp.ne.s32.totalorder %s13577_s1, %s7388_s15  ;;  %p7395_p5 = scmp.lt.u32.totalorder %s7388_s15, %s13577_s1 }
  0x21   : > { %p7391_p0 = pnand %p7757_p13, %p7389_p12 }
  0x23   : > { %p7392_p3 = pneg %p7391_p0 }
  0x25   : > { %p7397_p7 = pnand %p7395_p5, %p7392_p3 }
  0x27   : > { %7400 = shalt.err (!%p7397_p7)
}
  0x28   : > { %s7401_s26 = scalar_lea.vmem %s7734_s7, 73728  ;;  %p7409_p2 = scmp.lt.s32.totalorder %s7734_s7, %s7734_s7 }
  0x29   : > { %p7402_p9 = scmp.ne.s32.totalorder %s7734_s7, %s7401_s26  ;;  %p7410_p6 = scmp.lt.s32.totalorder %s7401_s26, %s7401_s26 }
  0x2b   : > { %p7404_p10 = pnand %p7402_p9, %p7757_p13  ;;  %p7411_p12 = por %p7410_p6, %p7409_p2 }
  0x2d   : > { %p7405_p1 = pneg %p7404_p10 }
  0x2f   : > { %p7412_p0 = pnand %p7411_p12, %p7405_p1 }
  0x31   : > { %7415 = shalt.err (!%p7412_p0)
}
  0x32   : > { %s13183_s30 = smov 768   ;;  %s13186_s9 = smov 48  }
  0x33   : > { %7044 = dma.hbm_to_vmem [thread:$0]  (!%p7741_p11), %s13577_s1, 73728, %s7734_s7, [#allocation6], %s13183_s30, %s13183_s30, %s13186_s9  }
  0x34   : > { %s7416_s16 = scalar_lea.hbm %s13177_s4, 96 }
  0x35   : > { %p7417_p1 = scmp.ne.s32.totalorder %s13177_s4, %s7416_s16  ;;  %p7423_p10 = scmp.lt.u32.totalorder %s7416_s16, %s13177_s4 }
  0x37   : > { %p7419_p2 = pnand %p7417_p1, %p7757_p13 }
  0x39   : > { %p7420_p6 = pneg %p7419_p2 }
  0x3b   : > { %p7425_p3 = pnand %p7423_p10, %p7420_p6 }
  0x3d   : > { %7428 = shalt.err (!%p7425_p3)
}
  0x3e   : > { %s7429_s7 = scalar_lea.vmem %s7745_s10, 96  ;;  %p7437_p12 = scmp.lt.s32.totalorder %s7745_s10, %s7745_s10 }
  0x3f   : > { %p7430_p5 = scmp.ne.s32.totalorder %s7745_s10, %s7429_s7  ;;  %p7438_p0 = scmp.lt.s32.totalorder %s7429_s7, %s7429_s7 }
  0x41   : > { %p7432_p7 = pnand %p7430_p5, %p7757_p13  ;;  %p7439_p1 = por %p7438_p0, %p7437_p12 }
  0x43   : > { %p7433_p9 = pneg %p7432_p7 }
  0x45   : > { %p7440_p2 = pnand %p7439_p1, %p7433_p9 }
  0x47   : > { %7443 = shalt.err (!%p7440_p2)
}
  0x48   : > { %7050 = dma.hbm_to_vmem [thread:$0]  (!%p7741_p11), %s13177_s4, 96, %s7745_s10, [#allocation9]  }
  0x49   : > { %s13579_s2 = sld [smem:[#allocation192_spill]] }
  0x4f   : > { %s7444_s16 = scalar_lea.hbm %s13579_s2, 96 }
  0x50   : > { %p7445_p6 = scmp.ne.s32.totalorder %s13579_s2, %s7444_s16  ;;  %p7451_p5 = scmp.lt.u32.totalorder %s7444_s16, %s13579_s2 }
  0x52   : > { %p7447_p10 = pnand %p7445_p6, %p7757_p13 }
  0x54   : > { %p7448_p3 = pneg %p7447_p10 }
  0x56   : > { %p7453_p7 = pnand %p7451_p5, %p7448_p3 }
  0x58   : > { %7456 = shalt.err (!%p7453_p7)
}
  0x59   : > { %s7457_s7 = scalar_lea.vmem %s221_s12, 96  ;;  %p7465_p1 = scmp.lt.s32.totalorder %s221_s12, %s221_s12 }
  0x5a   : > { %p7458_p9 = scmp.ne.s32.totalorder %s221_s12, %s7457_s7  ;;  %p7466_p2 = scmp.lt.s32.totalorder %s7457_s7, %s7457_s7 }
  0x5c   : > { %p7460_p12 = pnand %p7458_p9, %p7757_p13  ;;  %p7467_p4 = por %p7466_p2, %p7465_p1 }
  0x5e   : > { %p7461_p0 = pneg %p7460_p12 }
  0x60   : > { %p7468_p8 = pnand %p7467_p4, %p7461_p0 }
  0x62   : > { %7471 = shalt.err (!%p7468_p8)
}
  0x63   : > { %7047 = dma.hbm_to_vmem [thread:$0]  (!%p7741_p11), %s13579_s2, 96, %s221_s12, [#allocation6]  }
  0x64   : > { %s7649_s13 = smov [#allocation11]   ;;  %s7472_s17 = scalar_lea.hbm %s13178_s5, 96 }
  0x65   : > { %s242_s14 = sshll.u32 %s7649_s13, 4  ;;  %p7473_p6 = scmp.ne.s32.totalorder %s13178_s5, %s7472_s17  ;;  %s243_s14 = int_to_ptr.vmem [resolvable:$true] %s242_s14 }
  0x66   : > { %p7479_p10 = scmp.lt.u32.totalorder %s7472_s17, %s13178_s5 }
  0x67   : > { %p7475_p4 = pnand %p7473_p6, %p7757_p13 }
  0x69   : > { %p7476_p8 = pneg %p7475_p4 }
  0x6b   : > { %p7481_p3 = pnand %p7479_p10, %p7476_p8 }
  0x6d   : > { %7484 = shalt.err (!%p7481_p3)
}
  0x6e   : > { %s7485_s12 = scalar_lea.vmem %s243_s14, 96  ;;  %p7493_p12 = scmp.lt.s32.totalorder %s243_s14, %s243_s14 }
  0x6f   : > { %p7486_p5 = scmp.ne.s32.totalorder %s243_s14, %s7485_s12  ;;  %p7494_p0 = scmp.lt.s32.totalorder %s7485_s12, %s7485_s12 }
  0x71   : > { %p7488_p7 = pnand %p7486_p5, %p7757_p13  ;;  %p7495_p1 = por %p7494_p0, %p7493_p12 }
  0x73   : > { %p7489_p9 = pneg %p7488_p7 }
  0x75   : > { %p7496_p2 = pnand %p7495_p1, %p7489_p9 }
  0x77   : > { %7499 = shalt.err (!%p7496_p2)
}
  0x78   : > { %7053 = dma.hbm_to_vmem [thread:$0]  (!%p7741_p11), %s13178_s5, 96, %s243_s14, [#allocation12]  }
  0x79   : > { %s7842_s18 = sadd.s32 1, %s7642_s24   ;;  %s34_s8 = sadd.s32 1, %s7638_s23 }
  0x7a   : > { %s31_s13 = ssub.s32 %s7642_s24, %s7842_s18  ;;  %p41_p13 = scmp.ne.s32.totalorder %s7638_s23, %s7634_s22 }
  0x7b   : > { %p32_p6 = scmp.eq.s32.totalorder %s31_s13, 0  ;;  %p42_p4 = scmp.eq.s32.totalorder %s7642_s24, 0 }
  0x7c   : > { %p13580_p8 = scmp.eq.s32.totalorder %s7711_s25, 1  ;;  %p7069_p3 = scmp.lt.s32.totalorder %s7642_s24, 2 }
  0x7d   : > { %s7858_s16 = scalar_select %p32_p6, %s7638_s23, %s34_s8  }
  0x7e   : > { %p7852_p10 = por %p13580_p8, %p41_p13  ;;  %p43_p5 = por %p42_p4, %p41_p13 }
  0x7f   : > { %s253_s17 = sand.u32 1, %s7638_s23   ;;  %s13185_s19 = smul.u32 24576, %s7642_s24 }
  0x80   : > { %s7861_s14 = smul.u32 1536, %s253_s17  ;;  %p7864_p11 = pnand %p7069_p3, %p43_p5 }
  0x81   : > { %s13583_s0 = sld [smem:[#allocation190_spill]]  ;;  %s7879_s13 = scalar_lea.sflag [#allocation3], %s253_s17 }
  0x82   : > { %s257_s11 = scalar_lea.vmem [#allocation2], %s7861_s14  ;;  %p7502_p9 = pneg %p7864_p11 }
  0x83   : > { %s265_s8 = sshll.u32 %s257_s11, 4  ;;  %s7877_s8 = int_to_ptr.vmem [resolvable:$true] %s265_s8 }
  0x87   : > { %s7874_s10 = scalar_lea.hbm %s13583_s0, %s13185_s19  ;;  %s7505_s26 = scalar_lea.hbm %s13583_s0, 49152 }
  0x88   : > { %s7500_s30 = scalar_lea.hbm %s7874_s10, 24576  ;;  %p7506_p1 = scmp.lt.u32.totalorder %s7874_s10, %s13583_s0 }
  0x89   : > { %p7501_p7 = scmp.ne.s32.totalorder %s7874_s10, %s7500_s30  ;;  %p7507_p2 = scmp.lt.u32.totalorder %s7505_s26, %s7500_s30 }
  0x8a   : > { %p7509_p6 = scmp.lt.u32.totalorder %s7500_s30, %s7874_s10 }
  0x8b   : > { %p7503_p12 = pnand %p7502_p9, %p7501_p7  ;;  %p7508_p13 = por %p7507_p2, %p7506_p1 }
  0x8d   : > { %p7504_p0 = pneg %p7503_p12  ;;  %p7510_p4 = por %p7509_p6, %p7508_p13 }
  0x8f   : > { %p7511_p8 = pnand %p7510_p4, %p7504_p0 }
  0x91   : > { %7514 = shalt.err (!%p7511_p8)
}
  0x92   : > { %s7515_s17 = scalar_lea.vmem %s7877_s8, 24576  ;;  %s7650_s11 = smov [#allocation2]  }
  0x93   : > { %p7516_p3 = scmp.ne.s32.totalorder %s7877_s8, %s7515_s17  ;;  %s7520_s7 = sshll.u32 %s7650_s11, 4  ;;  %s7521_s7 = int_to_ptr.vmem [resolvable:$false] %s7520_s7 }
  0x94   : > { %s7522_s9 = scalar_lea.vmem %s7521_s7, 49152  ;;  %p7523_p12 = scmp.lt.s32.totalorder %s7877_s8, %s7521_s7 }
  0x95   : > { %p7518_p5 = pnand %p7516_p3, %p7502_p9  ;;  %p7524_p1 = scmp.lt.s32.totalorder %s7522_s9, %s7515_s17 }
  0x97   : > { %p7519_p7 = pneg %p7518_p5  ;;  %p7525_p2 = por %p7524_p1, %p7523_p12 }
  0x99   : > { %p7526_p13 = pnand %p7525_p2, %p7519_p7 }
  0x9b   : > { %7529 = shalt.err (!%p7526_p13)
}
  0x9c   : > { %s13584_s30 = smov 48   ;;  %s13585_s19 = smov 768  }
  0x9d   : > { %7057 = dma.hbm_to_vmem [thread:$0]  (!%p7864_p11), %s7874_s10, 24576, %s7877_s8, %s7879_s13, %s13585_s19, %s13585_s19, %s13584_s30  }
  0x9e   : > { %s13586_s26 = smul.u32 24576, %s7642_s24  ;;  %s279_s7 = scalar_lea.vmem [#allocation8], %s7861_s14 }
  0x9f   : > { %s287_s9 = sshll.u32 %s279_s7, 4  ;;  %s13587_s0 = sand.u32 1, %s7642_s24   ;;  %s7918_s9 = int_to_ptr.vmem [resolvable:$true] %s287_s9 }
  0xa0   : > { %s7915_s17 = scalar_lea.hbm %s13176_s3, %s13586_s26  ;;  %s7922_s1 = scalar_lea.sflag [#allocation9], %s13587_s0 }
  0xa1   : > { %s7530_s2 = scalar_lea.hbm %s7915_s17, 24576  ;;  %s7535_s13 = scalar_lea.hbm %s13176_s3, 49152 }
  0xa2   : > { %p7531_p0 = scmp.ne.s32.totalorder %s7915_s17, %s7530_s2  ;;  %p7536_p8 = scmp.lt.u32.totalorder %s7915_s17, %s13176_s3 }
  0xa3   : > { %p7537_p3 = scmp.lt.u32.totalorder %s7535_s13, %s7530_s2  ;;  %p7539_p7 = scmp.lt.u32.totalorder %s7530_s2, %s7915_s17 }
  0xa4   : > { %p7533_p6 = pnand %p7531_p0, %p7502_p9 }
  0xa5   : > { %p7538_p5 = por %p7537_p3, %p7536_p8 }
  0xa6   : > { %p7534_p4 = pneg %p7533_p6 }
  0xa7   : > { %p7540_p12 = por %p7539_p7, %p7538_p5 }
  0xa9   : > { %p7541_p1 = pnand %p7540_p12, %p7534_p4 }
  0xab   : > { %7544 = shalt.err (!%p7541_p1)
}
  0xac   : > { %s7545_s0 = scalar_lea.vmem %s7918_s9, 24576  ;;  %s7651_s14 = smov [#allocation8]  }
  0xad   : > { %p7546_p2 = scmp.ne.s32.totalorder %s7918_s9, %s7545_s0  ;;  %s7550_s11 = sshll.u32 %s7651_s14, 4  ;;  %s7551_s11 = int_to_ptr.vmem [resolvable:$false] %s7550_s11 }
  0xae   : > { %s7552_s7 = scalar_lea.vmem %s7551_s11, 49152  ;;  %p7553_p6 = scmp.lt.s32.totalorder %s7918_s9, %s7551_s11 }
  0xaf   : > { %p7548_p13 = pnand %p7546_p2, %p7502_p9  ;;  %p7554_p8 = scmp.lt.s32.totalorder %s7552_s7, %s7545_s0 }
  0xb1   : > { %p7549_p0 = pneg %p7548_p13  ;;  %p7555_p3 = por %p7554_p8, %p7553_p6 }
  0xb3   : > { %p7556_p5 = pnand %p7555_p3, %p7549_p0 }
  0xb5   : > { %7559 = shalt.err (!%p7556_p5)
}
  0xb6   : > { %7060 = dma.hbm_to_vmem [thread:$0]  (!%p7864_p11), %s7915_s17, 24576, %s7918_s9, %s7922_s1, %s13585_s19, %s13585_s19, %s13584_s30  }
  0xb7   : > { %p13588_p9 = scmp.ne.s32.totalorder %s13575_s29, 0 }
  0xb9   : > { %299 = sbr.rel (%p13588_p9) target bundleno = 1624 (0x658), region = 44 }
  0xc0   : > { %s7954_s2 = sand.u32 1, %s7634_s22   ;;  %p13589_p4 = scmp.ne.s32.totalorder %s13573_s27, 0 }
  0xc1   : > { %s7957_s10 = smul.u32 1536, %s7954_s2  ;;  %s302_s20 = scalar_lea.sflag [#allocation3], %s7954_s2 }
  0xc3   : > { %s7961_s8 = scalar_lea.vmem [#allocation2], %s7957_s10 }
  0xc4   : > { %7605 = dma.done.wait (%p13589_p4), %s302_s20, 24576  }
  0xc5   : > { %7607 = vsyncadd (%p13589_p4), %s302_s20, 4294942720  ;;  %p13590_p11 = scmp.eq.s32.totalorder %s7711_s25, 0 }
  0xc7   : > { %7609 = dma.done.wait (%p13590_p11), [#allocation6], 73824   ;;  %p13591_p7 = pmov %p13590_p11 }
  0xc8   : > { %s318_s1 = sand.u32 1, %s7711_s25   ;;  %s7973_s30 = scalar_lea.vmem [#allocation8], %s7957_s10 }
  0xc9   : > { %7611 = vsyncadd (%p13591_p7), [#allocation6], 4294893472  ;;  %s319_s29 = scalar_lea.sflag [#allocation9], %s318_s1 }
  0xca   : > { %7613 = dma.done.wait (%p13589_p4), %s319_s29, 24576  }
  0xcb   : > { %7615 = vsyncadd (%p13589_p4), %s319_s29, 4294942720  ;;  %p13592_p12 = pmov %p13591_p7 }
  0xcc   : > { %p13593_p1 = pmov %p13591_p7 }
  0xcd   : > { %7617 = dma.done.wait (%p13592_p12), [#allocation9], 96  }
  0xce   : > { %7619 = vsyncadd (%p13593_p1), [#allocation9], 4294967200  ;;  %p13594_p2 = pmov %p13593_p1 }
  0xcf   : > { %p13595_p13 = pmov %p13593_p1 }
  0xd0   : > { %7621 = dma.done.wait (%p13594_p2), [#allocation12], 96  }
  0xd1   : > { %7623 = vsyncadd (%p13595_p13), [#allocation12], 4294967200  ;;  %v560_v0 = vld [vmem:[#allocation5 + $0x8] sm:$0xff]  ;;  %v566_v1 = vld [vmem:[#allocation5 + $0x38] sm:$0xff]  ;;  %s12265_s27 = scalar_lea.vmem [#allocation13], %s7957_s10  ;;  %s7018_s19 = smul.u32 24576, %s7711_s25 }
  0xd2   : > { %v562_v2 = vld [vmem:[#allocation5 + $0x18] sm:$0xff]  ;;  %v5829_v3 = vpack.c.bf16 %v566_v1, %v560_v0  ;;  %v568_v4 = vld [vmem:[#allocation5 + $0x48] sm:$0xff]  ;;  %v559_v5 = vld [vmem:[#allocation5] sm:$0xff]  ;;  %s5672_s25 = sshll.u32 %s12265_s27, 4  ;;  %s5658_s26 = scalar_lea.sflag [#allocation4], %s7954_s2  ;;  %s13123_s25 = int_to_ptr.vmem [resolvable:$true] %s5672_s25 }
  0xd3   : > { %v565_v6 = vld [vmem:[#allocation5 + $0x30] sm:$0xff]  ;;  %v5893_v7 = vpack.c.bf16 %v568_v4, %v562_v2  ;;  %v567_v10 = vld [vmem:[#allocation5 + $0x40] sm:$0xff]  ;;  %v572_v11 = vld [vmem:[#allocation5 + $0x68] sm:$0xff]  ;;  %s13119_s13 = scalar_lea.hbm %s13179_s6, %s7018_s19  ;;  %s7560_s12 = scalar_lea.vmem %s13123_s25, 24576 }
  0xd4   : > { %v5831_v8 = vpack.c.bf16 %v565_v6, %v559_v5  ;;  %v561_v9 = vld [vmem:[#allocation5 + $0x10] sm:$0xff]  ;;  %5830 = vmatprep.subr.bf16.mxu1 %v5829_v3  ;;  %v578_v13 = vld [vmem:[#allocation5 + $0x98] sm:$0xff]  ;;  %v580_v15 = vld [vmem:[#allocation5 + $0xa8] sm:$0xff]  ;;  %p7561_p0 = scmp.ne.s32.totalorder %s13123_s25, %s7560_s12  ;;  %s7652_s0 = smov [#allocation13]  }
  0xd5   : > { %v5895_v12 = vpack.c.bf16 %v567_v10, %v561_v9  ;;  %v574_v14 = vld [vmem:[#allocation5 + $0x78] sm:$0xff]  ;;  %5894 = vmatprep.subr.bf16.mxu0 %v5893_v7  ;;  %v5833_v16 = vpack.c.bf16 %v578_v13, %v572_v11  ;;  %v571_v18 = vld [vmem:[#allocation5 + $0x60] sm:$0xff]  ;;  %v577_v19 = vld [vmem:[#allocation5 + $0x90] sm:$0xff]  ;;  %s7564_s14 = sshll.u32 %s7652_s0, 4  ;;  %s7565_s14 = int_to_ptr.vmem [resolvable:$false] %s7564_s14 }
  0xd6   : > { %5832 = vmatpush1.bf16.xpose.msra.mxu1 %v5831_v8  ;;  %v5897_v17 = vpack.c.bf16 %v580_v15, %v574_v14  ;;  %v573_v20 = vld [vmem:[#allocation5 + $0x70] sm:$0xff]  ;;  %v579_v21 = vld [vmem:[#allocation5 + $0xa0] sm:$0xff]  ;;  %v584_v22 = vld [vmem:[#allocation5 + $0xc8] sm:$0xff]  ;;  %v5835_v26 = vpack.c.bf16 %v577_v19, %v571_v18  ;;  %p7562_p6 = pnand %p7561_p0, %p7852_p10  ;;  %s7566_s11 = scalar_lea.vmem %s7565_s14, 49152 }
  0xd7   : > { %5896 = vmatpush1.bf16.xpose.msra.mxu0 %v5895_v12  ;;  %5834 = vmatprep.subr.bf16.mxu1 %v5833_v16  ;;  %v590_v23 = vld [vmem:[#allocation5 + $0xf8] sm:$0xff]  ;;  %v592_v25 = vld [vmem:[#allocation5 + $0x108] sm:$0xff]  ;;  %v5899_v27 = vpack.c.bf16 %v579_v21, %v573_v20  ;;  %v583_v30 = vld [vmem:[#allocation5 + $0xc0] sm:$0xff]  ;;  %p7567_p3 = scmp.lt.s32.totalorder %s13123_s25, %s7565_s14  ;;  %p7568_p5 = scmp.lt.s32.totalorder %s7566_s11, %s7560_s12 }
  0xd8   : > { %5898 = vmatprep.subr.bf16.mxu0 %v5897_v17  ;;  %v586_v24 = vld [vmem:[#allocation5 + $0xd8] sm:$0xff]  ;;  %v5837_v28 = vpack.c.bf16 %v590_v23, %v584_v22  ;;  %v589_v31 = vld [vmem:[#allocation5 + $0xf0] sm:$0xff]  ;;  %v591_v33 = vld [vmem:[#allocation5 + $0x100] sm:$0xff]  ;;  %p7563_p8 = pneg %p7562_p6 }
  0xd9   : > { %v5901_v29 = vpack.c.bf16 %v592_v25, %v586_v24  ;;  %v585_v32 = vld [vmem:[#allocation5 + $0xd0] sm:$0xff]  ;;  %v596_v34 = vld [vmem:[#allocation5 + $0x128] sm:$0xff]  ;;  %v602_v35 = vld [vmem:[#allocation5 + $0x158] sm:$0xff]  ;;  %v5839_v38 = vpack.c.bf16 %v589_v31, %v583_v30  ;;  %p7569_p9 = por %p7568_p5, %p7567_p3 }
  0xda   : > { %v598_v36 = vld [vmem:[#allocation5 + $0x138] sm:$0xff]  ;;  %v604_v37 = vld [vmem:[#allocation5 + $0x168] sm:$0xff]  ;;  %v5903_v39 = vpack.c.bf16 %v591_v33, %v585_v32  ;;  %v5841_v40 = vpack.c.bf16 %v602_v35, %v596_v34  ;;  %v595_v42 = vld [vmem:[#allocation5 + $0x120] sm:$0xff] }
  0xdb   : > { %v5905_v41 = vpack.c.bf16 %v604_v37, %v598_v36  ;;  %v601_v43 = vld [vmem:[#allocation5 + $0x150] sm:$0xff]  ;;  %v603_v45 = vld [vmem:[#allocation5 + $0x160] sm:$0xff]  ;;  %v608_v46 = vld [vmem:[#allocation5 + $0x188] sm:$0xff]  ;;  %p7570_p4 = pnand %p7569_p9, %p7563_p8 }
  0xdc   : > { %v597_v44 = vld [vmem:[#allocation5 + $0x130] sm:$0xff]  ;;  %v614_v47 = vld [vmem:[#allocation5 + $0x1b8] sm:$0xff]  ;;  %v616_v49 = vld [vmem:[#allocation5 + $0x1c8] sm:$0xff]  ;;  %v5843_v50 = vpack.c.bf16 %v601_v43, %v595_v42 }
  0xdd   : > { %v610_v48 = vld [vmem:[#allocation5 + $0x198] sm:$0xff]  ;;  %v5907_v51 = vpack.c.bf16 %v603_v45, %v597_v44  ;;  %v5845_v52 = vpack.c.bf16 %v614_v47, %v608_v46  ;;  %v607_v54 = vld [vmem:[#allocation5 + $0x180] sm:$0xff]  ;;  %v613_v55 = vld [vmem:[#allocation5 + $0x1b0] sm:$0xff] }
  0xde   : > { %5836 = vmatpush1.bf16.xpose.msra.mxu1 %v5835_v26  ;;  %v5909_v53 = vpack.c.bf16 %v616_v49, %v610_v48  ;;  %v609_v56 = vld [vmem:[#allocation5 + $0x190] sm:$0xff]  ;;  %v615_v57 = vld [vmem:[#allocation5 + $0x1c0] sm:$0xff]  ;;  %v620_v58 = vld [vmem:[#allocation5 + $0x1e8] sm:$0xff]  ;;  %v5847_v62 = vpack.c.bf16 %v613_v55, %v607_v54 }
  0xdf   : > { %5900 = vmatpush1.bf16.xpose.msra.mxu0 %v5899_v27  ;;  %5838 = vmatprep.subr.bf16.mxu1 %v5837_v28  ;;  %v626_v59 = vld [vmem:[#allocation5 + $0x218] sm:$0xff]  ;;  %v628_v61 = vld [vmem:[#allocation5 + $0x228] sm:$0xff]  ;;  %v5911_v63 = vpack.c.bf16 %v615_v57, %v609_v56  ;;  %v619_v2 = vld [vmem:[#allocation5 + $0x1e0] sm:$0xff] }
  0xe0   : > { %5902 = vmatprep.subr.bf16.mxu0 %v5901_v29  ;;  %v622_v60 = vld [vmem:[#allocation5 + $0x1f8] sm:$0xff]  ;;  %v5849_v0 = vpack.c.bf16 %v626_v59, %v620_v58  ;;  %v625_v3 = vld [vmem:[#allocation5 + $0x210] sm:$0xff]  ;;  %v627_v5 = vld [vmem:[#allocation5 + $0x220] sm:$0xff] }
  0xe1   : > { %v5913_v1 = vpack.c.bf16 %v628_v61, %v622_v60  ;;  %v621_v4 = vld [vmem:[#allocation5 + $0x1f0] sm:$0xff]  ;;  %v632_v6 = vld [vmem:[#allocation5 + $0x248] sm:$0xff]  ;;  %v638_v7 = vld [vmem:[#allocation5 + $0x278] sm:$0xff]  ;;  %v5851_v10 = vpack.c.bf16 %v625_v3, %v619_v2 }
  0xe2   : > { %v634_v8 = vld [vmem:[#allocation5 + $0x258] sm:$0xff]  ;;  %v640_v9 = vld [vmem:[#allocation5 + $0x288] sm:$0xff]  ;;  %v5915_v11 = vpack.c.bf16 %v627_v5, %v621_v4  ;;  %v5853_v12 = vpack.c.bf16 %v638_v7, %v632_v6  ;;  %v631_v16 = vld [vmem:[#allocation5 + $0x240] sm:$0xff] }
  0xe3   : > { %v5917_v13 = vpack.c.bf16 %v640_v9, %v634_v8  ;;  %v368_v14 = vld [vmem:[%s7961_s8 + $0x8] sm:$0xff]  ;;  %v370_v15 = vld [vmem:[%s7961_s8 + $0x18] sm:$0xff]  ;;  %v637_v17 = vld [vmem:[#allocation5 + $0x270] sm:$0xff] }
  0xe4   : > { %1231 = vmatprep.mubr.f32.mxu1 %v368_v14  ;;  %1488 = vmatprep.mubr.f32.mxu0 %v370_v15  ;;  %v633_v18 = vld [vmem:[#allocation5 + $0x250] sm:$0xff]  ;;  %v639_v19 = vld [vmem:[#allocation5 + $0x280] sm:$0xff]  ;;  %v644_v20 = vld [vmem:[#allocation5 + $0x2a8] sm:$0xff]  ;;  %v5855_v24 = vpack.c.bf16 %v637_v17, %v631_v16 }
  0xe5   : > { %v650_v21 = vld [vmem:[#allocation5 + $0x2d8] sm:$0xff]  ;;  %v652_v23 = vld [vmem:[#allocation5 + $0x2e8] sm:$0xff]  ;;  %v5919_v25 = vpack.c.bf16 %v639_v19, %v633_v18  ;;  %v643_v28 = vld [vmem:[#allocation5 + $0x2a0] sm:$0xff] }
  0xe6   : > { %5840 = vmatpush1.bf16.xpose.msra.mxu1 %v5839_v38  ;;  %v646_v22 = vld [vmem:[#allocation5 + $0x2b8] sm:$0xff]  ;;  %v5857_v26 = vpack.c.bf16 %v650_v21, %v644_v20  ;;  %v649_v29 = vld [vmem:[#allocation5 + $0x2d0] sm:$0xff]  ;;  %v651_v31 = vld [vmem:[#allocation5 + $0x2e0] sm:$0xff] }
  0xe7   : > { %5904 = vmatpush1.bf16.xpose.msra.mxu0 %v5903_v39  ;;  %5842 = vmatprep.subr.bf16.mxu1 %v5841_v40  ;;  %v5921_v27 = vpack.c.bf16 %v652_v23, %v646_v22  ;;  %v645_v30 = vld [vmem:[#allocation5 + $0x2b0] sm:$0xff]  ;;  %v656_v32 = vld [vmem:[#allocation5 + $0x308] sm:$0xff]  ;;  %v662_v33 = vld [vmem:[#allocation5 + $0x338] sm:$0xff]  ;;  %v5859_v36 = vpack.c.bf16 %v649_v29, %v643_v28 }
  0xe8   : > { %5906 = vmatprep.subr.bf16.mxu0 %v5905_v41  ;;  %v658_v34 = vld [vmem:[#allocation5 + $0x318] sm:$0xff]  ;;  %v664_v35 = vld [vmem:[#allocation5 + $0x348] sm:$0xff]  ;;  %v5923_v37 = vpack.c.bf16 %v651_v31, %v645_v30  ;;  %v5861_v38 = vpack.c.bf16 %v662_v33, %v656_v32  ;;  %v655_v40 = vld [vmem:[#allocation5 + $0x300] sm:$0xff] }
  0xe9   : > { %v5925_v39 = vpack.c.bf16 %v664_v35, %v658_v34  ;;  %v661_v41 = vld [vmem:[#allocation5 + $0x330] sm:$0xff]  ;;  %v663_v43 = vld [vmem:[#allocation5 + $0x340] sm:$0xff]  ;;  %v668_v44 = vld [vmem:[#allocation5 + $0x368] sm:$0xff] }
  0xea   : > { %v657_v42 = vld [vmem:[#allocation5 + $0x310] sm:$0xff]  ;;  %v674_v45 = vld [vmem:[#allocation5 + $0x398] sm:$0xff]  ;;  %v676_v47 = vld [vmem:[#allocation5 + $0x3a8] sm:$0xff]  ;;  %v5863_v48 = vpack.c.bf16 %v661_v41, %v655_v40 }
  0xeb   : > { %v670_v46 = vld [vmem:[#allocation5 + $0x378] sm:$0xff]  ;;  %v5927_v49 = vpack.c.bf16 %v663_v43, %v657_v42  ;;  %v669_v54 = vld [vmem:[#allocation5 + $0x370] sm:$0xff]  ;;  %v675_v55 = vld [vmem:[#allocation5 + $0x3a0] sm:$0xff] }
  0xec   : > { %v680_v56 = vld [vmem:[#allocation5 + $0x3c8] sm:$0xff]  ;;  %v686_v57 = vld [vmem:[#allocation5 + $0x3f8] sm:$0xff]  ;;  %v5931_v61 = vpack.c.bf16 %v675_v55, %v669_v54  ;;  %v681_v2 = vld [vmem:[#allocation5 + $0x3d0] sm:$0xff] }
  0xed   : > { %v682_v58 = vld [vmem:[#allocation5 + $0x3d8] sm:$0xff]  ;;  %v688_v59 = vld [vmem:[#allocation5 + $0x408] sm:$0xff]  ;;  %v687_v3 = vld [vmem:[#allocation5 + $0x400] sm:$0xff] }
  0xee   : > { %5844 = vmatpush1.bf16.xpose.msra.mxu1 %v5843_v50  ;;  %v5865_v50 = vpack.c.bf16 %v674_v45, %v668_v44  ;;  %v692_v4 = vld [vmem:[#allocation5 + $0x428] sm:$0xff]  ;;  %v698_v5 = vld [vmem:[#allocation5 + $0x458] sm:$0xff]  ;;  %v5935_v9 = vpack.c.bf16 %v687_v3, %v681_v2  ;;  %v693_v14 = vld [vmem:[#allocation5 + $0x430] sm:$0xff] }
  0xef   : > { %5908 = vmatpush1.bf16.xpose.msra.mxu0 %v5907_v51  ;;  %5846 = vmatprep.subr.bf16.mxu1 %v5845_v52  ;;  %v5929_v51 = vpack.c.bf16 %v676_v47, %v670_v46  ;;  %v667_v52 = vld [vmem:[#allocation5 + $0x360] sm:$0xff]  ;;  %v694_v6 = vld [vmem:[#allocation5 + $0x438] sm:$0xff]  ;;  %v700_v7 = vld [vmem:[#allocation5 + $0x468] sm:$0xff] }
  0xf0   : > { %5910 = vmatprep.subr.bf16.mxu0 %v5909_v53  ;;  %v673_v53 = vld [vmem:[#allocation5 + $0x390] sm:$0xff]  ;;  %v699_v15 = vld [vmem:[#allocation5 + $0x460] sm:$0xff]  ;;  %v704_v16 = vld [vmem:[#allocation5 + $0x488] sm:$0xff] }
  0xf1   : > { %v5867_v60 = vpack.c.bf16 %v673_v53, %v667_v52  ;;  %v710_v17 = vld [vmem:[#allocation5 + $0x4b8] sm:$0xff]  ;;  %v712_v19 = vld [vmem:[#allocation5 + $0x4c8] sm:$0xff]  ;;  %v5939_v21 = vpack.c.bf16 %v699_v15, %v693_v14  ;;  %v367_v14 = vld [vmem:[%s7961_s8] sm:$0xff] }
  0xf2   : > { %v706_v18 = vld [vmem:[#allocation5 + $0x498] sm:$0xff]  ;;  %v5877_v22 = vpack.c.bf16 %v710_v17, %v704_v16  ;;  %v716_v28 = vld [vmem:[#allocation5 + $0x4e8] sm:$0xff] }
  0xf3   : > { %v5941_v23 = vpack.c.bf16 %v712_v19, %v706_v18  ;;  %v722_v29 = vld [vmem:[#allocation5 + $0x518] sm:$0xff]  ;;  %v724_v31 = vld [vmem:[#allocation5 + $0x528] sm:$0xff]  ;;  %v369_v18 = vld [vmem:[%s7961_s8 + $0x10] sm:$0xff] }
  0xf4   : > { %v718_v30 = vld [vmem:[#allocation5 + $0x4f8] sm:$0xff]  ;;  %v5881_v34 = vpack.c.bf16 %v722_v29, %v716_v28  ;;  %v728_v40 = vld [vmem:[#allocation5 + $0x548] sm:$0xff]  ;;  %v769_v28 = vld [vmem:[#allocation5 + $0x690] sm:$0xff] }
  0xf5   : > { %v5945_v35 = vpack.c.bf16 %v724_v31, %v718_v30  ;;  %v734_v41 = vld [vmem:[#allocation5 + $0x578] sm:$0xff]  ;;  %v736_v43 = vld [vmem:[#allocation5 + $0x588] sm:$0xff]  ;;  %v575_v30 = vld [vmem:[#allocation5 + $0x80] sm:$0xff] }
  0xf6   : > { %5848 = vmatpush1.bf16.xpose.msra.mxu1 %v5847_v62  ;;  %v5869_v62 = vpack.c.bf16 %v686_v57, %v680_v56  ;;  %v730_v42 = vld [vmem:[#allocation5 + $0x558] sm:$0xff]  ;;  %v5885_v46 = vpack.c.bf16 %v734_v41, %v728_v40  ;;  %v740_v52 = vld [vmem:[#allocation5 + $0x5a8] sm:$0xff]  ;;  %v581_v31 = vld [vmem:[#allocation5 + $0xb0] sm:$0xff] }
  0xf7   : > { %5912 = vmatpush1.bf16.xpose.msra.mxu0 %v5911_v63  ;;  %5850 = vmatprep.subr.bf16.mxu1 %v5849_v0  ;;  %v5933_v63 = vpack.c.bf16 %v688_v59, %v682_v58  ;;  %v679_v0 = vld [vmem:[#allocation5 + $0x3c0] sm:$0xff]  ;;  %v5949_v47 = vpack.c.bf16 %v736_v43, %v730_v42  ;;  %v746_v53 = vld [vmem:[#allocation5 + $0x5d8] sm:$0xff]  ;;  %v748_v55 = vld [vmem:[#allocation5 + $0x5e8] sm:$0xff] }
  0xf8   : > { %5914 = vmatprep.subr.bf16.mxu0 %v5913_v1  ;;  %v685_v1 = vld [vmem:[#allocation5 + $0x3f0] sm:$0xff]  ;;  %v742_v54 = vld [vmem:[#allocation5 + $0x5b8] sm:$0xff]  ;;  %v5889_v58 = vpack.c.bf16 %v746_v53, %v740_v52  ;;  %v564_v2 = vld [vmem:[#allocation5 + $0x28] sm:$0xff] }
  0xf9   : > { %v5871_v8 = vpack.c.bf16 %v685_v1, %v679_v0  ;;  %v5953_v59 = vpack.c.bf16 %v748_v55, %v742_v54  ;;  %v752_v0 = vld [vmem:[#allocation5 + $0x608] sm:$0xff]  ;;  %v758_v1 = vld [vmem:[#allocation5 + $0x638] sm:$0xff]  ;;  %v8006_v54 = vld [vmem:[%s7961_s8 + $0xc0] sm:$0xff] }
  0xfa   : > { %v570_v3 = vld [vmem:[#allocation5 + $0x58] sm:$0xff]  ;;  %v764_v16 = vld [vmem:[#allocation5 + $0x668] sm:$0xff] }
  0xfb   : > { %v770_v17 = vld [vmem:[#allocation5 + $0x698] sm:$0xff]  ;;  %v388_v42 = vld [vmem:[%s7961_s8 + $0xa8] sm:$0xff] }
  0xfc   : > { %v382_v29 = vld [vmem:[%s7961_s8 + $0x78] sm:$0xff]  ;;  %v600_v52 = vld [vmem:[#allocation5 + $0x148] sm:$0xff] }
  0xfd   : > { %v386_v40 = vld [vmem:[%s7961_s8 + $0x98] sm:$0xff] }
  0xfe   : > { %5852 = vmatpush1.bf16.xpose.msra.mxu1 %v5851_v10  ;;  %v5873_v10 = vpack.c.bf16 %v698_v5, %v692_v4  ;;  %v606_v53 = vld [vmem:[#allocation5 + $0x178] sm:$0xff] }
  0xff   : > { %5916 = vmatpush1.bf16.xpose.msra.mxu0 %v5915_v11  ;;  %5854 = vmatprep.subr.bf16.mxu1 %v5853_v12  ;;  %v5937_v11 = vpack.c.bf16 %v700_v7, %v694_v6  ;;  %v691_v12 = vld [vmem:[#allocation5 + $0x420] sm:$0xff]  ;;  %v6021_v6 = vpack.c.bf16 %v758_v1, %v752_v0  ;;  %v5957_v7 = vpack.c.bf16 %v570_v3, %v564_v2  ;;  %v8013_v0 = vld [vmem:[%s7961_s8 + $0xf0] sm:$0xff]  ;;  %v404_v2 = vld [vmem:[%s7961_s8 + $0x128] sm:$0xff] }
 0x100   : > { %5918 = vmatprep.subr.bf16.mxu0 %v5917_v13  ;;  %v697_v13 = vld [vmem:[#allocation5 + $0x450] sm:$0xff]  ;;  %v399_v1 = vld [vmem:[%s7961_s8 + $0x100] sm:$0xff] }
 0x101   : > { %v5875_v20 = vpack.c.bf16 %v697_v13, %v691_v12  ;;  %v576_v12 = vld [vmem:[#allocation5 + $0x88] sm:$0xff]  ;;  %v582_v13 = vld [vmem:[#allocation5 + $0xb8] sm:$0xff]  ;;  %v787_v3 = vld [vmem:[#allocation5 + $0x720] sm:$0xff] }
 0x106   : > { %5856 = vmatpush1.bf16.xpose.msra.mxu1 %v5855_v24  ;;  %v703_v24 = vld [vmem:[#allocation5 + $0x480] sm:$0xff] }
 0x107   : > { %5920 = vmatpush1.bf16.xpose.msra.mxu0 %v5919_v25  ;;  %5858 = vmatprep.subr.bf16.mxu1 %v5857_v26  ;;  %v709_v25 = vld [vmem:[#allocation5 + $0x4b0] sm:$0xff] }
 0x108   : > { %5922 = vmatprep.subr.bf16.mxu0 %v5921_v27  ;;  %v705_v26 = vld [vmem:[#allocation5 + $0x490] sm:$0xff]  ;;  %v711_v27 = vld [vmem:[#allocation5 + $0x4c0] sm:$0xff]  ;;  %v5879_v32 = vpack.c.bf16 %v709_v25, %v703_v24 }
 0x109   : > { %v5943_v33 = vpack.c.bf16 %v711_v27, %v705_v26  ;;  %v373_v24 = vld [vmem:[%s7961_s8 + $0x30] sm:$0xff]  ;;  %v375_v25 = vld [vmem:[%s7961_s8 + $0x40] sm:$0xff]  ;;  %v380_v26 = vld [vmem:[%s7961_s8 + $0x68] sm:$0xff] }
 0x10a   : > { %v763_v27 = vld [vmem:[#allocation5 + $0x660] sm:$0xff] }
 0x10e   : > { %5860 = vmatpush1.bf16.xpose.msra.mxu1 %v5859_v36  ;;  %v715_v36 = vld [vmem:[#allocation5 + $0x4e0] sm:$0xff] }
 0x10f   : > { %5924 = vmatpush1.bf16.xpose.msra.mxu0 %v5923_v37  ;;  %5862 = vmatprep.subr.bf16.mxu1 %v5861_v38  ;;  %v721_v37 = vld [vmem:[#allocation5 + $0x510] sm:$0xff] }
 0x110   : > { %5926 = vmatprep.subr.bf16.mxu0 %v5925_v39  ;;  %v717_v38 = vld [vmem:[#allocation5 + $0x4f0] sm:$0xff]  ;;  %v723_v39 = vld [vmem:[#allocation5 + $0x520] sm:$0xff]  ;;  %v5883_v44 = vpack.c.bf16 %v721_v37, %v715_v36  ;;  %v776_v36 = vld [vmem:[#allocation5 + $0x6c8] sm:$0xff] }
 0x111   : > { %v5947_v45 = vpack.c.bf16 %v723_v39, %v717_v38  ;;  %v782_v37 = vld [vmem:[#allocation5 + $0x6f8] sm:$0xff]  ;;  %v381_v38 = vld [vmem:[%s7961_s8 + $0x70] sm:$0xff]  ;;  %v5963_v39 = vpack.c.bf16 %v581_v31, %v575_v30  ;;  %v8040_v30 = vld [vmem:[%s7961_s8 + $0x180] sm:$0xff] }
 0x112   : > { %v6029_v43 = vpack.c.bf16 %v782_v37, %v776_v36  ;;  %v8044_v36 = vld [vmem:[%s7961_s8 + $0x1b8] sm:$0xff] }
 0x116   : > { %5864 = vmatpush1.bf16.xpose.msra.mxu1 %v5863_v48  ;;  %v727_v48 = vld [vmem:[#allocation5 + $0x540] sm:$0xff] }
 0x117   : > { %5928 = vmatpush1.bf16.xpose.msra.mxu0 %v5927_v49  ;;  %5866 = vmatprep.subr.bf16.mxu1 %v5865_v50  ;;  %v733_v49 = vld [vmem:[#allocation5 + $0x570] sm:$0xff] }
 0x118   : > { %5930 = vmatprep.subr.bf16.mxu0 %v5929_v51  ;;  %v729_v50 = vld [vmem:[#allocation5 + $0x550] sm:$0xff]  ;;  %v735_v51 = vld [vmem:[#allocation5 + $0x580] sm:$0xff]  ;;  %v5887_v56 = vpack.c.bf16 %v733_v49, %v727_v48  ;;  %v394_v49 = vld [vmem:[%s7961_s8 + $0xd8] sm:$0xff] }
 0x119   : > { %v5951_v57 = vpack.c.bf16 %v735_v51, %v729_v50  ;;  %v781_v48 = vld [vmem:[#allocation5 + $0x6f0] sm:$0xff]  ;;  %v587_v50 = vld [vmem:[#allocation5 + $0xe0] sm:$0xff] }
 0x11a   : > { %v593_v51 = vld [vmem:[#allocation5 + $0x110] sm:$0xff] }
 0x11e   : > { %5868 = vmatpush1.bf16.xpose.msra.mxu1 %v5867_v60  ;;  %v739_v60 = vld [vmem:[#allocation5 + $0x5a0] sm:$0xff] }
 0x11f   : > { %5932 = vmatpush1.bf16.xpose.msra.mxu0 %v5931_v61  ;;  %5870 = vmatprep.subr.bf16.mxu1 %v5869_v62  ;;  %v745_v61 = vld [vmem:[#allocation5 + $0x5d0] sm:$0xff] }
 0x120   : > { %5934 = vmatprep.subr.bf16.mxu0 %v5933_v63  ;;  %v741_v62 = vld [vmem:[#allocation5 + $0x5b0] sm:$0xff]  ;;  %v747_v63 = vld [vmem:[#allocation5 + $0x5e0] sm:$0xff]  ;;  %v5891_v4 = vpack.c.bf16 %v745_v61, %v739_v60  ;;  %v398_v60 = vld [vmem:[%s7961_s8 + $0xf8] sm:$0xff]  ;;  %v5969_v61 = vpack.c.bf16 %v606_v53, %v600_v52 }
 0x121   : > { %v5955_v5 = vpack.c.bf16 %v747_v63, %v741_v62  ;;  %v400_v62 = vld [vmem:[%s7961_s8 + $0x108] sm:$0xff]  ;;  %v830_v53 = vld [vmem:[#allocation5 + $0x878] sm:$0xff] }
 0x122   : > { %v824_v52 = vld [vmem:[#allocation5 + $0x848] sm:$0xff] }
 0x126   : > { %5872 = vmatpush1.bf16.xpose.msra.mxu1 %v5871_v8  ;;  %v751_v8 = vld [vmem:[#allocation5 + $0x600] sm:$0xff] }
 0x127   : > { %5936 = vmatpush1.bf16.xpose.msra.mxu0 %v5935_v9  ;;  %5874 = vmatprep.subr.bf16.mxu1 %v5873_v10  ;;  %v757_v9 = vld [vmem:[#allocation5 + $0x630] sm:$0xff]  ;;  %v563_v10 = vld [vmem:[#allocation5 + $0x20] sm:$0xff] }
 0x128   : > { %5938 = vmatprep.subr.bf16.mxu0 %v5937_v11  ;;  %v569_v11 = vld [vmem:[#allocation5 + $0x50] sm:$0xff]  ;;  %v6023_v15 = vpack.c.bf16 %v757_v9, %v751_v8  ;;  %v612_v8 = vld [vmem:[#allocation5 + $0x1a8] sm:$0xff]  ;;  %v618_v9 = vld [vmem:[#allocation5 + $0x1d8] sm:$0xff] }
 0x129   : > { %v5959_v19 = vpack.c.bf16 %v569_v11, %v563_v10  ;;  %v8020_v10 = vld [vmem:[%s7961_s8 + $0x120] sm:$0xff] }
 0x12e   : > { %5876 = vmatpush1.bf16.xpose.msra.mxu1 %v5875_v20  ;;  %v374_v20 = vld [vmem:[%s7961_s8 + $0x38] sm:$0xff] }
 0x12f   : > { %5940 = vmatpush1.bf16.xpose.msra.mxu0 %v5939_v21  ;;  %5878 = vmatprep.subr.bf16.mxu1 %v5877_v22  ;;  %v5961_v21 = vpack.c.bf16 %v582_v13, %v576_v12  ;;  %v376_v22 = vld [vmem:[%s7961_s8 + $0x48] sm:$0xff]  ;;  %v806_v13 = vld [vmem:[#allocation5 + $0x7b8] sm:$0xff] }
 0x130   : > { %5942 = vmatprep.subr.bf16.mxu0 %v5941_v23  ;;  %v6025_v23 = vpack.c.bf16 %v770_v17, %v764_v16  ;;  %v800_v12 = vld [vmem:[#allocation5 + $0x788] sm:$0xff]  ;;  %v8024_v16 = vld [vmem:[%s7961_s8 + $0x158] sm:$0xff]  ;;  %v5973_v17 = vpack.c.bf16 %v618_v9, %v612_v8  ;;  %v8080_v8 = vld [vmem:[%s7961_s8 + $0x240] sm:$0xff] }
 0x136   : > { %5880 = vmatpush1.bf16.xpose.msra.mxu1 %v5879_v32  ;;  %v588_v32 = vld [vmem:[#allocation5 + $0xe8] sm:$0xff] }
 0x137   : > { %5944 = vmatpush1.bf16.xpose.msra.mxu0 %v5943_v33  ;;  %5882 = vmatprep.subr.bf16.mxu1 %v5881_v34  ;;  %v594_v33 = vld [vmem:[#allocation5 + $0x118] sm:$0xff]  ;;  %v379_v34 = vld [vmem:[%s7961_s8 + $0x60] sm:$0xff] }
 0x138   : > { %5946 = vmatprep.subr.bf16.mxu0 %v5945_v35  ;;  %v6027_v35 = vpack.c.bf16 %v769_v28, %v763_v27  ;;  %v5965_v41 = vpack.c.bf16 %v594_v33, %v588_v32  ;;  %v617_v27 = vld [vmem:[#allocation5 + $0x1d0] sm:$0xff]  ;;  %v624_v28 = vld [vmem:[#allocation5 + $0x208] sm:$0xff]  ;;  %v818_v33 = vld [vmem:[#allocation5 + $0x818] sm:$0xff] }
 0x139   : > { %v812_v32 = vld [vmem:[#allocation5 + $0x7e8] sm:$0xff] }
 0x13e   : > { %5884 = vmatpush1.bf16.xpose.msra.mxu1 %v5883_v44  ;;  %v385_v44 = vld [vmem:[%s7961_s8 + $0x90] sm:$0xff] }
 0x13f   : > { %5948 = vmatpush1.bf16.xpose.msra.mxu0 %v5947_v45  ;;  %5886 = vmatprep.subr.bf16.mxu1 %v5885_v46  ;;  %v387_v45 = vld [vmem:[%s7961_s8 + $0xa0] sm:$0xff]  ;;  %v392_v46 = vld [vmem:[%s7961_s8 + $0xc8] sm:$0xff] }
 0x140   : > { %5950 = vmatprep.subr.bf16.mxu0 %v5949_v47  ;;  %v775_v47 = vld [vmem:[#allocation5 + $0x6c0] sm:$0xff] }
 0x141   : > { %v6031_v55 = vpack.c.bf16 %v781_v48, %v775_v47  ;;  %v629_v47 = vld [vmem:[#allocation5 + $0x230] sm:$0xff]  ;;  %v636_v48 = vld [vmem:[#allocation5 + $0x268] sm:$0xff] }
 0x146   : > { %5888 = vmatpush1.bf16.xpose.msra.mxu1 %v5887_v56  ;;  %v788_v56 = vld [vmem:[#allocation5 + $0x728] sm:$0xff] }
 0x147   : > { %5952 = vmatpush1.bf16.xpose.msra.mxu0 %v5951_v57  ;;  %5890 = vmatprep.subr.bf16.mxu1 %v5889_v58  ;;  %v794_v57 = vld [vmem:[#allocation5 + $0x758] sm:$0xff]  ;;  %v393_v58 = vld [vmem:[%s7961_s8 + $0xd0] sm:$0xff] }
 0x148   : > { %5954 = vmatprep.subr.bf16.mxu0 %v5953_v59  ;;  %v5967_v59 = vpack.c.bf16 %v593_v51, %v587_v50  ;;  %v6033_v63 = vpack.c.bf16 %v794_v57, %v788_v56  ;;  %v8060_v50 = vld [vmem:[%s7961_s8 + $0x1e0] sm:$0xff]  ;;  %v8064_v57 = vld [vmem:[%s7961_s8 + $0x218] sm:$0xff] }
 0x14e   : > { %5892 = vmatpush1.bf16.xpose.msra.mxu1 %v5891_v4  ;;  %v793_v4 = vld [vmem:[#allocation5 + $0x750] sm:$0xff] }
 0x14f   : > { %5956 = vmatpush1.bf16.xpose.msra.mxu0 %v5955_v5  ;;  %6022 = vmatprep.subr.bf16.mxu1 %v6021_v6  ;;  %v406_v5 = vld [vmem:[%s7961_s8 + $0x138] sm:$0xff]  ;;  %v599_v6 = vld [vmem:[#allocation5 + $0x140] sm:$0xff]  ;;  %v6035_v11 = vpack.c.bf16 %v793_v4, %v787_v3 }
 0x150   : > { %5958 = vmatprep.subr.bf16.mxu0 %v5957_v7  ;;  %v605_v7 = vld [vmem:[#allocation5 + $0x170] sm:$0xff]  ;;  %v442_v3 = vld [vmem:[%s7961_s8 + $0x258] sm:$0xff]  ;;  %v635_v4 = vld [vmem:[#allocation5 + $0x260] sm:$0xff] }
 0x155   : > { %1232 = vmatmul.mubr.f32.vlgmr.msra.gmra.mrb[0].mxu1 %v367_v14  ;;  %v405_v14 = vld [vmem:[%s7961_s8 + $0x130] sm:$0xff] }
 0x156   : > { %1489 = vmatmul.mubr.f32.vlgmr.msra.gmra.mrb[0].mxu0 %v369_v18  ;;  %6024 = vmatpush1.bf16.xpose.msra.mxu1 %v6023_v15  ;;  %v5971_v15 = vpack.c.bf16 %v605_v7, %v599_v6  ;;  %v412_v18 = vld [vmem:[%s7961_s8 + $0x168] sm:$0xff]  ;;  %v654_v7 = vld [vmem:[#allocation5 + $0x2f8] sm:$0xff] }
 0x157   : > { %5960 = vmatpush1.bf16.xpose.msra.mxu0 %v5959_v19  ;;  %1237 = vmatprep.mubr.f32.mxu1 %v374_v20  ;;  %v6037_v19 = vpack.c.bf16 %v806_v13, %v800_v12  ;;  %v8029_v20 = vld [vmem:[%s7961_s8 + $0x150] sm:$0xff]  ;;  %v648_v6 = vld [vmem:[#allocation5 + $0x2c8] sm:$0xff]  ;;  %v842_v12 = vld [vmem:[#allocation5 + $0x8d8] sm:$0xff] }
 0x158   : > { %1494 = vmatprep.mubr.f32.mxu0 %v376_v22  ;;  %5962 = vmatprep.subr.bf16.mxu0 %v5961_v21  ;;  %v411_v21 = vld [vmem:[%s7961_s8 + $0x160] sm:$0xff]  ;;  %v8034_v22 = vld [vmem:[%s7961_s8 + $0x188] sm:$0xff]  ;;  %v441_v13 = vld [vmem:[%s7961_s8 + $0x250] sm:$0xff] }
 0x159   : > { %1238 = vmatmul.mubr.f32.gmra.mrb[2].mxu1 %v373_v24  ;;  %6026 = vmatprep.subr.bf16.mxu1 %v6025_v23  ;;  %v799_v23 = vld [vmem:[#allocation5 + $0x780] sm:$0xff]  ;;  %v805_v24 = vld [vmem:[#allocation5 + $0x7b0] sm:$0xff] }
 0x15a   : > { %1495 = vmatmul.mubr.f32.gmra.mrb[2].mxu0 %v375_v25  ;;  %1243 = vmatprep.mubr.f32.mxu1 %v380_v26  ;;  %v418_v25 = vld [vmem:[%s7961_s8 + $0x198] sm:$0xff]  ;;  %v611_v26 = vld [vmem:[#allocation5 + $0x1a0] sm:$0xff]  ;;  %v6039_v31 = vpack.c.bf16 %v805_v24, %v799_v23  ;;  %v8094_v24 = vld [vmem:[%s7961_s8 + $0x2a8] sm:$0xff] }
 0x15b   : > { %1500 = vmatprep.mubr.f32.mxu0 %v382_v29  ;;  %v630_v29 = vld [vmem:[#allocation5 + $0x238] sm:$0xff]  ;;  %v447_v23 = vld [vmem:[%s7961_s8 + $0x280] sm:$0xff] }
 0x15c   : > { %v5977_v37 = vpack.c.bf16 %v630_v29, %v624_v28  ;;  %v647_v28 = vld [vmem:[#allocation5 + $0x2c0] sm:$0xff]  ;;  %v653_v29 = vld [vmem:[#allocation5 + $0x2f0] sm:$0xff] }
 0x15d   : > { %1244 = vmatmul.mubr.f32.gmra.mrb[4].mxu1 %v379_v34  ;;  %v417_v34 = vld [vmem:[%s7961_s8 + $0x190] sm:$0xff] }
 0x15e   : > { %1501 = vmatmul.mubr.f32.gmra.mrb[4].mxu0 %v381_v38  ;;  %6028 = vmatpush1.bf16.xpose.msra.mxu1 %v6027_v35  ;;  %v5975_v35 = vpack.c.bf16 %v617_v27, %v611_v26  ;;  %v424_v38 = vld [vmem:[%s7961_s8 + $0x1c8] sm:$0xff]  ;;  %v841_v26 = vld [vmem:[#allocation5 + $0x8d0] sm:$0xff]  ;;  %v454_v27 = vld [vmem:[%s7961_s8 + $0x2b8] sm:$0xff] }
 0x15f   : > { %5964 = vmatpush1.bf16.xpose.msra.mxu0 %v5963_v39  ;;  %1249 = vmatprep.mubr.f32.mxu1 %v386_v40  ;;  %v6041_v39 = vpack.c.bf16 %v818_v33, %v812_v32  ;;  %v8049_v40 = vld [vmem:[%s7961_s8 + $0x1b0] sm:$0xff]  ;;  %v666_v32 = vld [vmem:[#allocation5 + $0x358] sm:$0xff]  ;;  %v8100_v33 = vld [vmem:[%s7961_s8 + $0x2a0] sm:$0xff] }
 0x160   : > { %1506 = vmatprep.mubr.f32.mxu0 %v388_v42  ;;  %5966 = vmatprep.subr.bf16.mxu0 %v5965_v41  ;;  %v423_v41 = vld [vmem:[%s7961_s8 + $0x1c0] sm:$0xff]  ;;  %v8054_v42 = vld [vmem:[%s7961_s8 + $0x1e8] sm:$0xff] }
 0x161   : > { %1250 = vmatmul.mubr.f32.gmra.mrb[6].mxu1 %v385_v44  ;;  %6030 = vmatprep.subr.bf16.mxu1 %v6029_v43  ;;  %v811_v43 = vld [vmem:[#allocation5 + $0x7e0] sm:$0xff]  ;;  %v817_v44 = vld [vmem:[#allocation5 + $0x810] sm:$0xff] }
 0x162   : > { %1507 = vmatmul.mubr.f32.gmra.mrb[6].mxu0 %v387_v45  ;;  %1255 = vmatprep.mubr.f32.mxu1 %v392_v46  ;;  %v430_v45 = vld [vmem:[%s7961_s8 + $0x1f8] sm:$0xff]  ;;  %v623_v46 = vld [vmem:[#allocation5 + $0x200] sm:$0xff]  ;;  %v6043_v51 = vpack.c.bf16 %v817_v44, %v811_v43  ;;  %v460_v44 = vld [vmem:[%s7961_s8 + $0x2e8] sm:$0xff] }
 0x163   : > { %1512 = vmatprep.mubr.f32.mxu0 %v394_v49  ;;  %v642_v49 = vld [vmem:[#allocation5 + $0x298] sm:$0xff]  ;;  %v5979_v56 = vpack.c.bf16 %v629_v47, %v623_v46  ;;  %v8109_v46 = vld [vmem:[%s7961_s8 + $0x2d0] sm:$0xff]  ;;  %v459_v47 = vld [vmem:[%s7961_s8 + $0x2e0] sm:$0xff] }
 0x165   : > { %1256 = vmatmul.mubr.f32.gmra.mrb[8].mxu1 %v8006_v54 }
 0x166   : > { %1513 = vmatmul.mubr.f32.gmra.mrb[8].mxu0 %v393_v58  ;;  %6032 = vmatpush1.bf16.xpose.msra.mxu1 %v6031_v55  ;;  %v429_v55 = vld [vmem:[%s7961_s8 + $0x1f0] sm:$0xff]  ;;  %v5981_v58 = vpack.c.bf16 %v642_v49, %v636_v48  ;;  %v8114_v48 = vld [vmem:[%s7961_s8 + $0x308] sm:$0xff]  ;;  %v847_v49 = vld [vmem:[#allocation5 + $0x900] sm:$0xff] }
 0x167   : > { %5968 = vmatpush1.bf16.xpose.msra.mxu0 %v5967_v59  ;;  %1261 = vmatprep.mubr.f32.mxu1 %v398_v60  ;;  %v436_v59 = vld [vmem:[%s7961_s8 + $0x228] sm:$0xff]  ;;  %v6045_v60 = vpack.c.bf16 %v830_v53, %v824_v52  ;;  %v466_v52 = vld [vmem:[%s7961_s8 + $0x318] sm:$0xff]  ;;  %v659_v53 = vld [vmem:[#allocation5 + $0x320] sm:$0xff] }
 0x168   : > { %1518 = vmatprep.mubr.f32.mxu0 %v400_v62  ;;  %5970 = vmatprep.subr.bf16.mxu0 %v5969_v61  ;;  %v8069_v61 = vld [vmem:[%s7961_s8 + $0x210] sm:$0xff]  ;;  %v435_v62 = vld [vmem:[%s7961_s8 + $0x220] sm:$0xff] }
 0x169   : > { %1262 = vmatmul.mubr.f32.gmra.mrb[10].mxu1 %v8013_v0  ;;  %6034 = vmatprep.subr.bf16.mxu1 %v6033_v63  ;;  %v8074_v63 = vld [vmem:[%s7961_s8 + $0x248] sm:$0xff] }
 0x16a   : > { %1519 = vmatmul.mubr.f32.gmra.mrb[10].mxu0 %v399_v1  ;;  %1267 = vmatprep.mubr.f32.mxu1 %v404_v2  ;;  %v823_v1 = vld [vmem:[#allocation5 + $0x840] sm:$0xff]  ;;  %v829_v2 = vld [vmem:[#allocation5 + $0x870] sm:$0xff] }
 0x16b   : > { %1524 = vmatprep.mubr.f32.mxu0 %v406_v5  ;;  %v641_v5 = vld [vmem:[#allocation5 + $0x290] sm:$0xff]  ;;  %v6047_v9 = vpack.c.bf16 %v829_v2, %v823_v1  ;;  %v866_v1 = vld [vmem:[#allocation5 + $0x998] sm:$0xff] }
 0x16c   : > { %v465_v2 = vld [vmem:[%s7961_s8 + $0x310] sm:$0xff] }
 0x16d   : > { %1268 = vmatmul.mubr.f32.gmra.mrb[12].mxu1 %v8020_v10 }
 0x16e   : > { %1525 = vmatmul.mubr.f32.gmra.mrb[12].mxu0 %v405_v14  ;;  %6036 = vmatpush1.bf16.xpose.msra.mxu1 %v6035_v11  ;;  %v836_v11 = vld [vmem:[#allocation5 + $0x8a8] sm:$0xff]  ;;  %v5983_v14 = vpack.c.bf16 %v641_v5, %v635_v4  ;;  %v8124_v4 = vld [vmem:[%s7961_s8 + $0x338] sm:$0xff] }
 0x16f   : > { %5972 = vmatpush1.bf16.xpose.msra.mxu0 %v5971_v15  ;;  %1273 = vmatprep.mubr.f32.mxu1 %v8024_v16  ;;  %v8084_v15 = vld [vmem:[%s7961_s8 + $0x278] sm:$0xff] }
 0x170   : > { %1530 = vmatprep.mubr.f32.mxu0 %v412_v18  ;;  %5974 = vmatprep.subr.bf16.mxu0 %v5973_v17  ;;  %v5985_v17 = vpack.c.bf16 %v654_v7, %v648_v6  ;;  %v448_v18 = vld [vmem:[%s7961_s8 + $0x288] sm:$0xff] }
 0x171   : > { %1274 = vmatmul.mubr.f32.gmra.mrb[14].mxu1 %v8029_v20  ;;  %6038 = vmatprep.subr.bf16.mxu1 %v6037_v19  ;;  %v6049_v19 = vpack.c.bf16 %v842_v12, %v836_v11  ;;  %v472_v6 = vld [vmem:[%s7961_s8 + $0x348] sm:$0xff]  ;;  %v471_v11 = vld [vmem:[%s7961_s8 + $0x340] sm:$0xff] }
 0x172   : > { %1531 = vmatmul.mubr.f32.gmra.mrb[14].mxu0 %v411_v21  ;;  %1279 = vmatprep.mubr.f32.mxu1 %v8034_v22  ;;  %v8089_v21 = vld [vmem:[%s7961_s8 + $0x270] sm:$0xff]  ;;  %v8134_v12 = vld [vmem:[%s7961_s8 + $0x368] sm:$0xff] }
 0x173   : > { %1536 = vmatprep.mubr.f32.mxu0 %v418_v25  ;;  %v835_v25 = vld [vmem:[#allocation5 + $0x8a0] sm:$0xff] }
 0x175   : > { %1280 = vmatmul.mubr.f32.gmra.mrb[16].mxu1 %v8040_v30 }
 0x176   : > { %1537 = vmatmul.mubr.f32.gmra.mrb[16].mxu0 %v417_v34  ;;  %6040 = vmatpush1.bf16.xpose.msra.mxu1 %v6039_v31  ;;  %v660_v31 = vld [vmem:[#allocation5 + $0x328] sm:$0xff]  ;;  %v6051_v34 = vpack.c.bf16 %v841_v26, %v835_v25  ;;  %v690_v25 = vld [vmem:[#allocation5 + $0x418] sm:$0xff]  ;;  %v8140_v26 = vld [vmem:[%s7961_s8 + $0x360] sm:$0xff] }
 0x177   : > { %5976 = vmatpush1.bf16.xpose.msra.mxu0 %v5975_v35  ;;  %1285 = vmatprep.mubr.f32.mxu1 %v8044_v36  ;;  %v848_v35 = vld [vmem:[#allocation5 + $0x908] sm:$0xff]  ;;  %v5989_v43 = vpack.c.bf16 %v666_v32, %v660_v31  ;;  %v477_v31 = vld [vmem:[%s7961_s8 + $0x370] sm:$0xff] }
 0x178   : > { %1542 = vmatprep.mubr.f32.mxu0 %v424_v38  ;;  %5978 = vmatprep.subr.bf16.mxu0 %v5977_v37  ;;  %v854_v37 = vld [vmem:[#allocation5 + $0x938] sm:$0xff]  ;;  %v453_v38 = vld [vmem:[%s7961_s8 + $0x2b0] sm:$0xff] }
 0x179   : > { %1286 = vmatmul.mubr.f32.gmra.mrb[18].mxu1 %v8049_v40  ;;  %6042 = vmatprep.subr.bf16.mxu1 %v6041_v39  ;;  %v5987_v39 = vpack.c.bf16 %v653_v29, %v647_v28  ;;  %v872_v28 = vld [vmem:[#allocation5 + $0x9c8] sm:$0xff]  ;;  %v878_v29 = vld [vmem:[#allocation5 + $0x9f8] sm:$0xff] }
 0x17a   : > { %1543 = vmatmul.mubr.f32.gmra.mrb[18].mxu0 %v423_v41  ;;  %1291 = vmatprep.mubr.f32.mxu1 %v8054_v42  ;;  %v8104_v41 = vld [vmem:[%s7961_s8 + $0x2d8] sm:$0xff] }
 0x17b   : > { %1548 = vmatprep.mubr.f32.mxu0 %v430_v45  ;;  %v6053_v45 = vpack.c.bf16 %v854_v37, %v848_v35  ;;  %v484_v37 = vld [vmem:[%s7961_s8 + $0x3a8] sm:$0xff] }
 0x17d   : > { %1292 = vmatmul.mubr.f32.gmra.mrb[20].mxu1 %v8060_v50 }
 0x17e   : > { %1549 = vmatmul.mubr.f32.gmra.mrb[20].mxu0 %v429_v55  ;;  %6044 = vmatpush1.bf16.xpose.msra.mxu1 %v6043_v51  ;;  %v853_v51 = vld [vmem:[#allocation5 + $0x930] sm:$0xff] }
 0x17f   : > { %5980 = vmatpush1.bf16.xpose.msra.mxu0 %v5979_v56  ;;  %1297 = vmatprep.mubr.f32.mxu1 %v8064_v57  ;;  %v665_v55 = vld [vmem:[#allocation5 + $0x350] sm:$0xff]  ;;  %v672_v56 = vld [vmem:[#allocation5 + $0x388] sm:$0xff] }
 0x180   : > { %1554 = vmatprep.mubr.f32.mxu0 %v436_v59  ;;  %5982 = vmatprep.subr.bf16.mxu0 %v5981_v58  ;;  %v678_v58 = vld [vmem:[#allocation5 + $0x3b8] sm:$0xff]  ;;  %v8120_v59 = vld [vmem:[%s7961_s8 + $0x300] sm:$0xff] }
 0x181   : > { %1298 = vmatmul.mubr.f32.gmra.mrb[22].mxu1 %v8069_v61  ;;  %6046 = vmatprep.subr.bf16.mxu1 %v6045_v60  ;;  %v6055_v60 = vpack.c.bf16 %v853_v51, %v847_v49  ;;  %v5993_v5 = vpack.c.bf16 %v678_v58, %v672_v56  ;;  %v490_v49 = vld [vmem:[%s7961_s8 + $0x3d8] sm:$0xff]  ;;  %v683_v51 = vld [vmem:[#allocation5 + $0x3e0] sm:$0xff] }
 0x182   : > { %1555 = vmatmul.mubr.f32.gmra.mrb[22].mxu0 %v435_v62  ;;  %1303 = vmatprep.mubr.f32.mxu1 %v8074_v63  ;;  %v860_v62 = vld [vmem:[#allocation5 + $0x968] sm:$0xff]  ;;  %v8160_v56 = vld [vmem:[%s7961_s8 + $0x3c0] sm:$0xff] }
 0x183   : > { %1560 = vmatprep.mubr.f32.mxu0 %v442_v3  ;;  %v5991_v3 = vpack.c.bf16 %v665_v55, %v659_v53  ;;  %v6057_v7 = vpack.c.bf16 %v866_v1, %v860_v62  ;;  %v696_v53 = vld [vmem:[#allocation5 + $0x448] sm:$0xff]  ;;  %v702_v55 = vld [vmem:[#allocation5 + $0x478] sm:$0xff]  ;;  %v489_v1 = vld [vmem:[%s7961_s8 + $0x3d0] sm:$0xff] }
 0x184   : > { %v890_v62 = vld [vmem:[#allocation5 + $0xa58] sm:$0xff] }
 0x185   : > { %1304 = vmatmul.mubr.f32.gmra.mrb[24].mxu1 %v8080_v8 }
 0x186   : > { %1561 = vmatmul.mubr.f32.gmra.mrb[24].mxu0 %v441_v13  ;;  %6048 = vmatpush1.bf16.xpose.msra.mxu1 %v6047_v9  ;;  %v8129_v9 = vld [vmem:[%s7961_s8 + $0x330] sm:$0xff]  ;;  %v859_v13 = vld [vmem:[#allocation5 + $0x960] sm:$0xff] }
 0x187   : > { %5984 = vmatpush1.bf16.xpose.msra.mxu0 %v5983_v14  ;;  %1309 = vmatprep.mubr.f32.mxu1 %v8084_v15  ;;  %v865_v14 = vld [vmem:[#allocation5 + $0x990] sm:$0xff] }
 0x188   : > { %1566 = vmatprep.mubr.f32.mxu0 %v448_v18  ;;  %5986 = vmatprep.subr.bf16.mxu0 %v5985_v17  ;;  %v478_v17 = vld [vmem:[%s7961_s8 + $0x378] sm:$0xff]  ;;  %v671_v18 = vld [vmem:[#allocation5 + $0x380] sm:$0xff] }
 0x189   : > { %1310 = vmatmul.mubr.f32.gmra.mrb[26].mxu1 %v8089_v21  ;;  %6050 = vmatprep.subr.bf16.mxu1 %v6049_v19  ;;  %v677_v19 = vld [vmem:[#allocation5 + $0x3b0] sm:$0xff] }
 0x18a   : > { %1567 = vmatmul.mubr.f32.gmra.mrb[26].mxu0 %v447_v23  ;;  %1315 = vmatprep.mubr.f32.mxu1 %v8094_v24  ;;  %v684_v23 = vld [vmem:[#allocation5 + $0x3e8] sm:$0xff]  ;;  %v5995_v32 = vpack.c.bf16 %v677_v19, %v671_v18  ;;  %v889_v18 = vld [vmem:[#allocation5 + $0xa50] sm:$0xff]  ;;  %v502_v19 = vld [vmem:[%s7961_s8 + $0x438] sm:$0xff] }
 0x18b   : > { %1572 = vmatprep.mubr.f32.mxu0 %v454_v27  ;;  %v6059_v27 = vpack.c.bf16 %v865_v14, %v859_v13  ;;  %v5997_v35 = vpack.c.bf16 %v690_v25, %v684_v23  ;;  %v495_v13 = vld [vmem:[%s7961_s8 + $0x400] sm:$0xff]  ;;  %v8174_v14 = vld [vmem:[%s7961_s8 + $0x428] sm:$0xff]  ;;  %v701_v25 = vld [vmem:[#allocation5 + $0x470] sm:$0xff] }
 0x18c   : > { %v695_v23 = vld [vmem:[#allocation5 + $0x440] sm:$0xff] }
 0x18d   : > { %1316 = vmatmul.mubr.f32.gmra.mrb[28].mxu1 %v8100_v33 }
 0x18e   : > { %1573 = vmatmul.mubr.f32.gmra.mrb[28].mxu0 %v453_v38  ;;  %6052 = vmatpush1.bf16.xpose.msra.mxu1 %v6051_v34  ;;  %v8144_v34 = vld [vmem:[%s7961_s8 + $0x398] sm:$0xff]  ;;  %v6061_v38 = vpack.c.bf16 %v878_v29, %v872_v28  ;;  %v8180_v29 = vld [vmem:[%s7961_s8 + $0x420] sm:$0xff] }
 0x18f   : > { %5988 = vmatpush1.bf16.xpose.msra.mxu0 %v5987_v39  ;;  %1321 = vmatprep.mubr.f32.mxu1 %v8104_v41  ;;  %v8149_v39 = vld [vmem:[%s7961_s8 + $0x390] sm:$0xff]  ;;  %v714_v28 = vld [vmem:[#allocation5 + $0x4d8] sm:$0xff] }
 0x190   : > { %1578 = vmatprep.mubr.f32.mxu0 %v460_v44  ;;  %5990 = vmatprep.subr.bf16.mxu0 %v5989_v43  ;;  %v483_v43 = vld [vmem:[%s7961_s8 + $0x3a0] sm:$0xff]  ;;  %v8154_v44 = vld [vmem:[%s7961_s8 + $0x3c8] sm:$0xff] }
 0x191   : > { %1322 = vmatmul.mubr.f32.gmra.mrb[30].mxu1 %v8109_v46  ;;  %6054 = vmatprep.subr.bf16.mxu1 %v6053_v45  ;;  %v871_v45 = vld [vmem:[#allocation5 + $0x9c0] sm:$0xff] }
 0x192   : > { %1579 = vmatmul.mubr.f32.gmra.mrb[30].mxu0 %v459_v47  ;;  %1327 = vmatprep.mubr.f32.mxu1 %v8114_v48  ;;  %v877_v47 = vld [vmem:[#allocation5 + $0x9f0] sm:$0xff] }
 0x193   : > { %1584 = vmatprep.mubr.f32.mxu0 %v466_v52  ;;  %v689_v52 = vld [vmem:[#allocation5 + $0x410] sm:$0xff]  ;;  %v6063_v58 = vpack.c.bf16 %v877_v47, %v871_v45  ;;  %v508_v47 = vld [vmem:[%s7961_s8 + $0x468] sm:$0xff] }
 0x195   : > { %1328 = vmatmul.mubr.f32.gmra.mrb[32].mxu1 %v8120_v59 }
 0x196   : > { %1585 = vmatmul.mubr.f32.gmra.mrb[32].mxu0 %v465_v2  ;;  %6056 = vmatpush1.bf16.xpose.msra.mxu1 %v6055_v60  ;;  %v884_v60 = vld [vmem:[#allocation5 + $0xa28] sm:$0xff]  ;;  %v5999_v2 = vpack.c.bf16 %v689_v52, %v683_v51  ;;  %v8189_v51 = vld [vmem:[%s7961_s8 + $0x450] sm:$0xff]  ;;  %v507_v52 = vld [vmem:[%s7961_s8 + $0x460] sm:$0xff] }
 0x197   : > { %5992 = vmatpush1.bf16.xpose.msra.mxu0 %v5991_v3  ;;  %1333 = vmatprep.mubr.f32.mxu1 %v8124_v4  ;;  %v8164_v3 = vld [vmem:[%s7961_s8 + $0x3f8] sm:$0xff] }
 0x198   : > { %1590 = vmatprep.mubr.f32.mxu0 %v472_v6  ;;  %5994 = vmatprep.subr.bf16.mxu0 %v5993_v5  ;;  %v6001_v5 = vpack.c.bf16 %v702_v55, %v696_v53  ;;  %v496_v6 = vld [vmem:[%s7961_s8 + $0x408] sm:$0xff]  ;;  %v895_v55 = vld [vmem:[#allocation5 + $0xa80] sm:$0xff] }
 0x199   : > { %1334 = vmatmul.mubr.f32.gmra.mrb[34].mxu1 %v8129_v9  ;;  %6058 = vmatprep.subr.bf16.mxu1 %v6057_v7  ;;  %v6065_v7 = vpack.c.bf16 %v890_v62, %v884_v60  ;;  %v8194_v53 = vld [vmem:[%s7961_s8 + $0x488] sm:$0xff]  ;;  %v514_v60 = vld [vmem:[%s7961_s8 + $0x498] sm:$0xff]  ;;  %v707_v62 = vld [vmem:[#allocation5 + $0x4a0] sm:$0xff] }
 0x19a   : > { %1591 = vmatmul.mubr.f32.gmra.mrb[34].mxu0 %v471_v11  ;;  %1339 = vmatprep.mubr.f32.mxu1 %v8134_v12  ;;  %v8169_v11 = vld [vmem:[%s7961_s8 + $0x3f0] sm:$0xff] }
 0x19b   : > { %1596 = vmatprep.mubr.f32.mxu0 %v478_v17  ;;  %v883_v17 = vld [vmem:[#allocation5 + $0xa20] sm:$0xff] }
 0x19d   : > { %1340 = vmatmul.mubr.f32.gmra.mrb[36].mxu1 %v8140_v26 }
 0x19e   : > { %1597 = vmatmul.mubr.f32.gmra.mrb[36].mxu0 %v477_v31  ;;  %6060 = vmatpush1.bf16.xpose.msra.mxu1 %v6059_v27  ;;  %v708_v27 = vld [vmem:[#allocation5 + $0x4a8] sm:$0xff]  ;;  %v6067_v31 = vpack.c.bf16 %v889_v18, %v883_v17  ;;  %v914_v17 = vld [vmem:[#allocation5 + $0xb18] sm:$0xff]  ;;  %v513_v18 = vld [vmem:[%s7961_s8 + $0x490] sm:$0xff] }
 0x19f   : > { %5996 = vmatpush1.bf16.xpose.msra.mxu0 %v5995_v32  ;;  %1345 = vmatprep.mubr.f32.mxu1 %v8144_v34  ;;  %v896_v32 = vld [vmem:[#allocation5 + $0xa88] sm:$0xff]  ;;  %v6005_v45 = vpack.c.bf16 %v714_v28, %v708_v27 }
 0x1a0   : > { %1602 = vmatprep.mubr.f32.mxu0 %v484_v37  ;;  %5998 = vmatprep.subr.bf16.mxu0 %v5997_v35  ;;  %v902_v35 = vld [vmem:[#allocation5 + $0xab8] sm:$0xff]  ;;  %v501_v37 = vld [vmem:[%s7961_s8 + $0x430] sm:$0xff]  ;;  %v520_v27 = vld [vmem:[%s7961_s8 + $0x4c8] sm:$0xff] }
 0x1a1   : > { %1346 = vmatmul.mubr.f32.gmra.mrb[38].mxu1 %v8149_v39  ;;  %6062 = vmatprep.subr.bf16.mxu1 %v6061_v38  ;;  %v6003_v38 = vpack.c.bf16 %v701_v25, %v695_v23  ;;  %v8204_v23 = vld [vmem:[%s7961_s8 + $0x4b8] sm:$0xff] }
 0x1a2   : > { %1603 = vmatmul.mubr.f32.gmra.mrb[38].mxu0 %v483_v43  ;;  %1351 = vmatprep.mubr.f32.mxu1 %v8154_v44  ;;  %v8184_v43 = vld [vmem:[%s7961_s8 + $0x458] sm:$0xff] }
 0x1a3   : > { %1608 = vmatprep.mubr.f32.mxu0 %v490_v49  ;;  %v6069_v49 = vpack.c.bf16 %v902_v35, %v896_v32  ;;  %v519_v32 = vld [vmem:[%s7961_s8 + $0x4c0] sm:$0xff]  ;;  %v8214_v35 = vld [vmem:[%s7961_s8 + $0x4e8] sm:$0xff] }
 0x1a5   : > { %1352 = vmatmul.mubr.f32.gmra.mrb[40].mxu1 %v8160_v56 }
 0x1a6   : > { %1609 = vmatmul.mubr.f32.gmra.mrb[40].mxu0 %v489_v1  ;;  %6064 = vmatpush1.bf16.xpose.msra.mxu1 %v6063_v58  ;;  %v901_v58 = vld [vmem:[#allocation5 + $0xab0] sm:$0xff] }
 0x1a7   : > { %6000 = vmatpush1.bf16.xpose.msra.mxu0 %v5999_v2  ;;  %1357 = vmatprep.mubr.f32.mxu1 %v8164_v3  ;;  %v713_v1 = vld [vmem:[#allocation5 + $0x4d0] sm:$0xff]  ;;  %v720_v2 = vld [vmem:[#allocation5 + $0x508] sm:$0xff] }
 0x1a8   : > { %1614 = vmatprep.mubr.f32.mxu0 %v496_v6  ;;  %6002 = vmatprep.subr.bf16.mxu0 %v6001_v5  ;;  %v726_v5 = vld [vmem:[#allocation5 + $0x538] sm:$0xff]  ;;  %v8200_v6 = vld [vmem:[%s7961_s8 + $0x480] sm:$0xff] }
 0x1a9   : > { %1358 = vmatmul.mubr.f32.gmra.mrb[42].mxu1 %v8169_v11  ;;  %6066 = vmatprep.subr.bf16.mxu1 %v6065_v7  ;;  %v6071_v7 = vpack.c.bf16 %v901_v58, %v895_v55  ;;  %v6009_v25 = vpack.c.bf16 %v726_v5, %v720_v2  ;;  %v738_v55 = vld [vmem:[#allocation5 + $0x598] sm:$0xff]  ;;  %v8220_v58 = vld [vmem:[%s7961_s8 + $0x4e0] sm:$0xff]  ;;  %v525_v2 = vld [vmem:[%s7961_s8 + $0x4f0] sm:$0xff] }
 0x1aa   : > { %1615 = vmatmul.mubr.f32.gmra.mrb[42].mxu0 %v495_v13  ;;  %1363 = vmatprep.mubr.f32.mxu1 %v8174_v14  ;;  %v908_v13 = vld [vmem:[#allocation5 + $0xae8] sm:$0xff] }
 0x1ab   : > { %1620 = vmatprep.mubr.f32.mxu0 %v502_v19  ;;  %v6007_v19 = vpack.c.bf16 %v713_v1, %v707_v62  ;;  %v6073_v28 = vpack.c.bf16 %v914_v17, %v908_v13  ;;  %v920_v62 = vld [vmem:[#allocation5 + $0xb48] sm:$0xff]  ;;  %v926_v1 = vld [vmem:[#allocation5 + $0xb78] sm:$0xff] }
 0x1ac   : > { %v532_v17 = vld [vmem:[%s7961_s8 + $0x528] sm:$0xff] }
 0x1ad   : > { %1364 = vmatmul.mubr.f32.gmra.mrb[44].mxu1 %v8180_v29 }
 0x1ae   : > { %1621 = vmatmul.mubr.f32.gmra.mrb[44].mxu0 %v501_v37  ;;  %6068 = vmatpush1.bf16.xpose.msra.mxu1 %v6067_v31  ;;  %v8209_v31 = vld [vmem:[%s7961_s8 + $0x4b0] sm:$0xff]  ;;  %v907_v37 = vld [vmem:[#allocation5 + $0xae0] sm:$0xff] }
 0x1af   : > { %6004 = vmatpush1.bf16.xpose.msra.mxu0 %v6003_v38  ;;  %1369 = vmatprep.mubr.f32.mxu1 %v8184_v43  ;;  %v913_v38 = vld [vmem:[#allocation5 + $0xb10] sm:$0xff] }
 0x1b0   : > { %1626 = vmatprep.mubr.f32.mxu0 %v508_v47  ;;  %6006 = vmatprep.subr.bf16.mxu0 %v6005_v45  ;;  %v526_v45 = vld [vmem:[%s7961_s8 + $0x4f8] sm:$0xff]  ;;  %v719_v47 = vld [vmem:[#allocation5 + $0x500] sm:$0xff] }
 0x1b1   : > { %1370 = vmatmul.mubr.f32.gmra.mrb[46].mxu1 %v8189_v51  ;;  %6070 = vmatprep.subr.bf16.mxu1 %v6069_v49  ;;  %v725_v49 = vld [vmem:[#allocation5 + $0x530] sm:$0xff] }
 0x1b2   : > { %1627 = vmatmul.mubr.f32.gmra.mrb[46].mxu0 %v507_v52  ;;  %1375 = vmatprep.mubr.f32.mxu1 %v8194_v53  ;;  %v732_v52 = vld [vmem:[#allocation5 + $0x568] sm:$0xff]  ;;  %v6011_v5 = vpack.c.bf16 %v725_v49, %v719_v47  ;;  %v750_v49 = vld [vmem:[#allocation5 + $0x5f8] sm:$0xff] }
 0x1b3   : > { %1632 = vmatprep.mubr.f32.mxu0 %v514_v60  ;;  %v6075_v60 = vpack.c.bf16 %v913_v38, %v907_v37  ;;  %v6013_v13 = vpack.c.bf16 %v738_v55, %v732_v52  ;;  %v538_v37 = vld [vmem:[%s7961_s8 + $0x558] sm:$0xff]  ;;  %v731_v38 = vld [vmem:[#allocation5 + $0x560] sm:$0xff]  ;;  %v744_v47 = vld [vmem:[#allocation5 + $0x5c8] sm:$0xff] }
 0x1b4   : > { %v8240_v52 = vld [vmem:[%s7961_s8 + $0x540] sm:$0xff] }
 0x1b5   : > { %1376 = vmatmul.mubr.f32.gmra.mrb[48].mxu1 %v8200_v6 }
 0x1b6   : > { %1633 = vmatmul.mubr.f32.gmra.mrb[48].mxu0 %v513_v18  ;;  %6072 = vmatpush1.bf16.xpose.msra.mxu1 %v6071_v7  ;;  %v8224_v7 = vld [vmem:[%s7961_s8 + $0x518] sm:$0xff]  ;;  %v6077_v18 = vpack.c.bf16 %v926_v1, %v920_v62  ;;  %v537_v1 = vld [vmem:[%s7961_s8 + $0x550] sm:$0xff] }
 0x1b7   : > { %6008 = vmatpush1.bf16.xpose.msra.mxu0 %v6007_v19  ;;  %1381 = vmatprep.mubr.f32.mxu1 %v8204_v23  ;;  %v8229_v19 = vld [vmem:[%s7961_s8 + $0x510] sm:$0xff]  ;;  %v938_v62 = vld [vmem:[#allocation5 + $0xbd8] sm:$0xff] }
 0x1b8   : > { %1638 = vmatprep.mubr.f32.mxu0 %v520_v27  ;;  %6010 = vmatprep.subr.bf16.mxu0 %v6009_v25  ;;  %v531_v25 = vld [vmem:[%s7961_s8 + $0x520] sm:$0xff]  ;;  %v8234_v27 = vld [vmem:[%s7961_s8 + $0x548] sm:$0xff] }
 0x1b9   : > { %1382 = vmatmul.mubr.f32.gmra.mrb[50].mxu1 %v8209_v31  ;;  %6074 = vmatprep.subr.bf16.mxu1 %v6073_v28  ;;  %13596 = vst [vmem:[#allocation20_spill] sm:$0xff] %v8234_v27  ;;  %v919_v28 = vld [vmem:[#allocation5 + $0xb40] sm:$0xff] }
 0x1ba   : > { %1639 = vmatmul.mubr.f32.gmra.mrb[50].mxu0 %v519_v32  ;;  %1387 = vmatprep.mubr.f32.mxu1 %v8214_v35  ;;  %v925_v32 = vld [vmem:[#allocation5 + $0xb70] sm:$0xff] }
 0x1bb   : > { %1644 = vmatprep.mubr.f32.mxu0 %v526_v45  ;;  %v737_v45 = vld [vmem:[#allocation5 + $0x590] sm:$0xff]  ;;  %v6079_v55 = vpack.c.bf16 %v925_v32, %v919_v28  ;;  %v8254_v28 = vld [vmem:[%s7961_s8 + $0x5a8] sm:$0xff]  ;;  %v931_v32 = vld [vmem:[#allocation5 + $0xba0] sm:$0xff] }
 0x1bc   : > { %13599 = vst [vmem:[#allocation23_spill] sm:$0xff] %v8254_v28 }
 0x1bd   : > { %1388 = vmatmul.mubr.f32.gmra.mrb[52].mxu1 %v8220_v58 }
 0x1be   : > { %1645 = vmatmul.mubr.f32.gmra.mrb[52].mxu0 %v525_v2  ;;  %6076 = vmatpush1.bf16.xpose.msra.mxu1 %v6075_v60  ;;  %v932_v60 = vld [vmem:[#allocation5 + $0xba8] sm:$0xff]  ;;  %v6015_v2 = vpack.c.bf16 %v737_v45, %v731_v38  ;;  %v550_v38 = vld [vmem:[%s7961_s8 + $0x5b8] sm:$0xff]  ;;  %v743_v45 = vld [vmem:[#allocation5 + $0x5c0] sm:$0xff] }
 0x1bf   : > { %6012 = vmatpush1.bf16.xpose.msra.mxu0 %v6011_v5  ;;  %1393 = vmatprep.mubr.f32.mxu1 %v8224_v7  ;;  %v8244_v5 = vld [vmem:[%s7961_s8 + $0x578] sm:$0xff] }
 0x1c0   : > { %1650 = vmatprep.mubr.f32.mxu0 %v532_v17  ;;  %6014 = vmatprep.subr.bf16.mxu0 %v6013_v13  ;;  %13597 = vst [vmem:[#allocation21_spill] sm:$0xff] %v8244_v5  ;;  %v6017_v13 = vpack.c.bf16 %v750_v49, %v744_v47  ;;  %v544_v17 = vld [vmem:[%s7961_s8 + $0x588] sm:$0xff]  ;;  %v749_v47 = vld [vmem:[#allocation5 + $0x5f0] sm:$0xff]  ;;  %v754_v49 = vld [vmem:[#allocation5 + $0x618] sm:$0xff] }
 0x1c1   : > { %1394 = vmatmul.mubr.f32.gmra.mrb[54].mxu1 %v8229_v19  ;;  %6078 = vmatprep.subr.bf16.mxu1 %v6077_v18  ;;  %v6081_v18 = vpack.c.bf16 %v938_v62, %v932_v60  ;;  %v8260_v60 = vld [vmem:[%s7961_s8 + $0x5a0] sm:$0xff] }
 0x1c2   : > { %1651 = vmatmul.mubr.f32.gmra.mrb[54].mxu0 %v531_v25  ;;  %1399 = vmatprep.mubr.f32.mxu1 %v8234_v27  ;;  %v8249_v25 = vld [vmem:[%s7961_s8 + $0x570] sm:$0xff]  ;;  %v543_v27 = vld [vmem:[%s7961_s8 + $0x580] sm:$0xff]  ;;  %13600 = vst [vmem:[#allocation24_spill] sm:$0xff] %v8260_v60 }
 0x1c3   : > { %1656 = vmatprep.mubr.f32.mxu0 %v538_v37  ;;  %13598 = vst [vmem:[#allocation22_spill] sm:$0xff] %v8249_v25  ;;  %v937_v37 = vld [vmem:[#allocation5 + $0xbd0] sm:$0xff] }
 0x1c4   : > { %v6083_v62 = vpack.c.bf16 %v937_v37, %v931_v32  ;;  %v555_v32 = vld [vmem:[%s7961_s8 + $0x5e0] sm:$0xff]  ;;  %v753_v37 = vld [vmem:[#allocation5 + $0x610] sm:$0xff] }
 0x1c5   : > { %1400 = vmatmul.mubr.f32.gmra.mrb[56].mxu1 %v8240_v52 }
 0x1c6   : > { %1657 = vmatmul.mubr.f32.gmra.mrb[56].mxu0 %v537_v1  ;;  %6080 = vmatpush1.bf16.xpose.msra.mxu1 %v6079_v55  ;;  %v760_v55 = vld [vmem:[#allocation5 + $0x648] sm:$0xff] }
 0x1c7   : > { %6016 = vmatpush1.bf16.xpose.msra.mxu0 %v6015_v2  ;;  %1405 = vmatprep.mubr.f32.mxu1 %v8244_v5  ;;  %v944_v1 = vld [vmem:[#allocation5 + $0xc08] sm:$0xff]  ;;  %v950_v2 = vld [vmem:[#allocation5 + $0xc38] sm:$0xff] }
 0x1c8   : > { %1662 = vmatprep.mubr.f32.mxu0 %v544_v17  ;;  %6018 = vmatprep.subr.bf16.mxu0 %v6017_v13  ;;  %v549_v13 = vld [vmem:[%s7961_s8 + $0x5b0] sm:$0xff]  ;;  %v6019_v17 = vpack.c.bf16 %v749_v47, %v743_v45  ;;  %v8264_v5 = vld [vmem:[%s7961_s8 + $0x5d8] sm:$0xff]  ;;  %v372_v45 = vld [vmem:[%s7961_s8 + $0x28] sm:$0xff] }
 0x1c9   : > { %1406 = vmatmul.mubr.f32.gmra.mrb[58].mxu1 %v8249_v25  ;;  %6082 = vmatprep.subr.bf16.mxu1 %v6081_v18  ;;  %13601 = vst [vmem:[#allocation25_spill] sm:$0xff] %v8264_v5  ;;  %v6085_v25 = vpack.c.bf16 %v760_v55, %v754_v49  ;;  %v556_v18 = vld [vmem:[%s7961_s8 + $0x5e8] sm:$0xff]  ;;  %v943_v47 = vld [vmem:[#allocation5 + $0xc00] sm:$0xff]  ;;  %v949_v49 = vld [vmem:[#allocation5 + $0xc30] sm:$0xff] }
 0x1ca   : > { %1663 = vmatmul.mubr.f32.gmra.mrb[58].mxu0 %v543_v27  ;;  %1411 = vmatprep.mubr.f32.mxu1 %v8254_v28  ;;  %v6213_v27 = vpack.c.bf16 %v950_v2, %v944_v1  ;;  %v8269_v28 = vld [vmem:[%s7961_s8 + $0x5d0] sm:$0xff]  ;;  %v766_v55 = vld [vmem:[#allocation5 + $0x678] sm:$0xff]  ;;  %v8276_v1 = vld [vmem:[%s7961_s8 + $0x8] sm:$0xff] }
 0x1cb   : > { %1668 = vmatprep.mubr.f32.mxu0 %v550_v38  ;;  %13602 = vst [vmem:[#allocation26_spill] sm:$0xff] %v8269_v28  ;;  %v759_v38 = vld [vmem:[#allocation5 + $0x640] sm:$0xff]  ;;  %13603 = vst [vmem:[#allocation27_spill] sm:$0xff] %v8276_v1 }
 0x1cc   : > { %v6087_v2 = vpack.c.bf16 %v759_v38, %v753_v37  ;;  %v765_v37 = vld [vmem:[#allocation5 + $0x670] sm:$0xff]  ;;  %v771_v38 = vld [vmem:[#allocation5 + $0x6a0] sm:$0xff] }
 0x1cd   : > { %1412 = vmatmul.mubr.f32.gmra.mrb[60].mxu1 %v8260_v60 }
 0x1ce   : > { %1669 = vmatmul.mubr.f32.gmra.mrb[60].mxu0 %v549_v13  ;;  %6084 = vmatpush1.bf16.xpose.msra.mxu1 %v6083_v62  ;;  %v772_v62 = vld [vmem:[#allocation5 + $0x6a8] sm:$0xff] }
 0x1cf   : > { %6020 = vmatpush1.bf16.xpose.msra.mxu0 %v6019_v17  ;;  %1417 = vmatprep.mubr.f32.mxu1 %v8264_v5  ;;  %v956_v13 = vld [vmem:[#allocation5 + $0xc68] sm:$0xff]  ;;  %v962_v17 = vld [vmem:[#allocation5 + $0xc98] sm:$0xff]  ;;  %v6089_v60 = vpack.c.bf16 %v772_v62, %v766_v55  ;;  %v961_v55 = vld [vmem:[#allocation5 + $0xc90] sm:$0xff] }
 0x1d0   : > { %1674 = vmatprep.mubr.f32.mxu0 %v556_v18  ;;  %6086 = vmatprep.subr.bf16.mxu1 %v6085_v25  ;;  %v371_v25 = vld [vmem:[%s7961_s8 + $0x20] sm:$0xff]  ;;  %v6215_v18 = vpack.c.bf16 %v949_v49, %v943_v47  ;;  %v378_v5 = vld [vmem:[%s7961_s8 + $0x58] sm:$0xff]  ;;  %v384_v47 = vld [vmem:[%s7961_s8 + $0x88] sm:$0xff] }
 0x1d1   : > { %1418 = vmatmul.mubr.f32.gmra.mrb[62].mxu1 %v8269_v28  ;;  %6214 = vmatprep.subr.bf16.mxu0 %v6213_v27  ;;  %v8282_v28 = vld [vmem:[%s7961_s8] sm:$0xff]  ;;  %v6217_v27 = vpack.c.bf16 %v962_v17, %v956_v13  ;;  %v8292_v62 = vld [vmem:[%s7961_s8 + $0x30] sm:$0xff]  ;;  %v8296_v13 = vld [vmem:[%s7961_s8 + $0x68] sm:$0xff]  ;;  %v6091_v17 = vpack.c.bf16 %v771_v38, %v765_v37 }
 0x1d2   : > { %1675 = vmatmul.mubr.f32.gmra.mrb[62].mxu0 %v555_v32  ;;  %2002 = vmatprep.mubr.f32.mxu1 %v8276_v1  ;;  %13604 = vst [vmem:[#allocation28_spill] sm:$0xff] %v8282_v28  ;;  %v377_v32 = vld [vmem:[%s7961_s8 + $0x50] sm:$0xff]  ;;  %v955_v49 = vld [vmem:[#allocation5 + $0xc60] sm:$0xff]  ;;  %13606 = vst [vmem:[#allocation30_spill] sm:$0xff] %v8292_v62 }
 0x1d3   : > { %1745 = vmatprep.mubr.f32.mxu0 %v372_v45  ;;  %v8287_v45 = vld [vmem:[%s7961_s8 + $0x38] sm:$0xff]  ;;  %13607 = vst [vmem:[#allocation31_spill] sm:$0xff] %v8296_v13  ;;  %v777_v37 = vld [vmem:[#allocation5 + $0x6d0] sm:$0xff]  ;;  %v783_v38 = vld [vmem:[#allocation5 + $0x700] sm:$0xff] }
 0x1d4   : > { %13605 = vst [vmem:[#allocation29_spill] sm:$0xff] %v8287_v45 }
 0x1d5   : > { %2003 = vmatmul.mubr.f32.vlgmr.msra.gmra.mrb[64].mxu1 %v8282_v28  ;;  %v390_v28 = vld [vmem:[%s7961_s8 + $0xb8] sm:$0xff] }
 0x1d6   : > { %1746 = vmatmul.mubr.f32.vlgmr.msra.gmra.mrb[0].mxu0 %v371_v25  ;;  %6088 = vmatpush1.bf16.xpose.msra.mxu1 %v6087_v2  ;;  %v784_v2 = vld [vmem:[#allocation5 + $0x708] sm:$0xff] }
 0x1d7   : > { %6216 = vmatpush1.bf16.xpose.msra.mxu0 %v6215_v18  ;;  %1751 = vmatprep.mubr.f32.mxu0 %v378_v5  ;;  %v778_v5 = vld [vmem:[#allocation5 + $0x6d8] sm:$0xff]  ;;  %v968_v25 = vld [vmem:[#allocation5 + $0xcc8] sm:$0xff]  ;;  %v383_v18 = vld [vmem:[%s7961_s8 + $0x80] sm:$0xff] }
 0x1d8   : > { %2008 = vmatprep.mubr.f32.mxu1 %v8287_v45  ;;  %6090 = vmatprep.subr.bf16.mxu1 %v6089_v60  ;;  %v974_v60 = vld [vmem:[#allocation5 + $0xcf8] sm:$0xff]  ;;  %v6219_v45 = vpack.c.bf16 %v961_v55, %v955_v49  ;;  %v6093_v1 = vpack.c.bf16 %v784_v2, %v778_v5  ;;  %v396_v49 = vld [vmem:[%s7961_s8 + $0xe8] sm:$0xff]  ;;  %v967_v55 = vld [vmem:[#allocation5 + $0xcc0] sm:$0xff] }
 0x1d9   : > { %2009 = vmatmul.mubr.f32.gmra.mrb[66].mxu1 %v8292_v62  ;;  %6218 = vmatprep.subr.bf16.mxu0 %v6217_v27  ;;  %v8302_v62 = vld [vmem:[%s7961_s8 + $0x60] sm:$0xff]  ;;  %v6221_v27 = vpack.c.bf16 %v974_v60, %v968_v25  ;;  %v973_v5 = vld [vmem:[#allocation5 + $0xcf0] sm:$0xff]  ;;  %v6095_v25 = vpack.c.bf16 %v783_v38, %v777_v37  ;;  %v980_v60 = vld [vmem:[#allocation5 + $0xd28] sm:$0xff] }
 0x1da   : > { %1752 = vmatmul.mubr.f32.gmra.mrb[2].mxu0 %v377_v32  ;;  %2014 = vmatprep.mubr.f32.mxu1 %v8296_v13  ;;  %13608 = vst [vmem:[#allocation32_spill] sm:$0xff] %v8302_v62  ;;  %v389_v32 = vld [vmem:[%s7961_s8 + $0xb0] sm:$0xff]  ;;  %v795_v37 = vld [vmem:[#allocation5 + $0x760] sm:$0xff]  ;;  %v8324_v38 = vld [vmem:[%s7961_s8 + $0xf8] sm:$0xff] }
 0x1db   : > { %1757 = vmatprep.mubr.f32.mxu0 %v384_v47  ;;  %v8307_v47 = vld [vmem:[%s7961_s8 + $0x98] sm:$0xff]  ;;  %v8312_v2 = vld [vmem:[%s7961_s8 + $0x90] sm:$0xff]  ;;  %13611 = vst [vmem:[#allocation35_spill] sm:$0xff] %v8324_v38 }
 0x1dc   : > { %13609 = vst [vmem:[#allocation33_spill] sm:$0xff] %v8307_v47 }
 0x1dd   : > { %2015 = vmatmul.mubr.f32.gmra.mrb[68].mxu1 %v8302_v62  ;;  %v402_v62 = vld [vmem:[%s7961_s8 + $0x118] sm:$0xff] }
 0x1de   : > { %1758 = vmatmul.mubr.f32.gmra.mrb[4].mxu0 %v383_v18  ;;  %6092 = vmatpush1.bf16.xpose.msra.mxu1 %v6091_v17  ;;  %v8316_v17 = vld [vmem:[%s7961_s8 + $0xc8] sm:$0xff]  ;;  %v395_v18 = vld [vmem:[%s7961_s8 + $0xe0] sm:$0xff] }
 0x1df   : > { %6220 = vmatpush1.bf16.xpose.msra.mxu0 %v6219_v45  ;;  %1763 = vmatprep.mubr.f32.mxu0 %v390_v28  ;;  %v790_v28 = vld [vmem:[#allocation5 + $0x738] sm:$0xff]  ;;  %v796_v45 = vld [vmem:[#allocation5 + $0x768] sm:$0xff]  ;;  %13610 = vst [vmem:[#allocation34_spill] sm:$0xff] %v8316_v17 }
 0x1e0   : > { %2020 = vmatprep.mubr.f32.mxu1 %v8307_v47  ;;  %6094 = vmatprep.subr.bf16.mxu1 %v6093_v1  ;;  %v986_v1 = vld [vmem:[#allocation5 + $0xd58] sm:$0xff]  ;;  %v6223_v47 = vpack.c.bf16 %v973_v5, %v967_v55  ;;  %v6097_v13 = vpack.c.bf16 %v796_v45, %v790_v28  ;;  %v979_v55 = vld [vmem:[#allocation5 + $0xd20] sm:$0xff]  ;;  %v985_v5 = vld [vmem:[#allocation5 + $0xd50] sm:$0xff] }
 0x1e1   : > { %2021 = vmatmul.mubr.f32.gmra.mrb[70].mxu1 %v8312_v2  ;;  %6222 = vmatprep.subr.bf16.mxu0 %v6221_v27  ;;  %v6225_v27 = vpack.c.bf16 %v986_v1, %v980_v60  ;;  %v992_v45 = vld [vmem:[#allocation5 + $0xd88] sm:$0xff]  ;;  %v6227_v60 = vpack.c.bf16 %v985_v5, %v979_v55  ;;  %v414_v1 = vld [vmem:[%s7961_s8 + $0x178] sm:$0xff] }
 0x1e2   : > { %1764 = vmatmul.mubr.f32.gmra.mrb[6].mxu0 %v389_v32  ;;  %2026 = vmatprep.mubr.f32.mxu1 %v8316_v17  ;;  %v401_v32 = vld [vmem:[%s7961_s8 + $0x110] sm:$0xff]  ;;  %v820_v55 = vld [vmem:[#allocation5 + $0x828] sm:$0xff] }
 0x1e3   : > { %1769 = vmatprep.mubr.f32.mxu0 %v396_v49  ;;  %v789_v17 = vld [vmem:[#allocation5 + $0x730] sm:$0xff]  ;;  %v408_v49 = vld [vmem:[%s7961_s8 + $0x148] sm:$0xff] }
 0x1e4   : > { %v6099_v28 = vpack.c.bf16 %v795_v37, %v789_v17  ;;  %v420_v17 = vld [vmem:[%s7961_s8 + $0x1a8] sm:$0xff]  ;;  %v991_v37 = vld [vmem:[#allocation5 + $0xd80] sm:$0xff] }
 0x1e5   : > { %2027 = vmatmul.mubr.f32.gmra.mrb[72].mxu1 %v8006_v54  ;;  %v802_v54 = vld [vmem:[#allocation5 + $0x798] sm:$0xff] }
 0x1e6   : > { %1770 = vmatmul.mubr.f32.gmra.mrb[8].mxu0 %v395_v18  ;;  %6096 = vmatpush1.bf16.xpose.msra.mxu1 %v6095_v25  ;;  %v998_v25 = vld [vmem:[#allocation5 + $0xdb8] sm:$0xff] }
 0x1e7   : > { %6224 = vmatpush1.bf16.xpose.msra.mxu0 %v6223_v47  ;;  %1775 = vmatprep.mubr.f32.mxu0 %v402_v62  ;;  %v808_v47 = vld [vmem:[#allocation5 + $0x7c8] sm:$0xff] }
 0x1e8   : > { %2032 = vmatprep.mubr.f32.mxu1 %v8324_v38  ;;  %6098 = vmatprep.subr.bf16.mxu1 %v6097_v13  ;;  %v8330_v62 = vld [vmem:[%s7961_s8 + $0x128] sm:$0xff]  ;;  %v407_v13 = vld [vmem:[%s7961_s8 + $0x140] sm:$0xff]  ;;  %v6101_v18 = vpack.c.bf16 %v808_v47, %v802_v54  ;;  %v1010_v47 = vld [vmem:[#allocation5 + $0xe18] sm:$0xff] }
 0x1e9   : > { %2033 = vmatmul.mubr.f32.gmra.mrb[74].mxu1 %v8013_v0  ;;  %6226 = vmatprep.subr.bf16.mxu0 %v6225_v27  ;;  %v6229_v0 = vpack.c.bf16 %v998_v25, %v992_v45  ;;  %v413_v27 = vld [vmem:[%s7961_s8 + $0x170] sm:$0xff]  ;;  %v807_v38 = vld [vmem:[#allocation5 + $0x7c0] sm:$0xff]  ;;  %v1004_v54 = vld [vmem:[#allocation5 + $0xde8] sm:$0xff] }
 0x1ea   : > { %1776 = vmatmul.mubr.f32.gmra.mrb[10].mxu0 %v401_v32  ;;  %2038 = vmatprep.mubr.f32.mxu1 %v8330_v62  ;;  %v801_v32 = vld [vmem:[#allocation5 + $0x790] sm:$0xff]  ;;  %v426_v45 = vld [vmem:[%s7961_s8 + $0x1d8] sm:$0xff] }
 0x1eb   : > { %1781 = vmatprep.mubr.f32.mxu0 %v408_v49  ;;  %v997_v49 = vld [vmem:[#allocation5 + $0xdb0] sm:$0xff]  ;;  %v6103_v5 = vpack.c.bf16 %v807_v38, %v801_v32  ;;  %v1003_v38 = vld [vmem:[#allocation5 + $0xde0] sm:$0xff]  ;;  %v1016_v32 = vld [vmem:[#allocation5 + $0xe48] sm:$0xff] }
 0x1ed   : > { %2039 = vmatmul.mubr.f32.gmra.mrb[76].mxu1 %v8020_v10  ;;  %v814_v10 = vld [vmem:[#allocation5 + $0x7f8] sm:$0xff] }
 0x1ee   : > { %1782 = vmatmul.mubr.f32.gmra.mrb[12].mxu0 %v407_v13  ;;  %6100 = vmatpush1.bf16.xpose.msra.mxu1 %v6099_v28  ;;  %v6231_v28 = vpack.c.bf16 %v997_v49, %v991_v37  ;;  %v6105_v25 = vpack.c.bf16 %v820_v55, %v814_v10  ;;  %v6233_v13 = vpack.c.bf16 %v1010_v47, %v1004_v54  ;;  %v438_v49 = vld [vmem:[%s7961_s8 + $0x238] sm:$0xff]  ;;  %v831_v54 = vld [vmem:[#allocation5 + $0x880] sm:$0xff] }
 0x1ef   : > { %6228 = vmatpush1.bf16.xpose.msra.mxu0 %v6227_v60  ;;  %1787 = vmatprep.mubr.f32.mxu0 %v414_v1  ;;  %v813_v60 = vld [vmem:[#allocation5 + $0x7f0] sm:$0xff]  ;;  %v819_v1 = vld [vmem:[#allocation5 + $0x820] sm:$0xff] }
 0x1f0   : > { %2044 = vmatprep.mubr.f32.mxu1 %v8024_v16  ;;  %6102 = vmatprep.subr.bf16.mxu1 %v6101_v18  ;;  %v419_v16 = vld [vmem:[%s7961_s8 + $0x1a0] sm:$0xff]  ;;  %v1009_v18 = vld [vmem:[#allocation5 + $0xe10] sm:$0xff] }
 0x1f1   : > { %2045 = vmatmul.mubr.f32.gmra.mrb[78].mxu1 %v8029_v20  ;;  %6230 = vmatprep.subr.bf16.mxu0 %v6229_v0  ;;  %v425_v20 = vld [vmem:[%s7961_s8 + $0x1d0] sm:$0xff]  ;;  %v832_v0 = vld [vmem:[#allocation5 + $0x888] sm:$0xff]  ;;  %v6235_v37 = vpack.c.bf16 %v1009_v18, %v1003_v38  ;;  %v1015_v47 = vld [vmem:[#allocation5 + $0xe40] sm:$0xff] }
 0x1f2   : > { %1788 = vmatmul.mubr.f32.gmra.mrb[14].mxu0 %v413_v27  ;;  %2050 = vmatprep.mubr.f32.mxu1 %v8034_v22  ;;  %v432_v22 = vld [vmem:[%s7961_s8 + $0x208] sm:$0xff]  ;;  %v6107_v27 = vpack.c.bf16 %v819_v1, %v813_v60  ;;  %v450_v60 = vld [vmem:[%s7961_s8 + $0x298] sm:$0xff]  ;;  %v837_v38 = vld [vmem:[#allocation5 + $0x8b0] sm:$0xff] }
 0x1f3   : > { %1793 = vmatprep.mubr.f32.mxu0 %v420_v17  ;;  %v1022_v17 = vld [vmem:[#allocation5 + $0xe78] sm:$0xff]  ;;  %v843_v18 = vld [vmem:[#allocation5 + $0x8e0] sm:$0xff] }
 0x1f4   : > { %v6237_v55 = vpack.c.bf16 %v1022_v17, %v1016_v32  ;;  %v6115_v32 = vpack.c.bf16 %v843_v18, %v837_v38  ;;  %v1040_v17 = vld [vmem:[#allocation5 + $0xf08] sm:$0xff] }
 0x1f5   : > { %2051 = vmatmul.mubr.f32.gmra.mrb[80].mxu1 %v8040_v30  ;;  %v826_v30 = vld [vmem:[#allocation5 + $0x858] sm:$0xff]  ;;  %v1064_v18 = vld [vmem:[#allocation5 + $0xfc8] sm:$0xff] }
 0x1f6   : > { %1794 = vmatmul.mubr.f32.gmra.mrb[16].mxu0 %v419_v16  ;;  %6104 = vmatpush1.bf16.xpose.msra.mxu1 %v6103_v5  ;;  %v6109_v10 = vpack.c.bf16 %v832_v0, %v826_v30  ;;  %v825_v5 = vld [vmem:[#allocation5 + $0x850] sm:$0xff]  ;;  %v1027_v30 = vld [vmem:[#allocation5 + $0xea0] sm:$0xff] }
 0x1f7   : > { %6232 = vmatpush1.bf16.xpose.msra.mxu0 %v6231_v28  ;;  %1799 = vmatprep.mubr.f32.mxu0 %v426_v45  ;;  %v1021_v16 = vld [vmem:[#allocation5 + $0xe70] sm:$0xff]  ;;  %v844_v28 = vld [vmem:[#allocation5 + $0x8e8] sm:$0xff]  ;;  %v6111_v45 = vpack.c.bf16 %v831_v54, %v825_v5  ;;  %v855_v5 = vld [vmem:[#allocation5 + $0x940] sm:$0xff] }
 0x1f8   : > { %2056 = vmatprep.mubr.f32.mxu1 %v8044_v36  ;;  %6106 = vmatprep.subr.bf16.mxu1 %v6105_v25  ;;  %v431_v36 = vld [vmem:[%s7961_s8 + $0x200] sm:$0xff]  ;;  %v1028_v25 = vld [vmem:[#allocation5 + $0xea8] sm:$0xff]  ;;  %v1033_v0 = vld [vmem:[#allocation5 + $0xed0] sm:$0xff] }
 0x1f9   : > { %2057 = vmatmul.mubr.f32.gmra.mrb[82].mxu1 %v8049_v40  ;;  %6234 = vmatprep.subr.bf16.mxu0 %v6233_v13  ;;  %v437_v40 = vld [vmem:[%s7961_s8 + $0x230] sm:$0xff]  ;;  %v1034_v13 = vld [vmem:[#allocation5 + $0xed8] sm:$0xff]  ;;  %v1039_v54 = vld [vmem:[#allocation5 + $0xf00] sm:$0xff] }
 0x1fa   : > { %1800 = vmatmul.mubr.f32.gmra.mrb[18].mxu0 %v425_v20  ;;  %2062 = vmatprep.mubr.f32.mxu1 %v8054_v42  ;;  %v444_v42 = vld [vmem:[%s7961_s8 + $0x268] sm:$0xff]  ;;  %v6239_v20 = vpack.c.bf16 %v1021_v16, %v1015_v47 }
 0x1fb   : > { %1805 = vmatprep.mubr.f32.mxu0 %v432_v22  ;;  %v6241_v22 = vpack.c.bf16 %v1034_v13, %v1028_v25  ;;  %v868_v47 = vld [vmem:[#allocation5 + $0x9a8] sm:$0xff]  ;;  %v474_v25 = vld [vmem:[%s7961_s8 + $0x358] sm:$0xff] }
 0x1fd   : > { %2063 = vmatmul.mubr.f32.gmra.mrb[84].mxu1 %v8060_v50  ;;  %v838_v50 = vld [vmem:[#allocation5 + $0x8b8] sm:$0xff] }
 0x1fe   : > { %1806 = vmatmul.mubr.f32.gmra.mrb[20].mxu0 %v431_v36  ;;  %6108 = vmatpush1.bf16.xpose.msra.mxu1 %v6107_v27  ;;  %v6113_v1 = vpack.c.bf16 %v844_v28, %v838_v50  ;;  %v856_v27 = vld [vmem:[#allocation5 + $0x948] sm:$0xff]  ;;  %v1046_v36 = vld [vmem:[#allocation5 + $0xf38] sm:$0xff] }
 0x1ff   : > { %6236 = vmatpush1.bf16.xpose.msra.mxu0 %v6235_v37  ;;  %1811 = vmatprep.mubr.f32.mxu0 %v438_v49  ;;  %v6243_v37 = vpack.c.bf16 %v1033_v0, %v1027_v30  ;;  %v462_v49 = vld [vmem:[%s7961_s8 + $0x2f8] sm:$0xff]  ;;  %v1052_v50 = vld [vmem:[#allocation5 + $0xf68] sm:$0xff] }
 0x200   : > { %2068 = vmatprep.mubr.f32.mxu1 %v8064_v57  ;;  %6110 = vmatprep.subr.bf16.mxu1 %v6109_v10  ;;  %v443_v57 = vld [vmem:[%s7961_s8 + $0x260] sm:$0xff]  ;;  %v1058_v28 = vld [vmem:[#allocation5 + $0xf98] sm:$0xff] }
 0x201   : > { %2069 = vmatmul.mubr.f32.gmra.mrb[86].mxu1 %v8069_v61  ;;  %6238 = vmatprep.subr.bf16.mxu0 %v6237_v55  ;;  %v449_v61 = vld [vmem:[%s7961_s8 + $0x290] sm:$0xff]  ;;  %v6245_v55 = vpack.c.bf16 %v1046_v36, %v1040_v17  ;;  %v486_v0 = vld [vmem:[%s7961_s8 + $0x3b8] sm:$0xff]  ;;  %v879_v17 = vld [vmem:[#allocation5 + $0xa00] sm:$0xff] }
 0x202   : > { %1812 = vmatmul.mubr.f32.gmra.mrb[22].mxu0 %v437_v40  ;;  %2074 = vmatprep.mubr.f32.mxu1 %v8074_v63  ;;  %v456_v63 = vld [vmem:[%s7961_s8 + $0x2c8] sm:$0xff]  ;;  %v849_v40 = vld [vmem:[#allocation5 + $0x910] sm:$0xff]  ;;  %v1063_v36 = vld [vmem:[#allocation5 + $0xfc0] sm:$0xff] }
 0x203   : > { %1817 = vmatprep.mubr.f32.mxu0 %v444_v42  ;;  %v1045_v42 = vld [vmem:[#allocation5 + $0xf30] sm:$0xff]  ;;  %v6119_v16 = vpack.c.bf16 %v855_v5, %v849_v40  ;;  %v498_v40 = vld [vmem:[%s7961_s8 + $0x418] sm:$0xff] }
 0x205   : > { %2075 = vmatmul.mubr.f32.gmra.mrb[88].mxu1 %v8080_v8  ;;  %v850_v8 = vld [vmem:[#allocation5 + $0x918] sm:$0xff] }
 0x206   : > { %1818 = vmatmul.mubr.f32.gmra.mrb[24].mxu0 %v443_v57  ;;  %6112 = vmatpush1.bf16.xpose.msra.mxu1 %v6111_v45  ;;  %v6117_v10 = vpack.c.bf16 %v856_v27, %v850_v8  ;;  %v6247_v45 = vpack.c.bf16 %v1045_v42, %v1039_v54  ;;  %v6249_v57 = vpack.c.bf16 %v1058_v28, %v1052_v50  ;;  %v885_v54 = vld [vmem:[#allocation5 + $0xa30] sm:$0xff]  ;;  %v891_v42 = vld [vmem:[#allocation5 + $0xa60] sm:$0xff]  ;;  %v898_v50 = vld [vmem:[#allocation5 + $0xa98] sm:$0xff] }
 0x207   : > { %6240 = vmatpush1.bf16.xpose.msra.mxu0 %v6239_v20  ;;  %1823 = vmatprep.mubr.f32.mxu0 %v450_v60  ;;  %v861_v20 = vld [vmem:[#allocation5 + $0x970] sm:$0xff]  ;;  %v867_v60 = vld [vmem:[#allocation5 + $0x9a0] sm:$0xff]  ;;  %v904_v28 = vld [vmem:[#allocation5 + $0xac8] sm:$0xff] }
 0x208   : > { %2080 = vmatprep.mubr.f32.mxu1 %v8084_v15  ;;  %6114 = vmatprep.subr.bf16.mxu1 %v6113_v1  ;;  %v455_v15 = vld [vmem:[%s7961_s8 + $0x2c0] sm:$0xff]  ;;  %v6123_v38 = vpack.c.bf16 %v867_v60, %v861_v20 }
 0x209   : > { %2081 = vmatmul.mubr.f32.gmra.mrb[90].mxu1 %v8089_v21  ;;  %6242 = vmatprep.subr.bf16.mxu0 %v6241_v22  ;;  %v461_v21 = vld [vmem:[%s7961_s8 + $0x2f0] sm:$0xff]  ;;  %v1051_v1 = vld [vmem:[#allocation5 + $0xf60] sm:$0xff] }
 0x20a   : > { %1824 = vmatmul.mubr.f32.gmra.mrb[26].mxu0 %v449_v61  ;;  %2086 = vmatprep.mubr.f32.mxu1 %v8094_v24  ;;  %v468_v24 = vld [vmem:[%s7961_s8 + $0x328] sm:$0xff]  ;;  %v1057_v22 = vld [vmem:[#allocation5 + $0xf90] sm:$0xff] }
 0x20b   : > { %1829 = vmatprep.mubr.f32.mxu0 %v456_v63  ;;  %v880_v61 = vld [vmem:[#allocation5 + $0xa08] sm:$0xff]  ;;  %v1070_v63 = vld [vmem:[#allocation5 + $0xff8] sm:$0xff]  ;;  %v6251_v30 = vpack.c.bf16 %v1057_v22, %v1051_v1  ;;  %v903_v1 = vld [vmem:[#allocation5 + $0xac0] sm:$0xff] }
 0x20c   : > { %v6253_v27 = vpack.c.bf16 %v1070_v63, %v1064_v18  ;;  %v910_v18 = vld [vmem:[#allocation5 + $0xaf8] sm:$0xff]  ;;  %v916_v63 = vld [vmem:[#allocation5 + $0xb28] sm:$0xff] }
 0x20d   : > { %2087 = vmatmul.mubr.f32.gmra.mrb[92].mxu1 %v8100_v33  ;;  %v862_v33 = vld [vmem:[#allocation5 + $0x978] sm:$0xff] }
 0x20e   : > { %1830 = vmatmul.mubr.f32.gmra.mrb[28].mxu0 %v455_v15  ;;  %6116 = vmatpush1.bf16.xpose.msra.mxu1 %v6115_v32  ;;  %v6121_v13 = vpack.c.bf16 %v868_v47, %v862_v33  ;;  %v873_v32 = vld [vmem:[#allocation5 + $0x9d0] sm:$0xff]  ;;  %v504_v33 = vld [vmem:[%s7961_s8 + $0x448] sm:$0xff]  ;;  %v1075_v47 = vld [vmem:[#allocation5 + $0x1020] sm:$0xff] }
 0x20f   : > { %6244 = vmatpush1.bf16.xpose.msra.mxu0 %v6243_v37  ;;  %1835 = vmatprep.mubr.f32.mxu0 %v462_v49  ;;  %v1069_v15 = vld [vmem:[#allocation5 + $0xff0] sm:$0xff]  ;;  %v892_v37 = vld [vmem:[#allocation5 + $0xa68] sm:$0xff]  ;;  %v6127_v49 = vpack.c.bf16 %v879_v17, %v873_v32 }
 0x210   : > { %2092 = vmatprep.mubr.f32.mxu1 %v8104_v41  ;;  %6118 = vmatprep.subr.bf16.mxu1 %v6117_v10  ;;  %v467_v41 = vld [vmem:[%s7961_s8 + $0x320] sm:$0xff]  ;;  %v1076_v10 = vld [vmem:[#allocation5 + $0x1028] sm:$0xff] }
 0x211   : > { %2093 = vmatmul.mubr.f32.gmra.mrb[94].mxu1 %v8109_v46  ;;  %6246 = vmatprep.subr.bf16.mxu0 %v6245_v55  ;;  %v473_v46 = vld [vmem:[%s7961_s8 + $0x350] sm:$0xff]  ;;  %v1082_v55 = vld [vmem:[#allocation5 + $0x1058] sm:$0xff] }
 0x212   : > { %1836 = vmatmul.mubr.f32.gmra.mrb[30].mxu0 %v461_v21  ;;  %2098 = vmatprep.mubr.f32.mxu1 %v8114_v48  ;;  %v480_v48 = vld [vmem:[%s7961_s8 + $0x388] sm:$0xff]  ;;  %v6255_v21 = vpack.c.bf16 %v1069_v15, %v1063_v36  ;;  %v915_v36 = vld [vmem:[#allocation5 + $0xb20] sm:$0xff] }
 0x213   : > { %1841 = vmatprep.mubr.f32.mxu0 %v468_v24  ;;  %v6257_v24 = vpack.c.bf16 %v1082_v55, %v1076_v10  ;;  %v922_v10 = vld [vmem:[#allocation5 + $0xb58] sm:$0xff]  ;;  %v928_v55 = vld [vmem:[#allocation5 + $0xb88] sm:$0xff] }
 0x215   : > { %2099 = vmatmul.mubr.f32.gmra.mrb[96].mxu1 %v8120_v59  ;;  %v874_v59 = vld [vmem:[#allocation5 + $0x9d8] sm:$0xff] }
 0x216   : > { %1842 = vmatmul.mubr.f32.gmra.mrb[32].mxu0 %v467_v41  ;;  %6120 = vmatpush1.bf16.xpose.msra.mxu1 %v6119_v16  ;;  %v6125_v8 = vpack.c.bf16 %v880_v61, %v874_v59  ;;  %v1081_v16 = vld [vmem:[#allocation5 + $0x1050] sm:$0xff]  ;;  %v6131_v41 = vpack.c.bf16 %v891_v42, %v885_v54  ;;  %v516_v59 = vld [vmem:[%s7961_s8 + $0x4a8] sm:$0xff]  ;;  %v1087_v61 = vld [vmem:[#allocation5 + $0x1080] sm:$0xff] }
 0x217   : > { %6248 = vmatpush1.bf16.xpose.msra.mxu0 %v6247_v45  ;;  %1847 = vmatprep.mubr.f32.mxu0 %v474_v25  ;;  %v1094_v45 = vld [vmem:[#allocation5 + $0x10b8] sm:$0xff]  ;;  %v503_v25 = vld [vmem:[%s7961_s8 + $0x440] sm:$0xff] }
 0x218   : > { %2104 = vmatprep.mubr.f32.mxu1 %v8124_v4  ;;  %6122 = vmatprep.subr.bf16.mxu1 %v6121_v13  ;;  %v479_v4 = vld [vmem:[%s7961_s8 + $0x380] sm:$0xff]  ;;  %v6259_v13 = vpack.c.bf16 %v1081_v16, %v1075_v47 }
 0x219   : > { %2105 = vmatmul.mubr.f32.gmra.mrb[98].mxu1 %v8129_v9  ;;  %6250 = vmatprep.subr.bf16.mxu0 %v6249_v57  ;;  %v485_v9 = vld [vmem:[%s7961_s8 + $0x3b0] sm:$0xff]  ;;  %v927_v47 = vld [vmem:[#allocation5 + $0xb80] sm:$0xff] }
 0x21a   : > { %1848 = vmatmul.mubr.f32.gmra.mrb[34].mxu0 %v473_v46  ;;  %2110 = vmatprep.mubr.f32.mxu1 %v8134_v12  ;;  %v492_v12 = vld [vmem:[%s7961_s8 + $0x3e8] sm:$0xff]  ;;  %v510_v46 = vld [vmem:[%s7961_s8 + $0x478] sm:$0xff] }
 0x21b   : > { %1853 = vmatprep.mubr.f32.mxu0 %v480_v48  ;;  %v897_v48 = vld [vmem:[#allocation5 + $0xa90] sm:$0xff] }
 0x21d   : > { %2111 = vmatmul.mubr.f32.gmra.mrb[100].mxu1 %v8140_v26  ;;  %v886_v26 = vld [vmem:[#allocation5 + $0xa38] sm:$0xff] }
 0x21e   : > { %1854 = vmatmul.mubr.f32.gmra.mrb[36].mxu0 %v479_v4  ;;  %6124 = vmatpush1.bf16.xpose.msra.mxu1 %v6123_v38  ;;  %v6129_v5 = vpack.c.bf16 %v892_v37, %v886_v26  ;;  %v6135_v4 = vpack.c.bf16 %v903_v1, %v897_v48  ;;  %v528_v26 = vld [vmem:[%s7961_s8 + $0x508] sm:$0xff]  ;;  %v1099_v37 = vld [vmem:[#allocation5 + $0x10e0] sm:$0xff]  ;;  %v546_v48 = vld [vmem:[%s7961_s8 + $0x598] sm:$0xff] }
 0x21f   : > { %6252 = vmatpush1.bf16.xpose.msra.mxu0 %v6251_v30  ;;  %1859 = vmatprep.mubr.f32.mxu0 %v486_v0  ;;  %v1106_v30 = vld [vmem:[#allocation5 + $0x1118] sm:$0xff]  ;;  %v515_v0 = vld [vmem:[%s7961_s8 + $0x4a0] sm:$0xff] }
 0x220   : > { %2116 = vmatprep.mubr.f32.mxu1 %v8144_v34  ;;  %6126 = vmatprep.subr.bf16.mxu1 %v6125_v8  ;;  %v491_v34 = vld [vmem:[%s7961_s8 + $0x3e0] sm:$0xff] }
 0x221   : > { %2117 = vmatmul.mubr.f32.gmra.mrb[102].mxu1 %v8149_v39  ;;  %6254 = vmatprep.subr.bf16.mxu0 %v6253_v27  ;;  %v497_v39 = vld [vmem:[%s7961_s8 + $0x410] sm:$0xff] }
 0x222   : > { %1860 = vmatmul.mubr.f32.gmra.mrb[38].mxu0 %v485_v9  ;;  %2122 = vmatprep.mubr.f32.mxu1 %v8154_v44  ;;  %v522_v9 = vld [vmem:[%s7961_s8 + $0x4d8] sm:$0xff] }
 0x223   : > { %1865 = vmatprep.mubr.f32.mxu0 %v492_v12  ;;  %v909_v12 = vld [vmem:[#allocation5 + $0xaf0] sm:$0xff] }
 0x225   : > { %2123 = vmatmul.mubr.f32.gmra.mrb[104].mxu1 %v8160_v56 }
 0x226   : > { %1866 = vmatmul.mubr.f32.gmra.mrb[40].mxu0 %v491_v34  ;;  %6128 = vmatpush1.bf16.xpose.msra.mxu1 %v6127_v49  ;;  %v6139_v34 = vpack.c.bf16 %v915_v36, %v909_v12  ;;  %v946_v12 = vld [vmem:[#allocation5 + $0xc18] sm:$0xff]  ;;  %v952_v36 = vld [vmem:[#allocation5 + $0xc48] sm:$0xff] }
 0x227   : > { %6256 = vmatpush1.bf16.xpose.msra.mxu0 %v6255_v21  ;;  %1871 = vmatprep.mubr.f32.mxu0 %v498_v40  ;;  %v1118_v21 = vld [vmem:[#allocation5 + $0x1178] sm:$0xff]  ;;  %v527_v40 = vld [vmem:[%s7961_s8 + $0x500] sm:$0xff] }
 0x228   : > { %2128 = vmatprep.mubr.f32.mxu1 %v8164_v3  ;;  %v8394_v44 = vpop.f32.mrb[0].mxu1  ;;  %6130 = vmatprep.subr.bf16.mxu1 %v6129_v5  ;;  %v1088_v3 = vld [vmem:[#allocation5 + $0x1088] sm:$0xff] }
 0x229   : > { %2129 = vmatmul.mubr.f32.gmra.mrb[106].mxu1 %v8169_v11  ;;  %v8398_v56 = vpop.f32.mrb[1].mxu1  ;;  %6258 = vmatprep.subr.bf16.mxu0 %v6257_v24  ;;  %v6133_v11 = vpack.c.bf16 %v904_v28, %v898_v50  ;;  %v6261_v60 = vpack.c.bf16 %v1094_v45, %v1088_v3  ;;  %v540_v50 = vld [vmem:[%s7961_s8 + $0x568] sm:$0xff]  ;;  %v1111_v28 = vld [vmem:[#allocation5 + $0x1140] sm:$0xff]  ;;  %v934_v3 = vld [vmem:[#allocation5 + $0xbb8] sm:$0xff] }
 0x22a   : > { %1872 = vmatmul.mubr.f32.gmra.mrb[42].mxu0 %v497_v39  ;;  %2134 = vmatprep.mubr.f32.mxu1 %v8174_v14  ;;  %v509_v14 = vld [vmem:[%s7961_s8 + $0x470] sm:$0xff]  ;;  %v534_v39 = vld [vmem:[%s7961_s8 + $0x538] sm:$0xff]  ;;  %v940_v45 = vld [vmem:[#allocation5 + $0xbe8] sm:$0xff] }
 0x22b   : > { %1877 = vmatprep.mubr.f32.mxu0 %v504_v33  ;;  %v921_v33 = vld [vmem:[#allocation5 + $0xb50] sm:$0xff] }
 0x22c   : > { %v8402_v57 = vpop.f32.mrb[2].mxu1 }
 0x22d   : > { %2135 = vmatmul.mubr.f32.gmra.mrb[108].mxu1 %v8180_v29  ;;  %v8406_v20 = vpop.f32.mrb[3].mxu1  ;;  %v1093_v29 = vld [vmem:[#allocation5 + $0x10b0] sm:$0xff] }
 0x22e   : > { %1878 = vmatmul.mubr.f32.gmra.mrb[44].mxu0 %v503_v25  ;;  %6132 = vmatpush1.bf16.xpose.msra.mxu1 %v6131_v41  ;;  %v6263_v8 = vpack.c.bf16 %v1093_v29, %v1087_v61  ;;  %v13612_v25 = vld [vmem:[#allocation20_spill] sm:$0xff] }
 0x22f   : > { %6260 = vmatpush1.bf16.xpose.msra.mxu0 %v6259_v13  ;;  %1883 = vmatprep.mubr.f32.mxu0 %v510_v46  ;;  %v6143_v13 = vpack.c.bf16 %v927_v47, %v921_v33  ;;  %v1130_v46 = vld [vmem:[#allocation5 + $0x11d8] sm:$0xff]  ;;  %v545_v61 = vld [vmem:[%s7961_s8 + $0x590] sm:$0xff]  ;;  %v951_v33 = vld [vmem:[#allocation5 + $0xc40] sm:$0xff] }
 0x230   : > { %2140 = vmatprep.mubr.f32.mxu1 %v8184_v43  ;;  %v8410_v22 = vpop.f32.mrb[4].mxu1  ;;  %6134 = vmatprep.subr.bf16.mxu1 %v6133_v11  ;;  %v1100_v43 = vld [vmem:[#allocation5 + $0x10e8] sm:$0xff]  ;;  %v539_v11 = vld [vmem:[%s7961_s8 + $0x560] sm:$0xff]  ;;  %v933_v29 = vld [vmem:[#allocation5 + $0xbb0] sm:$0xff] }
 0x231   : > { %2141 = vmatmul.mubr.f32.gmra.mrb[110].mxu1 %v8189_v51  ;;  %v8414_v38 = vpop.f32.mrb[5].mxu1  ;;  %6262 = vmatprep.subr.bf16.mxu0 %v6261_v60  ;;  %v6137_v51 = vpack.c.bf16 %v916_v63, %v910_v18  ;;  %v6265_v17 = vpack.c.bf16 %v1106_v30, %v1100_v43  ;;  %v939_v18 = vld [vmem:[#allocation5 + $0xbe0] sm:$0xff]  ;;  %v552_v43 = vld [vmem:[%s7961_s8 + $0x5c8] sm:$0xff] }
 0x232   : > { %1884 = vmatmul.mubr.f32.gmra.mrb[46].mxu0 %v509_v14  ;;  %2146 = vmatprep.mubr.f32.mxu1 %v8194_v53  ;;  %v521_v53 = vld [vmem:[%s7961_s8 + $0x4d0] sm:$0xff]  ;;  %v13613_v63 = vld [vmem:[#allocation21_spill] sm:$0xff]  ;;  %v13618_v47 = vld [vmem:[#allocation26_spill] sm:$0xff] }
 0x233   : > { %1889 = vmatprep.mubr.f32.mxu0 %v516_v59  ;;  %v1123_v30 = vld [vmem:[#allocation5 + $0x11a0] sm:$0xff] }
 0x234   : > { %v8418_v27 = vpop.f32.mrb[6].mxu1 }
 0x235   : > { %2147 = vmatmul.mubr.f32.gmra.mrb[112].mxu1 %v8200_v6  ;;  %v8422_v32 = vpop.f32.mrb[7].mxu1  ;;  %v1105_v6 = vld [vmem:[#allocation5 + $0x1110] sm:$0xff] }
 0x236   : > { %1890 = vmatmul.mubr.f32.gmra.mrb[48].mxu0 %v515_v0  ;;  %6136 = vmatpush1.bf16.xpose.msra.mxu1 %v6135_v4  ;;  %v6267_v5 = vpack.c.bf16 %v1105_v6, %v1099_v37  ;;  %v13614_v0 = vld [vmem:[#allocation22_spill] sm:$0xff] }
 0x237   : > { %6264 = vmatpush1.bf16.xpose.msra.mxu0 %v6263_v8  ;;  %1895 = vmatprep.mubr.f32.mxu0 %v522_v9  ;;  %v756_v9 = vld [vmem:[#allocation5 + $0x628] sm:$0xff] }
 0x238   : > { %2152 = vmatprep.mubr.f32.mxu1 %v8204_v23  ;;  %v8426_v15 = vpop.f32.mrb[8].mxu1  ;;  %6138 = vmatprep.subr.bf16.mxu1 %v6137_v51  ;;  %v1112_v23 = vld [vmem:[#allocation5 + $0x1148] sm:$0xff]  ;;  %v762_v51 = vld [vmem:[#allocation5 + $0x658] sm:$0xff] }
 0x239   : > { %2153 = vmatmul.mubr.f32.gmra.mrb[114].mxu1 %v8209_v31  ;;  %v8430_v49 = vpop.f32.mrb[9].mxu1  ;;  %6266 = vmatprep.subr.bf16.mxu0 %v6265_v17  ;;  %v6141_v31 = vpack.c.bf16 %v928_v55, %v922_v10  ;;  %v6269_v42 = vpack.c.bf16 %v1118_v21, %v1112_v23  ;;  %v13615_v17 = vld [vmem:[#allocation23_spill] sm:$0xff]  ;;  %v558_v10 = vld [vmem:[%s7961_s8 + $0x5f8] sm:$0xff]  ;;  %v6149_v55 = vpack.c.bf16 %v762_v51, %v756_v9  ;;  %v8501_v9 = vld [vmem:[%s7961_s8 + $0x40] sm:$0xff] }
 0x23a   : > { %1896 = vmatmul.mubr.f32.gmra.mrb[50].mxu0 %v521_v53  ;;  %2158 = vmatprep.mubr.f32.mxu1 %v8214_v35  ;;  %v533_v35 = vld [vmem:[%s7961_s8 + $0x530] sm:$0xff]  ;;  %v6147_v53 = vpack.c.bf16 %v939_v18, %v933_v29  ;;  %v6277_v21 = vpack.c.bf16 %v952_v36, %v946_v12  ;;  %v8494_v29 = vld [vmem:[%s7961_s8 + $0x48] sm:$0xff]  ;;  %v767_v18 = vld [vmem:[#allocation5 + $0x680] sm:$0xff] }
 0x23b   : > { %1901 = vmatprep.mubr.f32.mxu0 %v528_v26  ;;  %v551_v26 = vld [vmem:[%s7961_s8 + $0x5c0] sm:$0xff]  ;;  %v8508_v36 = vld [vmem:[%s7961_s8 + $0x78] sm:$0xff] }
 0x23c   : > { %v8434_v24 = vpop.f32.mrb[10].mxu1  ;;  %v13622_v12 = vld [vmem:[#allocation30_spill] sm:$0xff] }
 0x23d   : > { %2159 = vmatmul.mubr.f32.gmra.mrb[116].mxu1 %v8220_v58  ;;  %v8438_v54 = vpop.f32.mrb[11].mxu1  ;;  %v1117_v58 = vld [vmem:[#allocation5 + $0x1170] sm:$0xff] }
 0x23e   : > { %1902 = vmatmul.mubr.f32.gmra.mrb[52].mxu0 %v527_v40  ;;  %6140 = vmatpush1.bf16.xpose.msra.mxu1 %v6139_v34  ;;  %v6271_v60 = vpack.c.bf16 %v1117_v58, %v1111_v28  ;;  %v13616_v34 = vld [vmem:[#allocation24_spill] sm:$0xff]  ;;  %v768_v28 = vld [vmem:[#allocation5 + $0x688] sm:$0xff] }
 0x23f   : > { %6268 = vmatpush1.bf16.xpose.msra.mxu0 %v6267_v5  ;;  %1907 = vmatprep.mubr.f32.mxu0 %v534_v39  ;;  %v557_v40 = vld [vmem:[%s7961_s8 + $0x5f0] sm:$0xff]  ;;  %v755_v5 = vld [vmem:[#allocation5 + $0x620] sm:$0xff]  ;;  %v774_v58 = vld [vmem:[#allocation5 + $0x6b8] sm:$0xff] }
 0x240   : > { %2164 = vmatprep.mubr.f32.mxu1 %v8224_v7  ;;  %v8442_v16 = vpop.f32.mrb[12].mxu1  ;;  %6142 = vmatprep.subr.bf16.mxu1 %v6141_v31  ;;  %v1124_v7 = vld [vmem:[#allocation5 + $0x11a8] sm:$0xff]  ;;  %v761_v39 = vld [vmem:[#allocation5 + $0x650] sm:$0xff]  ;;  %v13617_v31 = vld [vmem:[#allocation25_spill] sm:$0xff] }
 0x241   : > { %2165 = vmatmul.mubr.f32.gmra.mrb[118].mxu1 %v8229_v19  ;;  %v8446_v41 = vpop.f32.mrb[13].mxu1  ;;  %6270 = vmatprep.subr.bf16.mxu0 %v6269_v42  ;;  %v6145_v19 = vpack.c.bf16 %v940_v45, %v934_v3  ;;  %v6273_v59 = vpack.c.bf16 %v1130_v46, %v1124_v7  ;;  %v8480_v3 = vld [vmem:[%s7961_s8 + $0x18] sm:$0xff]  ;;  %v6151_v45 = vpack.c.bf16 %v761_v39, %v755_v5  ;;  %v13619_v7 = vld [vmem:[#allocation27_spill] sm:$0xff] }
 0x242   : > { %1908 = vmatmul.mubr.f32.gmra.mrb[54].mxu0 %v533_v35  ;;  %2170 = vmatprep.mubr.f32.mxu1 %v13612_v25  ;;  %v945_v35 = vld [vmem:[#allocation5 + $0xc10] sm:$0xff]  ;;  %v958_v25 = vld [vmem:[#allocation5 + $0xc78] sm:$0xff] }
 0x243   : > { %1913 = vmatprep.mubr.f32.mxu0 %v540_v50  ;;  %v6279_v46 = vpack.c.bf16 %v951_v33, %v945_v35  ;;  %v8515_v5 = vld [vmem:[%s7961_s8 + $0x70] sm:$0xff]  ;;  %v8522_v33 = vld [vmem:[%s7961_s8 + $0xa8] sm:$0xff] }
 0x244   : > { %v8450_v14 = vpop.f32.mrb[14].mxu1  ;;  %v13624_v35 = vld [vmem:[#allocation32_spill] sm:$0xff] }
 0x245   : > { %2171 = vmatmul.mubr.f32.gmra.mrb[120].mxu1 %v8240_v52  ;;  %v8454_v1 = vpop.f32.mrb[15].mxu1  ;;  %v1129_v52 = vld [vmem:[#allocation5 + $0x11d0] sm:$0xff] }
 0x246   : > { %1914 = vmatmul.mubr.f32.gmra.mrb[56].mxu0 %v539_v11  ;;  %6144 = vmatpush1.bf16.xpose.msra.mxu1 %v6143_v13  ;;  %v6275_v37 = vpack.c.bf16 %v1129_v52, %v1123_v30  ;;  %v964_v13 = vld [vmem:[#allocation5 + $0xca8] sm:$0xff]  ;;  %v957_v52 = vld [vmem:[#allocation5 + $0xc70] sm:$0xff] }
 0x247   : > { %6272 = vmatpush1.bf16.xpose.msra.mxu0 %v6271_v60  ;;  %1919 = vmatprep.mubr.f32.mxu0 %v546_v48  ;;  %v6153_v60 = vpack.c.bf16 %v774_v58, %v768_v28  ;;  %v8487_v48 = vld [vmem:[%s7961_s8 + $0x10] sm:$0xff]  ;;  %v13625_v58 = vld [vmem:[#allocation33_spill] sm:$0xff] }
 0x248   : > { %2176 = vmatprep.mubr.f32.mxu1 %v13613_v63  ;;  %v8458_v4 = vpop.f32.mrb[16].mxu1  ;;  %6146 = vmatprep.subr.bf16.mxu1 %v6145_v19  ;;  %v773_v63 = vld [vmem:[#allocation5 + $0x6b0] sm:$0xff] }
 0x249   : > { %2177 = vmatmul.mubr.f32.gmra.mrb[122].mxu1 %v13614_v0  ;;  %v8462_v8 = vpop.f32.mrb[17].mxu1  ;;  %6274 = vmatprep.subr.bf16.mxu0 %v6273_v59  ;;  %v6281_v59 = vpack.c.bf16 %v964_v13, %v958_v25  ;;  %v963_v0 = vld [vmem:[#allocation5 + $0xca0] sm:$0xff]  ;;  %v785_v28 = vld [vmem:[#allocation5 + $0x710] sm:$0xff] }
 0x24a   : > { %1920 = vmatmul.mubr.f32.gmra.mrb[58].mxu0 %v545_v61  ;;  %2182 = vmatprep.mubr.f32.mxu1 %v13615_v17  ;;  %v13620_v61 = vld [vmem:[#allocation28_spill] sm:$0xff]  ;;  %v780_v17 = vld [vmem:[#allocation5 + $0x6e8] sm:$0xff]  ;;  %v975_v13 = vld [vmem:[#allocation5 + $0xd00] sm:$0xff] }
 0x24b   : > { %1925 = vmatprep.mubr.f32.mxu0 %v552_v43  ;;  %v13621_v43 = vld [vmem:[#allocation29_spill] sm:$0xff]  ;;  %v969_v25 = vld [vmem:[#allocation5 + $0xcd0] sm:$0xff] }
 0x24c   : > { %v8466_v6 = vpop.f32.mrb[18].mxu1 }
 0x24d   : > { %2183 = vmatmul.mubr.f32.gmra.mrb[124].mxu1 %v13616_v34  ;;  %v8470_v23 = vpop.f32.mrb[19].mxu1  ;;  %v6283_v34 = vpack.c.bf16 %v963_v0, %v957_v52  ;;  %v13626_v52 = vld [vmem:[#allocation34_spill] sm:$0xff]  ;;  %v6287_v0 = vpack.c.bf16 %v975_v13, %v969_v25  ;;  %v810_v13 = vld [vmem:[#allocation5 + $0x7d8] sm:$0xff] }
 0x24e   : > { %1926 = vmatmul.mubr.f32.gmra.mrb[60].mxu0 %v551_v26  ;;  %6148 = vmatpush1.bf16.xpose.msra.mxu1 %v6147_v53  ;;  %v786_v53 = vld [vmem:[#allocation5 + $0x718] sm:$0xff]  ;;  %v6155_v26 = vpack.c.bf16 %v773_v63, %v767_v18  ;;  %v804_v25 = vld [vmem:[#allocation5 + $0x7a8] sm:$0xff] }
 0x24f   : > { %6276 = vmatpush1.bf16.xpose.msra.mxu0 %v6275_v37  ;;  %1931 = vmatprep.mubr.f32.mxu0 %v558_v10  ;;  %v970_v37 = vld [vmem:[#allocation5 + $0xcd8] sm:$0xff]  ;;  %v976_v10 = vld [vmem:[#allocation5 + $0xd08] sm:$0xff] }
 0x250   : > { %2188 = vmatprep.mubr.f32.mxu1 %v13617_v31  ;;  %v8474_v42 = vpop.f32.mrb[20].mxu1  ;;  %6150 = vmatprep.subr.bf16.mxu1 %v6149_v55  ;;  %v13623_v55 = vld [vmem:[#allocation31_spill] sm:$0xff]  ;;  %v6285_v31 = vpack.c.bf16 %v976_v10, %v970_v37  ;;  %v982_v63 = vld [vmem:[#allocation5 + $0xd38] sm:$0xff]  ;;  %v7200_v37 = vld [vmem:[%s7961_s8 + $0xc0] sm:$0xff] }
 0x251   : > { %2189 = vmatmul.mubr.f32.gmra.mrb[126].mxu1 %v13618_v47  ;;  %v8477_v50 = vpop.f32.mrb[21].mxu1  ;;  %6278 = vmatprep.subr.bf16.mxu0 %v6277_v21  ;;  %v779_v47 = vld [vmem:[#allocation5 + $0x6e0] sm:$0xff]  ;;  %v8550_v10 = vld [vmem:[%s7961_s8 + $0x108] sm:$0xff] }
 0x252   : > { %1932 = vmatmul.mubr.f32.gmra.mrb[62].mxu0 %v557_v40  ;;  %2259 = vmatprep.mubr.f32.mxu1 %v8480_v3  ;;  %v6157_v40 = vpack.c.bf16 %v786_v53, %v780_v17  ;;  %v6159_v18 = vpack.c.bf16 %v785_v28, %v779_v47  ;;  %v987_v47 = vld [vmem:[#allocation5 + $0xd60] sm:$0xff] }
 0x253   : > { %2773 = vmatprep.mubr.f32.mxu0 %v13619_v7  ;;  %v8529_v7 = vld [vmem:[%s7961_s8 + $0xa0] sm:$0xff] }
 0x254   : > { %v8484_v11 = vpop.f32.mrb[22].mxu1  ;;  %v8557_v28 = vld [vmem:[%s7961_s8 + $0x100] sm:$0xff] }
 0x255   : > { %2260 = vmatmul.mubr.f32.vlgmr.msra.gmra.mrb[64].mxu1 %v8487_v48  ;;  %v8490_v19 = vpop.f32.mrb[23].mxu1  ;;  %13628 = vst [vmem:[#allocation20_spill] sm:$0xff] %v8557_v28 }
 0x256   : > { %2774 = vmatmul.mubr.f32.vlgmr.msra.gmra.mrb[64].mxu0 %v13620_v61  ;;  %6152 = vmatpush1.bf16.xpose.msra.mxu1 %v6151_v45  ;;  %v8536_v61 = vld [vmem:[%s7961_s8 + $0xd8] sm:$0xff] }
 0x257   : > { %6280 = vmatpush1.bf16.xpose.msra.mxu0 %v6279_v46  ;;  %2265 = vmatprep.mubr.f32.mxu1 %v8494_v29 }
 0x258   : > { %2779 = vmatprep.mubr.f32.mxu0 %v13621_v43  ;;  %v8498_v30 = vpop.f32.mrb[24].mxu1  ;;  %6154 = vmatprep.subr.bf16.mxu1 %v6153_v60  ;;  %v792_v60 = vld [vmem:[#allocation5 + $0x748] sm:$0xff] }
 0x259   : > { %2266 = vmatmul.mubr.f32.gmra.mrb[66].mxu1 %v8501_v9  ;;  %v8504_v51 = vpop.f32.mrb[25].mxu1  ;;  %6282 = vmatprep.subr.bf16.mxu0 %v6281_v59  ;;  %v798_v59 = vld [vmem:[#allocation5 + $0x778] sm:$0xff]  ;;  %v988_v43 = vld [vmem:[#allocation5 + $0xd68] sm:$0xff] }
 0x25a   : > { %2780 = vmatmul.mubr.f32.gmra.mrb[66].mxu0 %v13622_v12  ;;  %2271 = vmatprep.mubr.f32.mxu1 %v8508_v36  ;;  %v6161_v53 = vpack.c.bf16 %v798_v59, %v792_v60  ;;  %v8543_v12 = vld [vmem:[%s7961_s8 + $0xd0] sm:$0xff]  ;;  %v8564_v59 = vld [vmem:[%s7961_s8 + $0x138] sm:$0xff] }
 0x25b   : > { %2785 = vmatprep.mubr.f32.mxu0 %v13623_v55  ;;  %v791_v55 = vld [vmem:[#allocation5 + $0x740] sm:$0xff]  ;;  %v7203_v60 = vld [vmem:[%s7961_s8 + $0xf0] sm:$0xff]  ;;  %13630 = vst [vmem:[#allocation22_spill] sm:$0xff] %v8564_v59 }
 0x25c   : > { %v8512_v21 = vpop.f32.mrb[26].mxu1 }
 0x25d   : > { %2272 = vmatmul.mubr.f32.gmra.mrb[68].mxu1 %v8515_v5  ;;  %v8518_v39 = vpop.f32.mrb[27].mxu1 }
 0x25e   : > { %2786 = vmatmul.mubr.f32.gmra.mrb[68].mxu0 %v13624_v35  ;;  %6156 = vmatpush1.bf16.xpose.msra.mxu1 %v6155_v26  ;;  %v6289_v26 = vpack.c.bf16 %v988_v43, %v982_v63  ;;  %v981_v35 = vld [vmem:[#allocation5 + $0xd30] sm:$0xff]  ;;  %v994_v63 = vld [vmem:[#allocation5 + $0xd98] sm:$0xff]  ;;  %v1000_v43 = vld [vmem:[#allocation5 + $0xdc8] sm:$0xff] }
 0x25f   : > { %6284 = vmatpush1.bf16.xpose.msra.mxu0 %v6283_v34  ;;  %2277 = vmatprep.mubr.f32.mxu1 %v8522_v33  ;;  %v797_v34 = vld [vmem:[#allocation5 + $0x770] sm:$0xff] }
 0x260   : > { %2791 = vmatprep.mubr.f32.mxu0 %v13625_v58  ;;  %v8526_v45 = vpop.f32.mrb[28].mxu1  ;;  %6158 = vmatprep.subr.bf16.mxu1 %v6157_v40  ;;  %v13627_v40 = vld [vmem:[#allocation35_spill] sm:$0xff] }
 0x261   : > { %2278 = vmatmul.mubr.f32.gmra.mrb[70].mxu1 %v8529_v7  ;;  %v8532_v46 = vpop.f32.mrb[29].mxu1  ;;  %6286 = vmatprep.subr.bf16.mxu0 %v6285_v31 }
 0x262   : > { %2792 = vmatmul.mubr.f32.gmra.mrb[70].mxu0 %v8312_v2  ;;  %2283 = vmatprep.mubr.f32.mxu1 %v8536_v61 }
 0x263   : > { %2797 = vmatprep.mubr.f32.mxu0 %v13626_v52  ;;  %v6291_v52 = vpack.c.bf16 %v987_v47, %v981_v35  ;;  %v7208_v35 = vld [vmem:[%s7961_s8 + $0x158] sm:$0xff] }
 0x264   : > { %v8540_v17 = vpop.f32.mrb[30].mxu1 }
 0x265   : > { %2284 = vmatmul.mubr.f32.gmra.mrb[72].mxu1 %v8543_v12  ;;  %v8546_v2 = vpop.f32.mrb[31].mxu1 }
 0x266   : > { %2798 = vmatmul.mubr.f32.gmra.mrb[72].mxu0 %v7200_v37  ;;  %6160 = vmatpush1.bf16.xpose.msra.mxu1 %v6159_v18  ;;  %v6163_v18 = vpack.c.bf16 %v797_v34, %v791_v55  ;;  %v8578_v55 = vld [vmem:[%s7961_s8 + $0x168] sm:$0xff]  ;;  %v809_v34 = vld [vmem:[#allocation5 + $0x7d0] sm:$0xff] }
 0x267   : > { %6288 = vmatpush1.bf16.xpose.msra.mxu0 %v6287_v0  ;;  %2289 = vmatprep.mubr.f32.mxu1 %v8550_v10  ;;  %13634 = vst [vmem:[#allocation26_spill] sm:$0xff] %v8578_v55 }
 0x268   : > { %2803 = vmatprep.mubr.f32.mxu0 %v13627_v40  ;;  %v8554_v31 = vpop.f32.mrb[32].mxu1  ;;  %6162 = vmatprep.subr.bf16.mxu1 %v6161_v53  ;;  %v6165_v53 = vpack.c.bf16 %v810_v13, %v804_v25  ;;  %v6293_v40 = vpack.c.bf16 %v1000_v43, %v994_v63  ;;  %v993_v25 = vld [vmem:[#allocation5 + $0xd90] sm:$0xff]  ;;  %v999_v13 = vld [vmem:[#allocation5 + $0xdc0] sm:$0xff]  ;;  %v816_v43 = vld [vmem:[#allocation5 + $0x808] sm:$0xff] }
 0x269   : > { %2290 = vmatmul.mubr.f32.gmra.mrb[74].mxu1 %v8557_v28  ;;  %v8560_v58 = vpop.f32.mrb[33].mxu1  ;;  %6290 = vmatprep.subr.bf16.mxu0 %v6289_v26  ;;  %v8571_v26 = vld [vmem:[%s7961_s8 + $0x130] sm:$0xff]  ;;  %v8585_v63 = vld [vmem:[%s7961_s8 + $0x160] sm:$0xff] }
 0x26a   : > { %13629 = vst [vmem:[#allocation21_spill] sm:$0xff] %v8560_v58  ;;  %2804 = vmatmul.mubr.f32.gmra.mrb[74].mxu0 %v7203_v60  ;;  %2295 = vmatprep.mubr.f32.mxu1 %v8564_v59  ;;  %13632 = vst [vmem:[#allocation24_spill] sm:$0xff] %v8571_v26  ;;  %v7206_v60 = vld [vmem:[%s7961_s8 + $0x120] sm:$0xff] }
 0x26b   : > { %2809 = vmatprep.mubr.f32.mxu0 %v8330_v62  ;;  %v803_v62 = vld [vmem:[#allocation5 + $0x7a0] sm:$0xff]  ;;  %13636 = vst [vmem:[#allocation28_spill] sm:$0xff] %v8585_v63 }
 0x26c   : > { %v8568_v0 = vpop.f32.mrb[34].mxu1  ;;  %v7254_v58 = vld [vmem:[%s7961_s8 + $0x360] sm:$0xff] }
 0x26d   : > { %13631 = vst [vmem:[#allocation23_spill] sm:$0xff] %v8568_v0  ;;  %2296 = vmatmul.mubr.f32.gmra.mrb[76].mxu1 %v8571_v26  ;;  %v8574_v37 = vpop.f32.mrb[35].mxu1  ;;  %v7212_v26 = vld [vmem:[%s7961_s8 + $0x188] sm:$0xff] }
 0x26e   : > { %13633 = vst [vmem:[#allocation25_spill] sm:$0xff] %v8574_v37  ;;  %2810 = vmatmul.mubr.f32.gmra.mrb[76].mxu0 %v7206_v60  ;;  %6164 = vmatpush1.bf16.xpose.msra.mxu1 %v6163_v18  ;;  %v7210_v60 = vld [vmem:[%s7961_s8 + $0x150] sm:$0xff] }
 0x26f   : > { %6292 = vmatpush1.bf16.xpose.msra.mxu0 %v6291_v52  ;;  %2301 = vmatprep.mubr.f32.mxu1 %v8578_v55  ;;  %v822_v52 = vld [vmem:[#allocation5 + $0x838] sm:$0xff]  ;;  %v8599_v37 = vld [vmem:[%s7961_s8 + $0x190] sm:$0xff] }
 0x270   : > { %2815 = vmatprep.mubr.f32.mxu0 %v7208_v35  ;;  %v8582_v47 = vpop.f32.mrb[36].mxu1  ;;  %6166 = vmatprep.subr.bf16.mxu1 %v6165_v53  ;;  %v8592_v35 = vld [vmem:[%s7961_s8 + $0x198] sm:$0xff]  ;;  %v6167_v53 = vpack.c.bf16 %v809_v34, %v803_v62  ;;  %13640 = vst [vmem:[#allocation32_spill] sm:$0xff] %v8599_v37  ;;  %v8606_v62 = vld [vmem:[%s7961_s8 + $0x1c8] sm:$0xff]  ;;  %v821_v34 = vld [vmem:[#allocation5 + $0x830] sm:$0xff] }
 0x271   : > { %13635 = vst [vmem:[#allocation27_spill] sm:$0xff] %v8582_v47  ;;  %2302 = vmatmul.mubr.f32.gmra.mrb[78].mxu1 %v8585_v63  ;;  %v8588_v18 = vpop.f32.mrb[37].mxu1  ;;  %6294 = vmatprep.subr.bf16.mxu0 %v6293_v40  ;;  %13638 = vst [vmem:[#allocation30_spill] sm:$0xff] %v8592_v35  ;;  %v1006_v55 = vld [vmem:[#allocation5 + $0xdf8] sm:$0xff]  ;;  %v1012_v47 = vld [vmem:[#allocation5 + $0xe28] sm:$0xff]  ;;  %v6295_v63 = vpack.c.bf16 %v999_v13, %v993_v25  ;;  %v6169_v40 = vpack.c.bf16 %v822_v52, %v816_v43 }
 0x272   : > { %13637 = vst [vmem:[#allocation29_spill] sm:$0xff] %v8588_v18  ;;  %2816 = vmatmul.mubr.f32.gmra.mrb[78].mxu0 %v7210_v60  ;;  %2307 = vmatprep.mubr.f32.mxu1 %v8592_v35  ;;  %v6297_v0 = vpack.c.bf16 %v1012_v47, %v1006_v55  ;;  %v7214_v35 = vld [vmem:[%s7961_s8 + $0x180] sm:$0xff]  ;;  %13642 = vst [vmem:[#allocation34_spill] sm:$0xff] %v8606_v62  ;;  %v7216_v25 = vld [vmem:[%s7961_s8 + $0x1b8] sm:$0xff] }
 0x273   : > { %2821 = vmatprep.mubr.f32.mxu0 %v7212_v26  ;;  %v815_v26 = vld [vmem:[#allocation5 + $0x800] sm:$0xff]  ;;  %v1005_v43 = vld [vmem:[#allocation5 + $0xdf0] sm:$0xff]  ;;  %v828_v52 = vld [vmem:[#allocation5 + $0x868] sm:$0xff] }
 0x274   : > { %v8596_v18 = vpop.f32.mrb[38].mxu1  ;;  %v1011_v55 = vld [vmem:[#allocation5 + $0xe20] sm:$0xff] }
 0x275   : > { %13639 = vst [vmem:[#allocation31_spill] sm:$0xff] %v8596_v18  ;;  %2308 = vmatmul.mubr.f32.gmra.mrb[80].mxu1 %v8599_v37  ;;  %v8602_v60 = vpop.f32.mrb[39].mxu1  ;;  %v8613_v47 = vld [vmem:[%s7961_s8 + $0x1c0] sm:$0xff]  ;;  %v7220_v37 = vld [vmem:[%s7961_s8 + $0x1e8] sm:$0xff] }
 0x276   : > { %13641 = vst [vmem:[#allocation33_spill] sm:$0xff] %v8602_v60  ;;  %2822 = vmatmul.mubr.f32.gmra.mrb[80].mxu0 %v7214_v35  ;;  %6168 = vmatpush1.bf16.xpose.msra.mxu1 %v6167_v53  ;;  %13644 = vst [vmem:[#allocation36_spill] sm:$0xff] %v8613_v47  ;;  %v834_v35 = vld [vmem:[#allocation5 + $0x898] sm:$0xff]  ;;  %v7218_v53 = vld [vmem:[%s7961_s8 + $0x1b0] sm:$0xff] }
 0x277   : > { %6296 = vmatpush1.bf16.xpose.msra.mxu0 %v6295_v63  ;;  %2313 = vmatprep.mubr.f32.mxu1 %v8606_v62  ;;  %v1018_v62 = vld [vmem:[#allocation5 + $0xe58] sm:$0xff]  ;;  %v8627_v60 = vld [vmem:[%s7961_s8 + $0x1f0] sm:$0xff] }
 0x278   : > { %2827 = vmatprep.mubr.f32.mxu0 %v7216_v25  ;;  %v8610_v13 = vpop.f32.mrb[40].mxu1  ;;  %6170 = vmatprep.subr.bf16.mxu1 %v6169_v40  ;;  %v8620_v25 = vld [vmem:[%s7961_s8 + $0x1f8] sm:$0xff]  ;;  %v6171_v40 = vpack.c.bf16 %v821_v34, %v815_v26  ;;  %13648 = vst [vmem:[#allocation40_spill] sm:$0xff] %v8627_v60  ;;  %v8634_v26 = vld [vmem:[%s7961_s8 + $0x228] sm:$0xff]  ;;  %v833_v34 = vld [vmem:[#allocation5 + $0x890] sm:$0xff] }
 0x279   : > { %13643 = vst [vmem:[#allocation35_spill] sm:$0xff] %v8610_v13  ;;  %2314 = vmatmul.mubr.f32.gmra.mrb[82].mxu1 %v8613_v47  ;;  %v8616_v63 = vpop.f32.mrb[41].mxu1  ;;  %6298 = vmatprep.subr.bf16.mxu0 %v6297_v0  ;;  %13646 = vst [vmem:[#allocation38_spill] sm:$0xff] %v8620_v25  ;;  %v1024_v13 = vld [vmem:[#allocation5 + $0xe88] sm:$0xff]  ;;  %v6299_v47 = vpack.c.bf16 %v1011_v55, %v1005_v43  ;;  %v6173_v0 = vpack.c.bf16 %v834_v35, %v828_v52  ;;  %v7224_v43 = vld [vmem:[%s7961_s8 + $0x218] sm:$0xff] }
 0x27a   : > { %13645 = vst [vmem:[#allocation37_spill] sm:$0xff] %v8616_v63  ;;  %2828 = vmatmul.mubr.f32.gmra.mrb[82].mxu0 %v7218_v53  ;;  %2319 = vmatprep.mubr.f32.mxu1 %v8620_v25  ;;  %v6301_v18 = vpack.c.bf16 %v1024_v13, %v1018_v62  ;;  %v7222_v25 = vld [vmem:[%s7961_s8 + $0x1e0] sm:$0xff]  ;;  %13650 = vst [vmem:[#allocation42_spill] sm:$0xff] %v8634_v26  ;;  %v1017_v52 = vld [vmem:[#allocation5 + $0xe50] sm:$0xff] }
 0x27b   : > { %2833 = vmatprep.mubr.f32.mxu0 %v7220_v37  ;;  %v827_v37 = vld [vmem:[#allocation5 + $0x860] sm:$0xff] }
 0x27c   : > { %v8624_v63 = vpop.f32.mrb[42].mxu1  ;;  %v1023_v62 = vld [vmem:[#allocation5 + $0xe80] sm:$0xff] }
 0x27d   : > { %13647 = vst [vmem:[#allocation39_spill] sm:$0xff] %v8624_v63  ;;  %2320 = vmatmul.mubr.f32.gmra.mrb[84].mxu1 %v8627_v60  ;;  %v8630_v53 = vpop.f32.mrb[43].mxu1  ;;  %v7225_v13 = vld [vmem:[%s7961_s8 + $0x220] sm:$0xff]  ;;  %v7228_v60 = vld [vmem:[%s7961_s8 + $0x248] sm:$0xff] }
 0x27e   : > { %13649 = vst [vmem:[#allocation41_spill] sm:$0xff] %v8630_v53  ;;  %2834 = vmatmul.mubr.f32.gmra.mrb[84].mxu0 %v7222_v25  ;;  %6172 = vmatpush1.bf16.xpose.msra.mxu1 %v6171_v40  ;;  %v846_v25 = vld [vmem:[#allocation5 + $0x8f8] sm:$0xff]  ;;  %v7226_v40 = vld [vmem:[%s7961_s8 + $0x210] sm:$0xff] }
 0x27f   : > { %6300 = vmatpush1.bf16.xpose.msra.mxu0 %v6299_v47  ;;  %2325 = vmatprep.mubr.f32.mxu1 %v8634_v26  ;;  %v840_v47 = vld [vmem:[#allocation5 + $0x8c8] sm:$0xff]  ;;  %v8645_v26 = vld [vmem:[%s7961_s8 + $0x258] sm:$0xff]  ;;  %v8652_v53 = vld [vmem:[%s7961_s8 + $0x250] sm:$0xff] }
 0x280   : > { %2839 = vmatprep.mubr.f32.mxu0 %v7224_v43  ;;  %v8638_v55 = vpop.f32.mrb[44].mxu1  ;;  %6174 = vmatprep.subr.bf16.mxu1 %v6173_v0  ;;  %13653 = vst [vmem:[#allocation45_spill] sm:$0xff] %v8645_v26  ;;  %v6175_v43 = vpack.c.bf16 %v833_v34, %v827_v37  ;;  %v1030_v0 = vld [vmem:[#allocation5 + $0xeb8] sm:$0xff]  ;;  %13655 = vst [vmem:[#allocation47_spill] sm:$0xff] %v8652_v53  ;;  %v7231_v37 = vld [vmem:[%s7961_s8 + $0x288] sm:$0xff] }
 0x281   : > { %13651 = vst [vmem:[#allocation43_spill] sm:$0xff] %v8638_v55  ;;  %2326 = vmatmul.mubr.f32.gmra.mrb[86].mxu1 %v7225_v13  ;;  %v8641_v35 = vpop.f32.mrb[45].mxu1  ;;  %6302 = vmatprep.subr.bf16.mxu0 %v6301_v18  ;;  %v1036_v55 = vld [vmem:[#allocation5 + $0xee8] sm:$0xff]  ;;  %v6303_v13 = vpack.c.bf16 %v1023_v62, %v1017_v52  ;;  %v6177_v18 = vpack.c.bf16 %v846_v25, %v840_v47  ;;  %v845_v34 = vld [vmem:[#allocation5 + $0x8f0] sm:$0xff]  ;;  %v7232_v52 = vld [vmem:[%s7961_s8 + $0x278] sm:$0xff] }
 0x282   : > { %13652 = vst [vmem:[#allocation44_spill] sm:$0xff] %v8641_v35  ;;  %2840 = vmatmul.mubr.f32.gmra.mrb[86].mxu0 %v7226_v40  ;;  %2331 = vmatprep.mubr.f32.mxu1 %v8645_v26  ;;  %v6305_v63 = vpack.c.bf16 %v1036_v55, %v1030_v0  ;;  %v7230_v26 = vld [vmem:[%s7961_s8 + $0x240] sm:$0xff]  ;;  %v1029_v47 = vld [vmem:[#allocation5 + $0xeb0] sm:$0xff] }
 0x283   : > { %2845 = vmatprep.mubr.f32.mxu0 %v7228_v60  ;;  %v839_v60 = vld [vmem:[#allocation5 + $0x8c0] sm:$0xff]  ;;  %v7234_v0 = vld [vmem:[%s7961_s8 + $0x270] sm:$0xff] }
 0x284   : > { %v8649_v35 = vpop.f32.mrb[46].mxu1  ;;  %v1035_v25 = vld [vmem:[#allocation5 + $0xee0] sm:$0xff] }
 0x285   : > { %13654 = vst [vmem:[#allocation46_spill] sm:$0xff] %v8649_v35  ;;  %2332 = vmatmul.mubr.f32.gmra.mrb[88].mxu1 %v8652_v53  ;;  %v8655_v40 = vpop.f32.mrb[47].mxu1  ;;  %v7233_v53 = vld [vmem:[%s7961_s8 + $0x280] sm:$0xff]  ;;  %v7237_v35 = vld [vmem:[%s7961_s8 + $0x2b0] sm:$0xff] }
 0x286   : > { %13656 = vst [vmem:[#allocation48_spill] sm:$0xff] %v8655_v40  ;;  %2846 = vmatmul.mubr.f32.gmra.mrb[88].mxu0 %v7230_v26  ;;  %6176 = vmatpush1.bf16.xpose.msra.mxu1 %v6175_v43  ;;  %v852_v26 = vld [vmem:[#allocation5 + $0x928] sm:$0xff]  ;;  %v858_v43 = vld [vmem:[#allocation5 + $0x958] sm:$0xff]  ;;  %v6307_v40 = vpack.c.bf16 %v1035_v25, %v1029_v47 }
 0x287   : > { %6304 = vmatpush1.bf16.xpose.msra.mxu0 %v6303_v13  ;;  %2337 = vmatprep.mubr.f32.mxu1 %v7231_v37  ;;  %v7235_v13 = vld [vmem:[%s7961_s8 + $0x2b8] sm:$0xff]  ;;  %v6179_v37 = vpack.c.bf16 %v845_v34, %v839_v60  ;;  %v7239_v60 = vld [vmem:[%s7961_s8 + $0x2e8] sm:$0xff]  ;;  %v851_v34 = vld [vmem:[#allocation5 + $0x920] sm:$0xff] }
 0x288   : > { %2851 = vmatprep.mubr.f32.mxu0 %v7232_v52  ;;  %v8660_v62 = vpop.f32.mrb[48].mxu1  ;;  %6178 = vmatprep.subr.bf16.mxu1 %v6177_v18  ;;  %v1042_v52 = vld [vmem:[#allocation5 + $0xf18] sm:$0xff]  ;;  %v1048_v18 = vld [vmem:[#allocation5 + $0xf48] sm:$0xff] }
 0x289   : > { %13657 = vst [vmem:[#allocation49_spill] sm:$0xff] %v8660_v62  ;;  %2338 = vmatmul.mubr.f32.gmra.mrb[90].mxu1 %v7233_v53  ;;  %v8663_v55 = vpop.f32.mrb[49].mxu1  ;;  %6306 = vmatprep.subr.bf16.mxu0 %v6305_v63  ;;  %v7236_v62 = vld [vmem:[%s7961_s8 + $0x2a8] sm:$0xff]  ;;  %v6309_v59 = vpack.c.bf16 %v1048_v18, %v1042_v52  ;;  %v7240_v47 = vld [vmem:[%s7961_s8 + $0x2d8] sm:$0xff]  ;;  %v7242_v52 = vld [vmem:[%s7961_s8 + $0x2d0] sm:$0xff] }
 0x28a   : > { %13658 = vst [vmem:[#allocation50_spill] sm:$0xff] %v8663_v55  ;;  %2852 = vmatmul.mubr.f32.gmra.mrb[90].mxu0 %v7234_v0  ;;  %2343 = vmatprep.mubr.f32.mxu1 %v7235_v13  ;;  %v6181_v55 = vpack.c.bf16 %v858_v43, %v852_v26  ;;  %v7238_v0 = vld [vmem:[%s7961_s8 + $0x2a0] sm:$0xff]  ;;  %v7243_v18 = vld [vmem:[%s7961_s8 + $0x318] sm:$0xff] }
 0x28b   : > { %2857 = vmatprep.mubr.f32.mxu0 %v7236_v62  ;;  %v857_v62 = vld [vmem:[#allocation5 + $0x950] sm:$0xff]  ;;  %v1047_v26 = vld [vmem:[#allocation5 + $0xf40] sm:$0xff] }
 0x28c   : > { %v8668_v53 = vpop.f32.mrb[50].mxu1  ;;  %v7241_v43 = vld [vmem:[%s7961_s8 + $0x2e0] sm:$0xff] }
 0x28d   : > { %13659 = vst [vmem:[#allocation51_spill] sm:$0xff] %v8668_v53  ;;  %2344 = vmatmul.mubr.f32.gmra.mrb[92].mxu1 %v7237_v35  ;;  %v8671_v63 = vpop.f32.mrb[51].mxu1  ;;  %v1041_v35 = vld [vmem:[#allocation5 + $0xf10] sm:$0xff] }
 0x28e   : > { %13660 = vst [vmem:[#allocation52_spill] sm:$0xff] %v8671_v63  ;;  %2858 = vmatmul.mubr.f32.gmra.mrb[92].mxu0 %v7238_v0  ;;  %6180 = vmatpush1.bf16.xpose.msra.mxu1 %v6179_v37  ;;  %v870_v37 = vld [vmem:[#allocation5 + $0x9b8] sm:$0xff]  ;;  %v6183_v0 = vpack.c.bf16 %v857_v62, %v851_v34  ;;  %v7245_v63 = vld [vmem:[%s7961_s8 + $0x310] sm:$0xff]  ;;  %v1137_v34 = vlaneseq  ;;  %v7247_v62 = vld [vmem:[%s7961_s8 + $0x348] sm:$0xff] }
 0x28f   : > { %6308 = vmatpush1.bf16.xpose.msra.mxu0 %v6307_v40  ;;  %2349 = vmatprep.mubr.f32.mxu1 %v7239_v60  ;;  %v864_v40 = vld [vmem:[#allocation5 + $0x988] sm:$0xff]  ;;  %v1054_v60 = vld [vmem:[#allocation5 + $0xf78] sm:$0xff] }
 0x290   : > { %2863 = vmatprep.mubr.f32.mxu0 %v7240_v47  ;;  %v8676_v25 = vpop.f32.mrb[52].mxu1  ;;  %6182 = vmatprep.subr.bf16.mxu1 %v6181_v55  ;;  %v1060_v55 = vld [vmem:[#allocation5 + $0xfa8] sm:$0xff] }
 0x291   : > { %13661 = vst [vmem:[#allocation53_spill] sm:$0xff] %v8676_v25  ;;  %2350 = vmatmul.mubr.f32.gmra.mrb[94].mxu1 %v7241_v43  ;;  %v8679_v13 = vpop.f32.mrb[53].mxu1  ;;  %6310 = vmatprep.subr.bf16.mxu0 %v6309_v59  ;;  %v7244_v47 = vld [vmem:[%s7961_s8 + $0x308] sm:$0xff]  ;;  %v6311_v25 = vpack.c.bf16 %v1047_v26, %v1041_v35  ;;  %v6313_v53 = vpack.c.bf16 %v1060_v55, %v1054_v60  ;;  %v869_v35 = vld [vmem:[#allocation5 + $0x9b0] sm:$0xff]  ;;  %v7248_v26 = vld [vmem:[%s7961_s8 + $0x338] sm:$0xff] }
 0x292   : > { %13662 = vst [vmem:[#allocation54_spill] sm:$0xff] %v8679_v13  ;;  %2864 = vmatmul.mubr.f32.gmra.mrb[94].mxu0 %v7242_v52  ;;  %2355 = vmatprep.mubr.f32.mxu1 %v7243_v18  ;;  %v6185_v13 = vpack.c.bf16 %v870_v37, %v864_v40  ;;  %v7246_v52 = vld [vmem:[%s7961_s8 + $0x300] sm:$0xff] }
 0x293   : > { %2869 = vmatprep.mubr.f32.mxu0 %v7244_v47  ;;  %v863_v18 = vld [vmem:[#allocation5 + $0x980] sm:$0xff]  ;;  %v7250_v47 = vld [vmem:[%s7961_s8 + $0x330] sm:$0xff] }
 0x294   : > { %v8684_v43 = vpop.f32.mrb[54].mxu1  ;;  %v1059_v37 = vld [vmem:[#allocation5 + $0xfa0] sm:$0xff] }
 0x295   : > { %13663 = vst [vmem:[#allocation55_spill] sm:$0xff] %v8684_v43  ;;  %2356 = vmatmul.mubr.f32.gmra.mrb[96].mxu1 %v7245_v63  ;;  %v8687_v59 = vpop.f32.mrb[55].mxu1  ;;  %v1053_v63 = vld [vmem:[#allocation5 + $0xf70] sm:$0xff]  ;;  %v7249_v60 = vld [vmem:[%s7961_s8 + $0x340] sm:$0xff] }
 0x296   : > { %13664 = vst [vmem:[#allocation56_spill] sm:$0xff] %v8687_v59  ;;  %2870 = vmatmul.mubr.f32.gmra.mrb[96].mxu0 %v7246_v52  ;;  %6184 = vmatpush1.bf16.xpose.msra.mxu1 %v6183_v0  ;;  %v882_v0 = vld [vmem:[#allocation5 + $0xa18] sm:$0xff]  ;;  %v7252_v59 = vld [vmem:[%s7961_s8 + $0x368] sm:$0xff] }
 0x297   : > { %6312 = vmatpush1.bf16.xpose.msra.mxu0 %v6311_v25  ;;  %2361 = vmatprep.mubr.f32.mxu1 %v7247_v62  ;;  %v876_v25 = vld [vmem:[#allocation5 + $0x9e8] sm:$0xff]  ;;  %v7251_v52 = vld [vmem:[%s7961_s8 + $0x378] sm:$0xff]  ;;  %v6187_v62 = vpack.c.bf16 %v869_v35, %v863_v18  ;;  %v881_v35 = vld [vmem:[#allocation5 + $0xa10] sm:$0xff] }
 0x298   : > { %2875 = vmatprep.mubr.f32.mxu0 %v7248_v26  ;;  %v8692_v40 = vpop.f32.mrb[56].mxu1  ;;  %6186 = vmatprep.subr.bf16.mxu1 %v6185_v13  ;;  %v1066_v26 = vld [vmem:[#allocation5 + $0xfd8] sm:$0xff]  ;;  %v8699_v13 = vshrl.u32 %v1137_v34, 7  ;;  %v7255_v34 = vld [vmem:[%s7961_s8 + $0x3a8] sm:$0xff] }
 0x299   : > { %13665 = vst [vmem:[#allocation57_spill] sm:$0xff] %v8692_v40  ;;  %2362 = vmatmul.mubr.f32.gmra.mrb[98].mxu1 %v7249_v60  ;;  %v8695_v55 = vpop.f32.mrb[57].mxu1  ;;  %6314 = vmatprep.subr.bf16.mxu0 %v6313_v53  ;;  %v1072_v40 = vld [vmem:[#allocation5 + $0x1008] sm:$0xff]  ;;  %v6315_v60 = vpack.c.bf16 %v1059_v37, %v1053_v63  ;;  %v6189_v53 = vpack.c.bf16 %v882_v0, %v876_v25  ;;  %v1135_v63 = vld [vmem:[#allocation7] sm:$0x3f] }
 0x29a   : > { %13666 = vst [vmem:[#allocation58_spill] sm:$0xff] %v8695_v55  ;;  %2876 = vmatmul.mubr.f32.gmra.mrb[98].mxu0 %v7250_v47  ;;  %2367 = vmatprep.mubr.f32.mxu1 %v7251_v52  ;;  %13667 = vst [vmem:[#allocation59_spill] sm:$0xff] %v8699_v13  ;;  %v7253_v55 = vld [vmem:[%s7961_s8 + $0x370] sm:$0xff]  ;;  %v6317_v47 = vpack.c.bf16 %v1072_v40, %v1066_v26  ;;  %v8709_v18 = vsub.s32 0, %v8699_v13  ;;  %v8713_v37 = vsub.s32 1, %v8699_v13  ;;  %v1071_v25 = vld [vmem:[#allocation5 + $0x1000] sm:$0xff] }
 0x29b   : > { %2881 = vmatprep.mubr.f32.mxu0 %v7252_v59  ;;  %v875_v59 = vld [vmem:[#allocation5 + $0x9e0] sm:$0xff]  ;;  %v894_v26 = vld [vmem:[#allocation5 + $0xa78] sm:$0xff] }
 0x29c   : > { %v8702_v43 = vpop.f32.mrb[58].mxu1  ;;  %13670 = vst [vmem:[#allocation62_spill] sm:$0xff] %v8709_v18  ;;  %13671 = vst [vmem:[#allocation63_spill] sm:$0xff] %v8713_v37  ;;  %v7257_v0 = vld [vmem:[%s7961_s8 + $0x3a0] sm:$0xff]  ;;  %v1078_v13 = vld [vmem:[#allocation5 + $0x1038] sm:$0xff] }
 0x29d   : > { %13668 = vst [vmem:[#allocation60_spill] sm:$0xff] %v8702_v43  ;;  %2368 = vmatmul.mubr.f32.gmra.mrb[100].mxu1 %v7253_v55  ;;  %v8705_v28 = vpop.f32.mrb[59].mxu1  ;;  %v7256_v55 = vld [vmem:[%s7961_s8 + $0x398] sm:$0xff] }
 0x29e   : > { %13669 = vst [vmem:[#allocation61_spill] sm:$0xff] %v8705_v28  ;;  %2882 = vmatmul.mubr.f32.gmra.mrb[100].mxu0 %v7254_v58  ;;  %6188 = vmatpush1.bf16.xpose.msra.mxu1 %v6187_v62  ;;  %v1065_v58 = vld [vmem:[#allocation5 + $0xfd0] sm:$0xff]  ;;  %v888_v62 = vld [vmem:[#allocation5 + $0xa48] sm:$0xff] }
 0x29f   : > { %6316 = vmatpush1.bf16.xpose.msra.mxu0 %v6315_v60  ;;  %2373 = vmatprep.mubr.f32.mxu1 %v7255_v34  ;;  %v7258_v60 = vld [vmem:[%s7961_s8 + $0x390] sm:$0xff]  ;;  %v7259_v34 = vld [vmem:[%s7961_s8 + $0x3d8] sm:$0xff]  ;;  %v7260_v28 = vld [vmem:[%s7961_s8 + $0x3c8] sm:$0xff]  ;;  %v6193_v43 = vpack.c.bf16 %v894_v26, %v888_v62 }
 0x2a0   : > { %2887 = vmatprep.mubr.f32.mxu0 %v7256_v55  ;;  %v8716_v40 = vpop.f32.mrb[60].mxu1  ;;  %6190 = vmatprep.subr.bf16.mxu1 %v6189_v53  ;;  %v6191_v55 = vpack.c.bf16 %v881_v35, %v875_v59  ;;  %v8724_v53 = vrot.slane %v1135_v63, %v8709_v18  ;;  %v7262_v18 = vld [vmem:[%s7961_s8 + $0x3c0] sm:$0xff]  ;;  %v7264_v62 = vld [vmem:[%s7961_s8 + $0x3f8] sm:$0xff] }
 0x2a1   : > { %13672 = vst [vmem:[#allocation64_spill] sm:$0xff] %v8716_v40  ;;  %2374 = vmatmul.mubr.f32.gmra.mrb[102].mxu1 %v7257_v0  ;;  %v8719_v52 = vpop.f32.mrb[61].mxu1  ;;  %6318 = vmatprep.subr.bf16.mxu0 %v6317_v47  ;;  %v1084_v40 = vld [vmem:[#allocation5 + $0x1068] sm:$0xff]  ;;  %v6319_v0 = vpack.c.bf16 %v1071_v25, %v1065_v58  ;;  %v8728_v47 = vrot.slane %v1135_v63, %v8713_v37  ;;  %v887_v58 = vld [vmem:[#allocation5 + $0xa40] sm:$0xff]  ;;  %v893_v25 = vld [vmem:[#allocation5 + $0xa70] sm:$0xff] }
 0x2a2   : > { %13673 = vst [vmem:[#allocation65_spill] sm:$0xff] %v8719_v52  ;;  %2888 = vmatmul.mubr.f32.gmra.mrb[102].mxu0 %v7258_v60  ;;  %2379 = vmatprep.mubr.f32.mxu1 %v7259_v34  ;;  %v8731_v60 = vld [vmem:[%s7961_s8 + $0x3d0] sm:$0xff]  ;;  %v6321_v34 = vpack.c.bf16 %v1084_v40, %v1078_v13  ;;  %v8742_v63 = vld [vmem:[%s7961_s8 + $0x408] sm:$0xff] }
 0x2a3   : > { %2893 = vmatprep.mubr.f32.mxu0 %v7260_v28  ;;  %13674 = vst [vmem:[#allocation66_spill] sm:$0xff] %v8731_v60  ;;  %13676 = vst [vmem:[#allocation68_spill] sm:$0xff] %v8742_v63  ;;  %v1077_v13 = vld [vmem:[#allocation5 + $0x1030] sm:$0xff]  ;;  %v1236_v40 = vadd.f32 %v8398_v56, %v8728_v47  ;;  %v6195_v56 = vpack.c.bf16 %v893_v25, %v887_v58 }
 0x2a4   : > { %v1419_v52 = vpop.f32.mrb[62].mxu1 }
 0x2a5   : > { %2380 = vmatmul.mubr.f32.gmra.mrb[104].mxu1 %v8731_v60  ;;  %v8735_v59 = vadd.f32 %v1419_v52, %v8724_v53  ;;  %v1421_v35 = vpop.f32.mrb[63].mxu1  ;;  %v1234_v52 = vadd.f32 %v8394_v44, %v8724_v53 }
 0x2a6   : > { %2894 = vmatmul.mubr.f32.gmra.mrb[104].mxu0 %v7262_v18  ;;  %6192 = vmatpush1.bf16.xpose.msra.mxu1 %v6191_v55  ;;  %v8739_v28 = vadd.f32 %v1421_v35, %v8728_v47  ;;  %v1083_v18 = vld [vmem:[#allocation5 + $0x1060] sm:$0xff]  ;;  %v906_v35 = vld [vmem:[#allocation5 + $0xad8] sm:$0xff] }
 0x2a7   : > { %6320 = vmatpush1.bf16.xpose.msra.mxu0 %v6319_v0  ;;  %2385 = vmatprep.mubr.f32.mxu1 %v8742_v63  ;;  %v8751_v55 = vld [vmem:[%s7961_s8 + $0x400] sm:$0xff]  ;;  %v900_v0 = vld [vmem:[#allocation5 + $0xaa8] sm:$0xff]  ;;  %v1090_v63 = vld [vmem:[#allocation5 + $0x1098] sm:$0xff] }
 0x2a8   : > { %13675 = vst [vmem:[#allocation67_spill] sm:$0xff] %v8739_v28  ;;  %2899 = vmatprep.mubr.f32.mxu0 %v7264_v62  ;;  %6194 = vmatprep.subr.bf16.mxu1 %v6193_v43  ;;  %13677 = vst [vmem:[#allocation69_spill] sm:$0xff] %v8751_v55  ;;  %v7266_v62 = vld [vmem:[%s7961_s8 + $0x3f0] sm:$0xff]  ;;  %v8758_v43 = vld [vmem:[%s7961_s8 + $0x438] sm:$0xff] }
 0x2a9   : > { %v1747_v26 = vpop.f32.mrb[0].mxu0  ;;  %2386 = vmatmul.mubr.f32.gmra.mrb[106].mxu1 %v8751_v55  ;;  %6322 = vmatprep.subr.bf16.mxu0 %v6321_v34  ;;  %13679 = vst [vmem:[#allocation71_spill] sm:$0xff] %v8758_v43  ;;  %v1096_v28 = vld [vmem:[#allocation5 + $0x10c8] sm:$0xff]  ;;  %v6323_v34 = vpack.c.bf16 %v1083_v18, %v1077_v13  ;;  %v905_v18 = vld [vmem:[#allocation5 + $0xad0] sm:$0xff] }
 0x2aa   : > { %v8754_v37 = vadd.f32 %v1747_v26, %v1234_v52  ;;  %v1749_v44 = vpop.f32.mrb[1].mxu0  ;;  %2900 = vmatmul.mubr.f32.gmra.mrb[106].mxu0 %v7266_v62  ;;  %2391 = vmatprep.mubr.f32.mxu1 %v8758_v43  ;;  %v7268_v55 = vld [vmem:[%s7961_s8 + $0x428] sm:$0xff]  ;;  %v1240_v52 = vadd.f32 %v8402_v57, %v8724_v53  ;;  %v6197_v26 = vpack.c.bf16 %v906_v35, %v900_v0  ;;  %v8769_v43 = vld [vmem:[%s7961_s8 + $0x430] sm:$0xff]  ;;  %v1095_v0 = vld [vmem:[#allocation5 + $0x10c0] sm:$0xff] }
 0x2ab   : > { %v8761_v60 = vadd.f32 %v1749_v44, %v1236_v40  ;;  %2905 = vmatprep.mubr.f32.mxu0 %v7268_v55  ;;  %v1242_v62 = vadd.f32 %v8406_v20, %v8728_v47  ;;  %v6325_v58 = vpack.c.bf16 %v1096_v28, %v1090_v63  ;;  %v7270_v55 = vld [vmem:[%s7961_s8 + $0x420] sm:$0xff]  ;;  %v8778_v57 = vld [vmem:[%s7961_s8 + $0x468] sm:$0xff]  ;;  %v1246_v28 = vadd.f32 %v8410_v22, %v8724_v53  ;;  %v1089_v63 = vld [vmem:[#allocation5 + $0x1090] sm:$0xff] }
 0x2ac   : > { %13678 = vst [vmem:[#allocation70_spill] sm:$0xff] %v8754_v37  ;;  %v899_v20 = vld [vmem:[#allocation5 + $0xaa0] sm:$0xff]  ;;  %v1248_v35 = vadd.f32 %v8414_v38, %v8728_v47 }
 0x2ad   : > { %13680 = vst [vmem:[#allocation72_spill] sm:$0xff] %v8761_v60  ;;  %v1753_v37 = vpop.f32.mrb[2].mxu0  ;;  %2392 = vmatmul.mubr.f32.gmra.mrb[108].mxu1 %v8769_v43  ;;  %v6199_v38 = vpack.c.bf16 %v905_v18, %v899_v20  ;;  %v8805_v60 = vld [vmem:[%s7961_s8 + $0x490] sm:$0xff] }
 0x2ae   : > { %v8772_v25 = vadd.f32 %v1753_v37, %v1240_v52  ;;  %v1755_v40 = vpop.f32.mrb[3].mxu0  ;;  %2906 = vmatmul.mubr.f32.gmra.mrb[108].mxu0 %v7270_v55  ;;  %6196 = vmatpush1.bf16.xpose.msra.mxu1 %v6195_v56  ;;  %v7272_v37 = vld [vmem:[%s7961_s8 + $0x458] sm:$0xff]  ;;  %v8787_v56 = vld [vmem:[%s7961_s8 + $0x460] sm:$0xff] }
 0x2af   : > { %v8775_v13 = vadd.f32 %v1755_v40, %v1242_v62  ;;  %6324 = vmatpush1.bf16.xpose.msra.mxu0 %v6323_v34  ;;  %2397 = vmatprep.mubr.f32.mxu1 %v8778_v57  ;;  %v912_v34 = vld [vmem:[#allocation5 + $0xb08] sm:$0xff]  ;;  %v918_v52 = vld [vmem:[#allocation5 + $0xb38] sm:$0xff]  ;;  %v7274_v40 = vld [vmem:[%s7961_s8 + $0x450] sm:$0xff] }
 0x2b0   : > { %13681 = vst [vmem:[#allocation73_spill] sm:$0xff] %v8772_v25  ;;  %2911 = vmatprep.mubr.f32.mxu0 %v7272_v37  ;;  %6198 = vmatprep.subr.bf16.mxu1 %v6197_v26  ;;  %v8794_v26 = vld [vmem:[%s7961_s8 + $0x498] sm:$0xff]  ;;  %v1108_v37 = vld [vmem:[#allocation5 + $0x1128] sm:$0xff] }
 0x2b1   : > { %13682 = vst [vmem:[#allocation74_spill] sm:$0xff] %v8775_v13  ;;  %v1759_v44 = vpop.f32.mrb[4].mxu0  ;;  %2398 = vmatmul.mubr.f32.gmra.mrb[110].mxu1 %v8787_v56  ;;  %6326 = vmatprep.subr.bf16.mxu0 %v6325_v58  ;;  %v1102_v55 = vld [vmem:[#allocation5 + $0x10f8] sm:$0xff]  ;;  %v7276_v25 = vld [vmem:[%s7961_s8 + $0x488] sm:$0xff]  ;;  %v6327_v58 = vpack.c.bf16 %v1095_v0, %v1089_v63  ;;  %v917_v0 = vld [vmem:[#allocation5 + $0xb30] sm:$0xff] }
 0x2b2   : > { %v8790_v62 = vadd.f32 %v1759_v44, %v1246_v28  ;;  %v1761_v22 = vpop.f32.mrb[5].mxu0  ;;  %2912 = vmatmul.mubr.f32.gmra.mrb[110].mxu0 %v7274_v40  ;;  %2403 = vmatprep.mubr.f32.mxu1 %v8794_v26  ;;  %v1252_v28 = vadd.f32 %v8418_v27, %v8724_v53  ;;  %v6201_v44 = vpack.c.bf16 %v918_v52, %v912_v34  ;;  %v8814_v27 = vld [vmem:[%s7961_s8 + $0x4c8] sm:$0xff]  ;;  %v7280_v52 = vld [vmem:[%s7961_s8 + $0x4b8] sm:$0xff] }
 0x2b3   : > { %v8797_v13 = vadd.f32 %v1761_v22, %v1248_v35  ;;  %2917 = vmatprep.mubr.f32.mxu0 %v7276_v25  ;;  %v1254_v40 = vadd.f32 %v8422_v32, %v8728_v47  ;;  %v6329_v20 = vpack.c.bf16 %v1108_v37, %v1102_v55  ;;  %v7278_v25 = vld [vmem:[%s7961_s8 + $0x480] sm:$0xff]  ;;  %v1258_v34 = vadd.f32 %v8426_v15, %v8724_v53 }
 0x2b4   : > { %13683 = vst [vmem:[#allocation75_spill] sm:$0xff] %v8790_v62  ;;  %v911_v32 = vld [vmem:[#allocation5 + $0xb00] sm:$0xff] }
 0x2b5   : > { %13684 = vst [vmem:[#allocation76_spill] sm:$0xff] %v8797_v13  ;;  %v1765_v62 = vpop.f32.mrb[6].mxu0  ;;  %2404 = vmatmul.mubr.f32.gmra.mrb[112].mxu1 %v8805_v60  ;;  %v1107_v22 = vld [vmem:[#allocation5 + $0x1120] sm:$0xff]  ;;  %v8841_v13 = vld [vmem:[%s7961_s8 + $0x4f0] sm:$0xff] }
 0x2b6   : > { %v8808_v18 = vadd.f32 %v1765_v62, %v1252_v28  ;;  %v1767_v35 = vpop.f32.mrb[7].mxu0  ;;  %2918 = vmatmul.mubr.f32.gmra.mrb[112].mxu0 %v7278_v25  ;;  %6200 = vmatpush1.bf16.xpose.msra.mxu1 %v6199_v38  ;;  %v1101_v62 = vld [vmem:[#allocation5 + $0x10f0] sm:$0xff]  ;;  %v1260_v38 = vadd.f32 %v8430_v49, %v8728_v47  ;;  %v8823_v37 = vld [vmem:[%s7961_s8 + $0x4c0] sm:$0xff]  ;;  %v930_v28 = vld [vmem:[#allocation5 + $0xb98] sm:$0xff]  ;;  %v6203_v49 = vpack.c.bf16 %v917_v0, %v911_v32 }
 0x2b7   : > { %v8811_v63 = vadd.f32 %v1767_v35, %v1254_v40  ;;  %6328 = vmatpush1.bf16.xpose.msra.mxu0 %v6327_v58  ;;  %2409 = vmatprep.mubr.f32.mxu1 %v8814_v27  ;;  %v924_v58 = vld [vmem:[#allocation5 + $0xb68] sm:$0xff]  ;;  %v7282_v35 = vld [vmem:[%s7961_s8 + $0x4b0] sm:$0xff]  ;;  %v1114_v25 = vld [vmem:[#allocation5 + $0x1158] sm:$0xff] }
 0x2b8   : > { %13685 = vst [vmem:[#allocation77_spill] sm:$0xff] %v8808_v18  ;;  %2923 = vmatprep.mubr.f32.mxu0 %v7280_v52  ;;  %6202 = vmatprep.subr.bf16.mxu1 %v6201_v44  ;;  %v8830_v44 = vld [vmem:[%s7961_s8 + $0x4f8] sm:$0xff]  ;;  %v1120_v52 = vld [vmem:[#allocation5 + $0x1188] sm:$0xff] }
 0x2b9   : > { %13686 = vst [vmem:[#allocation78_spill] sm:$0xff] %v8811_v63  ;;  %v1771_v55 = vpop.f32.mrb[8].mxu0  ;;  %2410 = vmatmul.mubr.f32.gmra.mrb[114].mxu1 %v8823_v37  ;;  %6330 = vmatprep.subr.bf16.mxu0 %v6329_v20  ;;  %v7284_v18 = vld [vmem:[%s7961_s8 + $0x4e8] sm:$0xff]  ;;  %v6331_v20 = vpack.c.bf16 %v1107_v22, %v1101_v62  ;;  %v6333_v32 = vpack.c.bf16 %v1120_v52, %v1114_v25  ;;  %v929_v22 = vld [vmem:[#allocation5 + $0xb90] sm:$0xff]  ;;  %v8859_v52 = vld [vmem:[%s7961_s8 + $0x520] sm:$0xff] }
 0x2ba   : > { %v8826_v40 = vadd.f32 %v1771_v55, %v1258_v34  ;;  %v1773_v15 = vpop.f32.mrb[9].mxu0  ;;  %2924 = vmatmul.mubr.f32.gmra.mrb[114].mxu0 %v7282_v35  ;;  %2415 = vmatprep.mubr.f32.mxu1 %v8830_v44  ;;  %v1264_v34 = vadd.f32 %v8434_v24, %v8724_v53  ;;  %v6205_v55 = vpack.c.bf16 %v930_v28, %v924_v58  ;;  %v8850_v24 = vld [vmem:[%s7961_s8 + $0x528] sm:$0xff]  ;;  %v7288_v28 = vld [vmem:[%s7961_s8 + $0x518] sm:$0xff] }
 0x2bb   : > { %v8833_v63 = vadd.f32 %v1773_v15, %v1260_v38  ;;  %2929 = vmatprep.mubr.f32.mxu0 %v7284_v18  ;;  %v1266_v35 = vadd.f32 %v8438_v54, %v8728_v47  ;;  %v7286_v18 = vld [vmem:[%s7961_s8 + $0x4e0] sm:$0xff]  ;;  %v1270_v58 = vadd.f32 %v8442_v16, %v8724_v53 }
 0x2bc   : > { %13687 = vst [vmem:[#allocation79_spill] sm:$0xff] %v8826_v40  ;;  %v923_v54 = vld [vmem:[#allocation5 + $0xb60] sm:$0xff] }
 0x2bd   : > { %13688 = vst [vmem:[#allocation80_spill] sm:$0xff] %v8833_v63  ;;  %v1777_v40 = vpop.f32.mrb[10].mxu0  ;;  %2416 = vmatmul.mubr.f32.gmra.mrb[116].mxu1 %v8841_v13  ;;  %v1119_v15 = vld [vmem:[#allocation5 + $0x1180] sm:$0xff]  ;;  %v8877_v63 = vld [vmem:[%s7961_s8 + $0x550] sm:$0xff] }
 0x2be   : > { %v8844_v0 = vadd.f32 %v1777_v40, %v1264_v34  ;;  %v1779_v38 = vpop.f32.mrb[11].mxu0  ;;  %2930 = vmatmul.mubr.f32.gmra.mrb[116].mxu0 %v7286_v18  ;;  %6204 = vmatpush1.bf16.xpose.msra.mxu1 %v6203_v49  ;;  %v1113_v40 = vld [vmem:[#allocation5 + $0x1150] sm:$0xff]  ;;  %v1272_v49 = vadd.f32 %v8446_v41, %v8728_v47  ;;  %v942_v34 = vld [vmem:[#allocation5 + $0xbf8] sm:$0xff]  ;;  %v6207_v41 = vpack.c.bf16 %v929_v22, %v923_v54 }
 0x2bf   : > { %v8847_v62 = vadd.f32 %v1779_v38, %v1266_v35  ;;  %6332 = vmatpush1.bf16.xpose.msra.mxu0 %v6331_v20  ;;  %2421 = vmatprep.mubr.f32.mxu1 %v8850_v24  ;;  %v936_v20 = vld [vmem:[#allocation5 + $0xbc8] sm:$0xff]  ;;  %v7290_v38 = vld [vmem:[%s7961_s8 + $0x510] sm:$0xff]  ;;  %v1126_v18 = vld [vmem:[#allocation5 + $0x11b8] sm:$0xff] }
 0x2c0   : > { %13689 = vst [vmem:[#allocation81_spill] sm:$0xff] %v8844_v0  ;;  %2935 = vmatprep.mubr.f32.mxu0 %v7288_v28  ;;  %6206 = vmatprep.subr.bf16.mxu1 %v6205_v55  ;;  %v8866_v55 = vld [vmem:[%s7961_s8 + $0x558] sm:$0xff]  ;;  %v1132_v28 = vld [vmem:[#allocation5 + $0x11e8] sm:$0xff] }
 0x2c1   : > { %13690 = vst [vmem:[#allocation82_spill] sm:$0xff] %v8847_v62  ;;  %v1783_v25 = vpop.f32.mrb[12].mxu0  ;;  %2422 = vmatmul.mubr.f32.gmra.mrb[118].mxu1 %v8859_v52  ;;  %6334 = vmatprep.subr.bf16.mxu0 %v6333_v32  ;;  %v7292_v0 = vld [vmem:[%s7961_s8 + $0x548] sm:$0xff]  ;;  %v6335_v32 = vpack.c.bf16 %v1119_v15, %v1113_v40  ;;  %v6337_v54 = vpack.c.bf16 %v1132_v28, %v1126_v18  ;;  %v941_v15 = vld [vmem:[#allocation5 + $0xbf0] sm:$0xff]  ;;  %v8895_v28 = vld [vmem:[%s7961_s8 + $0x580] sm:$0xff] }
 0x2c2   : > { %v8862_v35 = vadd.f32 %v1783_v25, %v1270_v58  ;;  %v1785_v16 = vpop.f32.mrb[13].mxu0  ;;  %2936 = vmatmul.mubr.f32.gmra.mrb[118].mxu0 %v7290_v38  ;;  %2427 = vmatprep.mubr.f32.mxu1 %v8866_v55  ;;  %v1276_v58 = vadd.f32 %v8450_v14, %v8724_v53  ;;  %v6209_v25 = vpack.c.bf16 %v942_v34, %v936_v20  ;;  %v8886_v14 = vld [vmem:[%s7961_s8 + $0x588] sm:$0xff]  ;;  %v7296_v34 = vld [vmem:[%s7961_s8 + $0x578] sm:$0xff] }
 0x2c3   : > { %v8869_v62 = vadd.f32 %v1785_v16, %v1272_v49  ;;  %2941 = vmatprep.mubr.f32.mxu0 %v7292_v0  ;;  %v1278_v38 = vadd.f32 %v8454_v1, %v8728_v47  ;;  %v7294_v0 = vld [vmem:[%s7961_s8 + $0x540] sm:$0xff]  ;;  %v1282_v20 = vadd.f32 %v8458_v4, %v8724_v53 }
 0x2c4   : > { %13691 = vst [vmem:[#allocation83_spill] sm:$0xff] %v8862_v35  ;;  %v935_v1 = vld [vmem:[#allocation5 + $0xbc0] sm:$0xff] }
 0x2c5   : > { %13692 = vst [vmem:[#allocation84_spill] sm:$0xff] %v8869_v62  ;;  %v1789_v35 = vpop.f32.mrb[14].mxu0  ;;  %2428 = vmatmul.mubr.f32.gmra.mrb[120].mxu1 %v8877_v63  ;;  %v1131_v16 = vld [vmem:[#allocation5 + $0x11e0] sm:$0xff] }
 0x2c6   : > { %v8880_v22 = vadd.f32 %v1789_v35, %v1276_v58  ;;  %v1791_v49 = vpop.f32.mrb[15].mxu0  ;;  %2942 = vmatmul.mubr.f32.gmra.mrb[120].mxu0 %v7294_v0  ;;  %6208 = vmatpush1.bf16.xpose.msra.mxu1 %v6207_v41  ;;  %v1125_v35 = vld [vmem:[#allocation5 + $0x11b0] sm:$0xff]  ;;  %v1284_v41 = vadd.f32 %v8462_v8, %v8728_v47  ;;  %v954_v58 = vld [vmem:[#allocation5 + $0xc58] sm:$0xff]  ;;  %v6211_v8 = vpack.c.bf16 %v941_v15, %v935_v1 }
 0x2c7   : > { %v8883_v40 = vadd.f32 %v1791_v49, %v1278_v38  ;;  %6336 = vmatpush1.bf16.xpose.msra.mxu0 %v6335_v32  ;;  %2433 = vmatprep.mubr.f32.mxu1 %v8886_v14  ;;  %v948_v32 = vld [vmem:[#allocation5 + $0xc28] sm:$0xff]  ;;  %v7298_v49 = vld [vmem:[%s7961_s8 + $0x570] sm:$0xff] }
 0x2c8   : > { %13693 = vst [vmem:[#allocation85_spill] sm:$0xff] %v8880_v22  ;;  %2947 = vmatprep.mubr.f32.mxu0 %v7296_v34  ;;  %6210 = vmatprep.subr.bf16.mxu1 %v6209_v25  ;;  %v8902_v25 = vld [vmem:[%s7961_s8 + $0x5b8] sm:$0xff]  ;;  %v7300_v34 = vld [vmem:[%s7961_s8 + $0x5a8] sm:$0xff] }
 0x2c9   : > { %13694 = vst [vmem:[#allocation86_spill] sm:$0xff] %v8883_v40  ;;  %v1795_v18 = vpop.f32.mrb[16].mxu0  ;;  %2434 = vmatmul.mubr.f32.gmra.mrb[122].mxu1 %v8895_v28  ;;  %6338 = vmatprep.subr.bf16.mxu0 %v6337_v54  ;;  %v6339_v54 = vpack.c.bf16 %v1131_v16, %v1125_v35  ;;  %v1288_v40 = vadd.f32 %v8466_v6, %v8724_v53  ;;  %v8922_v6 = vld [vmem:[%s7961_s8 + $0x5e8] sm:$0xff]  ;;  %v953_v16 = vld [vmem:[#allocation5 + $0xc50] sm:$0xff] }
 0x2ca   : > { %v8898_v4 = vadd.f32 %v1795_v18, %v1282_v20  ;;  %v1797_v38 = vpop.f32.mrb[17].mxu0  ;;  %2948 = vmatmul.mubr.f32.gmra.mrb[122].mxu0 %v7298_v49  ;;  %2439 = vmatprep.mubr.f32.mxu1 %v8902_v25  ;;  %v6341_v20 = vpack.c.bf16 %v954_v58, %v948_v32  ;;  %v1290_v18 = vadd.f32 %v8470_v23, %v8728_v47  ;;  %v947_v23 = vld [vmem:[#allocation5 + $0xc20] sm:$0xff]  ;;  %v7304_v32 = vld [vmem:[%s7961_s8 + $0x5d8] sm:$0xff] }
 0x2cb   : > { %v8905_v0 = vadd.f32 %v1797_v38, %v1284_v41  ;;  %2953 = vmatprep.mubr.f32.mxu0 %v7300_v34  ;;  %v7302_v41 = vld [vmem:[%s7961_s8 + $0x5a0] sm:$0xff]  ;;  %v1296_v58 = vadd.f32 %v8477_v50, %v8728_v47  ;;  %v960_v34 = vld [vmem:[#allocation5 + $0xc88] sm:$0xff]  ;;  %v6343_v50 = vpack.c.bf16 %v953_v16, %v947_v23  ;;  %v965_v16 = vld [vmem:[#allocation5 + $0xcb0] sm:$0xff] }
 0x2cc   : > { %13695 = vst [vmem:[#allocation87_spill] sm:$0xff] %v8898_v4  ;;  %v8913_v4 = vld [vmem:[%s7961_s8 + $0x5b0] sm:$0xff] }
 0x2cd   : > { %13696 = vst [vmem:[#allocation88_spill] sm:$0xff] %v8905_v0  ;;  %v1801_v49 = vpop.f32.mrb[18].mxu0  ;;  %2440 = vmatmul.mubr.f32.gmra.mrb[124].mxu1 %v8913_v4 }
 0x2ce   : > { %v8916_v1 = vadd.f32 %v1801_v49, %v1288_v40  ;;  %v1803_v15 = vpop.f32.mrb[19].mxu0  ;;  %2954 = vmatmul.mubr.f32.gmra.mrb[124].mxu0 %v7302_v41  ;;  %6212 = vmatpush1.bf16.xpose.msra.mxu1 %v6211_v8  ;;  %v1294_v40 = vadd.f32 %v8474_v42, %v8724_v53  ;;  %v8931_v8 = vld [vmem:[%s7961_s8 + $0x5e0] sm:$0xff]  ;;  %v8938_v42 = vld [vmem:[%s7961_s8 + $0x28] sm:$0xff] }
 0x2cf   : > { %v8919_v35 = vadd.f32 %v1803_v15, %v1290_v18  ;;  %6340 = vmatpush1.bf16.xpose.msra.mxu0 %v6339_v54  ;;  %2445 = vmatprep.mubr.f32.mxu1 %v8922_v6  ;;  %v966_v54 = vld [vmem:[#allocation5 + $0xcb8] sm:$0xff]  ;;  %v7306_v15 = vld [vmem:[%s7961_s8 + $0x5d0] sm:$0xff] }
 0x2d0   : > { %13697 = vst [vmem:[#allocation89_spill] sm:$0xff] %v8916_v1  ;;  %2959 = vmatprep.mubr.f32.mxu0 %v7304_v32  ;;  %6342 = vmatprep.subr.bf16.mxu0 %v6341_v20  ;;  %v6345_v32 = vpack.c.bf16 %v966_v54, %v960_v34  ;;  %v8967_v54 = vld [vmem:[%s7961_s8 + $0x50] sm:$0xff]  ;;  %v13756_v1 = vld [vmem:[#allocation45_spill] sm:$0xff] }
 0x2d1   : > { %13698 = vst [vmem:[#allocation90_spill] sm:$0xff] %v8919_v35  ;;  %v1807_v38 = vpop.f32.mrb[20].mxu0  ;;  %2446 = vmatmul.mubr.f32.gmra.mrb[126].mxu1 %v8931_v8  ;;  %6405 = vmatprep.subr.bf16.mxu1 %v6341_v20  ;;  %v1300_v20 = vadd.f32 %v8484_v11, %v8724_v53  ;;  %v8958_v11 = vld [vmem:[%s7961_s8 + $0x58] sm:$0xff]  ;;  %v9129_v35 = vld [vmem:[%s7961_s8 + $0x200] sm:$0xff] }
 0x2d2   : > { %v8934_v18 = vadd.f32 %v1807_v38, %v1294_v40  ;;  %v1809_v49 = vpop.f32.mrb[21].mxu0  ;;  %2960 = vmatmul.mubr.f32.gmra.mrb[126].mxu0 %v7306_v15  ;;  %2516 = vmatprep.mubr.f32.mxu1 %v8938_v42  ;;  %v1302_v40 = vadd.f32 %v8490_v19, %v8728_v47  ;;  %v959_v19 = vld [vmem:[#allocation5 + $0xc80] sm:$0xff] }
 0x2d3   : > { %v8941_v41 = vadd.f32 %v1809_v49, %v1296_v58  ;;  %3030 = vmatprep.mubr.f32.mxu0 %v8480_v3  ;;  %v1306_v58 = vadd.f32 %v8498_v30, %v8724_v53  ;;  %v972_v49 = vld [vmem:[#allocation5 + $0xce8] sm:$0xff] }
 0x2d4   : > { %13699 = vst [vmem:[#allocation91_spill] sm:$0xff] %v8934_v18  ;;  %v8949_v18 = vld [vmem:[%s7961_s8 + $0x20] sm:$0xff]  ;;  %v8974_v30 = vld [vmem:[%s7961_s8 + $0x88] sm:$0xff] }
 0x2d5   : > { %13700 = vst [vmem:[#allocation92_spill] sm:$0xff] %v8941_v41  ;;  %v1813_v38 = vpop.f32.mrb[22].mxu0  ;;  %2517 = vmatmul.mubr.f32.vlgmr.msra.gmra.mrb[64].mxu1 %v8949_v18 }
 0x2d6   : > { %v8952_v15 = vadd.f32 %v1813_v38, %v1300_v20  ;;  %v1815_v23 = vpop.f32.mrb[23].mxu0  ;;  %3031 = vmatmul.mubr.f32.vlgmr.msra.gmra.mrb[64].mxu0 %v8487_v48  ;;  %6421 = vmatpush1.bf16.xpose.msra.mxu1 %v6343_v50  ;;  %v1308_v48 = vadd.f32 %v8504_v51, %v8728_v47 }
 0x2d7   : > { %v8955_v3 = vadd.f32 %v1815_v23, %v1302_v40  ;;  %6344 = vmatpush1.bf16.xpose.msra.mxu0 %v6343_v50  ;;  %2522 = vmatprep.mubr.f32.mxu1 %v8958_v11  ;;  %v978_v50 = vld [vmem:[#allocation5 + $0xd18] sm:$0xff]  ;;  %v1314_v23 = vadd.f32 %v8518_v39, %v8728_v47  ;;  %v971_v39 = vld [vmem:[#allocation5 + $0xce0] sm:$0xff] }
 0x2d8   : > { %13701 = vst [vmem:[#allocation93_spill] sm:$0xff] %v8952_v15  ;;  %3036 = vmatprep.mubr.f32.mxu0 %v8494_v29  ;;  %6346 = vmatprep.subr.bf16.mxu0 %v6345_v32  ;;  %v6347_v29 = vpack.c.bf16 %v965_v16, %v959_v19  ;;  %v6349_v38 = vpack.c.bf16 %v978_v50, %v972_v49  ;;  %v977_v16 = vld [vmem:[#allocation5 + $0xd10] sm:$0xff] }
 0x2d9   : > { %13702 = vst [vmem:[#allocation94_spill] sm:$0xff] %v8955_v3  ;;  %v1819_v34 = vpop.f32.mrb[24].mxu0  ;;  %2523 = vmatmul.mubr.f32.gmra.mrb[66].mxu1 %v8967_v54  ;;  %6406 = vmatprep.subr.bf16.mxu1 %v6345_v32  ;;  %v1312_v32 = vadd.f32 %v8512_v21, %v8724_v53  ;;  %v8994_v21 = vld [vmem:[%s7961_s8 + $0xb8] sm:$0xff]  ;;  %v9003_v50 = vld [vmem:[%s7961_s8 + $0xb0] sm:$0xff]  ;;  %v13741_v3 = vld [vmem:[#allocation38_spill] sm:$0xff] }
 0x2da   : > { %v8970_v20 = vadd.f32 %v1819_v34, %v1306_v58  ;;  %v1821_v40 = vpop.f32.mrb[25].mxu0  ;;  %3037 = vmatmul.mubr.f32.gmra.mrb[66].mxu0 %v8501_v9  ;;  %2528 = vmatprep.mubr.f32.mxu1 %v8974_v30  ;;  %v8985_v34 = vld [vmem:[%s7961_s8 + $0x80] sm:$0xff]  ;;  %v13742_v15 = vld [vmem:[#allocation39_spill] sm:$0xff] }
 0x2db   : > { %v8977_v51 = vadd.f32 %v1821_v40, %v1308_v48  ;;  %3042 = vmatprep.mubr.f32.mxu0 %v8508_v36  ;;  %v1318_v48 = vadd.f32 %v8526_v45, %v8724_v53  ;;  %v984_v40 = vld [vmem:[#allocation5 + $0xd48] sm:$0xff] }
 0x2dc   : > { %13703 = vst [vmem:[#allocation95_spill] sm:$0xff] %v8970_v20  ;;  %v9010_v45 = vld [vmem:[%s7961_s8 + $0xe8] sm:$0xff]  ;;  %v9093_v20 = vld [vmem:[%s7961_s8 + $0x1a0] sm:$0xff] }
 0x2dd   : > { %13704 = vst [vmem:[#allocation96_spill] sm:$0xff] %v8977_v51  ;;  %v1825_v58 = vpop.f32.mrb[26].mxu0  ;;  %2529 = vmatmul.mubr.f32.gmra.mrb[68].mxu1 %v8985_v34 }
 0x2de   : > { %v8988_v9 = vadd.f32 %v1825_v58, %v1312_v32  ;;  %v1827_v19 = vpop.f32.mrb[27].mxu0  ;;  %3043 = vmatmul.mubr.f32.gmra.mrb[68].mxu0 %v8515_v5  ;;  %6422 = vmatpush1.bf16.xpose.msra.mxu1 %v6347_v29  ;;  %v1320_v5 = vadd.f32 %v8532_v46, %v8728_v47 }
 0x2df   : > { %v8991_v36 = vadd.f32 %v1827_v19, %v1314_v23  ;;  %6348 = vmatpush1.bf16.xpose.msra.mxu0 %v6347_v29  ;;  %2534 = vmatprep.mubr.f32.mxu1 %v8994_v21  ;;  %v990_v29 = vld [vmem:[#allocation5 + $0xd78] sm:$0xff]  ;;  %v1326_v19 = vadd.f32 %v8546_v2, %v8728_v47  ;;  %v983_v2 = vld [vmem:[#allocation5 + $0xd40] sm:$0xff] }
 0x2e0   : > { %13705 = vst [vmem:[#allocation97_spill] sm:$0xff] %v8988_v9  ;;  %3048 = vmatprep.mubr.f32.mxu0 %v8522_v33  ;;  %6350 = vmatprep.subr.bf16.mxu0 %v6349_v38  ;;  %v6351_v33 = vpack.c.bf16 %v977_v16, %v971_v39  ;;  %v6353_v58 = vpack.c.bf16 %v990_v29, %v984_v40  ;;  %v989_v16 = vld [vmem:[#allocation5 + $0xd70] sm:$0xff]  ;;  %v13711_v40 = vld [vmem:[#allocation21_spill] sm:$0xff] }
 0x2e1   : > { %13706 = vst [vmem:[#allocation98_spill] sm:$0xff] %v8991_v36  ;;  %v1831_v49 = vpop.f32.mrb[28].mxu0  ;;  %2535 = vmatmul.mubr.f32.gmra.mrb[70].mxu1 %v9003_v50  ;;  %6407 = vmatprep.subr.bf16.mxu1 %v6349_v38  ;;  %v1324_v38 = vadd.f32 %v8540_v17, %v8724_v53  ;;  %v9030_v17 = vld [vmem:[%s7961_s8 + $0x118] sm:$0xff]  ;;  %v13727_v36 = vld [vmem:[#allocation30_spill] sm:$0xff]  ;;  %v13728_v9 = vld [vmem:[#allocation31_spill] sm:$0xff] }
 0x2e2   : > { %v9006_v32 = vadd.f32 %v1831_v49, %v1318_v48  ;;  %v1833_v23 = vpop.f32.mrb[29].mxu0  ;;  %3049 = vmatmul.mubr.f32.gmra.mrb[70].mxu0 %v8529_v7  ;;  %2540 = vmatprep.mubr.f32.mxu1 %v9010_v45  ;;  %v9021_v49 = vld [vmem:[%s7961_s8 + $0xe0] sm:$0xff] }
 0x2e3   : > { %v9013_v46 = vadd.f32 %v1833_v23, %v1320_v5  ;;  %3054 = vmatprep.mubr.f32.mxu0 %v8536_v61  ;;  %v1330_v5 = vadd.f32 %v8554_v31, %v8724_v53  ;;  %v9039_v23 = vld [vmem:[%s7961_s8 + $0x110] sm:$0xff]  ;;  %v9046_v31 = vld [vmem:[%s7961_s8 + $0x148] sm:$0xff] }
 0x2e4   : > { %13707 = vst [vmem:[#allocation99_spill] sm:$0xff] %v9006_v32  ;;  %v9057_v32 = vld [vmem:[%s7961_s8 + $0x140] sm:$0xff] }
 0x2e5   : > { %13708 = vst [vmem:[#allocation100_spill] sm:$0xff] %v9013_v46  ;;  %v1837_v48 = vpop.f32.mrb[30].mxu0  ;;  %2541 = vmatmul.mubr.f32.gmra.mrb[72].mxu1 %v9021_v49 }
 0x2e6   : > { %v9024_v7 = vadd.f32 %v1837_v48, %v1324_v38  ;;  %v1839_v39 = vpop.f32.mrb[31].mxu0  ;;  %3055 = vmatmul.mubr.f32.gmra.mrb[72].mxu0 %v8543_v12  ;;  %6423 = vmatpush1.bf16.xpose.msra.mxu1 %v6351_v33  ;;  %v1332_v12 = vadd.f32 %v13711_v40, %v8728_v47  ;;  %v1002_v38 = vld [vmem:[#allocation5 + $0xdd8] sm:$0xff] }
 0x2e7   : > { %v9027_v61 = vadd.f32 %v1839_v39, %v1326_v19  ;;  %6352 = vmatpush1.bf16.xpose.msra.mxu0 %v6351_v33  ;;  %2546 = vmatprep.mubr.f32.mxu1 %v9030_v17  ;;  %v996_v33 = vld [vmem:[#allocation5 + $0xda8] sm:$0xff]  ;;  %v13713_v39 = vld [vmem:[#allocation20_spill] sm:$0xff] }
 0x2e8   : > { %13709 = vst [vmem:[#allocation101_spill] sm:$0xff] %v9024_v7  ;;  %3060 = vmatprep.mubr.f32.mxu0 %v8550_v10  ;;  %6354 = vmatprep.subr.bf16.mxu0 %v6353_v58  ;;  %v6355_v10 = vpack.c.bf16 %v989_v16, %v983_v2  ;;  %v13716_v7 = vld [vmem:[#allocation23_spill] sm:$0xff]  ;;  %v6357_v46 = vpack.c.bf16 %v1002_v38, %v996_v33  ;;  %v13719_v16 = vld [vmem:[#allocation24_spill] sm:$0xff] }
 0x2e9   : > { %13710 = vst [vmem:[#allocation102_spill] sm:$0xff] %v9027_v61  ;;  %v1843_v29 = vpop.f32.mrb[32].mxu0  ;;  %2547 = vmatmul.mubr.f32.gmra.mrb[74].mxu1 %v9039_v23  ;;  %6408 = vmatprep.subr.bf16.mxu1 %v6353_v58  ;;  %v13715_v61 = vld [vmem:[#allocation22_spill] sm:$0xff]  ;;  %v1336_v58 = vadd.f32 %v13716_v7, %v8724_v53  ;;  %v9066_v7 = vld [vmem:[%s7961_s8 + $0x178] sm:$0xff]  ;;  %v1001_v33 = vld [vmem:[#allocation5 + $0xdd0] sm:$0xff] }
 0x2ea   : > { %v9042_v19 = vadd.f32 %v1843_v29, %v1330_v5  ;;  %v1845_v48 = vpop.f32.mrb[33].mxu0  ;;  %3061 = vmatmul.mubr.f32.gmra.mrb[74].mxu0 %v13713_v39  ;;  %2552 = vmatprep.mubr.f32.mxu1 %v9046_v31  ;;  %v13717_v5 = vld [vmem:[#allocation25_spill] sm:$0xff]  ;;  %v13721_v38 = vld [vmem:[#allocation27_spill] sm:$0xff] }
 0x2eb   : > { %v9049_v40 = vadd.f32 %v1845_v48, %v1332_v12  ;;  %3066 = vmatprep.mubr.f32.mxu0 %v13715_v61  ;;  %v1338_v29 = vadd.f32 %v13717_v5, %v8728_v47  ;;  %v995_v12 = vld [vmem:[#allocation5 + $0xda0] sm:$0xff]  ;;  %v1342_v48 = vadd.f32 %v13721_v38, %v8724_v53  ;;  %v9082_v38 = vld [vmem:[%s7961_s8 + $0x1a8] sm:$0xff] }
 0x2ec   : > { %13712 = vst [vmem:[#allocation21_spill] sm:$0xff] %v9042_v19  ;;  %v13722_v5 = vld [vmem:[#allocation26_spill] sm:$0xff] }
 0x2ed   : > { %13714 = vst [vmem:[#allocation20_spill] sm:$0xff] %v9049_v40  ;;  %v1849_v19 = vpop.f32.mrb[34].mxu0  ;;  %2553 = vmatmul.mubr.f32.gmra.mrb[76].mxu1 %v9057_v32  ;;  %v13725_v40 = vld [vmem:[#allocation28_spill] sm:$0xff] }
 0x2ee   : > { %v9060_v39 = vadd.f32 %v1849_v19, %v1336_v58  ;;  %v1851_v2 = vpop.f32.mrb[35].mxu0  ;;  %3067 = vmatmul.mubr.f32.gmra.mrb[76].mxu0 %v13719_v16  ;;  %6424 = vmatpush1.bf16.xpose.msra.mxu1 %v6355_v10  ;;  %v13723_v19 = vld [vmem:[#allocation29_spill] sm:$0xff] }
 0x2ef   : > { %v9063_v61 = vadd.f32 %v1851_v2, %v1338_v29  ;;  %6356 = vmatpush1.bf16.xpose.msra.mxu0 %v6355_v10  ;;  %2558 = vmatprep.mubr.f32.mxu1 %v9066_v7  ;;  %v1344_v58 = vadd.f32 %v13723_v19, %v8728_v47  ;;  %v9075_v29 = vld [vmem:[%s7961_s8 + $0x170] sm:$0xff]  ;;  %v1008_v10 = vld [vmem:[#allocation5 + $0xe08] sm:$0xff]  ;;  %v1014_v2 = vld [vmem:[#allocation5 + $0xe38] sm:$0xff] }
 0x2f0   : > { %13718 = vst [vmem:[#allocation22_spill] sm:$0xff] %v9060_v39  ;;  %3072 = vmatprep.mubr.f32.mxu0 %v13722_v5  ;;  %6358 = vmatprep.subr.bf16.mxu0 %v6357_v46  ;;  %v6359_v5 = vpack.c.bf16 %v1001_v33, %v995_v12  ;;  %v6361_v51 = vpack.c.bf16 %v1014_v2, %v1008_v10  ;;  %v1007_v33 = vld [vmem:[#allocation5 + $0xe00] sm:$0xff]  ;;  %v13733_v10 = vld [vmem:[#allocation35_spill] sm:$0xff] }
 0x2f1   : > { %13720 = vst [vmem:[#allocation23_spill] sm:$0xff] %v9063_v61  ;;  %v1855_v16 = vpop.f32.mrb[36].mxu0  ;;  %2559 = vmatmul.mubr.f32.gmra.mrb[78].mxu1 %v9075_v29  ;;  %6409 = vmatprep.subr.bf16.mxu1 %v6357_v46  ;;  %v1348_v46 = vadd.f32 %v13728_v9, %v8724_v53  ;;  %v9102_v9 = vld [vmem:[%s7961_s8 + $0x1d8] sm:$0xff]  ;;  %v1354_v2 = vadd.f32 %v13733_v10, %v8724_v53  ;;  %v9118_v10 = vld [vmem:[%s7961_s8 + $0x208] sm:$0xff] }
 0x2f2   : > { %v9078_v61 = vadd.f32 %v1855_v16, %v1342_v48  ;;  %v1857_v39 = vpop.f32.mrb[37].mxu0  ;;  %3073 = vmatmul.mubr.f32.gmra.mrb[78].mxu0 %v13725_v40  ;;  %2564 = vmatprep.mubr.f32.mxu1 %v9082_v38  ;;  %v13729_v48 = vld [vmem:[#allocation33_spill] sm:$0xff]  ;;  %13739 = vst [vmem:[#allocation30_spill] sm:$0xff] %v9118_v10 }
 0x2f3   : > { %v9085_v19 = vadd.f32 %v1857_v39, %v1344_v58  ;;  %3078 = vmatprep.mubr.f32.mxu0 %v13727_v36  ;;  %v1350_v16 = vadd.f32 %v13729_v48, %v8728_v47  ;;  %v13731_v39 = vld [vmem:[#allocation32_spill] sm:$0xff]  ;;  %v13734_v48 = vld [vmem:[#allocation34_spill] sm:$0xff]  ;;  %13744 = vst [vmem:[#allocation33_spill] sm:$0xff] %v9129_v35 }
 0x2f4   : > { %13724 = vst [vmem:[#allocation25_spill] sm:$0xff] %v9078_v61  ;;  %v1013_v58 = vld [vmem:[#allocation5 + $0xe30] sm:$0xff] }
 0x2f5   : > { %13726 = vst [vmem:[#allocation24_spill] sm:$0xff] %v9085_v19  ;;  %v1861_v61 = vpop.f32.mrb[38].mxu0  ;;  %2565 = vmatmul.mubr.f32.gmra.mrb[80].mxu1 %v9093_v20  ;;  %v13738_v19 = vld [vmem:[#allocation36_spill] sm:$0xff] }
 0x2f6   : > { %v9096_v40 = vadd.f32 %v1861_v61, %v1348_v46  ;;  %v1863_v12 = vpop.f32.mrb[39].mxu0  ;;  %3079 = vmatmul.mubr.f32.gmra.mrb[80].mxu0 %v13731_v39  ;;  %6425 = vmatpush1.bf16.xpose.msra.mxu1 %v6359_v5  ;;  %v13735_v61 = vld [vmem:[#allocation37_spill] sm:$0xff] }
 0x2f7   : > { %v9099_v36 = vadd.f32 %v1863_v12, %v1350_v16  ;;  %6360 = vmatpush1.bf16.xpose.msra.mxu0 %v6359_v5  ;;  %2570 = vmatprep.mubr.f32.mxu1 %v9102_v9  ;;  %v1356_v46 = vadd.f32 %v13735_v61, %v8728_v47  ;;  %v9111_v16 = vld [vmem:[%s7961_s8 + $0x1d0] sm:$0xff]  ;;  %v1020_v5 = vld [vmem:[#allocation5 + $0xe68] sm:$0xff]  ;;  %v1026_v12 = vld [vmem:[#allocation5 + $0xe98] sm:$0xff] }
 0x2f8   : > { %13730 = vst [vmem:[#allocation27_spill] sm:$0xff] %v9096_v40  ;;  %3084 = vmatprep.mubr.f32.mxu0 %v13734_v48  ;;  %6362 = vmatprep.subr.bf16.mxu0 %v6361_v51  ;;  %13736 = vst [vmem:[#allocation29_spill] sm:$0xff] %v9111_v16  ;;  %v6363_v48 = vpack.c.bf16 %v1013_v58, %v1007_v33  ;;  %v6365_v41 = vpack.c.bf16 %v1026_v12, %v1020_v5  ;;  %v1019_v58 = vld [vmem:[#allocation5 + $0xe60] sm:$0xff]  ;;  %v13749_v5 = vld [vmem:[#allocation43_spill] sm:$0xff] }
 0x2f9   : > { %13732 = vst [vmem:[#allocation26_spill] sm:$0xff] %v9099_v36  ;;  %v1867_v39 = vpop.f32.mrb[40].mxu0  ;;  %2571 = vmatmul.mubr.f32.gmra.mrb[82].mxu1 %v9111_v16  ;;  %6410 = vmatprep.subr.bf16.mxu1 %v6361_v51  ;;  %v1360_v51 = vadd.f32 %v13742_v15, %v8724_v53  ;;  %v9138_v15 = vld [vmem:[%s7961_s8 + $0x238] sm:$0xff]  ;;  %v1366_v12 = vadd.f32 %v13749_v5, %v8724_v53  ;;  %v9154_v5 = vld [vmem:[%s7961_s8 + $0x268] sm:$0xff]  ;;  %v9305_v16 = vld [vmem:[%s7961_s8 + $0x3e0] sm:$0xff] }
 0x2fa   : > { %v9114_v36 = vadd.f32 %v1867_v39, %v1354_v2  ;;  %v1869_v40 = vpop.f32.mrb[41].mxu0  ;;  %3085 = vmatmul.mubr.f32.gmra.mrb[82].mxu0 %v13738_v19  ;;  %2576 = vmatprep.mubr.f32.mxu1 %v9118_v10  ;;  %v13743_v2 = vld [vmem:[#allocation41_spill] sm:$0xff]  ;;  %13748 = vst [vmem:[#allocation34_spill] sm:$0xff] %v9138_v15  ;;  %13754 = vst [vmem:[#allocation38_spill] sm:$0xff] %v9154_v5 }
 0x2fb   : > { %v9121_v61 = vadd.f32 %v1869_v40, %v1356_v46  ;;  %3090 = vmatprep.mubr.f32.mxu0 %v13741_v3  ;;  %v1362_v39 = vadd.f32 %v13743_v2, %v8728_v47  ;;  %v13746_v40 = vld [vmem:[#allocation40_spill] sm:$0xff] }
 0x2fc   : > { %13737 = vst [vmem:[#allocation28_spill] sm:$0xff] %v9114_v36  ;;  %v1025_v46 = vld [vmem:[#allocation5 + $0xe90] sm:$0xff] }
 0x2fd   : > { %13740 = vst [vmem:[#allocation31_spill] sm:$0xff] %v9121_v61  ;;  %v1873_v36 = vpop.f32.mrb[42].mxu0  ;;  %2577 = vmatmul.mubr.f32.gmra.mrb[84].mxu1 %v9129_v35  ;;  %v7331_v61 = vld [vmem:[%s7961_s8 + $0x220] sm:$0xff] }
 0x2fe   : > { %v9132_v19 = vadd.f32 %v1873_v36, %v1360_v51  ;;  %v1875_v33 = vpop.f32.mrb[43].mxu0  ;;  %3091 = vmatmul.mubr.f32.gmra.mrb[84].mxu0 %v13746_v40  ;;  %6426 = vmatpush1.bf16.xpose.msra.mxu1 %v6363_v48  ;;  %v13750_v36 = vld [vmem:[#allocation42_spill] sm:$0xff]  ;;  %v13751_v51 = vld [vmem:[#allocation44_spill] sm:$0xff] }
 0x2ff   : > { %v9135_v3 = vadd.f32 %v1875_v33, %v1362_v39  ;;  %6364 = vmatpush1.bf16.xpose.msra.mxu0 %v6363_v48  ;;  %2582 = vmatprep.mubr.f32.mxu1 %v9138_v15  ;;  %v1368_v2 = vadd.f32 %v13751_v51, %v8728_v47  ;;  %v9147_v33 = vld [vmem:[%s7961_s8 + $0x230] sm:$0xff]  ;;  %v1032_v48 = vld [vmem:[#allocation5 + $0xec8] sm:$0xff]  ;;  %v1038_v40 = vld [vmem:[#allocation5 + $0xef8] sm:$0xff] }
 0x300   : > { %13745 = vst [vmem:[#allocation32_spill] sm:$0xff] %v9132_v19  ;;  %3096 = vmatprep.mubr.f32.mxu0 %v13750_v36  ;;  %6366 = vmatprep.subr.bf16.mxu0 %v6365_v41  ;;  %13752 = vst [vmem:[#allocation37_spill] sm:$0xff] %v9147_v33  ;;  %v6367_v36 = vpack.c.bf16 %v1025_v46, %v1019_v58  ;;  %v6369_v22 = vpack.c.bf16 %v1038_v40, %v1032_v48  ;;  %v13761_v58 = vld [vmem:[#allocation47_spill] sm:$0xff]  ;;  %v9174_v46 = vld [vmem:[%s7961_s8 + $0x298] sm:$0xff] }
 0x301   : > { %13747 = vst [vmem:[#allocation35_spill] sm:$0xff] %v9135_v3  ;;  %v1879_v39 = vpop.f32.mrb[44].mxu0  ;;  %2583 = vmatmul.mubr.f32.gmra.mrb[86].mxu1 %v9147_v33  ;;  %6411 = vmatprep.subr.bf16.mxu1 %v6365_v41  ;;  %v13757_v41 = vld [vmem:[#allocation46_spill] sm:$0xff]  ;;  %13763 = vst [vmem:[#allocation42_spill] sm:$0xff] %v9174_v46  ;;  %v1037_v48 = vld [vmem:[#allocation5 + $0xef0] sm:$0xff] }
 0x302   : > { %v9150_v3 = vadd.f32 %v1879_v39, %v1366_v12  ;;  %v1881_v19 = vpop.f32.mrb[45].mxu0  ;;  %3097 = vmatmul.mubr.f32.gmra.mrb[86].mxu0 %v7331_v61  ;;  %2588 = vmatprep.mubr.f32.mxu1 %v9154_v5  ;;  %v1372_v0 = vadd.f32 %v13757_v41, %v8724_v53  ;;  %v13758_v12 = vld [vmem:[#allocation48_spill] sm:$0xff]  ;;  %v9165_v61 = vld [vmem:[%s7961_s8 + $0x260] sm:$0xff] }
 0x303   : > { %v9157_v51 = vadd.f32 %v1881_v19, %v1368_v2  ;;  %3102 = vmatprep.mubr.f32.mxu0 %v13756_v1  ;;  %v1374_v39 = vadd.f32 %v13758_v12, %v8728_v47  ;;  %13759 = vst [vmem:[#allocation41_spill] sm:$0xff] %v9165_v61  ;;  %v1031_v2 = vld [vmem:[#allocation5 + $0xec0] sm:$0xff]  ;;  %v7355_v33 = vld [vmem:[%s7961_s8 + $0x378] sm:$0xff] }
 0x304   : > { %13753 = vst [vmem:[#allocation36_spill] sm:$0xff] %v9150_v3  ;;  %v13764_v40 = vld [vmem:[#allocation49_spill] sm:$0xff]  ;;  %v13765_v41 = vld [vmem:[#allocation50_spill] sm:$0xff] }
 0x305   : > { %13755 = vst [vmem:[#allocation39_spill] sm:$0xff] %v9157_v51  ;;  %v1885_v3 = vpop.f32.mrb[46].mxu0  ;;  %2589 = vmatmul.mubr.f32.gmra.mrb[88].mxu1 %v9165_v61  ;;  %v1380_v12 = vadd.f32 %v13765_v41, %v8728_v47  ;;  %v6371_v41 = vpack.c.bf16 %v1037_v48, %v1031_v2  ;;  %v7341_v2 = vld [vmem:[%s7961_s8 + $0x2b0] sm:$0xff]  ;;  %v9210_v48 = vld [vmem:[%s7961_s8 + $0x2f8] sm:$0xff] }
 0x306   : > { %v9168_v62 = vadd.f32 %v1885_v3, %v1372_v0  ;;  %v1887_v19 = vpop.f32.mrb[47].mxu0  ;;  %3103 = vmatmul.mubr.f32.gmra.mrb[88].mxu0 %v13761_v58  ;;  %6427 = vmatpush1.bf16.xpose.msra.mxu1 %v6367_v36  ;;  %v1378_v0 = vadd.f32 %v13764_v40, %v8724_v53  ;;  %v7335_v3 = vld [vmem:[%s7961_s8 + $0x288] sm:$0xff]  ;;  %v1050_v58 = vld [vmem:[#allocation5 + $0xf58] sm:$0xff]  ;;  %v7337_v40 = vld [vmem:[%s7961_s8 + $0x280] sm:$0xff] }
 0x307   : > { %v9171_v1 = vadd.f32 %v1887_v19, %v1374_v39  ;;  %6368 = vmatpush1.bf16.xpose.msra.mxu0 %v6367_v36  ;;  %2594 = vmatprep.mubr.f32.mxu1 %v9174_v46  ;;  %v9183_v36 = vld [vmem:[%s7961_s8 + $0x290] sm:$0xff]  ;;  %v1044_v19 = vld [vmem:[#allocation5 + $0xf28] sm:$0xff]  ;;  %v7339_v46 = vld [vmem:[%s7961_s8 + $0x2b8] sm:$0xff] }
 0x308   : > { %13760 = vst [vmem:[#allocation40_spill] sm:$0xff] %v9168_v62  ;;  %3108 = vmatprep.mubr.f32.mxu0 %v7335_v3  ;;  %6370 = vmatprep.subr.bf16.mxu0 %v6369_v22  ;;  %13766 = vst [vmem:[#allocation44_spill] sm:$0xff] %v9183_v36  ;;  %v9190_v3 = vld [vmem:[%s7961_s8 + $0x2c8] sm:$0xff]  ;;  %v6373_v61 = vpack.c.bf16 %v1050_v58, %v1044_v19  ;;  %v1049_v19 = vld [vmem:[#allocation5 + $0xf50] sm:$0xff] }
 0x309   : > { %13762 = vst [vmem:[#allocation43_spill] sm:$0xff] %v9171_v1  ;;  %v1891_v39 = vpop.f32.mrb[48].mxu0  ;;  %2595 = vmatmul.mubr.f32.gmra.mrb[90].mxu1 %v9183_v36  ;;  %6412 = vmatprep.subr.bf16.mxu1 %v6369_v22  ;;  %13768 = vst [vmem:[#allocation46_spill] sm:$0xff] %v9190_v3  ;;  %v13770_v22 = vld [vmem:[#allocation51_spill] sm:$0xff]  ;;  %v13776_v58 = vld [vmem:[#allocation53_spill] sm:$0xff] }
 0x30a   : > { %v9186_v1 = vadd.f32 %v1891_v39, %v1378_v0  ;;  %v1893_v62 = vpop.f32.mrb[49].mxu0  ;;  %3109 = vmatmul.mubr.f32.gmra.mrb[90].mxu0 %v7337_v40  ;;  %2600 = vmatprep.mubr.f32.mxu1 %v9190_v3  ;;  %v1384_v36 = vadd.f32 %v13770_v22, %v8724_v53  ;;  %v13771_v0 = vld [vmem:[#allocation52_spill] sm:$0xff]  ;;  %v9201_v40 = vld [vmem:[%s7961_s8 + $0x2c0] sm:$0xff]  ;;  %13775 = vst [vmem:[#allocation51_spill] sm:$0xff] %v9210_v48 }
 0x30b   : > { %v9193_v51 = vadd.f32 %v1893_v62, %v1380_v12  ;;  %3114 = vmatprep.mubr.f32.mxu0 %v7339_v46  ;;  %v1386_v39 = vadd.f32 %v13771_v0, %v8728_v47  ;;  %13772 = vst [vmem:[#allocation47_spill] sm:$0xff] %v9201_v40  ;;  %v1043_v12 = vld [vmem:[#allocation5 + $0xf20] sm:$0xff] }
 0x30c   : > { %13767 = vst [vmem:[#allocation45_spill] sm:$0xff] %v9186_v1  ;;  %v13777_v22 = vld [vmem:[#allocation54_spill] sm:$0xff] }
 0x30d   : > { %13769 = vst [vmem:[#allocation48_spill] sm:$0xff] %v9193_v51  ;;  %v1897_v1 = vpop.f32.mrb[50].mxu0  ;;  %2601 = vmatmul.mubr.f32.gmra.mrb[92].mxu1 %v9201_v40  ;;  %v1392_v0 = vadd.f32 %v13777_v22, %v8728_v47  ;;  %v6375_v22 = vpack.c.bf16 %v1049_v19, %v1043_v12  ;;  %v7349_v12 = vld [vmem:[%s7961_s8 + $0x310] sm:$0xff]  ;;  %v9246_v19 = vld [vmem:[%s7961_s8 + $0x358] sm:$0xff] }
 0x30e   : > { %v9204_v3 = vadd.f32 %v1897_v1, %v1384_v36  ;;  %v1899_v62 = vpop.f32.mrb[51].mxu0  ;;  %3115 = vmatmul.mubr.f32.gmra.mrb[92].mxu0 %v7341_v2  ;;  %6428 = vmatpush1.bf16.xpose.msra.mxu1 %v6371_v41  ;;  %v1390_v1 = vadd.f32 %v13776_v58, %v8724_v53  ;;  %v7343_v36 = vld [vmem:[%s7961_s8 + $0x2e8] sm:$0xff]  ;;  %v1062_v2 = vld [vmem:[#allocation5 + $0xfb8] sm:$0xff]  ;;  %v7345_v58 = vld [vmem:[%s7961_s8 + $0x2e0] sm:$0xff] }
 0x30f   : > { %v9207_v46 = vadd.f32 %v1899_v62, %v1386_v39  ;;  %6372 = vmatpush1.bf16.xpose.msra.mxu0 %v6371_v41  ;;  %2606 = vmatprep.mubr.f32.mxu1 %v9210_v48  ;;  %v9219_v41 = vld [vmem:[%s7961_s8 + $0x2f0] sm:$0xff]  ;;  %v1056_v62 = vld [vmem:[#allocation5 + $0xf88] sm:$0xff]  ;;  %v7347_v48 = vld [vmem:[%s7961_s8 + $0x318] sm:$0xff] }
 0x310   : > { %13773 = vst [vmem:[#allocation49_spill] sm:$0xff] %v9204_v3  ;;  %3120 = vmatprep.mubr.f32.mxu0 %v7343_v36  ;;  %6374 = vmatprep.subr.bf16.mxu0 %v6373_v61  ;;  %13778 = vst [vmem:[#allocation52_spill] sm:$0xff] %v9219_v41  ;;  %v9226_v36 = vld [vmem:[%s7961_s8 + $0x328] sm:$0xff]  ;;  %v6377_v40 = vpack.c.bf16 %v1062_v2, %v1056_v62  ;;  %v1061_v62 = vld [vmem:[#allocation5 + $0xfb0] sm:$0xff] }
 0x311   : > { %13774 = vst [vmem:[#allocation50_spill] sm:$0xff] %v9207_v46  ;;  %v1903_v39 = vpop.f32.mrb[52].mxu0  ;;  %2607 = vmatmul.mubr.f32.gmra.mrb[94].mxu1 %v9219_v41  ;;  %6413 = vmatprep.subr.bf16.mxu1 %v6373_v61  ;;  %v13781_v61 = vld [vmem:[#allocation55_spill] sm:$0xff]  ;;  %v13785_v2 = vld [vmem:[#allocation57_spill] sm:$0xff] }
 0x312   : > { %v9222_v46 = vadd.f32 %v1903_v39, %v1390_v1  ;;  %v1905_v3 = vpop.f32.mrb[53].mxu0  ;;  %3121 = vmatmul.mubr.f32.gmra.mrb[94].mxu0 %v7345_v58  ;;  %2612 = vmatprep.mubr.f32.mxu1 %v9226_v36  ;;  %v1396_v41 = vadd.f32 %v13781_v61, %v8724_v53  ;;  %v13782_v1 = vld [vmem:[#allocation56_spill] sm:$0xff]  ;;  %v9237_v58 = vld [vmem:[%s7961_s8 + $0x320] sm:$0xff] }
 0x313   : > { %v9229_v51 = vadd.f32 %v1905_v3, %v1392_v0  ;;  %3126 = vmatprep.mubr.f32.mxu0 %v7347_v48  ;;  %v1398_v39 = vadd.f32 %v13782_v1, %v8728_v47  ;;  %v1055_v0 = vld [vmem:[#allocation5 + $0xf80] sm:$0xff] }
 0x314   : > { %13779 = vst [vmem:[#allocation53_spill] sm:$0xff] %v9222_v46  ;;  %v13786_v61 = vld [vmem:[#allocation58_spill] sm:$0xff] }
 0x315   : > { %13780 = vst [vmem:[#allocation54_spill] sm:$0xff] %v9229_v51  ;;  %v1909_v46 = vpop.f32.mrb[54].mxu0  ;;  %2613 = vmatmul.mubr.f32.gmra.mrb[96].mxu1 %v9237_v58  ;;  %v1404_v1 = vadd.f32 %v13786_v61, %v8728_v47  ;;  %v6379_v61 = vpack.c.bf16 %v1061_v62, %v1055_v0  ;;  %v7357_v0 = vld [vmem:[%s7961_s8 + $0x370] sm:$0xff]  ;;  %v9282_v62 = vld [vmem:[%s7961_s8 + $0x3b8] sm:$0xff] }
 0x316   : > { %v9240_v5 = vadd.f32 %v1909_v46, %v1396_v41  ;;  %v1911_v3 = vpop.f32.mrb[55].mxu0  ;;  %3127 = vmatmul.mubr.f32.gmra.mrb[96].mxu0 %v7349_v12  ;;  %6429 = vmatpush1.bf16.xpose.msra.mxu1 %v6375_v22  ;;  %v1402_v46 = vadd.f32 %v13785_v2, %v8724_v53  ;;  %v7351_v41 = vld [vmem:[%s7961_s8 + $0x348] sm:$0xff]  ;;  %v1074_v12 = vld [vmem:[#allocation5 + $0x1018] sm:$0xff]  ;;  %v7353_v2 = vld [vmem:[%s7961_s8 + $0x340] sm:$0xff] }
 0x317   : > { %v9243_v48 = vadd.f32 %v1911_v3, %v1398_v39  ;;  %6376 = vmatpush1.bf16.xpose.msra.mxu0 %v6375_v22  ;;  %2618 = vmatprep.mubr.f32.mxu1 %v9246_v19  ;;  %v9255_v22 = vld [vmem:[%s7961_s8 + $0x350] sm:$0xff]  ;;  %v1068_v3 = vld [vmem:[#allocation5 + $0xfe8] sm:$0xff] }
 0x318   : > { %13783 = vst [vmem:[#allocation55_spill] sm:$0xff] %v9240_v5  ;;  %3132 = vmatprep.mubr.f32.mxu0 %v7351_v41  ;;  %6378 = vmatprep.subr.bf16.mxu0 %v6377_v40  ;;  %v9262_v41 = vld [vmem:[%s7961_s8 + $0x388] sm:$0xff]  ;;  %v6381_v35 = vpack.c.bf16 %v1074_v12, %v1068_v3  ;;  %v1073_v3 = vld [vmem:[#allocation5 + $0x1010] sm:$0xff] }
 0x319   : > { %13784 = vst [vmem:[#allocation56_spill] sm:$0xff] %v9243_v48  ;;  %v1915_v39 = vpop.f32.mrb[56].mxu0  ;;  %2619 = vmatmul.mubr.f32.gmra.mrb[98].mxu1 %v9255_v22  ;;  %6414 = vmatprep.subr.bf16.mxu1 %v6377_v40  ;;  %v13789_v40 = vld [vmem:[#allocation60_spill] sm:$0xff] }
 0x31a   : > { %v9258_v48 = vadd.f32 %v1915_v39, %v1402_v46  ;;  %v1917_v5 = vpop.f32.mrb[57].mxu0  ;;  %3133 = vmatmul.mubr.f32.gmra.mrb[98].mxu0 %v7353_v2  ;;  %2624 = vmatprep.mubr.f32.mxu1 %v9262_v41  ;;  %v1408_v15 = vadd.f32 %v13789_v40, %v8724_v53  ;;  %v13790_v46 = vld [vmem:[#allocation61_spill] sm:$0xff]  ;;  %v13793_v12 = vld [vmem:[#allocation64_spill] sm:$0xff] }
 0x31b   : > { %v9265_v51 = vadd.f32 %v1917_v5, %v1404_v1  ;;  %3138 = vmatprep.mubr.f32.mxu0 %v7355_v33  ;;  %v1410_v39 = vadd.f32 %v13790_v46, %v8728_v47  ;;  %v9273_v2 = vld [vmem:[%s7961_s8 + $0x380] sm:$0xff] }
 0x31c   : > { %13787 = vst [vmem:[#allocation57_spill] sm:$0xff] %v9258_v48  ;;  %v1067_v1 = vld [vmem:[#allocation5 + $0xfe0] sm:$0xff] }
 0x31d   : > { %13788 = vst [vmem:[#allocation58_spill] sm:$0xff] %v9265_v51  ;;  %v1921_v48 = vpop.f32.mrb[58].mxu0  ;;  %2625 = vmatmul.mubr.f32.gmra.mrb[100].mxu1 %v9273_v2  ;;  %v13794_v40 = vld [vmem:[#allocation65_spill] sm:$0xff] }
 0x31e   : > { %v9276_v10 = vadd.f32 %v1921_v48, %v1408_v15  ;;  %v1923_v5 = vpop.f32.mrb[59].mxu0  ;;  %3139 = vmatmul.mubr.f32.gmra.mrb[100].mxu0 %v7357_v0  ;;  %6430 = vmatpush1.bf16.xpose.msra.mxu1 %v6379_v61  ;;  %v1414_v15 = vadd.f32 %v13793_v12, %v8724_v53  ;;  %v7359_v48 = vld [vmem:[%s7961_s8 + $0x3a8] sm:$0xff]  ;;  %v1416_v46 = vadd.f32 %v13794_v40, %v8728_v47  ;;  %v1086_v0 = vld [vmem:[#allocation5 + $0x1078] sm:$0xff]  ;;  %v7361_v53 = vld [vmem:[%s7961_s8 + $0x3a0] sm:$0xff] }
 0x31f   : > { %v9279_v33 = vadd.f32 %v1923_v5, %v1410_v39  ;;  %6380 = vmatpush1.bf16.xpose.msra.mxu0 %v6379_v61  ;;  %2630 = vmatprep.mubr.f32.mxu1 %v9282_v62  ;;  %v9291_v61 = vld [vmem:[%s7961_s8 + $0x3b0] sm:$0xff]  ;;  %v1080_v5 = vld [vmem:[#allocation5 + $0x1048] sm:$0xff]  ;;  %v6383_v47 = vpack.c.bf16 %v1073_v3, %v1067_v1  ;;  %v7363_v40 = vld [vmem:[%s7961_s8 + $0x3d8] sm:$0xff] }
 0x320   : > { %13791 = vst [vmem:[#allocation60_spill] sm:$0xff] %v9276_v10  ;;  %3144 = vmatprep.mubr.f32.mxu0 %v7359_v48  ;;  %6382 = vmatprep.subr.bf16.mxu0 %v6381_v35  ;;  %v9298_v12 = vld [vmem:[%s7961_s8 + $0x3e8] sm:$0xff]  ;;  %v6385_v51 = vpack.c.bf16 %v1086_v0, %v1080_v5  ;;  %v9316_v3 = vld [vmem:[%s7961_s8 + $0x418] sm:$0xff]  ;;  %v1085_v5 = vld [vmem:[#allocation5 + $0x1070] sm:$0xff] }
 0x321   : > { %13792 = vst [vmem:[#allocation61_spill] sm:$0xff] %v9279_v33  ;;  %v1927_v39 = vpop.f32.mrb[60].mxu0  ;;  %2631 = vmatmul.mubr.f32.gmra.mrb[102].mxu1 %v9291_v61  ;;  %6415 = vmatprep.subr.bf16.mxu1 %v6381_v35  ;;  %v13797_v1 = vld [vmem:[#allocation67_spill] sm:$0xff]  ;;  %v13799_v0 = vld [vmem:[#allocation68_spill] sm:$0xff] }
 0x322   : > { %v9294_v33 = vadd.f32 %v1927_v39, %v1414_v15  ;;  %v1929_v10 = vpop.f32.mrb[61].mxu0  ;;  %3145 = vmatmul.mubr.f32.gmra.mrb[102].mxu0 %v7361_v53  ;;  %2636 = vmatprep.mubr.f32.mxu1 %v9298_v12  ;;  %v13796_v53 = vld [vmem:[#allocation66_spill] sm:$0xff] }
 0x323   : > { %v9301_v48 = vadd.f32 %v1929_v10, %v1416_v46  ;;  %3150 = vmatprep.mubr.f32.mxu0 %v7363_v40  ;;  %v1079_v46 = vld [vmem:[#allocation5 + $0x1040] sm:$0xff]  ;;  %v1092_v40 = vld [vmem:[#allocation5 + $0x10a8] sm:$0xff] }
 0x325   : > { %v1933_v35 = vpop.f32.mrb[62].mxu0  ;;  %2637 = vmatmul.mubr.f32.gmra.mrb[104].mxu1 %v9305_v16 }
 0x326   : > { %v9309_v15 = vadd.f32 %v1933_v35, %v8735_v59  ;;  %v1935_v39 = vpop.f32.mrb[63].mxu0  ;;  %3151 = vmatmul.mubr.f32.gmra.mrb[104].mxu0 %v13796_v53  ;;  %6431 = vmatpush1.bf16.xpose.msra.mxu1 %v6383_v47  ;;  %v9321_v59 = vld [vmem:[%s7961_s8 + $0x410] sm:$0xff]  ;;  %v1098_v35 = vld [vmem:[#allocation5 + $0x10d8] sm:$0xff]  ;;  %v6387_v53 = vpack.c.bf16 %v1085_v5, %v1079_v46  ;;  %v1104_v5 = vld [vmem:[#allocation5 + $0x1108] sm:$0xff] }
 0x327   : > { %v9313_v10 = vadd.f32 %v1935_v39, %v13797_v1  ;;  %6384 = vmatpush1.bf16.xpose.msra.mxu0 %v6383_v47  ;;  %2642 = vmatprep.mubr.f32.mxu1 %v9316_v3  ;;  %v13800_v39 = vld [vmem:[#allocation69_spill] sm:$0xff]  ;;  %v9326_v47 = vld [vmem:[%s7961_s8 + $0x448] sm:$0xff]  ;;  %v9341_v46 = vld [vmem:[%s7961_s8 + $0x470] sm:$0xff] }
 0x328   : > { %13795 = vst [vmem:[#allocation64_spill] sm:$0xff] %v9309_v15  ;;  %3156 = vmatprep.mubr.f32.mxu0 %v13799_v0  ;;  %6386 = vmatprep.subr.bf16.mxu0 %v6385_v51  ;;  %v13801_v1 = vld [vmem:[#allocation71_spill] sm:$0xff]  ;;  %v6389_v0 = vpack.c.bf16 %v1098_v35, %v1092_v40 }
 0x329   : > { %13798 = vst [vmem:[#allocation65_spill] sm:$0xff] %v9313_v10  ;;  %2643 = vmatmul.mubr.f32.gmra.mrb[106].mxu1 %v9321_v59  ;;  %6416 = vmatprep.subr.bf16.mxu1 %v6385_v51  ;;  %v9331_v10 = vld [vmem:[%s7961_s8 + $0x440] sm:$0xff]  ;;  %v9336_v51 = vld [vmem:[%s7961_s8 + $0x478] sm:$0xff]  ;;  %v1097_v15 = vld [vmem:[#allocation5 + $0x10d0] sm:$0xff] }
 0x32a   : > { %3157 = vmatmul.mubr.f32.gmra.mrb[106].mxu0 %v13800_v39  ;;  %2648 = vmatprep.mubr.f32.mxu1 %v9326_v47  ;;  %v1091_v39 = vld [vmem:[#allocation5 + $0x10a0] sm:$0xff]  ;;  %v9346_v40 = vld [vmem:[%s7961_s8 + $0x4a8] sm:$0xff] }
 0x32b   : > { %3162 = vmatprep.mubr.f32.mxu0 %v13801_v1  ;;  %v6391_v35 = vpack.c.bf16 %v1097_v15, %v1091_v39  ;;  %v9356_v1 = vld [vmem:[%s7961_s8 + $0x4d8] sm:$0xff]  ;;  %v1116_v15 = vld [vmem:[#allocation5 + $0x1168] sm:$0xff] }
 0x32c   : > { %v9366_v39 = vld [vmem:[%s7961_s8 + $0x508] sm:$0xff] }
 0x32d   : > { %2649 = vmatmul.mubr.f32.gmra.mrb[108].mxu1 %v9331_v10 }
 0x32e   : > { %3163 = vmatmul.mubr.f32.gmra.mrb[108].mxu0 %v8769_v43  ;;  %6432 = vmatpush1.bf16.xpose.msra.mxu1 %v6387_v53  ;;  %v1110_v43 = vld [vmem:[#allocation5 + $0x1138] sm:$0xff] }
 0x32f   : > { %6388 = vmatpush1.bf16.xpose.msra.mxu0 %v6387_v53  ;;  %2654 = vmatprep.mubr.f32.mxu1 %v9336_v51  ;;  %v9351_v53 = vld [vmem:[%s7961_s8 + $0x4a0] sm:$0xff] }
 0x330   : > { %3168 = vmatprep.mubr.f32.mxu0 %v8778_v57  ;;  %6390 = vmatprep.subr.bf16.mxu0 %v6389_v0  ;;  %v6393_v57 = vpack.c.bf16 %v1110_v43, %v1104_v5  ;;  %v9371_v43 = vld [vmem:[%s7961_s8 + $0x500] sm:$0xff] }
 0x331   : > { %2655 = vmatmul.mubr.f32.gmra.mrb[110].mxu1 %v9341_v46  ;;  %6417 = vmatprep.subr.bf16.mxu1 %v6389_v0  ;;  %v1109_v0 = vld [vmem:[#allocation5 + $0x1130] sm:$0xff] }
 0x332   : > { %3169 = vmatmul.mubr.f32.gmra.mrb[110].mxu0 %v8787_v56  ;;  %2660 = vmatprep.mubr.f32.mxu1 %v9346_v40  ;;  %v1103_v56 = vld [vmem:[#allocation5 + $0x1100] sm:$0xff] }
 0x333   : > { %3174 = vmatprep.mubr.f32.mxu0 %v8794_v26  ;;  %v9361_v26 = vld [vmem:[%s7961_s8 + $0x4d0] sm:$0xff]  ;;  %v6395_v5 = vpack.c.bf16 %v1109_v0, %v1103_v56  ;;  %v1128_v56 = vld [vmem:[#allocation5 + $0x11c8] sm:$0xff] }
 0x334   : > { %v9386_v0 = vld [vmem:[%s7961_s8 + $0x568] sm:$0xff] }
 0x335   : > { %2661 = vmatmul.mubr.f32.gmra.mrb[112].mxu1 %v9351_v53 }
 0x336   : > { %3175 = vmatmul.mubr.f32.gmra.mrb[112].mxu0 %v8805_v60  ;;  %6433 = vmatpush1.bf16.xpose.msra.mxu1 %v6391_v35  ;;  %v1122_v60 = vld [vmem:[#allocation5 + $0x1198] sm:$0xff] }
 0x337   : > { %6392 = vmatpush1.bf16.xpose.msra.mxu0 %v6391_v35  ;;  %2666 = vmatprep.mubr.f32.mxu1 %v9356_v1  ;;  %v9376_v35 = vld [vmem:[%s7961_s8 + $0x538] sm:$0xff] }
 0x338   : > { %3180 = vmatprep.mubr.f32.mxu0 %v8814_v27  ;;  %6394 = vmatprep.subr.bf16.mxu0 %v6393_v57  ;;  %v6397_v27 = vpack.c.bf16 %v1122_v60, %v1116_v15  ;;  %v9391_v60 = vld [vmem:[%s7961_s8 + $0x560] sm:$0xff] }
 0x339   : > { %2667 = vmatmul.mubr.f32.gmra.mrb[114].mxu1 %v9361_v26  ;;  %6418 = vmatprep.subr.bf16.mxu1 %v6393_v57  ;;  %v1121_v57 = vld [vmem:[#allocation5 + $0x1190] sm:$0xff] }
 0x33a   : > { %3181 = vmatmul.mubr.f32.gmra.mrb[114].mxu0 %v8823_v37  ;;  %2672 = vmatprep.mubr.f32.mxu1 %v9366_v39  ;;  %v1115_v37 = vld [vmem:[#allocation5 + $0x1160] sm:$0xff] }
 0x33b   : > { %3186 = vmatprep.mubr.f32.mxu0 %v8830_v44  ;;  %v9381_v44 = vld [vmem:[%s7961_s8 + $0x530] sm:$0xff]  ;;  %v6399_v15 = vpack.c.bf16 %v1121_v57, %v1115_v37  ;;  %v9411_v57 = vld [vmem:[%s7961_s8 + $0x5c0] sm:$0xff] }
 0x33d   : > { %2673 = vmatmul.mubr.f32.gmra.mrb[116].mxu1 %v9371_v43 }
 0x33e   : > { %3187 = vmatmul.mubr.f32.gmra.mrb[116].mxu0 %v8841_v13  ;;  %6434 = vmatpush1.bf16.xpose.msra.mxu1 %v6395_v5  ;;  %v1134_v13 = vld [vmem:[#allocation5 + $0x11f8] sm:$0xff] }
 0x33f   : > { %6396 = vmatpush1.bf16.xpose.msra.mxu0 %v6395_v5  ;;  %2678 = vmatprep.mubr.f32.mxu1 %v9376_v35  ;;  %v1127_v5 = vld [vmem:[#allocation5 + $0x11c0] sm:$0xff] }
 0x340   : > { %3192 = vmatprep.mubr.f32.mxu0 %v8850_v24  ;;  %6398 = vmatprep.subr.bf16.mxu0 %v6397_v27  ;;  %v6401_v24 = vpack.c.bf16 %v1134_v13, %v1128_v56  ;;  %v3493_v13 = vld [vmem:[%s7973_s30 + $0x68] sm:$0xff] }
 0x341   : > { %2679 = vmatmul.mubr.f32.gmra.mrb[118].mxu1 %v9381_v44  ;;  %6419 = vmatprep.subr.bf16.mxu1 %v6397_v27  ;;  %v1133_v27 = vld [vmem:[#allocation5 + $0x11f0] sm:$0xff] }
 0x342   : > { %3193 = vmatmul.mubr.f32.gmra.mrb[118].mxu0 %v8859_v52  ;;  %2684 = vmatprep.mubr.f32.mxu1 %v9386_v0  ;;  %v9396_v52 = vld [vmem:[%s7961_s8 + $0x598] sm:$0xff]  ;;  %v6403_v37 = vpack.c.bf16 %v1133_v27, %v1127_v5  ;;  %v3516_v27 = vld [vmem:[%s7973_s30 + $0x120] sm:$0xff] }
 0x343   : > { %3198 = vmatprep.mubr.f32.mxu0 %v8866_v55  ;;  %v9401_v55 = vld [vmem:[%s7961_s8 + $0x590] sm:$0xff]  ;;  %v3511_v5 = vld [vmem:[%s7973_s30 + $0xf8] sm:$0xff] }
 0x345   : > { %2685 = vmatmul.mubr.f32.gmra.mrb[120].mxu1 %v9391_v60 }
 0x346   : > { %3199 = vmatmul.mubr.f32.gmra.mrb[120].mxu0 %v8877_v63  ;;  %6435 = vmatpush1.bf16.xpose.msra.mxu1 %v6399_v15  ;;  %v9406_v63 = vld [vmem:[%s7961_s8 + $0x5c8] sm:$0xff] }
 0x347   : > { %6400 = vmatpush1.bf16.xpose.msra.mxu0 %v6399_v15  ;;  %2690 = vmatprep.mubr.f32.mxu1 %v9396_v52  ;;  %v3499_v15 = vld [vmem:[%s7973_s30 + $0x98] sm:$0xff] }
 0x348   : > { %3204 = vmatprep.mubr.f32.mxu0 %v8886_v14  ;;  %6402 = vmatprep.subr.bf16.mxu0 %v6401_v24  ;;  %v9416_v14 = vld [vmem:[%s7961_s8 + $0x5f8] sm:$0xff] }
 0x349   : > { %2691 = vmatmul.mubr.f32.gmra.mrb[122].mxu1 %v9401_v55  ;;  %6420 = vmatprep.subr.bf16.mxu1 %v6401_v24  ;;  %v3504_v24 = vld [vmem:[%s7973_s30 + $0xc0] sm:$0xff] }
 0x34a   : > { %3205 = vmatmul.mubr.f32.gmra.mrb[122].mxu0 %v8895_v28  ;;  %2696 = vmatprep.mubr.f32.mxu1 %v9406_v63  ;;  %v9421_v28 = vld [vmem:[%s7961_s8 + $0x5f0] sm:$0xff] }
 0x34b   : > { %3210 = vmatprep.mubr.f32.mxu0 %v8902_v25  ;;  %v13803_v25 = vld [vmem:[#allocation30_spill] sm:$0xff] }
 0x34d   : > { %2697 = vmatmul.mubr.f32.gmra.mrb[124].mxu1 %v9411_v57 }
 0x34e   : > { %3211 = vmatmul.mubr.f32.gmra.mrb[124].mxu0 %v8913_v4  ;;  %6436 = vmatpush1.bf16.xpose.msra.mxu1 %v6403_v37  ;;  %v13802_v4 = vld [vmem:[#allocation29_spill] sm:$0xff] }
 0x34f   : > { %6404 = vmatpush1.bf16.xpose.msra.mxu0 %v6403_v37  ;;  %2702 = vmatprep.mubr.f32.mxu1 %v9416_v14  ;;  %v13829_v37 = vld [vmem:[#allocation70_spill] sm:$0xff] }
 0x350   : > { %3216 = vmatprep.mubr.f32.mxu0 %v8922_v6  ;;  %v13804_v6 = vld [vmem:[#allocation33_spill] sm:$0xff] }
 0x351   : > { %2703 = vmatmul.mubr.f32.gmra.mrb[126].mxu1 %v9421_v28 }
 0x352   : > { %3217 = vmatmul.mubr.f32.gmra.mrb[126].mxu0 %v8931_v8  ;;  %3383 = vmatprep.mubr.f32.mxu1 %v9226_v36  ;;  %v13805_v8 = vld [vmem:[#allocation34_spill] sm:$0xff] }
 0x353   : > { %3287 = vmatprep.mubr.f32.mxu0 %v8938_v42  ;;  %v13807_v42 = vld [vmem:[#allocation38_spill] sm:$0xff] }
 0x355   : > { %3384 = vmatmul.mubr.f32.vlgmr.msra.gmra.mrb[128].mxu1 %v9237_v58 }
 0x356   : > { %3288 = vmatmul.mubr.f32.vlgmr.msra.gmra.mrb[64].mxu0 %v8949_v18  ;;  %3389 = vmatprep.mubr.f32.mxu1 %v9246_v19  ;;  %v13806_v18 = vld [vmem:[#allocation37_spill] sm:$0xff] }
 0x357   : > { %3293 = vmatprep.mubr.f32.mxu0 %v8958_v11  ;;  %v13808_v11 = vld [vmem:[#allocation41_spill] sm:$0xff] }
 0x359   : > { %3390 = vmatmul.mubr.f32.gmra.mrb[130].mxu1 %v9255_v22 }
 0x35a   : > { %3294 = vmatmul.mubr.f32.gmra.mrb[66].mxu0 %v8967_v54  ;;  %3395 = vmatprep.mubr.f32.mxu1 %v9262_v41  ;;  %v13809_v54 = vld [vmem:[#allocation42_spill] sm:$0xff] }
 0x35b   : > { %3299 = vmatprep.mubr.f32.mxu0 %v8974_v30  ;;  %v13811_v30 = vld [vmem:[#allocation46_spill] sm:$0xff] }
 0x35d   : > { %3396 = vmatmul.mubr.f32.gmra.mrb[132].mxu1 %v9273_v2 }
 0x35e   : > { %3300 = vmatmul.mubr.f32.gmra.mrb[68].mxu0 %v8985_v34  ;;  %3401 = vmatprep.mubr.f32.mxu1 %v9282_v62  ;;  %v13812_v34 = vld [vmem:[#allocation47_spill] sm:$0xff] }
 0x35f   : > { %3305 = vmatprep.mubr.f32.mxu0 %v8994_v21  ;;  %v13813_v21 = vld [vmem:[#allocation51_spill] sm:$0xff] }
 0x361   : > { %3402 = vmatmul.mubr.f32.gmra.mrb[134].mxu1 %v9291_v61 }
 0x362   : > { %3306 = vmatmul.mubr.f32.gmra.mrb[70].mxu0 %v9003_v50  ;;  %3407 = vmatprep.mubr.f32.mxu1 %v9298_v12  ;;  %v13814_v50 = vld [vmem:[#allocation52_spill] sm:$0xff] }
 0x363   : > { %3311 = vmatprep.mubr.f32.mxu0 %v9010_v45 }
 0x365   : > { %3408 = vmatmul.mubr.f32.gmra.mrb[136].mxu1 %v9305_v16 }
 0x366   : > { %3312 = vmatmul.mubr.f32.gmra.mrb[72].mxu0 %v9021_v49  ;;  %3413 = vmatprep.mubr.f32.mxu1 %v9316_v3 }
 0x367   : > { %3317 = vmatprep.mubr.f32.mxu0 %v9030_v17 }
 0x369   : > { %3414 = vmatmul.mubr.f32.gmra.mrb[138].mxu1 %v9321_v59 }
 0x36a   : > { %3318 = vmatmul.mubr.f32.gmra.mrb[74].mxu0 %v9039_v23  ;;  %3419 = vmatprep.mubr.f32.mxu1 %v9326_v47 }
 0x36b   : > { %3323 = vmatprep.mubr.f32.mxu0 %v9046_v31 }
 0x36d   : > { %3420 = vmatmul.mubr.f32.gmra.mrb[140].mxu1 %v9331_v10 }
 0x36e   : > { %3324 = vmatmul.mubr.f32.gmra.mrb[76].mxu0 %v9057_v32  ;;  %3425 = vmatprep.mubr.f32.mxu1 %v9336_v51 }
 0x36f   : > { %3329 = vmatprep.mubr.f32.mxu0 %v9066_v7 }
 0x371   : > { %3426 = vmatmul.mubr.f32.gmra.mrb[142].mxu1 %v9341_v46 }
 0x372   : > { %3330 = vmatmul.mubr.f32.gmra.mrb[78].mxu0 %v9075_v29  ;;  %3431 = vmatprep.mubr.f32.mxu1 %v9346_v40 }
 0x373   : > { %3335 = vmatprep.mubr.f32.mxu0 %v9082_v38 }
 0x375   : > { %3432 = vmatmul.mubr.f32.gmra.mrb[144].mxu1 %v9351_v53 }
 0x376   : > { %3336 = vmatmul.mubr.f32.gmra.mrb[80].mxu0 %v9093_v20  ;;  %3437 = vmatprep.mubr.f32.mxu1 %v9356_v1  ;;  %v13810_v20 = vld [vmem:[#allocation44_spill] sm:$0xff]  ;;  %v3480_v1 = vld [vmem:[%s7973_s30] sm:$0xff] }
 0x377   : > { %3341 = vmatprep.mubr.f32.mxu0 %v9102_v9 }
 0x379   : > { %3438 = vmatmul.mubr.f32.gmra.mrb[146].mxu1 %v9361_v26  ;;  %v3481_v26 = vld [vmem:[%s7973_s30 + $0x8] sm:$0xff] }
 0x37a   : > { %3342 = vmatmul.mubr.f32.gmra.mrb[82].mxu0 %v13802_v4  ;;  %3443 = vmatprep.mubr.f32.mxu1 %v9366_v39  ;;  %v3522_v4 = vld [vmem:[%s7973_s30 + $0x150] sm:$0xff] }
 0x37b   : > { %3347 = vmatprep.mubr.f32.mxu0 %v13803_v25  ;;  %v3523_v25 = vld [vmem:[%s7973_s30 + $0x158] sm:$0xff] }
 0x37d   : > { %3444 = vmatmul.mubr.f32.gmra.mrb[148].mxu1 %v9371_v43  ;;  %v3486_v43 = vld [vmem:[%s7973_s30 + $0x30] sm:$0xff] }
 0x37e   : > { %3348 = vmatmul.mubr.f32.gmra.mrb[84].mxu0 %v13804_v6  ;;  %3449 = vmatprep.mubr.f32.mxu1 %v9376_v35  ;;  %v3487_v35 = vld [vmem:[%s7973_s30 + $0x38] sm:$0xff]  ;;  %v3528_v6 = vld [vmem:[%s7973_s30 + $0x180] sm:$0xff] }
 0x37f   : > { %3353 = vmatprep.mubr.f32.mxu0 %v13805_v8 }
 0x381   : > { %3450 = vmatmul.mubr.f32.gmra.mrb[150].mxu1 %v9381_v44  ;;  %v3492_v44 = vld [vmem:[%s7973_s30 + $0x60] sm:$0xff] }
 0x382   : > { %3354 = vmatmul.mubr.f32.gmra.mrb[86].mxu0 %v13806_v18  ;;  %3455 = vmatprep.mubr.f32.mxu1 %v9386_v0  ;;  %v3498_v0 = vld [vmem:[%s7973_s30 + $0x90] sm:$0xff] }
 0x383   : > { %3359 = vmatprep.mubr.f32.mxu0 %v13807_v42  ;;  %v13834_v18 = vld [vmem:[#allocation73_spill] sm:$0xff] }
 0x384   : > { %v9577_v42 = vadd.f32 %v13834_v18, %v3486_v43  ;;  %v13844_v43 = vld [vmem:[#allocation78_spill] sm:$0xff] }
 0x385   : > { %3456 = vmatmul.mubr.f32.gmra.mrb[152].mxu1 %v9391_v60  ;;  %v3505_v60 = vld [vmem:[%s7973_s30 + $0xc8] sm:$0xff]  ;;  %v9595_v18 = vadd.f32 %v13844_v43, %v3499_v15 }
 0x386   : > { %3360 = vmatmul.mubr.f32.gmra.mrb[88].mxu0 %v13808_v11  ;;  %3461 = vmatprep.mubr.f32.mxu1 %v9396_v52  ;;  %v3510_v52 = vld [vmem:[%s7973_s30 + $0xf0] sm:$0xff]  ;;  %13835 = vst [vmem:[#allocation52_spill] sm:$0xff] %v9577_v42  ;;  %v13836_v11 = vld [vmem:[#allocation74_spill] sm:$0xff] }
 0x387   : > { %3365 = vmatprep.mubr.f32.mxu0 %v13809_v54  ;;  %v9580_v54 = vadd.f32 %v13836_v11, %v3487_v35  ;;  %v13846_v35 = vld [vmem:[#allocation79_spill] sm:$0xff]  ;;  %v13856_v15 = vld [vmem:[#allocation84_spill] sm:$0xff] }
 0x388   : > { %v9598_v11 = vadd.f32 %v13846_v35, %v3504_v24  ;;  %v3547_v24 = vld [vmem:[%s7973_s30 + $0x218] sm:$0xff]  ;;  %v3552_v35 = vld [vmem:[%s7973_s30 + $0x240] sm:$0xff] }
 0x389   : > { %3462 = vmatmul.mubr.f32.gmra.mrb[154].mxu1 %v9401_v55  ;;  %v3517_v55 = vld [vmem:[%s7973_s30 + $0x128] sm:$0xff]  ;;  %13837 = vst [vmem:[#allocation70_spill] sm:$0xff] %v9580_v54 }
 0x38a   : > { %3366 = vmatmul.mubr.f32.gmra.mrb[90].mxu0 %v13810_v20  ;;  %3467 = vmatprep.mubr.f32.mxu1 %v9406_v63  ;;  %v13838_v20 = vld [vmem:[#allocation75_spill] sm:$0xff]  ;;  %v9616_v43 = vadd.f32 %v13856_v15, %v3517_v55 }
 0x38b   : > { %3371 = vmatprep.mubr.f32.mxu0 %v13811_v30  ;;  %v9583_v30 = vadd.f32 %v13838_v20, %v3492_v44  ;;  %13845 = vst [vmem:[#allocation75_spill] sm:$0xff] %v9595_v18  ;;  %v13848_v44 = vld [vmem:[#allocation80_spill] sm:$0xff] }
 0x38c   : > { %v9601_v20 = vadd.f32 %v13848_v44, %v3505_v60  ;;  %v13859_v44 = vld [vmem:[#allocation85_spill] sm:$0xff] }
 0x38d   : > { %3468 = vmatmul.mubr.f32.gmra.mrb[156].mxu1 %v9411_v57  ;;  %v9566_v57 = vadd.f32 %v13829_v37, %v3480_v1  ;;  %v3534_v1 = vld [vmem:[%s7973_s30 + $0x1b0] sm:$0xff] }
 0x38e   : > { %3372 = vmatmul.mubr.f32.gmra.mrb[92].mxu0 %v13812_v34  ;;  %3473 = vmatprep.mubr.f32.mxu1 %v9416_v14  ;;  %v13831_v14 = vld [vmem:[#allocation72_spill] sm:$0xff]  ;;  %v13842_v37 = vld [vmem:[#allocation77_spill] sm:$0xff] }
 0x38f   : > { %3377 = vmatprep.mubr.f32.mxu0 %v13813_v21  ;;  %13830 = vst [vmem:[#allocation46_spill] sm:$0xff] %v9566_v57  ;;  %13839 = vst [vmem:[#allocation72_spill] sm:$0xff] %v9583_v30  ;;  %v13840_v34 = vld [vmem:[#allocation76_spill] sm:$0xff] }
 0x390   : > { %v9586_v21 = vadd.f32 %v13840_v34, %v3493_v13  ;;  %13847 = vst [vmem:[#allocation76_spill] sm:$0xff] %v9598_v11  ;;  %13849 = vst [vmem:[#allocation77_spill] sm:$0xff] %v9601_v20  ;;  %v3541_v13 = vld [vmem:[%s7973_s30 + $0x1e8] sm:$0xff]  ;;  %v3546_v34 = vld [vmem:[%s7973_s30 + $0x210] sm:$0xff] }
 0x391   : > { %3474 = vmatmul.mubr.f32.gmra.mrb[158].mxu1 %v9421_v28  ;;  %v9569_v28 = vadd.f32 %v13831_v14, %v3481_v26  ;;  %v3535_v26 = vld [vmem:[%s7973_s30 + $0x1b8] sm:$0xff]  ;;  %v9592_v14 = vadd.f32 %v13842_v37, %v3498_v0  ;;  %v13854_v0 = vld [vmem:[#allocation83_spill] sm:$0xff] }
 0x392   : > { %3378 = vmatmul.mubr.f32.gmra.mrb[94].mxu0 %v13814_v50  ;;  %13841 = vst [vmem:[#allocation73_spill] sm:$0xff] %v9586_v21  ;;  %v3529_v50 = vld [vmem:[%s7973_s30 + $0x188] sm:$0xff]  ;;  %v9613_v37 = vadd.f32 %v13854_v0, %v3516_v27 }
 0x393   : > { %13832 = vst [vmem:[#allocation47_spill] sm:$0xff] %v9569_v28  ;;  %13843 = vst [vmem:[#allocation74_spill] sm:$0xff] %v9592_v14  ;;  %v13865_v27 = vld [vmem:[#allocation88_spill] sm:$0xff] }
 0x394   : > { %13855 = vst [vmem:[#allocation80_spill] sm:$0xff] %v9613_v37  ;;  %v9633_v55 = vadd.f32 %v13865_v27, %v3529_v50  ;;  %v13878_v27 = vld [vmem:[#allocation93_spill] sm:$0xff] }
 0x3a8   : > { %v9489_v32 = vpop.f32.mrb[64].mxu1 }
 0x3a9   : > { %v9491_v45 = vpop.f32.mrb[65].mxu1 }
 0x3ac   : > { %v9493_v49 = vpop.f32.mrb[66].mxu1 }
 0x3ad   : > { %v9495_v17 = vpop.f32.mrb[67].mxu1 }
 0x3b0   : > { %v9497_v23 = vpop.f32.mrb[68].mxu1 }
 0x3b1   : > { %v9499_v31 = vpop.f32.mrb[69].mxu1 }
 0x3b4   : > { %v9501_v7 = vpop.f32.mrb[70].mxu1 }
 0x3b5   : > { %v9503_v29 = vpop.f32.mrb[71].mxu1 }
 0x3b8   : > { %v9505_v38 = vpop.f32.mrb[72].mxu1 }
 0x3b9   : > { %v9507_v9 = vpop.f32.mrb[73].mxu1 }
 0x3bc   : > { %v9509_v16 = vpop.f32.mrb[74].mxu1 }
 0x3bd   : > { %v9511_v36 = vpop.f32.mrb[75].mxu1 }
 0x3c0   : > { %v9513_v58 = vpop.f32.mrb[76].mxu1 }
 0x3c1   : > { %v9515_v19 = vpop.f32.mrb[77].mxu1 }
 0x3c4   : > { %v9517_v22 = vpop.f32.mrb[78].mxu1 }
 0x3c5   : > { %v9519_v41 = vpop.f32.mrb[79].mxu1 }
 0x3c6   : > { %13815 = vst [vmem:[#allocation66_spill] sm:$0xff] %v9519_v41 }
 0x3c8   : > { %v9521_v2 = vpop.f32.mrb[80].mxu1 }
 0x3c9   : > { %v9523_v62 = vpop.f32.mrb[81].mxu1 }
 0x3ca   : > { %13816 = vst [vmem:[#allocation67_spill] sm:$0xff] %v9523_v62  ;;  %v3625_v62 = vld [vmem:[%s7973_s30 + $0x488] sm:$0xff] }
 0x3cc   : > { %v9525_v61 = vpop.f32.mrb[82].mxu1 }
 0x3cd   : > { %v9527_v12 = vpop.f32.mrb[83].mxu1 }
 0x3ce   : > { %13817 = vst [vmem:[#allocation68_spill] sm:$0xff] %v9527_v12 }
 0x3d0   : > { %v9529_v10 = vpop.f32.mrb[84].mxu1 }
 0x3d1   : > { %13818 = vst [vmem:[#allocation69_spill] sm:$0xff] %v9529_v10  ;;  %v9531_v3 = vpop.f32.mrb[85].mxu1 }
 0x3d2   : > { %13819 = vst [vmem:[#allocation71_spill] sm:$0xff] %v9531_v3 }
 0x3d4   : > { %v9533_v59 = vpop.f32.mrb[86].mxu1 }
 0x3d5   : > { %13820 = vst [vmem:[#allocation29_spill] sm:$0xff] %v9533_v59  ;;  %v9535_v47 = vpop.f32.mrb[87].mxu1  ;;  %v13936_v59 = vld [vmem:[#allocation36_spill] sm:$0xff] }
 0x3d6   : > { %13821 = vst [vmem:[#allocation30_spill] sm:$0xff] %v9535_v47  ;;  %v3553_v47 = vld [vmem:[%s7973_s30 + $0x248] sm:$0xff] }
 0x3d8   : > { %v9537_v51 = vpop.f32.mrb[88].mxu1 }
 0x3d9   : > { %13822 = vst [vmem:[#allocation33_spill] sm:$0xff] %v9537_v51  ;;  %v9539_v46 = vpop.f32.mrb[89].mxu1 }
 0x3da   : > { %13823 = vst [vmem:[#allocation34_spill] sm:$0xff] %v9539_v46 }
 0x3dc   : > { %v9541_v40 = vpop.f32.mrb[90].mxu1 }
 0x3dd   : > { %13824 = vst [vmem:[#allocation37_spill] sm:$0xff] %v9541_v40  ;;  %v9543_v53 = vpop.f32.mrb[91].mxu1 }
 0x3de   : > { %13825 = vst [vmem:[#allocation38_spill] sm:$0xff] %v9543_v53  ;;  %v13852_v53 = vld [vmem:[#allocation82_spill] sm:$0xff] }
 0x3df   : > { %v9610_v46 = vadd.f32 %v13852_v53, %v3511_v5  ;;  %v13863_v53 = vld [vmem:[#allocation87_spill] sm:$0xff] }
 0x3e0   : > { %v9547_v39 = vpop.f32.mrb[92].mxu1  ;;  %v9630_v5 = vadd.f32 %v13863_v53, %v3528_v6  ;;  %v13875_v6 = vld [vmem:[#allocation92_spill] sm:$0xff] }
 0x3e1   : > { %13826 = vst [vmem:[#allocation41_spill] sm:$0xff] %v9547_v39  ;;  %v9552_v56 = vpop.f32.mrb[93].mxu1  ;;  %13853 = vst [vmem:[#allocation79_spill] sm:$0xff] %v9610_v46  ;;  %v9624_v39 = vadd.f32 %v13859_v44, %v3522_v4  ;;  %v13871_v44 = vld [vmem:[#allocation90_spill] sm:$0xff]  ;;  %v9649_v53 = vadd.f32 %v13875_v6, %v3541_v13  ;;  %v9670_v6 = vadd.f32 %v9569_v28, %v9566_v57  ;;  %v3577_v28 = vld [vmem:[%s7973_s30 + $0x308] sm:$0xff] }
 0x3e2   : > { %13827 = vst [vmem:[#allocation42_spill] sm:$0xff] %v9552_v56  ;;  %13864 = vst [vmem:[#allocation85_spill] sm:$0xff] %v9630_v5  ;;  %v3559_v13 = vld [vmem:[%s7973_s30 + $0x278] sm:$0xff]  ;;  %v3582_v57 = vld [vmem:[%s7973_s30 + $0x330] sm:$0xff] }
 0x3e3   : > { %13860 = vst [vmem:[#allocation83_spill] sm:$0xff] %v9624_v39  ;;  %13876 = vst [vmem:[#allocation92_spill] sm:$0xff] %v9649_v53 }
 0x3e4   : > { %v9563_v63 = vpop.f32.mrb[94].mxu1 }
 0x3e5   : > { %13828 = vst [vmem:[#allocation44_spill] sm:$0xff] %v9563_v63  ;;  %v9574_v8 = vpop.f32.mrb[95].mxu1  ;;  %v13850_v63 = vld [vmem:[#allocation81_spill] sm:$0xff] }
 0x3e6   : > { %13833 = vst [vmem:[#allocation51_spill] sm:$0xff] %v9574_v8  ;;  %v3540_v8 = vld [vmem:[%s7973_s30 + $0x1e0] sm:$0xff]  ;;  %v9607_v56 = vadd.f32 %v13850_v63, %v3510_v52  ;;  %13857 = vst [vmem:[#allocation81_spill] sm:$0xff] %v9616_v43 }
 0x3e7   : > { %v13861_v52 = vld [vmem:[#allocation86_spill] sm:$0xff] }
 0x3e8   : > { %13851 = vst [vmem:[#allocation78_spill] sm:$0xff] %v9607_v56  ;;  %v9621_v60 = vpop.f32.mrb[96].mxu1  ;;  %v9627_v63 = vadd.f32 %v13861_v52, %v3523_v25  ;;  %13866 = vst [vmem:[#allocation86_spill] sm:$0xff] %v9633_v55  ;;  %v9643_v25 = vadd.f32 %v13871_v44, %v3535_v26  ;;  %v13873_v52 = vld [vmem:[#allocation91_spill] sm:$0xff]  ;;  %v13884_v26 = vld [vmem:[#allocation96_spill] sm:$0xff] }
 0x3e9   : > { %13858 = vst [vmem:[#allocation82_spill] sm:$0xff] %v9621_v60  ;;  %v9635_v0 = vpop.f32.mrb[96].mxu0  ;;  %v9637_v15 = vpop.f32.mrb[97].mxu1  ;;  %v13869_v60 = vld [vmem:[#allocation89_spill] sm:$0xff]  ;;  %v9646_v3 = vadd.f32 %v13873_v52, %v3540_v8  ;;  %v9663_v44 = vadd.f32 %v13884_v26, %v3553_v47  ;;  %v3564_v52 = vld [vmem:[%s7973_s30 + $0x2a0] sm:$0xff]  ;;  %v9683_v47 = vadd.f32 %v9586_v21, %v9583_v30  ;;  %v9691_v26 = vadd.f32 %v9601_v20, %v9598_v11  ;;  %v3589_v30 = vld [vmem:[%s7973_s30 + $0x368] sm:$0xff] }
 0x3ea   : > { %13862 = vst [vmem:[#allocation84_spill] sm:$0xff] %v9627_v63  ;;  %13867 = vst [vmem:[#allocation87_spill] sm:$0xff] %v9635_v0  ;;  %v9640_v4 = vadd.f32 %v13869_v60, %v3534_v1  ;;  %v9651_v50 = vpop.f32.mrb[97].mxu0  ;;  %v9654_v0 = vadd.f32 %v13878_v27, %v3546_v34  ;;  %v13882_v1 = vld [vmem:[#allocation95_spill] sm:$0xff]  ;;  %v3558_v8 = vld [vmem:[%s7973_s30 + $0x270] sm:$0xff]  ;;  %v9674_v34 = vadd.f32 %v9580_v54, %v9577_v42 }
 0x3eb   : > { %13868 = vst [vmem:[#allocation88_spill] sm:$0xff] %v9637_v15  ;;  %13872 = vst [vmem:[#allocation90_spill] sm:$0xff] %v9643_v25  ;;  %v13880_v15 = vld [vmem:[#allocation94_spill] sm:$0xff]  ;;  %v9660_v60 = vadd.f32 %v13882_v1, %v3552_v35  ;;  %v9687_v1 = vadd.f32 %v9595_v18, %v9592_v14  ;;  %v9695_v54 = vadd.f32 %v9610_v46, %v9607_v56 }
 0x3ec   : > { %13870 = vst [vmem:[#allocation89_spill] sm:$0xff] %v9640_v4  ;;  %13874 = vst [vmem:[#allocation91_spill] sm:$0xff] %v9646_v3  ;;  %v9657_v12 = vadd.f32 %v13880_v15, %v3547_v24  ;;  %v3565_v24 = vld [vmem:[%s7973_s30 + $0x2a8] sm:$0xff]  ;;  %v3570_v15 = vld [vmem:[%s7973_s30 + $0x2d0] sm:$0xff]  ;;  %v9679_v27 = vpop.f32.mrb[98].mxu1  ;;  %v9706_v18 = vadd.f32 %v9616_v43, %v9613_v37  ;;  %v9710_v20 = vadd.f32 %v9627_v63, %v9624_v39 }
 0x3ed   : > { %13877 = vst [vmem:[#allocation103_spill] sm:$0xff] %v9651_v50  ;;  %13879 = vst [vmem:[#allocation93_spill] sm:$0xff] %v9654_v0  ;;  %v3571_v35 = vld [vmem:[%s7973_s30 + $0x2d8] sm:$0xff]  ;;  %v3576_v42 = vld [vmem:[%s7973_s30 + $0x300] sm:$0xff]  ;;  %v9700_v50 = vpop.f32.mrb[98].mxu0  ;;  %v9702_v21 = vpop.f32.mrb[99].mxu1  ;;  %v9714_v46 = vadd.f32 %v9633_v55, %v9630_v5  ;;  %v9718_v56 = vadd.f32 %v9643_v25, %v9640_v4  ;;  %v9727_v63 = vadd.f32 %v9649_v53, %v9646_v3 }
 0x3ee   : > { %13881 = vst [vmem:[#allocation94_spill] sm:$0xff] %v9657_v12  ;;  %13883 = vst [vmem:[#allocation95_spill] sm:$0xff] %v9660_v60  ;;  %v3583_v11 = vld [vmem:[%s7973_s30 + $0x338] sm:$0xff]  ;;  %v3588_v14 = vld [vmem:[%s7973_s30 + $0x360] sm:$0xff]  ;;  %v9723_v43 = vpop.f32.mrb[99].mxu0  ;;  %v9731_v55 = vadd.f32 %v9657_v12, %v9654_v0  ;;  %v9735_v25 = vadd.f32 %v9663_v44, %v9660_v60 }
 0x3ef   : > { %13885 = vst [vmem:[#allocation96_spill] sm:$0xff] %v9663_v44  ;;  %13886 = vst [vmem:[#allocation104_spill] sm:$0xff] %v9679_v27  ;;  %v13896_v4 = vld [vmem:[#allocation97_spill] sm:$0xff]  ;;  %v13900_v3 = vld [vmem:[#allocation99_spill] sm:$0xff] }
 0x3f0   : > { %13887 = vst [vmem:[#allocation105_spill] sm:$0xff] %v9700_v50  ;;  %13888 = vst [vmem:[#allocation106_spill] sm:$0xff] %v9702_v21  ;;  %v9738_v5 = vadd.f32 %v13896_v4, %v3558_v8  ;;  %v3594_v39 = vld [vmem:[%s7973_s30 + $0x390] sm:$0xff]  ;;  %v3595_v37 = vld [vmem:[%s7973_s30 + $0x398] sm:$0xff]  ;;  %v9747_v21 = vadd.f32 %v13900_v3, %v3564_v52 }
 0x3f1   : > { %13889 = vst [vmem:[#allocation107_spill] sm:$0xff] %v9710_v20  ;;  %13890 = vst [vmem:[#allocation108_spill] sm:$0xff] %v9714_v46  ;;  %v13898_v50 = vld [vmem:[#allocation98_spill] sm:$0xff]  ;;  %v13902_v12 = vld [vmem:[#allocation100_spill] sm:$0xff]  ;;  %v9775_v46 = vpop.f32.mrb[100].mxu0 }
 0x3f2   : > { %13891 = vst [vmem:[#allocation109_spill] sm:$0xff] %v9718_v56  ;;  %13892 = vst [vmem:[#allocation110_spill] sm:$0xff] %v9723_v43  ;;  %v3600_v43 = vld [vmem:[%s7973_s30 + $0x3c0] sm:$0xff]  ;;  %v9744_v53 = vadd.f32 %v13898_v50, %v3559_v13  ;;  %v9750_v0 = vadd.f32 %v13902_v12, %v3565_v24  ;;  %v13904_v44 = vld [vmem:[#allocation101_spill] sm:$0xff]  ;;  %v9794_v51 = vpop.f32.mrb[101].mxu0 }
 0x3f3   : > { %13893 = vst [vmem:[#allocation111_spill] sm:$0xff] %v9727_v63  ;;  %13894 = vst [vmem:[#allocation112_spill] sm:$0xff] %v9731_v55  ;;  %v9753_v60 = vadd.f32 %v13904_v44, %v3570_v15  ;;  %v3601_v4 = vld [vmem:[%s7973_s30 + $0x3c8] sm:$0xff]  ;;  %v3606_v8 = vld [vmem:[%s7973_s30 + $0x3f0] sm:$0xff] }
 0x3f4   : > { %13895 = vst [vmem:[#allocation113_spill] sm:$0xff] %v9735_v25  ;;  %13897 = vst [vmem:[#allocation97_spill] sm:$0xff] %v9738_v5  ;;  %v3607_v27 = vld [vmem:[%s7973_s30 + $0x3f8] sm:$0xff]  ;;  %v9758_v25 = vpop.f32.mrb[100].mxu1  ;;  %v13911_v52 = vld [vmem:[#allocation20_spill] sm:$0xff] }
 0x3f5   : > { %13899 = vst [vmem:[#allocation98_spill] sm:$0xff] %v9744_v53  ;;  %13901 = vst [vmem:[#allocation99_spill] sm:$0xff] %v9747_v21  ;;  %v13907_v55 = vld [vmem:[#allocation102_spill] sm:$0xff]  ;;  %v13909_v13 = vld [vmem:[#allocation21_spill] sm:$0xff]  ;;  %v9767_v12 = vadd.f32 %v13911_v52, %v3577_v28  ;;  %v9777_v20 = vpop.f32.mrb[101].mxu1 }
 0x3f6   : > { %13903 = vst [vmem:[#allocation100_spill] sm:$0xff] %v9750_v0  ;;  %13905 = vst [vmem:[#allocation101_spill] sm:$0xff] %v9753_v60  ;;  %v9761_v50 = vadd.f32 %v13907_v55, %v3571_v35  ;;  %v9764_v3 = vadd.f32 %v13909_v13, %v3576_v42  ;;  %v13913_v24 = vld [vmem:[#allocation22_spill] sm:$0xff]  ;;  %v3613_v63 = vld [vmem:[%s7973_s30 + $0x428] sm:$0xff] }
 0x3f7   : > { %13906 = vst [vmem:[#allocation114_spill] sm:$0xff] %v9758_v25  ;;  %13912 = vst [vmem:[#allocation20_spill] sm:$0xff] %v9767_v12  ;;  %v9770_v44 = vadd.f32 %v13913_v24, %v3582_v57  ;;  %v3612_v15 = vld [vmem:[%s7973_s30 + $0x420] sm:$0xff]  ;;  %v3618_v56 = vld [vmem:[%s7973_s30 + $0x450] sm:$0xff] }
 0x3f8   : > { %13908 = vst [vmem:[#allocation102_spill] sm:$0xff] %v9761_v50  ;;  %13910 = vst [vmem:[#allocation21_spill] sm:$0xff] %v9764_v3  ;;  %v13917_v25 = vld [vmem:[#allocation23_spill] sm:$0xff]  ;;  %v13919_v55 = vld [vmem:[#allocation25_spill] sm:$0xff]  ;;  %v9812_v10 = vadd.f32 %v13936_v59, %v3612_v15 }
 0x3f9   : > { %13914 = vst [vmem:[#allocation22_spill] sm:$0xff] %v9770_v44  ;;  %13915 = vst [vmem:[#allocation115_spill] sm:$0xff] %v9775_v46  ;;  %v9780_v40 = vadd.f32 %v13917_v25, %v3583_v11  ;;  %v9783_v35 = vadd.f32 %v13919_v55, %v3588_v14  ;;  %v13921_v42 = vld [vmem:[#allocation24_spill] sm:$0xff]  ;;  %v13923_v28 = vld [vmem:[#allocation27_spill] sm:$0xff] }
 0x3fa   : > { %13916 = vst [vmem:[#allocation116_spill] sm:$0xff] %v9777_v20  ;;  %v9786_v13 = vadd.f32 %v13921_v42, %v3589_v30  ;;  %v9789_v52 = vadd.f32 %v13923_v28, %v3594_v39  ;;  %v3619_v57 = vld [vmem:[%s7973_s30 + $0x458] sm:$0xff]  ;;  %v3624_v24 = vld [vmem:[%s7973_s30 + $0x480] sm:$0xff]  ;;  %13925 = vst [vmem:[#allocation117_spill] sm:$0xff] %v9794_v51 }
 0x3fb   : > { %13918 = vst [vmem:[#allocation23_spill] sm:$0xff] %v9780_v40  ;;  %13920 = vst [vmem:[#allocation25_spill] sm:$0xff] %v9783_v35  ;;  %v13926_v46 = vld [vmem:[#allocation26_spill] sm:$0xff]  ;;  %v13928_v11 = vld [vmem:[#allocation28_spill] sm:$0xff] }
 0x3fc   : > { %13922 = vst [vmem:[#allocation24_spill] sm:$0xff] %v9786_v13  ;;  %13924 = vst [vmem:[#allocation27_spill] sm:$0xff] %v9789_v52  ;;  %v9797_v20 = vadd.f32 %v13926_v46, %v3595_v37  ;;  %v9800_v25 = vadd.f32 %v13928_v11, %v3600_v43  ;;  %v13930_v14 = vld [vmem:[#allocation31_spill] sm:$0xff]  ;;  %v13932_v30 = vld [vmem:[#allocation32_spill] sm:$0xff] }
 0x3fd   : > { %v9803_v55 = vadd.f32 %v13930_v14, %v3601_v4  ;;  %v9806_v42 = vadd.f32 %v13932_v30, %v3606_v8  ;;  %v13934_v39 = vld [vmem:[#allocation35_spill] sm:$0xff]  ;;  %13937 = vst [vmem:[#allocation36_spill] sm:$0xff] %v9812_v10  ;;  %v9820_v4 = vpop.f32.mrb[102].mxu1  ;;  %v13942_v11 = vld [vmem:[#allocation40_spill] sm:$0xff]  ;;  %v13946_v30 = vld [vmem:[#allocation45_spill] sm:$0xff] }
 0x3fe   : > { %13927 = vst [vmem:[#allocation26_spill] sm:$0xff] %v9797_v20  ;;  %13929 = vst [vmem:[#allocation28_spill] sm:$0xff] %v9800_v25  ;;  %v9809_v28 = vadd.f32 %v13934_v39, %v3607_v27  ;;  %v13938_v51 = vld [vmem:[#allocation39_spill] sm:$0xff]  ;;  %v9823_v8 = vadd.f32 %v13942_v11, %v3618_v56  ;;  %v9829_v39 = vadd.f32 %v13946_v30, %v3624_v24  ;;  %v13948_v59 = vld [vmem:[#allocation48_spill] sm:$0xff]  ;;  %v9837_v41 = vpop.f32.mrb[103].mxu1 }
 0x3ff   : > { %13931 = vst [vmem:[#allocation31_spill] sm:$0xff] %v9803_v55  ;;  %13933 = vst [vmem:[#allocation32_spill] sm:$0xff] %v9806_v42  ;;  %v9815_v46 = vadd.f32 %v13938_v51, %v3613_v63  ;;  %v13940_v37 = vld [vmem:[#allocation59_spill] sm:$0xff]  ;;  %v9832_v15 = vadd.f32 %v13948_v59, %v3625_v62  ;;  %v3630_v51 = vld [vmem:[%s7973_s30 + $0x4b0] sm:$0xff]  ;;  %v9835_v63 = vpop.f32.mrb[102].mxu0  ;;  %v9841_v56 = vadd.f32 %v9744_v53, %v9738_v5 }
 0x400   : > { %13935 = vst [vmem:[#allocation35_spill] sm:$0xff] %v9809_v28  ;;  %v9818_v43 = vsub.s32 2, %v13940_v37  ;;  %13943 = vst [vmem:[#allocation40_spill] sm:$0xff] %v9823_v8  ;;  %v13944_v14 = vld [vmem:[#allocation43_spill] sm:$0xff]  ;;  %v9849_v62 = vadd.f32 %v9761_v50, %v9753_v60  ;;  %v9853_v24 = vadd.f32 %v9767_v12, %v9764_v3  ;;  %v3631_v11 = vld [vmem:[%s7973_s30 + $0x4b8] sm:$0xff]  ;;  %v9858_v59 = vpop.f32.mrb[103].mxu0  ;;  %v9870_v50 = vadd.f32 %v9797_v20, %v9789_v52 }
 0x401   : > { %13939 = vst [vmem:[#allocation39_spill] sm:$0xff] %v9815_v46  ;;  %v9826_v27 = vadd.f32 %v13944_v14, %v3619_v57  ;;  %13947 = vst [vmem:[#allocation45_spill] sm:$0xff] %v9829_v39  ;;  %v9845_v57 = vadd.f32 %v9750_v0, %v9747_v21  ;;  %v3636_v14 = vld [vmem:[%s7973_s30 + $0x4e0] sm:$0xff]  ;;  %v3637_v30 = vld [vmem:[%s7973_s30 + $0x4e8] sm:$0xff]  ;;  %v9862_v0 = vadd.f32 %v9780_v40, %v9770_v44 }
 0x402   : > { %13941 = vst [vmem:[#allocation59_spill] sm:$0xff] %v9818_v43  ;;  %13949 = vst [vmem:[#allocation48_spill] sm:$0xff] %v9832_v15  ;;  %v9866_v21 = vadd.f32 %v9786_v13, %v9783_v35  ;;  %v9874_v60 = vadd.f32 %v9803_v55, %v9800_v25  ;;  %v3642_v53 = vld [vmem:[%s7973_s30 + $0x510] sm:$0xff]  ;;  %v3643_v5 = vld [vmem:[%s7973_s30 + $0x518] sm:$0xff]  ;;  %v9881_v40 = vadd.f32 %v9809_v28, %v9806_v42  ;;  %v9897_v25 = vsub.s32 3, %v13940_v37  ;;  %v9899_v28 = vpop.f32.mrb[104].mxu1 }
 0x403   : > { %13945 = vst [vmem:[#allocation43_spill] sm:$0xff] %v9826_v27  ;;  %13950 = vst [vmem:[#allocation118_spill] sm:$0xff] %v9835_v63  ;;  %v3648_v12 = vld [vmem:[%s7973_s30 + $0x540] sm:$0xff]  ;;  %v9885_v13 = vadd.f32 %v9815_v46, %v9812_v10  ;;  %v3649_v35 = vld [vmem:[%s7973_s30 + $0x548] sm:$0xff]  ;;  %v9903_v46 = vadd.f32 %v9826_v27, %v9823_v8  ;;  %v9907_v10 = vadd.f32 %v9832_v15, %v9829_v39  ;;  %v9919_v63 = vpop.f32.mrb[105].mxu1 }
 0x404   : > { %13951 = vst [vmem:[#allocation119_spill] sm:$0xff] %v9858_v59  ;;  %13952 = vst [vmem:[#allocation120_spill] sm:$0xff] %v9866_v21  ;;  %v3654_v20 = vld [vmem:[%s7973_s30 + $0x570] sm:$0xff]  ;;  %v3655_v52 = vld [vmem:[%s7973_s30 + $0x578] sm:$0xff]  ;;  %v9917_v59 = vpop.f32.mrb[104].mxu0 }
 0x405   : > { %13953 = vst [vmem:[#allocation121_spill] sm:$0xff] %v9870_v50  ;;  %13954 = vst [vmem:[#allocation122_spill] sm:$0xff] %v9874_v60  ;;  %v9890_v44 = vld [vmem:[#allocation7] sm:$0x3f]  ;;  %v3661_v60 = vld [vmem:[%s7973_s30 + $0x5a8] sm:$0xff] }
 0x406   : > { %13955 = vst [vmem:[#allocation123_spill] sm:$0xff] %v9881_v40  ;;  %13956 = vst [vmem:[#allocation124_spill] sm:$0xff] %v9885_v13  ;;  %v9894_v55 = vrot.slane %v9890_v44, %v9818_v43  ;;  %v13960_v42 = vld [vmem:[#allocation49_spill] sm:$0xff]  ;;  %v13962_v13 = vld [vmem:[#allocation50_spill] sm:$0xff] }
 0x407   : > { %13957 = vst [vmem:[#allocation125_spill] sm:$0xff] %v9897_v25  ;;  %13958 = vst [vmem:[#allocation126_spill] sm:$0xff] %v9903_v46  ;;  %v9910_v3 = vadd.f32 %v13960_v42, %v3630_v51  ;;  %v9913_v43 = vadd.f32 %v13962_v13, %v3631_v11  ;;  %v3660_v40 = vld [vmem:[%s7973_s30 + $0x5a0] sm:$0xff]  ;;  %v13966_v50 = vld [vmem:[#allocation53_spill] sm:$0xff] }
 0x408   : > { %13959 = vst [vmem:[#allocation127_spill] sm:$0xff] %v9907_v10  ;;  %13964 = vst [vmem:[#allocation128_spill] sm:$0xff] %v9917_v59  ;;  %v9922_v21 = vadd.f32 %v13966_v50, %v3636_v14  ;;  %v13968_v27 = vld [vmem:[#allocation54_spill] sm:$0xff]  ;;  %v13970_v15 = vld [vmem:[#allocation55_spill] sm:$0xff]  ;;  %v9935_v10 = vpop.f32.mrb[105].mxu0 }
 0x409   : > { %13961 = vst [vmem:[#allocation49_spill] sm:$0xff] %v9910_v3  ;;  %13963 = vst [vmem:[#allocation50_spill] sm:$0xff] %v9913_v43  ;;  %v9925_v8 = vadd.f32 %v13968_v27, %v3637_v30  ;;  %v9928_v39 = vadd.f32 %v13970_v15, %v3642_v53  ;;  %v13972_v42 = vld [vmem:[#allocation56_spill] sm:$0xff]  ;;  %v3667_v11 = vld [vmem:[%s7973_s30 + $0x5d8] sm:$0xff]  ;;  %v9953_v15 = vadd.f32 %v9301_v48, %v3661_v60 }
 0x40a   : > { %13965 = vst [vmem:[#allocation129_spill] sm:$0xff] %v9919_v63  ;;  %13967 = vst [vmem:[#allocation53_spill] sm:$0xff] %v9922_v21  ;;  %v9931_v51 = vadd.f32 %v13972_v42, %v3643_v5  ;;  %v3666_v13 = vld [vmem:[%s7973_s30 + $0x5d0] sm:$0xff]  ;;  %v13976_v63 = vld [vmem:[#allocation58_spill] sm:$0xff]  ;;  %v9950_v5 = vadd.f32 %v9294_v33, %v3660_v40 }
 0x40b   : > { %13969 = vst [vmem:[#allocation54_spill] sm:$0xff] %v9925_v8  ;;  %13971 = vst [vmem:[#allocation55_spill] sm:$0xff] %v9928_v39  ;;  %v13974_v46 = vld [vmem:[#allocation57_spill] sm:$0xff]  ;;  %v9941_v50 = vadd.f32 %v13976_v63, %v3649_v35  ;;  %v13978_v14 = vld [vmem:[#allocation60_spill] sm:$0xff]  ;;  %v9959_v35 = vrot.slane %v9890_v44, %v9897_v25  ;;  %v9976_v63 = vpop.f32.mrb[106].mxu0 }
 0x40c   : > { %13973 = vst [vmem:[#allocation56_spill] sm:$0xff] %v9931_v51  ;;  %v9938_v59 = vadd.f32 %v13974_v46, %v3648_v12  ;;  %v9944_v27 = vadd.f32 %v13978_v14, %v3654_v20  ;;  %v13980_v30 = vld [vmem:[#allocation61_spill] sm:$0xff]  ;;  %13982 = vst [vmem:[#allocation130_spill] sm:$0xff] %v9950_v5  ;;  %v6565_v12 = vadd.f32 %v9489_v32, %v9894_v55  ;;  %v9961_v46 = vpop.f32.mrb[106].mxu1 }
 0x40d   : > { %13977 = vst [vmem:[#allocation58_spill] sm:$0xff] %v9941_v50  ;;  %v9947_v53 = vadd.f32 %v13980_v30, %v3655_v52  ;;  %13983 = vst [vmem:[#allocation131_spill] sm:$0xff] %v9953_v15  ;;  %v9965_v20 = vadd.f32 %v9913_v43, %v9910_v3  ;;  %v13985_v52 = vld [vmem:[#allocation64_spill] sm:$0xff]  ;;  %v13987_v40 = vld [vmem:[#allocation65_spill] sm:$0xff]  ;;  %v6567_v32 = vadd.f32 %v9493_v49, %v9894_v55  ;;  %v9978_v42 = vpop.f32.mrb[107].mxu1  ;;  %v9992_v49 = vsub.s32 4, %v13940_v37 }
 0x40e   : > { %13975 = vst [vmem:[#allocation57_spill] sm:$0xff] %v9938_v59  ;;  %13979 = vst [vmem:[#allocation60_spill] sm:$0xff] %v9944_v27  ;;  %v9968_v33 = vadd.f32 %v13985_v52, %v3666_v13  ;;  %v9971_v48 = vadd.f32 %v13987_v40, %v3667_v11  ;;  %v3482_v60 = vld [vmem:[%s7973_s30 + $0x10] sm:$0xff]  ;;  %v9982_v14 = vadd.f32 %v9925_v8, %v9922_v21  ;;  %v3488_v11 = vld [vmem:[%s7973_s30 + $0x40] sm:$0xff]  ;;  %v9994_v52 = vpop.f32.mrb[107].mxu0 }
 0x40f   : > { %13981 = vst [vmem:[#allocation61_spill] sm:$0xff] %v9947_v53  ;;  %13984 = vst [vmem:[#allocation132_spill] sm:$0xff] %v9965_v20  ;;  %v9986_v13 = vadd.f32 %v9931_v51, %v9928_v39  ;;  %v6569_v30 = vadd.f32 %v9497_v23, %v9894_v55  ;;  %v9998_v40 = vadd.f32 %v9941_v50, %v9938_v59  ;;  %v3494_v51 = vld [vmem:[%s7973_s30 + $0x70] sm:$0xff]  ;;  %v10035_v43 = vpop.f32.mrb[108].mxu0  ;;  %v3489_v3 = vld [vmem:[%s7973_s30 + $0x48] sm:$0xff] }
 0x410   : > { %13986 = vst [vmem:[#allocation64_spill] sm:$0xff] %v9968_v33  ;;  %13988 = vst [vmem:[#allocation65_spill] sm:$0xff] %v9971_v48  ;;  %v10002_v25 = vadd.f32 %v9947_v53, %v9944_v27  ;;  %v6571_v39 = vadd.f32 %v9501_v7, %v9894_v55  ;;  %v6573_v23 = vadd.f32 %v9505_v38, %v9894_v55  ;;  %v3500_v53 = vld [vmem:[%s7973_s30 + $0xa0] sm:$0xff]  ;;  %v3506_v27 = vld [vmem:[%s7973_s30 + $0xd0] sm:$0xff]  ;;  %v10021_v7 = vpop.f32.mrb[108].mxu1 }
 0x411   : > { %13989 = vst [vmem:[#allocation133_spill] sm:$0xff] %v9982_v14  ;;  %13990 = vst [vmem:[#allocation134_spill] sm:$0xff] %v9986_v13  ;;  %v10011_v8 = vadd.f32 %v9953_v15, %v9950_v5  ;;  %v10013_v21 = vadd.f32 %v6565_v12, %v3482_v60  ;;  %v6566_v50 = vadd.f32 %v9491_v45, %v9959_v35  ;;  %v3483_v15 = vld [vmem:[%s7973_s30 + $0x18] sm:$0xff]  ;;  %v3512_v45 = vld [vmem:[%s7973_s30 + $0x100] sm:$0xff] }
 0x412   : > { %13991 = vst [vmem:[#allocation135_spill] sm:$0xff] %v9992_v49  ;;  %13992 = vst [vmem:[#allocation136_spill] sm:$0xff] %v9998_v40  ;;  %v6575_v59 = vadd.f32 %v9509_v16, %v9894_v55  ;;  %v10025_v38 = vadd.f32 %v9971_v48, %v9968_v33  ;;  %v10028_v5 = vadd.f32 %v6567_v32, %v3488_v11  ;;  %v10037_v16 = vpop.f32.mrb[109].mxu1  ;;  %v3518_v11 = vld [vmem:[%s7973_s30 + $0x130] sm:$0xff]  ;;  %v10050_v48 = vsub.s32 5, %v13940_v37  ;;  %v3495_v33 = vld [vmem:[%s7973_s30 + $0x78] sm:$0xff] }
 0x413   : > { %13993 = vst [vmem:[#allocation137_spill] sm:$0xff] %v10002_v25  ;;  %13994 = vst [vmem:[#allocation138_spill] sm:$0xff] %v10011_v8  ;;  %v6568_v12 = vadd.f32 %v9495_v17, %v9959_v35  ;;  %v6577_v60 = vadd.f32 %v9513_v58, %v9894_v55  ;;  %v10040_v8 = vadd.f32 %v6569_v30, %v3494_v51  ;;  %v10052_v58 = vpop.f32.mrb[109].mxu0  ;;  %v3501_v25 = vld [vmem:[%s7973_s30 + $0xa8] sm:$0xff]  ;;  %v3507_v40 = vld [vmem:[%s7973_s30 + $0xd8] sm:$0xff] }
 0x414   : > { %13995 = vst [vmem:[#allocation139_spill] sm:$0xff] %v10013_v21  ;;  %13996 = vst [vmem:[#allocation140_spill] sm:$0xff] %v10025_v38  ;;  %v6570_v32 = vadd.f32 %v9499_v31, %v9959_v35  ;;  %v10047_v17 = vrot.slane %v9890_v44, %v9992_v49  ;;  %v10055_v38 = vadd.f32 %v6571_v39, %v3500_v53  ;;  %v10073_v53 = vpop.f32.mrb[110].mxu1 }
 0x415   : > { %13997 = vst [vmem:[#allocation141_spill] sm:$0xff] %v10028_v5  ;;  %13998 = vst [vmem:[#allocation142_spill] sm:$0xff] %v10040_v8  ;;  %v6572_v51 = vadd.f32 %v9503_v29, %v9959_v35  ;;  %v10059_v30 = vadd.f32 %v6573_v23, %v3506_v27  ;;  %v6574_v31 = vadd.f32 %v9507_v9, %v9959_v35  ;;  %v3513_v9 = vld [vmem:[%s7973_s30 + $0x108] sm:$0xff] }
 0x416   : > { %13999 = vst [vmem:[#allocation143_spill] sm:$0xff] %v10050_v48  ;;  %14000 = vst [vmem:[#allocation144_spill] sm:$0xff] %v10055_v38  ;;  %v3865_v49 = vadd.f32 %v9670_v6, %v10013_v21  ;;  %v10065_v37 = vadd.f32 %v6566_v50, %v3483_v15  ;;  %v10069_v13 = vadd.f32 %v6575_v59, %v3512_v45  ;;  %v10084_v15 = vpop.f32.mrb[110].mxu0  ;;  %v10086_v59 = vpop.f32.mrb[111].mxu1  ;;  %v3519_v45 = vld [vmem:[%s7973_s30 + $0x138] sm:$0xff] }
 0x417   : > { %14001 = vst [vmem:[#allocation145_spill] sm:$0xff] %v10059_v30  ;;  %v6576_v39 = vadd.f32 %v9511_v36, %v9959_v35  ;;  %v3872_v29 = vadd.f32 %v9674_v34, %v10028_v5  ;;  %v10077_v27 = vadd.f32 %v6568_v12, %v3489_v3  ;;  %v10080_v6 = vadd.f32 %v6577_v60, %v3518_v11  ;;  %v10099_v12 = vpop.f32.mrb[111].mxu0  ;;  %v14024_v5 = vld [vmem:[#allocation37_spill] sm:$0xff] }
 0x418   : > { %14002 = vst [vmem:[#allocation146_spill] sm:$0xff] %v10065_v37  ;;  %14003 = vst [vmem:[#allocation147_spill] sm:$0xff] %v10069_v13  ;;  %v6578_v50 = vadd.f32 %v9515_v19, %v9959_v35  ;;  %v3879_v36 = vadd.f32 %v9683_v47, %v10040_v8  ;;  %v10090_v23 = vadd.f32 %v6570_v32, %v3495_v33  ;;  %v3524_v32 = vld [vmem:[%s7973_s30 + $0x160] sm:$0xff] }
 0x419   : > { %14004 = vst [vmem:[#allocation148_spill] sm:$0xff] %v10077_v27  ;;  %14005 = vst [vmem:[#allocation149_spill] sm:$0xff] %v10080_v6  ;;  %v6579_v34 = vadd.f32 %v9517_v22, %v9894_v55  ;;  %v10097_v3 = vrot.slane %v9890_v44, %v10050_v48  ;;  %v3886_v19 = vadd.f32 %v9687_v1, %v10055_v38  ;;  %v10116_v48 = vpop.f32.mrb[112].mxu1 }
 0x41a   : > { %14006 = vst [vmem:[#allocation150_spill] sm:$0xff] %v10090_v23  ;;  %v10103_v60 = vadd.f32 %v6572_v51, %v3501_v25  ;;  %v3893_v47 = vadd.f32 %v9691_v26, %v10059_v30  ;;  %v10107_v33 = vadd.f32 %v6574_v31, %v3507_v40  ;;  %v3900_v22 = vadd.f32 %v9695_v54, %v10069_v13  ;;  %v3530_v54 = vld [vmem:[%s7973_s30 + $0x190] sm:$0xff]  ;;  %v10133_v31 = vpop.f32.mrb[113].mxu1 }
 0x41b   : > { %v10112_v11 = vadd.f32 %v6576_v39, %v3513_v9  ;;  %v6581_v44 = vadd.f32 %v9521_v2, %v9894_v55  ;;  %v10119_v1 = vadd.f32 %v3865_v49, %v10065_v37  ;;  %v10122_v26 = vadd.f32 %v3872_v29, %v10077_v27  ;;  %v10131_v2 = vpop.f32.mrb[112].mxu0  ;;  %v14015_v29 = vld [vmem:[#allocation66_spill] sm:$0xff]  ;;  %v10170_v8 = vpop.f32.mrb[114].mxu1 }
 0x41c   : > { %14007 = vst [vmem:[#allocation151_spill] sm:$0xff] %v10103_v60  ;;  %14008 = vst [vmem:[#allocation152_spill] sm:$0xff] %v10107_v33  ;;  %v3907_v25 = vadd.f32 %v9706_v18, %v10080_v6  ;;  %v10126_v40 = vadd.f32 %v6578_v50, %v3519_v45  ;;  %v6583_v51 = vadd.f32 %v9525_v61, %v9894_v55  ;;  %v3536_v9 = vld [vmem:[%s7973_s30 + $0x1c0] sm:$0xff]  ;;  %v14016_v50 = vld [vmem:[#allocation69_spill] sm:$0xff]  ;;  %v10145_v61 = vpop.f32.mrb[113].mxu0 }
 0x41d   : > { %14009 = vst [vmem:[#allocation153_spill] sm:$0xff] %v10112_v11  ;;  %14010 = vst [vmem:[#allocation154_spill] sm:$0xff] %v10119_v1  ;;  %v10136_v49 = vadd.f32 %v3879_v36, %v10090_v23  ;;  %v10138_v39 = vadd.f32 %v6579_v34, %v3524_v32  ;;  %v6580_v18 = vadd.f32 %v14015_v29, %v9959_v35  ;;  %v3525_v36 = vld [vmem:[%s7973_s30 + $0x168] sm:$0xff]  ;;  %v3542_v34 = vld [vmem:[%s7973_s30 + $0x1f0] sm:$0xff]  ;;  %v10183_v21 = vpop.f32.mrb[114].mxu0 }
 0x41e   : > { %14011 = vst [vmem:[#allocation155_spill] sm:$0xff] %v10122_v26  ;;  %14012 = vst [vmem:[#allocation156_spill] sm:$0xff] %v10126_v40  ;;  %v6585_v45 = vadd.f32 %v14016_v50, %v9894_v55  ;;  %v10148_v6 = vadd.f32 %v3886_v19, %v10103_v60  ;;  %v10151_v13 = vadd.f32 %v3893_v47, %v10107_v33  ;;  %v14019_v32 = vld [vmem:[#allocation29_spill] sm:$0xff]  ;;  %v14023_v19 = vld [vmem:[#allocation67_spill] sm:$0xff] }
 0x41f   : > { %14013 = vst [vmem:[#allocation157_spill] sm:$0xff] %v10136_v49  ;;  %14014 = vst [vmem:[#allocation158_spill] sm:$0xff] %v10138_v39  ;;  %v6587_v30 = vadd.f32 %v14019_v32, %v9894_v55  ;;  %v14020_v29 = vld [vmem:[#allocation33_spill] sm:$0xff]  ;;  %v10160_v50 = vadd.f32 %v3900_v22, %v10112_v11  ;;  %v10162_v27 = vadd.f32 %v6581_v44, %v3530_v54  ;;  %v3548_v47 = vld [vmem:[%s7973_s30 + $0x220] sm:$0xff] }
 0x420   : > { %14017 = vst [vmem:[#allocation66_spill] sm:$0xff] %v10148_v6  ;;  %14018 = vst [vmem:[#allocation69_spill] sm:$0xff] %v10151_v13  ;;  %v6589_v38 = vadd.f32 %v14020_v29, %v9894_v55  ;;  %v6582_v60 = vadd.f32 %v14023_v19, %v9959_v35  ;;  %v3554_v33 = vld [vmem:[%s7973_s30 + $0x250] sm:$0xff]  ;;  %v6591_v23 = vadd.f32 %v14024_v5, %v9894_v55  ;;  %v3531_v29 = vld [vmem:[%s7973_s30 + $0x198] sm:$0xff]  ;;  %v10185_v5 = vpop.f32.mrb[115].mxu1 }
 0x421   : > { %14021 = vst [vmem:[#allocation29_spill] sm:$0xff] %v10160_v50  ;;  %14022 = vst [vmem:[#allocation33_spill] sm:$0xff] %v10162_v27  ;;  %v10173_v32 = vadd.f32 %v3907_v25, %v10126_v40  ;;  %v10176_v22 = vadd.f32 %v6583_v51, %v3536_v9  ;;  %v14027_v44 = vld [vmem:[#allocation68_spill] sm:$0xff]  ;;  %v14028_v11 = vld [vmem:[#allocation71_spill] sm:$0xff]  ;;  %v10189_v40 = vadd.f32 %v6580_v18, %v3525_v36 }
 0x422   : > { %v6584_v54 = vadd.f32 %v14027_v44, %v9959_v35  ;;  %v6586_v19 = vadd.f32 %v14028_v11, %v9959_v35  ;;  %v3560_v37 = vld [vmem:[%s7973_s30 + $0x280] sm:$0xff]  ;;  %14029 = vst [vmem:[#allocation68_spill] sm:$0xff] %v10183_v21  ;;  %v3537_v51 = vld [vmem:[%s7973_s30 + $0x1c8] sm:$0xff]  ;;  %v10192_v9 = vadd.f32 %v6585_v45, %v3542_v34  ;;  %v3543_v44 = vld [vmem:[%s7973_s30 + $0x1f8] sm:$0xff]  ;;  %v10197_v11 = vpop.f32.mrb[115].mxu0  ;;  %v10199_v6 = vadd.f32 %v6587_v30, %v3548_v47 }
 0x423   : > { %14025 = vst [vmem:[#allocation67_spill] sm:$0xff] %v10173_v32  ;;  %14026 = vst [vmem:[#allocation37_spill] sm:$0xff] %v10176_v22  ;;  %v14030_v50 = vld [vmem:[#allocation107_spill] sm:$0xff]  ;;  %v14033_v32 = vld [vmem:[#allocation41_spill] sm:$0xff]  ;;  %v10203_v26 = vadd.f32 %v6589_v38, %v3554_v33  ;;  %v10214_v20 = vadd.f32 %v6591_v23, %v3560_v37  ;;  %v10229_v37 = vpop.f32.mrb[116].mxu0 }
 0x424   : > { %v3914_v25 = vadd.f32 %v14030_v50, %v10138_v39  ;;  %14031 = vst [vmem:[#allocation71_spill] sm:$0xff] %v10189_v40  ;;  %14032 = vst [vmem:[#allocation107_spill] sm:$0xff] %v10192_v9  ;;  %v6593_v13 = vadd.f32 %v14033_v32, %v9894_v55  ;;  %v14036_v49 = vld [vmem:[#allocation30_spill] sm:$0xff]  ;;  %v3566_v50 = vld [vmem:[%s7973_s30 + $0x2b0] sm:$0xff]  ;;  %v10210_v39 = vadd.f32 %v6582_v60, %v3531_v29 }
 0x425   : > { %14034 = vst [vmem:[#allocation41_spill] sm:$0xff] %v10197_v11  ;;  %14035 = vst [vmem:[#allocation159_spill] sm:$0xff] %v10199_v6  ;;  %v6588_v14 = vadd.f32 %v14036_v49, %v9959_v35  ;;  %v14038_v18 = vld [vmem:[#allocation34_spill] sm:$0xff]  ;;  %v14039_v45 = vld [vmem:[#allocation108_spill] sm:$0xff]  ;;  %v10218_v49 = vpop.f32.mrb[116].mxu1  ;;  %v10224_v11 = vadd.f32 %v6586_v19, %v3543_v44 }
 0x426   : > { %14037 = vst [vmem:[#allocation30_spill] sm:$0xff] %v10203_v26  ;;  %v6590_v36 = vadd.f32 %v14038_v18, %v9959_v35  ;;  %v3921_v34 = vadd.f32 %v14039_v45, %v10162_v27  ;;  %14040 = vst [vmem:[#allocation34_spill] sm:$0xff] %v10210_v39  ;;  %v3549_v32 = vld [vmem:[%s7973_s30 + $0x228] sm:$0xff]  ;;  %v3555_v1 = vld [vmem:[%s7973_s30 + $0x258] sm:$0xff]  ;;  %v10222_v18 = vadd.f32 %v6584_v54, %v3537_v51  ;;  %v10231_v23 = vpop.f32.mrb[117].mxu1 }
 0x427   : > { %14041 = vst [vmem:[#allocation108_spill] sm:$0xff] %v10214_v20  ;;  %v14042_v30 = vld [vmem:[#allocation38_spill] sm:$0xff]  ;;  %v14044_v38 = vld [vmem:[#allocation109_spill] sm:$0xff]  ;;  %14046 = vst [vmem:[#allocation160_spill] sm:$0xff] %v10224_v11  ;;  %v10246_v21 = vadd.f32 %v6588_v14, %v3549_v32 }
 0x428   : > { %v6592_v47 = vadd.f32 %v14042_v30, %v9959_v35  ;;  %14043 = vst [vmem:[#allocation38_spill] sm:$0xff] %v10218_v49  ;;  %v3928_v33 = vadd.f32 %v14044_v38, %v10176_v22  ;;  %14045 = vst [vmem:[#allocation109_spill] sm:$0xff] %v10222_v18  ;;  %v3561_v60 = vld [vmem:[%s7973_s30 + $0x288] sm:$0xff]  ;;  %v14047_v29 = vld [vmem:[#allocation82_spill] sm:$0xff]  ;;  %v10235_v49 = vadd.f32 %v6593_v13, %v3566_v50  ;;  %v10242_v22 = vpop.f32.mrb[117].mxu0 }
 0x429   : > { %v6597_v45 = vadd.f32 %v14047_v29, %v9894_v55  ;;  %14048 = vst [vmem:[#allocation82_spill] sm:$0xff] %v10229_v37  ;;  %14049 = vst [vmem:[#allocation161_spill] sm:$0xff] %v10231_v23  ;;  %v14050_v30 = vld [vmem:[#allocation111_spill] sm:$0xff]  ;;  %v14052_v54 = vld [vmem:[#allocation42_spill] sm:$0xff]  ;;  %v10250_v13 = vadd.f32 %v6590_v36, %v3555_v1  ;;  %v10266_v1 = vadd.f32 %v3921_v34, %v10210_v39 }
 0x42a   : > { %v3935_v27 = vadd.f32 %v14050_v30, %v10192_v9  ;;  %14051 = vst [vmem:[#allocation111_spill] sm:$0xff] %v10235_v49  ;;  %v6594_v51 = vadd.f32 %v14052_v54, %v9959_v35  ;;  %v14053_v19 = vld [vmem:[#allocation44_spill] sm:$0xff]  ;;  %14054 = vst [vmem:[#allocation42_spill] sm:$0xff] %v10242_v22  ;;  %v14057_v23 = vld [vmem:[#allocation113_spill] sm:$0xff]  ;;  %v10255_v54 = vadd.f32 %v3914_v25, %v10189_v40 }
 0x42b   : > { %v6595_v44 = vadd.f32 %v14053_v19, %v9894_v55  ;;  %v3578_v38 = vld [vmem:[%s7973_s30 + $0x310] sm:$0xff]  ;;  %14056 = vst [vmem:[#allocation44_spill] sm:$0xff] %v10246_v21  ;;  %v3949_v30 = vadd.f32 %v14057_v23, %v10203_v26  ;;  %v3567_v50 = vld [vmem:[%s7973_s30 + $0x2b8] sm:$0xff]  ;;  %v3572_v9 = vld [vmem:[%s7973_s30 + $0x2e0] sm:$0xff]  ;;  %v3956_v19 = vadd.f32 %v9841_v56, %v10214_v20  ;;  %v10259_v22 = vadd.f32 %v6592_v47, %v3561_v60  ;;  %v10275_v47 = vpop.f32.mrb[118].mxu0 }
 0x42c   : > { %v14055_v29 = vld [vmem:[#allocation112_spill] sm:$0xff]  ;;  %v10268_v36 = vadd.f32 %v6597_v45, %v3578_v38  ;;  %v3584_v26 = vld [vmem:[%s7973_s30 + $0x340] sm:$0xff]  ;;  %v10289_v40 = vpop.f32.mrb[119].mxu0 }
 0x42d   : > { %v3942_v37 = vadd.f32 %v14055_v29, %v10199_v6  ;;  %14058 = vst [vmem:[#allocation112_spill] sm:$0xff] %v10250_v13  ;;  %14059 = vst [vmem:[#allocation113_spill] sm:$0xff] %v10259_v22  ;;  %v14060_v14 = vld [vmem:[#allocation104_spill] sm:$0xff]  ;;  %v10263_v29 = vpop.f32.mrb[118].mxu1  ;;  %v14064_v56 = vld [vmem:[#allocation114_spill] sm:$0xff]  ;;  %v10281_v6 = vadd.f32 %v6594_v51, %v3567_v50  ;;  %v10283_v34 = vadd.f32 %v6595_v44, %v3572_v9 }
 0x42e   : > { %v6599_v32 = vadd.f32 %v14060_v14, %v9894_v55  ;;  %14061 = vst [vmem:[#allocation104_spill] sm:$0xff] %v10266_v1  ;;  %14062 = vst [vmem:[#allocation162_spill] sm:$0xff] %v10268_v36  ;;  %v14063_v25 = vld [vmem:[#allocation88_spill] sm:$0xff]  ;;  %v6601_v20 = vadd.f32 %v14064_v56, %v9894_v55  ;;  %v10277_v60 = vpop.f32.mrb[119].mxu1  ;;  %v3963_v14 = vadd.f32 %v9845_v57, %v10235_v49  ;;  %v14067_v45 = vld [vmem:[#allocation51_spill] sm:$0xff] }
 0x42f   : > { %v6598_v23 = vadd.f32 %v14063_v25, %v9959_v35  ;;  %14065 = vst [vmem:[#allocation88_spill] sm:$0xff] %v10281_v6  ;;  %14066 = vst [vmem:[#allocation114_spill] sm:$0xff] %v10283_v34  ;;  %v6596_v38 = vadd.f32 %v14067_v45, %v9959_v35  ;;  %v3579_v25 = vld [vmem:[%s7973_s30 + $0x318] sm:$0xff]  ;;  %v3590_v39 = vld [vmem:[%s7973_s30 + $0x370] sm:$0xff]  ;;  %v10292_v56 = vadd.f32 %v3928_v33, %v10222_v18  ;;  %v10313_v49 = vpop.f32.mrb[120].mxu1 }
 0x430   : > { %v10295_v1 = vadd.f32 %v3935_v27, %v10224_v11  ;;  %v10298_v57 = vadd.f32 %v3942_v37, %v10246_v21  ;;  %v10301_v9 = vadd.f32 %v3949_v30, %v10250_v13  ;;  %v3573_v51 = vld [vmem:[%s7973_s30 + $0x2e8] sm:$0xff]  ;;  %v10305_v44 = vadd.f32 %v3956_v19, %v10259_v22  ;;  %v14074_v45 = vld [vmem:[#allocation106_spill] sm:$0xff]  ;;  %v10325_v21 = vpop.f32.mrb[120].mxu0 }
 0x431   : > { %14068 = vst [vmem:[#allocation51_spill] sm:$0xff] %v10292_v56  ;;  %v10307_v50 = vadd.f32 %v6599_v32, %v3584_v26  ;;  %v6600_v33 = vadd.f32 %v14074_v45, %v9959_v35  ;;  %v6603_v27 = vadd.f32 %v9820_v4, %v9894_v55  ;;  %v3977_v37 = vadd.f32 %v9853_v24, %v10268_v36  ;;  %v3585_v13 = vld [vmem:[%s7973_s30 + $0x348] sm:$0xff]  ;;  %v3596_v22 = vld [vmem:[%s7973_s30 + $0x3a0] sm:$0xff]  ;;  %v10327_v45 = vpop.f32.mrb[121].mxu1 }
 0x432   : > { %14069 = vst [vmem:[#allocation163_spill] sm:$0xff] %v10295_v1  ;;  %14070 = vst [vmem:[#allocation164_spill] sm:$0xff] %v10298_v57  ;;  %v10317_v30 = vadd.f32 %v6598_v23, %v3579_v25  ;;  %v10320_v19 = vadd.f32 %v6601_v20, %v3590_v39  ;;  %v14077_v26 = vld [vmem:[#allocation116_spill] sm:$0xff]  ;;  %v10330_v4 = vadd.f32 %v3963_v14, %v10281_v6  ;;  %v3591_v20 = vld [vmem:[%s7973_s30 + $0x378] sm:$0xff]  ;;  %v10341_v25 = vpop.f32.mrb[121].mxu0 }
 0x433   : > { %14071 = vst [vmem:[#allocation165_spill] sm:$0xff] %v10301_v9  ;;  %14072 = vst [vmem:[#allocation166_spill] sm:$0xff] %v10305_v44  ;;  %v6602_v32 = vadd.f32 %v14077_v26, %v9959_v35  ;;  %v10334_v24 = vadd.f32 %v9849_v62, %v10283_v34  ;;  %v10336_v23 = vadd.f32 %v6596_v38, %v3573_v51  ;;  %v14081_v26 = vld [vmem:[#allocation87_spill] sm:$0xff]  ;;  %v14083_v62 = vld [vmem:[#allocation105_spill] sm:$0xff] }
 0x434   : > { %14073 = vst [vmem:[#allocation167_spill] sm:$0xff] %v10307_v50  ;;  %14075 = vst [vmem:[#allocation106_spill] sm:$0xff] %v10317_v30  ;;  %v6605_v39 = vadd.f32 %v9899_v28, %v9894_v55  ;;  %v10345_v11 = vadd.f32 %v14081_v26, %v10047_v17  ;;  %v14082_v14 = vld [vmem:[#allocation103_spill] sm:$0xff]  ;;  %v10353_v34 = vadd.f32 %v14083_v62, %v10047_v17  ;;  %v3602_v38 = vld [vmem:[%s7973_s30 + $0x3d0] sm:$0xff] }
 0x435   : > { %14076 = vst [vmem:[#allocation168_spill] sm:$0xff] %v10320_v19  ;;  %14078 = vst [vmem:[#allocation116_spill] sm:$0xff] %v10330_v4  ;;  %v10349_v6 = vadd.f32 %v14082_v14, %v10097_v3  ;;  %v6607_v51 = vadd.f32 %v9961_v46, %v9894_v55  ;;  %v3984_v28 = vadd.f32 %v9862_v0, %v10307_v50  ;;  %v3608_v36 = vld [vmem:[%s7973_s30 + $0x400] sm:$0xff]  ;;  %v14086_v46 = vld [vmem:[#allocation120_spill] sm:$0xff] }
 0x436   : > { %14079 = vst [vmem:[#allocation169_spill] sm:$0xff] %v10334_v24  ;;  %14080 = vst [vmem:[#allocation170_spill] sm:$0xff] %v10336_v23  ;;  %v10360_v18 = vadd.f32 %v6600_v33, %v3585_v13  ;;  %v10362_v26 = vadd.f32 %v6603_v27, %v3596_v22  ;;  %v6604_v14 = vadd.f32 %v9837_v41, %v9959_v35  ;;  %v10367_v24 = vpop.f32.mrb[122].mxu1  ;;  %v3597_v0 = vld [vmem:[%s7973_s30 + $0x3a8] sm:$0xff]  ;;  %v10379_v13 = vpop.f32.mrb[122].mxu0  ;;  %v14089_v33 = vld [vmem:[#allocation110_spill] sm:$0xff] }
 0x437   : > { %v10370_v62 = vadd.f32 %v3977_v37, %v10317_v30  ;;  %v3991_v23 = vadd.f32 %v14086_v46, %v10320_v19  ;;  %v10374_v4 = vadd.f32 %v6602_v32, %v3591_v20  ;;  %v6609_v22 = vadd.f32 %v10021_v7, %v9894_v55  ;;  %v10381_v41 = vpop.f32.mrb[123].mxu1  ;;  %v14090_v37 = vld [vmem:[#allocation115_spill] sm:$0xff]  ;;  %v14092_v20 = vld [vmem:[#allocation129_spill] sm:$0xff]  ;;  %v10396_v19 = vpop.f32.mrb[123].mxu0 }
 0x438   : > { %14084 = vst [vmem:[#allocation87_spill] sm:$0xff] %v10360_v18  ;;  %14085 = vst [vmem:[#allocation103_spill] sm:$0xff] %v10362_v26  ;;  %v10385_v27 = vadd.f32 %v14089_v33, %v10097_v3  ;;  %v10389_v50 = vadd.f32 %v14090_v37, %v10047_v17  ;;  %v10391_v32 = vadd.f32 %v6605_v39, %v3602_v38  ;;  %v3614_v7 = vld [vmem:[%s7973_s30 + $0x430] sm:$0xff]  ;;  %v3603_v9 = vld [vmem:[%s7973_s30 + $0x3d8] sm:$0xff] }
 0x439   : > { %14087 = vst [vmem:[#allocation105_spill] sm:$0xff] %v10374_v4  ;;  %14088 = vst [vmem:[#allocation120_spill] sm:$0xff] %v10381_v41  ;;  %v6606_v46 = vadd.f32 %v14092_v20, %v9959_v35  ;;  %v14094_v30 = vld [vmem:[#allocation117_spill] sm:$0xff]  ;;  %v10403_v33 = vadd.f32 %v6607_v51, %v3608_v36  ;;  %v6608_v37 = vadd.f32 %v9978_v42, %v9959_v35  ;;  %v3609_v1 = vld [vmem:[%s7973_s30 + $0x408] sm:$0xff] }
 0x43a   : > { %14091 = vst [vmem:[#allocation110_spill] sm:$0xff] %v10391_v32  ;;  %14093 = vst [vmem:[#allocation115_spill] sm:$0xff] %v10396_v19  ;;  %v10400_v44 = vadd.f32 %v14094_v30, %v10097_v3  ;;  %v6611_v39 = vadd.f32 %v10073_v53, %v9894_v55  ;;  %v14096_v38 = vld [vmem:[#allocation121_spill] sm:$0xff]  ;;  %v10411_v57 = vadd.f32 %v6604_v14, %v3597_v0  ;;  %v3620_v56 = vld [vmem:[%s7973_s30 + $0x460] sm:$0xff]  ;;  %v10417_v19 = vpop.f32.mrb[124].mxu1 }
 0x43b   : > { %14095 = vst [vmem:[#allocation129_spill] sm:$0xff] %v10403_v33  ;;  %v3998_v20 = vadd.f32 %v14096_v38, %v10362_v26  ;;  %v6613_v30 = vadd.f32 %v10116_v48, %v9894_v55  ;;  %14098 = vst [vmem:[#allocation121_spill] sm:$0xff] %v10417_v19  ;;  %v10420_v36 = vadd.f32 %v3984_v28, %v10360_v18  ;;  %v14099_v53 = vld [vmem:[#allocation118_spill] sm:$0xff]  ;;  %v3626_v38 = vld [vmem:[%s7973_s30 + $0x490] sm:$0xff]  ;;  %v10434_v48 = vpop.f32.mrb[124].mxu0  ;;  %v10436_v26 = vpop.f32.mrb[125].mxu1 }
 0x43c   : > { %14097 = vst [vmem:[#allocation117_spill] sm:$0xff] %v10411_v57  ;;  %v10423_v42 = vadd.f32 %v3991_v23, %v10374_v4  ;;  %v10427_v51 = vadd.f32 %v14099_v53, %v10047_v17  ;;  %v10429_v14 = vadd.f32 %v6609_v22, %v3614_v7  ;;  %v6610_v0 = vadd.f32 %v10037_v16, %v9959_v35  ;;  %v14103_v28 = vld [vmem:[#allocation119_spill] sm:$0xff]  ;;  %v14104_v23 = vld [vmem:[#allocation122_spill] sm:$0xff]  ;;  %v14105_v53 = vld [vmem:[#allocation128_spill] sm:$0xff]  ;;  %v10451_v19 = vpop.f32.mrb[125].mxu0 }
 0x43d   : > { %14101 = vst [vmem:[#allocation171_spill] sm:$0xff] %v10434_v48  ;;  %14102 = vst [vmem:[#allocation172_spill] sm:$0xff] %v10436_v26  ;;  %v10440_v18 = vadd.f32 %v14103_v28, %v10097_v3  ;;  %v4005_v4 = vadd.f32 %v14104_v23, %v10391_v32  ;;  %v10446_v22 = vadd.f32 %v14105_v53, %v10047_v17  ;;  %v3615_v16 = vld [vmem:[%s7973_s30 + $0x438] sm:$0xff]  ;;  %v14108_v48 = vld [vmem:[#allocation123_spill] sm:$0xff] }
 0x43e   : > { %14100 = vst [vmem:[#allocation118_spill] sm:$0xff] %v10429_v14  ;;  %v10448_v7 = vadd.f32 %v6606_v46, %v3603_v9  ;;  %14107 = vst [vmem:[#allocation122_spill] sm:$0xff] %v10451_v19  ;;  %v4012_v26 = vadd.f32 %v14108_v48, %v10403_v33  ;;  %v10455_v41 = vadd.f32 %v6608_v37, %v3609_v1  ;;  %v3621_v46 = vld [vmem:[%s7973_s30 + $0x468] sm:$0xff]  ;;  %v2704_v1 = vpop.f32.mrb[126].mxu1 }
 0x43f   : > { %v10457_v28 = vadd.f32 %v6611_v39, %v3620_v56  ;;  %v6612_v23 = vadd.f32 %v10086_v59, %v9959_v35  ;;  %v10462_v32 = vadd.f32 %v3998_v20, %v10411_v57  ;;  %v10466_v9 = vadd.f32 %v9935_v10, %v10097_v3  ;;  %v14112_v59 = vld [vmem:[#allocation124_spill] sm:$0xff]  ;;  %v3627_v20 = vld [vmem:[%s7973_s30 + $0x498] sm:$0xff] }
 0x440   : > { %14106 = vst [vmem:[#allocation119_spill] sm:$0xff] %v10448_v7  ;;  %14109 = vst [vmem:[#allocation128_spill] sm:$0xff] %v10455_v41  ;;  %v10469_v53 = vadd.f32 %v6613_v30, %v3626_v38  ;;  %v6614_v48 = vadd.f32 %v10133_v31, %v9959_v35  ;;  %v10475_v56 = vadd.f32 %v9976_v63, %v10047_v17  ;;  %v10485_v30 = vpop.f32.mrb[126].mxu0  ;;  %v2706_v38 = vpop.f32.mrb[127].mxu1 }
 0x441   : > { %14110 = vst [vmem:[#allocation123_spill] sm:$0xff] %v10457_v28  ;;  %v4019_v37 = vadd.f32 %v14112_v59, %v10429_v14  ;;  %v10479_v39 = vadd.f32 %v6610_v0, %v3615_v16  ;;  %v10483_v10 = vadd.f32 %v2704_v1, %v9894_v55  ;;  %14115 = vst [vmem:[#allocation175_spill] sm:$0xff] %v10485_v30  ;;  %v10499_v16 = vpop.f32.mrb[127].mxu0  ;;  %v14118_v14 = vld [vmem:[#allocation126_spill] sm:$0xff]  ;;  %v3385_v57 = vpop.f32.mrb[128].mxu1 }
 0x442   : > { %14111 = vst [vmem:[#allocation173_spill] sm:$0xff] %v10469_v53  ;;  %v10488_v31 = vadd.f32 %v4005_v4, %v10448_v7  ;;  %v10492_v63 = vadd.f32 %v9994_v52, %v10097_v3  ;;  %v6615_v59 = vadd.f32 %v10170_v8, %v9894_v55  ;;  %v10497_v0 = vadd.f32 %v2706_v38, %v9959_v35  ;;  %v3632_v7 = vld [vmem:[%s7973_s30 + $0x4c0] sm:$0xff] }
 0x443   : > { %14113 = vst [vmem:[#allocation124_spill] sm:$0xff] %v10479_v39  ;;  %14114 = vst [vmem:[#allocation174_spill] sm:$0xff] %v10483_v10  ;;  %v10502_v1 = vadd.f32 %v4012_v26, %v10455_v41  ;;  %v10506_v4 = vadd.f32 %v10035_v43, %v10047_v17  ;;  %v4026_v52 = vadd.f32 %v14118_v14, %v10457_v28  ;;  %v14120_v26 = vld [vmem:[#allocation127_spill] sm:$0xff]  ;;  %v3490_v10 = vld [vmem:[%s7973_s30 + $0x50] sm:$0xff] }
 0x444   : > { %14116 = vst [vmem:[#allocation176_spill] sm:$0xff] %v10497_v0  ;;  %14117 = vst [vmem:[#allocation177_spill] sm:$0xff] %v10499_v16  ;;  %v10510_v33 = vadd.f32 %v6612_v23, %v3621_v46  ;;  %v10515_v8 = vadd.f32 %v10052_v58, %v10097_v3  ;;  %v10519_v38 = vadd.f32 %v10084_v15, %v10047_v17  ;;  %v3580_v14 = vld [vmem:[%s7973_s30 + $0x320] sm:$0xff]  ;;  %v3289_v15 = vpop.f32.mrb[64].mxu0 }
 0x445   : > { %v4033_v41 = vadd.f32 %v14120_v26, %v10469_v53  ;;  %v10523_v43 = vadd.f32 %v6614_v48, %v3627_v20  ;;  %v10527_v23 = vadd.f32 %v4019_v37, %v10479_v39  ;;  %v10531_v46 = vadd.f32 %v10099_v12, %v10097_v3  ;;  %v3484_v28 = vld [vmem:[%s7973_s30 + $0x20] sm:$0xff]  ;;  %v3387_v26 = vpop.f32.mrb[129].mxu1  ;;  %v3633_v37 = vld [vmem:[%s7973_s30 + $0x4c8] sm:$0xff]  ;;  %v3291_v53 = vpop.f32.mrb[65].mxu0 }
 0x446   : > { %14119 = vst [vmem:[#allocation126_spill] sm:$0xff] %v10510_v33  ;;  %v6616_v58 = vadd.f32 %v10185_v5, %v9959_v35  ;;  %v6662_v0 = vadd.f32 %v10345_v11, %v3385_v57  ;;  %v10539_v48 = vadd.f32 %v10131_v2, %v10047_v17  ;;  %v10541_v20 = vadd.f32 %v6615_v59, %v3632_v7  ;;  %v3485_v5 = vld [vmem:[%s7973_s30 + $0x28] sm:$0xff] }
 0x447   : > { %14121 = vst [vmem:[#allocation127_spill] sm:$0xff] %v10523_v43  ;;  %v6629_v12 = vadd.f32 %v3289_v15, %v10047_v17  ;;  %v6664_v39 = vadd.f32 %v10349_v6, %v3387_v26  ;;  %v10548_v16 = vadd.f32 %v4026_v52, %v10510_v33  ;;  %v10552_v11 = vadd.f32 %v10145_v61, %v10097_v3  ;;  %v14125_v59 = vld [vmem:[#allocation68_spill] sm:$0xff]  ;;  %v14127_v52 = vld [vmem:[#allocation41_spill] sm:$0xff] }
 0x448   : > { %14122 = vst [vmem:[#allocation178_spill] sm:$0xff] %v10541_v20  ;;  %v10554_v2 = vadd.f32 %v6662_v0, %v3580_v14  ;;  %v6630_v57 = vadd.f32 %v3291_v53, %v10097_v3  ;;  %v10558_v7 = vadd.f32 %v4033_v41, %v10523_v43  ;;  %v10562_v6 = vadd.f32 %v14125_v59, %v10047_v17  ;;  %v3581_v61 = vld [vmem:[%s7973_s30 + $0x328] sm:$0xff]  ;;  %v3391_v0 = vpop.f32.mrb[130].mxu1  ;;  %v3586_v14 = vld [vmem:[%s7973_s30 + $0x350] sm:$0xff]  ;;  %v14131_v53 = vld [vmem:[#allocation38_spill] sm:$0xff]  ;;  %v3295_v43 = vpop.f32.mrb[66].mxu0 }
 0x449   : > { %v10566_v15 = vadd.f32 %v14127_v52, %v10097_v3  ;;  %v10568_v26 = vadd.f32 %v6629_v12, %v3484_v28  ;;  %v10572_v33 = vadd.f32 %v6616_v58, %v3633_v37  ;;  %v6617_v41 = vadd.f32 %v14131_v53, %v9894_v55  ;;  %v3393_v30 = vpop.f32.mrb[131].mxu1  ;;  %v3587_v52 = vld [vmem:[%s7973_s30 + $0x358] sm:$0xff]  ;;  %v14133_v28 = vld [vmem:[#allocation132_spill] sm:$0xff]  ;;  %v3297_v58 = vpop.f32.mrb[67].mxu0 }
 0x44a   : > { %14123 = vst [vmem:[#allocation179_spill] sm:$0xff] %v10554_v2  ;;  %14124 = vst [vmem:[#allocation180_spill] sm:$0xff] %v10558_v7  ;;  %v6666_v59 = vadd.f32 %v10353_v34, %v3391_v0  ;;  %v10578_v19 = vadd.f32 %v6630_v57, %v3485_v5  ;;  %v4040_v12 = vadd.f32 %v14133_v28, %v10541_v20  ;;  %v3638_v7 = vld [vmem:[%s7973_s30 + $0x4f0] sm:$0xff]  ;;  %v14134_v53 = vld [vmem:[#allocation154_spill] sm:$0xff] }
 0x44b   : > { %14126 = vst [vmem:[#allocation68_spill] sm:$0xff] %v10562_v6  ;;  %14128 = vst [vmem:[#allocation41_spill] sm:$0xff] %v10566_v15  ;;  %v6631_v15 = vadd.f32 %v3295_v43, %v10047_v17  ;;  %v6668_v37 = vadd.f32 %v10385_v27, %v3393_v30  ;;  %v3867_v6 = vadd.f32 %v14134_v53, %v10568_v26  ;;  %v14135_v34 = vld [vmem:[#allocation161_spill] sm:$0xff]  ;;  %v3397_v30 = vpop.f32.mrb[132].mxu1 }
 0x44c   : > { %14129 = vst [vmem:[#allocation181_spill] sm:$0xff] %v10568_v26  ;;  %14130 = vst [vmem:[#allocation182_spill] sm:$0xff] %v10572_v33  ;;  %v6618_v0 = vadd.f32 %v14135_v34, %v9959_v35  ;;  %v10590_v5 = vadd.f32 %v6664_v39, %v3581_v61  ;;  %v10592_v57 = vadd.f32 %v6666_v59, %v3586_v14  ;;  %v3639_v43 = vld [vmem:[%s7973_s30 + $0x4f8] sm:$0xff]  ;;  %v3301_v59 = vpop.f32.mrb[68].mxu0 }
 0x44d   : > { %14132 = vst [vmem:[#allocation38_spill] sm:$0xff] %v10578_v19  ;;  %v3979_v28 = vadd.f32 %v10370_v62, %v10554_v2  ;;  %v10597_v20 = vadd.f32 %v6631_v15, %v3490_v10  ;;  %v6632_v27 = vadd.f32 %v3297_v58, %v10097_v3  ;;  %v3868_v53 = vadd.f32 %v3867_v6, %v10578_v19  ;;  %v14140_v39 = vld [vmem:[#allocation82_spill] sm:$0xff]  ;;  %v3399_v2 = vpop.f32.mrb[133].mxu1  ;;  %v3593_v19 = vld [vmem:[%s7973_s30 + $0x388] sm:$0xff] }
 0x44e   : > { %14136 = vst [vmem:[#allocation132_spill] sm:$0xff] %v10592_v57  ;;  %v10601_v26 = vadd.f32 %v6668_v37, %v3587_v52  ;;  %v10603_v34 = vadd.f32 %v6617_v41, %v3638_v7  ;;  %v10607_v61 = vadd.f32 %v14140_v39, %v10047_v17  ;;  %v3491_v14 = vld [vmem:[%s7973_s30 + $0x58] sm:$0xff]  ;;  %v3496_v62 = vld [vmem:[%s7973_s30 + $0x80] sm:$0xff]  ;;  %v6670_v10 = vadd.f32 %v10389_v50, %v3397_v30  ;;  %v3303_v37 = vpop.f32.mrb[69].mxu0  ;;  %v3497_v39 = vld [vmem:[%s7973_s30 + $0x88] sm:$0xff] }
 0x44f   : > { %14137 = vst [vmem:[#allocation154_spill] sm:$0xff] %v10597_v20  ;;  %v3592_v15 = vld [vmem:[%s7973_s30 + $0x380] sm:$0xff]  ;;  %v3986_v58 = vadd.f32 %v10420_v36, %v10592_v57  ;;  %v10616_v6 = vadd.f32 %v4040_v12, %v10572_v33  ;;  %v6633_v52 = vadd.f32 %v3301_v59, %v10047_v17  ;;  %v6672_v50 = vadd.f32 %v10400_v44, %v3399_v2  ;;  %v3403_v44 = vpop.f32.mrb[134].mxu1  ;;  %v3598_v2 = vld [vmem:[%s7973_s30 + $0x3b0] sm:$0xff] }
 0x450   : > { %14138 = vst [vmem:[#allocation161_spill] sm:$0xff] %v10601_v26  ;;  %14139 = vst [vmem:[#allocation183_spill] sm:$0xff] %v10603_v34  ;;  %v14141_v7 = vld [vmem:[#allocation42_spill] sm:$0xff]  ;;  %3869 = vadd.xlane.f32.xlu0 %v3868_v53  ;;  %v10625_v30 = vadd.f32 %v6618_v0, %v3639_v43  ;;  %v6634_v36 = vadd.f32 %v3303_v37, %v10097_v3  ;;  %v3980_v33 = vadd.f32 %v3979_v28, %v10590_v5  ;;  %v14144_v0 = vld [vmem:[#allocation155_spill] sm:$0xff] }
 0x451   : > { %v10620_v41 = vadd.f32 %v14141_v7, %v10097_v3  ;;  %v3987_v12 = vadd.f32 %v3986_v58, %v10601_v26  ;;  %v10630_v57 = vadd.f32 %v6632_v27, %v3491_v14  ;;  %v10632_v7 = vadd.f32 %v6633_v52, %v3496_v62  ;;  %v14145_v53 = vld [vmem:[#allocation133_spill] sm:$0xff]  ;;  %v3307_v27 = vpop.f32.mrb[70].mxu0 }
 0x452   : > { %14142 = vst [vmem:[#allocation82_spill] sm:$0xff] %v10625_v30  ;;  %v10634_v59 = vadd.f32 %v6670_v10, %v3592_v15  ;;  %v3874_v43 = vadd.f32 %v14144_v0, %v10597_v20  ;;  %v4047_v37 = vadd.f32 %v14145_v53, %v10603_v34  ;;  %v6619_v28 = vadd.f32 %v10263_v29, %v9894_v55  ;;  %v3502_v14 = vld [vmem:[%s7973_s30 + $0xb0] sm:$0xff]  ;;  %v3405_v10 = vpop.f32.mrb[135].mxu1  ;;  %v3644_v15 = vld [vmem:[%s7973_s30 + $0x520] sm:$0xff]  ;;  %v3309_v53 = vpop.f32.mrb[71].mxu0  ;;  %v3503_v34 = vld [vmem:[%s7973_s30 + $0xb8] sm:$0xff] }
 0x453   : > { %14143 = vst [vmem:[#allocation42_spill] sm:$0xff] %v10630_v57  ;;  %v10644_v58 = vadd.f32 %v6634_v36, %v3497_v39  ;;  %v6674_v62 = vadd.f32 %v10427_v51, %v3403_v44  ;;  %3988 = vadd.xlane.f32.xlu1 %v3987_v12  ;;  %v10651_v52 = vadd.f32 %v10275_v47, %v10047_v17  ;;  %v14146_v39 = vld [vmem:[#allocation157_spill] sm:$0xff]  ;;  %v3509_v20 = vld [vmem:[%s7973_s30 + $0xe8] sm:$0xff] }
 0x454   : > { %v6635_v0 = vadd.f32 %v3307_v27, %v10047_v17  ;;  %v6676_v29 = vadd.f32 %v10440_v18, %v3405_v10  ;;  %3981 = vadd.xlane.f32.xlu0 %v3980_v33  ;;  %v3881_v36 = vadd.f32 %v14146_v39, %v10632_v7  ;;  %v6620_v51 = vadd.f32 %v10277_v60, %v9959_v35  ;;  %v3599_v26 = vld [vmem:[%s7973_s30 + $0x3b8] sm:$0xff]  ;;  %v3409_v18 = vpop.f32.mrb[136].mxu1 }
 0x455   : > { %v10660_v12 = vadd.f32 %v6672_v50, %v3593_v19  ;;  %v10662_v44 = vadd.f32 %v6674_v62, %v3598_v2  ;;  %v6636_v47 = vadd.f32 %v3309_v53, %v10097_v3  ;;  %v3875_v10 = vadd.f32 %v3874_v43, %v10630_v57  ;;  %v3313_v62 = vpop.f32.mrb[72].mxu0  ;;  %v3604_v53 = vld [vmem:[%s7973_s30 + $0x3e0] sm:$0xff]  ;;  %v3411_v39 = vpop.f32.mrb[137].mxu1 }
 0x456   : > { %v10665_v27 = vadd.f32 %v6635_v0, %v3502_v14  ;;  %v3882_v33 = vadd.f32 %v3881_v36, %v10644_v58  ;;  %v3993_v60 = vadd.f32 %v10423_v42, %v10634_v59  ;;  %v10673_v19 = vadd.f32 %v4047_v37, %v10625_v30  ;;  %v3508_v14 = vld [vmem:[%s7973_s30 + $0xe0] sm:$0xff]  ;;  %v3645_v36 = vld [vmem:[%s7973_s30 + $0x528] sm:$0xff]  ;;  %v3315_v57 = vpop.f32.mrb[73].mxu0 }
 0x457   : > { %v10675_v50 = vadd.f32 %v6619_v28, %v3644_v15  ;;  %v10677_v2 = vadd.f32 %v6636_v47, %v3503_v34  ;;  %v6678_v0 = vadd.f32 %v10446_v22, %v3409_v18  ;;  %v6637_v43 = vadd.f32 %v3313_v62, %v10047_v17  ;;  %v14148_v34 = vld [vmem:[#allocation66_spill] sm:$0xff] }
 0x458   : > { %v6680_v42 = vadd.f32 %v10466_v9, %v3411_v39  ;;  %3883 = vadd.xlane.f32.xlu1 %v3882_v33  ;;  %3876 = vadd.xlane.f32.xlu0 %v3875_v10  ;;  %v3888_v37 = vadd.f32 %v14148_v34, %v10665_v27  ;;  %v10690_v22 = vadd.f32 %v10289_v40, %v10097_v3  ;;  %v3415_v33 = vpop.f32.mrb[138].mxu1  ;;  %v3610_v10 = vld [vmem:[%s7973_s30 + $0x410] sm:$0xff]  ;;  %v14150_v40 = vld [vmem:[#allocation134_spill] sm:$0xff]  ;;  %v3605_v34 = vld [vmem:[%s7973_s30 + $0x3e8] sm:$0xff] }
 0x459   : > { %14147 = vst [vmem:[#allocation155_spill] sm:$0xff] %v10675_v50  ;;  %v10692_v28 = vadd.f32 %v6676_v29, %v3599_v26  ;;  %v6638_v15 = vadd.f32 %v3315_v57, %v10097_v3  ;;  %v4000_v47 = vadd.f32 %v10462_v32, %v10662_v44  ;;  %v10697_v18 = vadd.f32 %v6637_v43, %v3508_v14  ;;  %v3319_v32 = vpop.f32.mrb[74].mxu0  ;;  %v3514_v14 = vld [vmem:[%s7973_s30 + $0x110] sm:$0xff] }
 0x45a   : > { %v10699_v9 = vadd.f32 %v6678_v0, %v3604_v53  ;;  %v3889_v62 = vadd.f32 %v3888_v37, %v10677_v2  ;;  %v3994_v39 = vadd.f32 %v3993_v60, %v10660_v12  ;;  %v4054_v26 = vadd.f32 %v14150_v40, %v10675_v50  ;;  %v3417_v53 = vpop.f32.mrb[139].mxu1  ;;  %v3321_v30 = vpop.f32.mrb[75].mxu0  ;;  %v3515_v37 = vld [vmem:[%s7973_s30 + $0x118] sm:$0xff] }
 0x45b   : > { %v10706_v29 = vadd.f32 %v6620_v51, %v3645_v36  ;;  %v10708_v57 = vadd.f32 %v6638_v15, %v3509_v20  ;;  %v6682_v0 = vadd.f32 %v10475_v56, %v3415_v33  ;;  %v6639_v43 = vadd.f32 %v3319_v32, %v10047_v17  ;;  %v14152_v51 = vld [vmem:[#allocation69_spill] sm:$0xff] }
 0x45c   : > { %14149 = vst [vmem:[#allocation133_spill] sm:$0xff] %v10699_v9  ;;  %v6684_v60 = vadd.f32 %v10492_v63, %v3417_v53  ;;  %3890 = vadd.xlane.f32.xlu1 %v3889_v62  ;;  %3995 = vadd.xlane.f32.xlu0 %v3994_v39  ;;  %v3895_v20 = vadd.f32 %v14152_v51, %v10697_v18  ;;  %v3611_v62 = vld [vmem:[%s7973_s30 + $0x418] sm:$0xff]  ;;  %v3421_v39 = vpop.f32.mrb[140].mxu1 }
 0x45d   : > { %14151 = vst [vmem:[#allocation157_spill] sm:$0xff] %v10706_v29  ;;  %v6621_v36 = vadd.f32 %v10313_v49, %v9894_v55  ;;  %v10720_v15 = vadd.f32 %v6682_v0, %v3610_v10  ;;  %v6640_v56 = vadd.f32 %v3321_v30, %v10097_v3  ;;  %v4001_v33 = vadd.f32 %v4000_v47, %v10692_v28  ;;  %v3616_v0 = vld [vmem:[%s7973_s30 + $0x440] sm:$0xff]  ;;  %v3423_v53 = vpop.f32.mrb[141].mxu1  ;;  %v3651_v50 = vld [vmem:[%s7973_s30 + $0x558] sm:$0xff] }
 0x45e   : > { %v10724_v40 = vadd.f32 %v6680_v42, %v3605_v34  ;;  %v10726_v63 = vadd.f32 %v6639_v43, %v3514_v14  ;;  %v3896_v32 = vadd.f32 %v3895_v20, %v10708_v57  ;;  %v4007_v49 = vadd.f32 %v10488_v31, %v10699_v9  ;;  %v3325_v42 = vpop.f32.mrb[76].mxu0  ;;  %v3520_v34 = vld [vmem:[%s7973_s30 + $0x140] sm:$0xff]  ;;  %v3650_v43 = vld [vmem:[%s7973_s30 + $0x550] sm:$0xff]  ;;  %v3521_v20 = vld [vmem:[%s7973_s30 + $0x148] sm:$0xff] }
 0x45f   : > { %v10734_v10 = vadd.f32 %v10325_v21, %v10047_v17  ;;  %v6622_v30 = vadd.f32 %v10327_v45, %v9959_v35  ;;  %v10738_v47 = vadd.f32 %v6640_v56, %v3515_v37  ;;  %v6686_v14 = vadd.f32 %v10506_v4, %v3421_v39  ;;  %v3327_v51 = vpop.f32.mrb[77].mxu0  ;;  %v14153_v45 = vld [vmem:[#allocation29_spill] sm:$0xff] }
 0x460   : > { %v6641_v31 = vadd.f32 %v3325_v42, %v10047_v17  ;;  %v6688_v21 = vadd.f32 %v10515_v8, %v3423_v53  ;;  %4002 = vadd.xlane.f32.xlu1 %v4001_v33  ;;  %3897 = vadd.xlane.f32.xlu0 %v3896_v32  ;;  %v3902_v37 = vadd.f32 %v14153_v45, %v10726_v63  ;;  %v3427_v33 = vpop.f32.mrb[142].mxu1  ;;  %v3622_v32 = vld [vmem:[%s7973_s30 + $0x470] sm:$0xff] }
 0x461   : > { %v10750_v56 = vadd.f32 %v4054_v26, %v10706_v29  ;;  %v10752_v4 = vadd.f32 %v6684_v60, %v3611_v62  ;;  %v6642_v39 = vadd.f32 %v3327_v51, %v10097_v3  ;;  %v4014_v42 = vadd.f32 %v10502_v1, %v10720_v15  ;;  %v3617_v1 = vld [vmem:[%s7973_s30 + $0x448] sm:$0xff]  ;;  %v3527_v29 = vld [vmem:[%s7973_s30 + $0x178] sm:$0xff] }
 0x462   : > { %v10758_v9 = vadd.f32 %v6641_v31, %v3520_v34  ;;  %v10760_v8 = vadd.f32 %v6686_v14, %v3616_v0  ;;  %v3903_v53 = vadd.f32 %v3902_v37, %v10738_v47  ;;  %v4008_v26 = vadd.f32 %v4007_v49, %v10724_v40  ;;  %v3331_v34 = vpop.f32.mrb[78].mxu0  ;;  %v3526_v31 = vld [vmem:[%s7973_s30 + $0x170] sm:$0xff]  ;;  %v3429_v0 = vpop.f32.mrb[143].mxu1 }
 0x463   : > { %v10765_v45 = vadd.f32 %v6621_v36, %v3650_v43  ;;  %v10769_v60 = vadd.f32 %v10341_v25, %v10097_v3  ;;  %v10771_v62 = vadd.f32 %v6642_v39, %v3521_v20  ;;  %v6690_v14 = vadd.f32 %v10519_v38, %v3427_v33  ;;  %v3333_v37 = vpop.f32.mrb[79].mxu0  ;;  %v14155_v25 = vld [vmem:[#allocation67_spill] sm:$0xff] }
 0x464   : > { %v6643_v51 = vadd.f32 %v3331_v34, %v10047_v17  ;;  %v6692_v36 = vadd.f32 %v10531_v46, %v3429_v0  ;;  %3904 = vadd.xlane.f32.xlu1 %v3903_v53  ;;  %4009 = vadd.xlane.f32.xlu0 %v4008_v26  ;;  %v3909_v49 = vadd.f32 %v14155_v25, %v10758_v9  ;;  %v3623_v46 = vld [vmem:[%s7973_s30 + $0x478] sm:$0xff]  ;;  %v3433_v53 = vpop.f32.mrb[144].mxu1 }
 0x465   : > { %14154 = vst [vmem:[#allocation66_spill] sm:$0xff] %v10765_v45  ;;  %v10781_v43 = vadd.f32 %v6622_v30, %v3651_v50  ;;  %v10783_v20 = vadd.f32 %v6690_v14, %v3622_v32  ;;  %v6644_v38 = vadd.f32 %v3333_v37, %v10097_v3  ;;  %v4015_v39 = vadd.f32 %v4014_v42, %v10752_v4  ;;  %v14160_v30 = vld [vmem:[#allocation136_spill] sm:$0xff]  ;;  %v3532_v42 = vld [vmem:[%s7973_s30 + $0x1a0] sm:$0xff] }
 0x466   : > { %v10787_v33 = vadd.f32 %v6688_v21, %v3617_v1  ;;  %v10789_v34 = vadd.f32 %v6643_v51, %v3526_v31  ;;  %v3910_v26 = vadd.f32 %v3909_v49, %v10771_v62  ;;  %v4021_v50 = vadd.f32 %v10527_v23, %v10760_v8  ;;  %v3337_v21 = vpop.f32.mrb[80].mxu0  ;;  %v3628_v31 = vld [vmem:[%s7973_s30 + $0x4a0] sm:$0xff]  ;;  %v3435_v51 = vpop.f32.mrb[145].mxu1  ;;  %v3533_v23 = vld [vmem:[%s7973_s30 + $0x1a8] sm:$0xff] }
 0x467   : > { %14156 = vst [vmem:[#allocation134_spill] sm:$0xff] %v10781_v43  ;;  %14157 = vst [vmem:[#allocation69_spill] sm:$0xff] %v10783_v20  ;;  %v4061_v32 = vadd.f32 %v14160_v30, %v10765_v45  ;;  %v6623_v14 = vadd.f32 %v10367_v24, %v9894_v55  ;;  %v10799_v0 = vadd.f32 %v6644_v38, %v3527_v29  ;;  %v3339_v25 = vpop.f32.mrb[81].mxu0  ;;  %v3634_v30 = vld [vmem:[%s7973_s30 + $0x4d0] sm:$0xff] }
 0x468   : > { %14158 = vst [vmem:[#allocation29_spill] sm:$0xff] %v10787_v33  ;;  %14159 = vst [vmem:[#allocation67_spill] sm:$0xff] %v10789_v34  ;;  %v6694_v1 = vadd.f32 %v10539_v48, %v3433_v53  ;;  %v6645_v37 = vadd.f32 %v3337_v21, %v10047_v17  ;;  %v6696_v49 = vadd.f32 %v10552_v11, %v3435_v51  ;;  %4016 = vadd.xlane.f32.xlu1 %v4015_v39  ;;  %v3656_v11 = vld [vmem:[%s7973_s30 + $0x580] sm:$0xff] }
 0x469   : > { %14161 = vst [vmem:[#allocation136_spill] sm:$0xff] %v10799_v0  ;;  %3911 = vadd.xlane.f32.xlu0 %v3910_v26  ;;  %v3916_v24 = vadd.f32 %v10255_v54, %v10789_v34  ;;  %v10811_v29 = vadd.f32 %v10379_v13, %v10047_v17  ;;  %v10813_v48 = vadd.f32 %v6692_v36, %v3623_v46  ;;  %v3439_v54 = vpop.f32.mrb[146].mxu1  ;;  %v14163_v46 = vld [vmem:[#allocation120_spill] sm:$0xff]  ;;  %v14165_v34 = vld [vmem:[#allocation41_spill] sm:$0xff] }
 0x46a   : > { %v6646_v38 = vadd.f32 %v3339_v25, %v10097_v3  ;;  %v4028_v53 = vadd.f32 %v10548_v16, %v10783_v20  ;;  %v10819_v39 = vadd.f32 %v6645_v37, %v3532_v42  ;;  %v10821_v26 = vadd.f32 %v6694_v1, %v3628_v31  ;;  %v3629_v25 = vld [vmem:[%s7973_s30 + $0x4a8] sm:$0xff]  ;;  %v3343_v42 = vpop.f32.mrb[82].mxu0  ;;  %v3538_v37 = vld [vmem:[%s7973_s30 + $0x1d0] sm:$0xff]  ;;  %v3441_v45 = vpop.f32.mrb[147].mxu1 }
 0x46b   : > { %14162 = vst [vmem:[#allocation184_spill] sm:$0xff] %v10813_v48  ;;  %v3917_v13 = vadd.f32 %v3916_v24, %v10799_v0  ;;  %v4022_v21 = vadd.f32 %v4021_v50, %v10787_v33  ;;  %v10827_v36 = vadd.f32 %v4061_v32, %v10781_v43  ;;  %v6624_v51 = vadd.f32 %v14163_v46, %v9959_v35  ;;  %v14164_v1 = vld [vmem:[#allocation68_spill] sm:$0xff]  ;;  %v3345_v0 = vpop.f32.mrb[83].mxu0  ;;  %v3539_v50 = vld [vmem:[%s7973_s30 + $0x1d8] sm:$0xff] }
 0x46c   : > { %v10831_v16 = vadd.f32 %v6646_v38, %v3533_v23  ;;  %v6698_v31 = vadd.f32 %v14164_v1, %v3439_v54  ;;  %v3657_v20 = vld [vmem:[%s7973_s30 + $0x588] sm:$0xff]  ;;  %v6647_v24 = vadd.f32 %v3343_v42, %v10047_v17  ;;  %v6700_v32 = vadd.f32 %v14165_v34, %v3441_v45  ;;  %v3635_v45 = vld [vmem:[%s7973_s30 + $0x4d8] sm:$0xff]  ;;  %v3445_v34 = vpop.f32.mrb[148].mxu1 }
 0x46d   : > { %3918 = vadd.xlane.f32.xlu1 %v3917_v13  ;;  %4023 = vadd.xlane.f32.xlu0 %v4022_v21  ;;  %v14166_v46 = vld [vmem:[#allocation104_spill] sm:$0xff]  ;;  %v10842_v38 = vadd.f32 %v6623_v14, %v3656_v11  ;;  %v6648_v54 = vadd.f32 %v3345_v0, %v10097_v3  ;;  %v4029_v1 = vadd.f32 %v4028_v53, %v10813_v48  ;;  %v3544_v53 = vld [vmem:[%s7973_s30 + $0x200] sm:$0xff] }
 0x46e   : > { %v3923_v23 = vadd.f32 %v14166_v46, %v10819_v39  ;;  %v10844_v43 = vadd.f32 %v6698_v31, %v3634_v30  ;;  %v10848_v42 = vadd.f32 %v6696_v49, %v3629_v25  ;;  %v10850_v33 = vadd.f32 %v6647_v24, %v3538_v37  ;;  %v14170_v21 = vld [vmem:[#allocation180_spill] sm:$0xff]  ;;  %v14172_v30 = vld [vmem:[#allocation115_spill] sm:$0xff]  ;;  %v3349_v49 = vpop.f32.mrb[84].mxu0  ;;  %v3447_v24 = vpop.f32.mrb[149].mxu1 }
 0x46f   : > { %14167 = vst [vmem:[#allocation120_spill] sm:$0xff] %v10842_v38  ;;  %v4035_v14 = vadd.f32 %v14170_v21, %v10821_v26  ;;  %v10856_v11 = vadd.f32 %v6624_v51, %v3657_v20  ;;  %v10860_v31 = vadd.f32 %v14172_v30, %v10097_v3  ;;  %v10862_v0 = vadd.f32 %v6648_v54, %v3539_v50  ;;  %v3640_v37 = vld [vmem:[%s7973_s30 + $0x500] sm:$0xff]  ;;  %v3545_v48 = vld [vmem:[%s7973_s30 + $0x208] sm:$0xff]  ;;  %v14175_v54 = vld [vmem:[#allocation137_spill] sm:$0xff] }
 0x470   : > { %14168 = vst [vmem:[#allocation68_spill] sm:$0xff] %v10844_v43  ;;  %14169 = vst [vmem:[#allocation41_spill] sm:$0xff] %v10850_v33  ;;  %v3924_v13 = vadd.f32 %v3923_v23, %v10831_v16  ;;  %v6702_v25 = vadd.f32 %v10607_v61, %v3445_v34  ;;  %v6649_v46 = vadd.f32 %v3349_v49, %v10047_v17  ;;  %v3351_v23 = vpop.f32.mrb[85].mxu0  ;;  %v14174_v51 = vld [vmem:[#allocation51_spill] sm:$0xff] }
 0x471   : > { %14171 = vst [vmem:[#allocation104_spill] sm:$0xff] %v10856_v11  ;;  %14173 = vst [vmem:[#allocation180_spill] sm:$0xff] %v10862_v0  ;;  %v6704_v20 = vadd.f32 %v10620_v41, %v3447_v24  ;;  %4030 = vadd.xlane.f32.xlu1 %v4029_v1  ;;  %v3930_v50 = vadd.f32 %v14174_v51, %v10850_v33  ;;  %v4068_v21 = vadd.f32 %v14175_v54, %v10842_v38  ;;  %v3451_v1 = vpop.f32.mrb[150].mxu1 }
 0x472   : > { %3925 = vadd.xlane.f32.xlu0 %v3924_v13  ;;  %v10874_v61 = vadd.f32 %v6700_v32, %v3635_v45  ;;  %v6650_v34 = vadd.f32 %v3351_v23, %v10097_v3  ;;  %v4042_v30 = vadd.f32 %v10616_v6, %v10844_v43  ;;  %v10879_v49 = vadd.f32 %v6649_v46, %v3544_v53  ;;  %v3646_v13 = vld [vmem:[%s7973_s30 + $0x530] sm:$0xff]  ;;  %v14178_v23 = vld [vmem:[#allocation171_spill] sm:$0xff]  ;;  %v3355_v53 = vpop.f32.mrb[86].mxu0  ;;  %v3453_v46 = vpop.f32.mrb[151].mxu1 }
 0x473   : > { %v10881_v41 = vadd.f32 %v6702_v25, %v3640_v37  ;;  %v3931_v24 = vadd.f32 %v3930_v50, %v10862_v0  ;;  %v4036_v51 = vadd.f32 %v4035_v14, %v10848_v42  ;;  %v14177_v32 = vld [vmem:[#allocation121_spill] sm:$0xff]  ;;  %v10890_v54 = vadd.f32 %v14178_v23, %v10047_v17  ;;  %v3641_v6 = vld [vmem:[%s7973_s30 + $0x508] sm:$0xff]  ;;  %v3357_v14 = vpop.f32.mrb[87].mxu0 }
 0x474   : > { %14176 = vst [vmem:[#allocation115_spill] sm:$0xff] %v10874_v61  ;;  %v6625_v45 = vadd.f32 %v14177_v32, %v9894_v55  ;;  %v10892_v38 = vadd.f32 %v6650_v34, %v3545_v48  ;;  %v3550_v25 = vld [vmem:[%s7973_s30 + $0x230] sm:$0xff]  ;;  %v6706_v37 = vadd.f32 %v10651_v52, %v3451_v1  ;;  %v6651_v50 = vadd.f32 %v3355_v53, %v10047_v17  ;;  %v3551_v0 = vld [vmem:[%s7973_s30 + $0x238] sm:$0xff]  ;;  %v14179_v32 = vld [vmem:[#allocation163_spill] sm:$0xff] }
 0x475   : > { %v3662_v43 = vld [vmem:[%s7973_s30 + $0x5b0] sm:$0xff]  ;;  %v6708_v55 = vadd.f32 %v10690_v22, %v3453_v46  ;;  %3932 = vadd.xlane.f32.xlu1 %v3931_v24  ;;  %v3937_v48 = vadd.f32 %v14179_v32, %v10879_v49  ;;  %v6652_v1 = vadd.f32 %v3357_v14, %v10097_v3  ;;  %v4043_v53 = vadd.f32 %v4042_v30, %v10874_v61  ;;  %v3647_v24 = vld [vmem:[%s7973_s30 + $0x538] sm:$0xff]  ;;  %v3361_v30 = vpop.f32.mrb[88].mxu0  ;;  %v3557_v61 = vld [vmem:[%s7973_s30 + $0x268] sm:$0xff] }
 0x476   : > { %4037 = vadd.xlane.f32.xlu0 %v4036_v51  ;;  %v14180_v34 = vld [vmem:[#allocation172_spill] sm:$0xff]  ;;  %v10905_v52 = vadd.f32 %v6706_v37, %v3646_v13  ;;  %v10909_v33 = vadd.f32 %v6704_v20, %v3641_v6  ;;  %v10911_v22 = vadd.f32 %v6651_v50, %v3550_v25  ;;  %v3457_v51 = vpop.f32.mrb[152].mxu1  ;;  %v10918_v13 = vadd.f32 %v4068_v21, %v10856_v11  ;;  %v3556_v20 = vld [vmem:[%s7973_s30 + $0x260] sm:$0xff]  ;;  %v3663_v32 = vld [vmem:[%s7973_s30 + $0x5b8] sm:$0xff] }
 0x477   : > { %v6626_v23 = vadd.f32 %v14180_v34, %v9959_v35  ;;  %v3938_v46 = vadd.f32 %v3937_v48, %v10892_v38  ;;  %v4049_v35 = vadd.f32 %v10673_v19, %v10881_v41  ;;  %v10920_v37 = vadd.f32 %v6625_v45, %v3662_v43  ;;  %v3652_v25 = vld [vmem:[%s7973_s30 + $0x560] sm:$0xff]  ;;  %v3459_v50 = vpop.f32.mrb[153].mxu1  ;;  %v3363_v34 = vpop.f32.mrb[89].mxu0  ;;  %v14184_v43 = vld [vmem:[#allocation164_spill] sm:$0xff] }
 0x478   : > { %14181 = vst [vmem:[#allocation51_spill] sm:$0xff] %v10905_v52  ;;  %v10922_v14 = vadd.f32 %v6652_v1, %v3551_v0  ;;  %v6710_v6 = vadd.f32 %v10734_v10, %v3457_v51  ;;  %v6653_v48 = vadd.f32 %v3361_v30, %v10047_v17  ;;  %v6712_v19 = vadd.f32 %v10769_v60, %v3459_v50  ;;  %v14185_v21 = vld [vmem:[#allocation122_spill] sm:$0xff]  ;;  %v3653_v11 = vld [vmem:[%s7973_s30 + $0x568] sm:$0xff] }
 0x479   : > { %14182 = vst [vmem:[#allocation137_spill] sm:$0xff] %v10920_v37  ;;  %4044 = vadd.xlane.f32.xlu1 %v4043_v53  ;;  %v3944_v0 = vadd.f32 %v14184_v43, %v10911_v22  ;;  %v6719_v10 = vadd.f32 %v14185_v21, %v10097_v3  ;;  %v10935_v45 = vadd.f32 %v6708_v55, %v3647_v24  ;;  %v3463_v53 = vpop.f32.mrb[154].mxu1  ;;  %v14187_v55 = vld [vmem:[#allocation138_spill] sm:$0xff] }
 0x47a   : > { %14183 = vst [vmem:[#allocation121_spill] sm:$0xff] %v10922_v14  ;;  %3939 = vadd.xlane.f32.xlu0 %v3938_v46  ;;  %v6654_v1 = vadd.f32 %v3363_v34, %v10097_v3  ;;  %v4056_v51 = vadd.f32 %v10750_v56, %v10905_v52  ;;  %v10940_v30 = vadd.f32 %v6653_v48, %v3556_v20  ;;  %v3658_v46 = vld [vmem:[%s7973_s30 + $0x590] sm:$0xff]  ;;  %v3367_v56 = vpop.f32.mrb[90].mxu0  ;;  %v3668_v48 = vld [vmem:[%s7973_s30 + $0x5e0] sm:$0xff] }
 0x47b   : > { %14186 = vst [vmem:[#allocation171_spill] sm:$0xff] %v10935_v45  ;;  %v10942_v60 = vadd.f32 %v6710_v6, %v3652_v25  ;;  %v3945_v50 = vadd.f32 %v3944_v0, %v10922_v14  ;;  %v4050_v43 = vadd.f32 %v4049_v35, %v10909_v33  ;;  %v4075_v24 = vadd.f32 %v14187_v55, %v10920_v37  ;;  %v3562_v20 = vld [vmem:[%s7973_s30 + $0x290] sm:$0xff]  ;;  %v3465_v25 = vpop.f32.mrb[155].mxu1  ;;  %v3369_v0 = vpop.f32.mrb[91].mxu0  ;;  %v3563_v14 = vld [vmem:[%s7973_s30 + $0x298] sm:$0xff]  ;;  %v3669_v37 = vld [vmem:[%s7973_s30 + $0x5e8] sm:$0xff] }
 0x47c   : > { %v10949_v21 = vadd.f32 %v6626_v23, %v3663_v32  ;;  %v10951_v34 = vadd.f32 %v6654_v1, %v3557_v61  ;;  %v6714_v6 = vadd.f32 %v10811_v29, %v3463_v53  ;;  %v6655_v52 = vadd.f32 %v3367_v56, %v10047_v17  ;;  %v14190_v23 = vld [vmem:[#allocation165_spill] sm:$0xff]  ;;  %v14191_v32 = vld [vmem:[#allocation175_spill] sm:$0xff] }
 0x47d   : > { %v6716_v35 = vadd.f32 %v10860_v31, %v3465_v25  ;;  %3946 = vadd.xlane.f32.xlu1 %v3945_v50  ;;  %v3951_v61 = vadd.f32 %v14190_v23, %v10940_v30  ;;  %v6721_v1 = vadd.f32 %v14191_v32, %v10047_v17  ;;  %v6656_v53 = vadd.f32 %v3369_v0, %v10097_v3  ;;  %v3659_v50 = vld [vmem:[%s7973_s30 + $0x598] sm:$0xff] }
 0x47e   : > { %14188 = vst [vmem:[#allocation163_spill] sm:$0xff] %v10949_v21  ;;  %14189 = vst [vmem:[#allocation172_spill] sm:$0xff] %v10951_v34  ;;  %4051 = vadd.xlane.f32.xlu0 %v4050_v43  ;;  %v10964_v29 = vadd.f32 %v6714_v6, %v3658_v46  ;;  %v4057_v55 = vadd.f32 %v4056_v51, %v10935_v45  ;;  %v10968_v56 = vadd.f32 %v6712_v19, %v3653_v11  ;;  %v3469_v43 = vpop.f32.mrb[156].mxu1  ;;  %v14194_v6 = vld [vmem:[#allocation174_spill] sm:$0xff]  ;;  %v3373_v51 = vpop.f32.mrb[92].mxu0 }
 0x47f   : > { %v10970_v31 = vadd.f32 %v6655_v52, %v3562_v20  ;;  %v3952_v25 = vadd.f32 %v3951_v61, %v10951_v34  ;;  %v4063_v23 = vadd.f32 %v10827_v36, %v10942_v60  ;;  %v4076_v46 = vadd.f32 %v4075_v24, %v10949_v21  ;;  %v3568_v11 = vld [vmem:[%s7973_s30 + $0x2c0] sm:$0xff]  ;;  %v3471_v20 = vpop.f32.mrb[157].mxu1  ;;  %v3375_v45 = vpop.f32.mrb[93].mxu0  ;;  %v3569_v34 = vld [vmem:[%s7973_s30 + $0x2c8] sm:$0xff] }
 0x480   : > { %14192 = vst [vmem:[#allocation164_spill] sm:$0xff] %v10964_v29  ;;  %v10978_v32 = vadd.f32 %v14194_v6, %v3668_v48  ;;  %v10980_v0 = vadd.f32 %v6656_v53, %v3563_v14  ;;  %v6718_v52 = vadd.f32 %v10890_v54, %v3469_v43  ;;  %v3664_v19 = vld [vmem:[%s7973_s30 + $0x5c0] sm:$0xff]  ;;  %v6657_v61 = vadd.f32 %v3373_v51, %v10047_v17  ;;  %v14198_v48 = vld [vmem:[#allocation177_spill] sm:$0xff] }
 0x481   : > { %14193 = vst [vmem:[#allocation122_spill] sm:$0xff] %v10970_v31  ;;  %v6720_v36 = vadd.f32 %v6719_v10, %v3471_v20  ;;  %4058 = vadd.xlane.f32.xlu1 %v4057_v55  ;;  %v14197_v24 = vld [vmem:[#allocation166_spill] sm:$0xff]  ;;  %v6723_v53 = vadd.f32 %v14198_v48, %v10097_v3  ;;  %v10992_v54 = vadd.f32 %v6716_v35, %v3659_v50  ;;  %v3665_v55 = vld [vmem:[%s7973_s30 + $0x5c8] sm:$0xff] }
 0x482   : > { %14195 = vst [vmem:[#allocation138_spill] sm:$0xff] %v10978_v32  ;;  %14196 = vst [vmem:[#allocation165_spill] sm:$0xff] %v10980_v0  ;;  %3953 = vadd.xlane.f32.xlu0 %v3952_v25  ;;  %v3958_v14 = vadd.f32 %v14197_v24, %v10970_v31  ;;  %v6658_v43 = vadd.f32 %v3375_v45, %v10097_v3  ;;  %v4070_v6 = vadd.f32 %v10918_v13, %v10964_v29  ;;  %v3475_v25 = vpop.f32.mrb[158].mxu1  ;;  %v14199_v48 = vld [vmem:[#allocation140_spill] sm:$0xff]  ;;  %v3379_v13 = vpop.f32.mrb[94].mxu0 }
 0x483   : > { %v10997_v51 = vadd.f32 %v6657_v61, %v3568_v11  ;;  %v10999_v10 = vadd.f32 %v6718_v52, %v3664_v19  ;;  %v4064_v24 = vadd.f32 %v4063_v23, %v10968_v56  ;;  %v4082_v35 = vadd.f32 %v14199_v48, %v10978_v32  ;;  %v14200_v50 = vld [vmem:[#allocation176_spill] sm:$0xff]  ;;  %v3477_v52 = vpop.f32.mrb[159].mxu1  ;;  %v3381_v31 = vpop.f32.mrb[95].mxu0 }
 0x484   : > { %v3959_v20 = vadd.f32 %v3958_v14, %v10980_v0  ;;  %v11007_v21 = vadd.f32 %v14200_v50, %v3669_v37  ;;  %v11009_v45 = vadd.f32 %v6658_v43, %v3569_v34  ;;  %v3574_v11 = vld [vmem:[%s7973_s30 + $0x2f0] sm:$0xff]  ;;  %v6722_v61 = vadd.f32 %v6721_v1, %v3475_v25  ;;  %v3575_v14 = vld [vmem:[%s7973_s30 + $0x2f8] sm:$0xff] }
 0x485   : > { %v3670_v29 = vld [vmem:[%s7973_s30 + $0x5f0] sm:$0xff]  ;;  %v6659_v19 = vadd.f32 %v3379_v13, %v10047_v17  ;;  %v6724_v0 = vadd.f32 %v6723_v53, %v3477_v52  ;;  %v14203_v37 = vld [vmem:[#allocation170_spill] sm:$0xff]  ;;  %v11019_v43 = vadd.f32 %v6720_v36, %v3665_v55  ;;  %v6660_v1 = vadd.f32 %v3381_v31, %v10097_v3 }
 0x486   : > { %14201 = vst [vmem:[#allocation175_spill] sm:$0xff] %v11007_v21  ;;  %3960 = vadd.xlane.f32.xlu1 %v3959_v20  ;;  %4065 = vadd.xlane.f32.xlu0 %v4064_v24  ;;  %v14202_v23 = vld [vmem:[#allocation116_spill] sm:$0xff]  ;;  %v14204_v50 = vld [vmem:[#allocation169_spill] sm:$0xff]  ;;  %v4071_v25 = vadd.f32 %v4070_v6, %v10992_v54  ;;  %v11025_v17 = vadd.f32 %v6722_v61, %v3670_v29  ;;  %v14210_v61 = vld [vmem:[#allocation46_spill] sm:$0xff] }
 0x487   : > { %v3965_v48 = vadd.f32 %v14202_v23, %v10997_v51  ;;  %v3971_v34 = vadd.f32 %v14204_v50, %v14203_v37  ;;  %14205 = vst [vmem:[#allocation174_spill] sm:$0xff] %v11019_v43  ;;  %v11023_v32 = vadd.f32 %v6659_v19, %v3574_v11  ;;  %v4077_v20 = vadd.f32 %v4076_v46, %v10999_v10  ;;  %v3671_v13 = vld [vmem:[%s7973_s30 + $0x5f8] sm:$0xff]  ;;  %v14214_v23 = vld [vmem:[#allocation139_spill] sm:$0xff] }
 0x488   : > { %14207 = vst [vmem:[#allocation177_spill] sm:$0xff] %v11025_v17  ;;  %v11029_v24 = vadd.f32 %v6660_v1, %v3575_v14  ;;  %v4083_v52 = vadd.f32 %v4082_v35, %v11007_v21  ;;  %v11034_v3 = vadd.f32 %v6724_v0, %v3671_v13  ;;  %v14212_v14 = vld [vmem:[#allocation47_spill] sm:$0xff] }
 0x489   : > { %14206 = vst [vmem:[#allocation166_spill] sm:$0xff] %v11023_v32  ;;  %v3966_v53 = vadd.f32 %v3965_v48, %v11009_v45  ;;  %v3972_v36 = vadd.f32 %v3971_v34, %v11023_v32  ;;  %v4078_v29 = vadd.f32 %v4077_v20, %v11019_v43  ;;  %v14216_v34 = vld [vmem:[#allocation146_spill] sm:$0xff] }
 0x48a   : > { %14208 = vst [vmem:[#allocation140_spill] sm:$0xff] %v11029_v24  ;;  %4072 = vadd.xlane.f32.xlu1 %v4071_v25  ;;  %14209 = vst [vmem:[#allocation176_spill] sm:$0xff] %v11034_v3  ;;  %v4084_v6 = vadd.f32 %v4083_v52, %v11025_v17  ;;  %v14218_v25 = vld [vmem:[#allocation181_spill] sm:$0xff] }
 0x48b   : > { %3967 = vadd.xlane.f32.xlu0 %v3966_v53  ;;  %v3973_v31 = vadd.f32 %v3972_v36, %v11029_v24 }
 0x48c   : > { %v4085_v46 = vadd.f32 %v4084_v6, %v11034_v3 }
 0x48e   : > { %3974 = vadd.xlane.f32.xlu1 %v3973_v31  ;;  %v14220_v31 = vld [vmem:[#allocation38_spill] sm:$0xff] }
 0x48f   : > { %4079 = vadd.xlane.f32.xlu0 %v4078_v29 }
 0x492   : > { %4086 = vadd.xlane.f32.xlu1 %v4085_v46 }
 0x4dd   : > { %v3870_v55 = vpop.xlane.xlu0 %3869 }
 0x4de   : > { %v4089_v11 = vmul.f32 0.0013020834, %v3870_v55  ;;  %v14222_v55 = vld [vmem:[#allocation21_spill] sm:$0xff] }
 0x4e0   : > { %v3989_v35 = vpop.xlane.xlu1 %3988  ;;  %v11041_v19 = vsub.f32 %v14210_v61, %v4089_v11  ;;  %v11044_v0 = vsub.f32 %v14212_v14, %v4089_v11  ;;  %v11047_v48 = vsub.f32 %v14214_v23, %v4089_v11  ;;  %v11050_v1 = vsub.f32 %v14216_v34, %v4089_v11  ;;  %v14224_v14 = vld [vmem:[#allocation20_spill] sm:$0xff] }
 0x4e1   : > { %v3982_v50 = vpop.xlane.xlu0 %3981  ;;  %v11053_v53 = vsub.f32 %v14218_v25, %v4089_v11  ;;  %v11059_v36 = vmul.f32 0.0013020834, %v3989_v35  ;;  %v11062_v29 = vsub.f32 %v14220_v31, %v4089_v11  ;;  %v14226_v11 = vld [vmem:[#allocation162_spill] sm:$0xff] }
 0x4e2   : > { %14211 = vst [vmem:[#allocation116_spill] sm:$0xff] %v11041_v19  ;;  %14213 = vst [vmem:[#allocation169_spill] sm:$0xff] %v11044_v0  ;;  %v4105_v20 = vmul.f32 0.0013020834, %v3982_v50  ;;  %v4313_v13 = vmul.f32 %v11041_v19, %v11041_v19  ;;  %v4314_v52 = vmul.f32 %v11044_v0, %v11044_v0  ;;  %v4315_v6 = vmul.f32 %v11047_v48, %v11047_v48  ;;  %v14228_v0 = vld [vmem:[#allocation106_spill] sm:$0xff] }
 0x4e3   : > { %14215 = vst [vmem:[#allocation46_spill] sm:$0xff] %v11047_v48  ;;  %14217 = vst [vmem:[#allocation47_spill] sm:$0xff] %v11050_v1  ;;  %v4316_v25 = vmul.f32 %v11050_v1, %v11050_v1  ;;  %v4317_v35 = vmul.f32 %v11053_v53, %v11053_v53  ;;  %v4318_v1 = vmul.f32 %v11062_v29, %v11062_v29 }
 0x4e4   : > { %14219 = vst [vmem:[#allocation139_spill] sm:$0xff] %v11053_v53  ;;  %14221 = vst [vmem:[#allocation146_spill] sm:$0xff] %v11062_v29  ;;  %v4505_v46 = vadd.f32 %v4314_v52, %v4313_v13  ;;  %v11067_v61 = vsub.f32 %v14222_v55, %v4105_v20  ;;  %v11070_v23 = vsub.f32 %v14224_v14, %v4105_v20  ;;  %v14230_v55 = vld [vmem:[#allocation179_spill] sm:$0xff] }
 0x4e5   : > { %v3884_v50 = vpop.xlane.xlu1 %3883  ;;  %v3877_v34 = vpop.xlane.xlu0 %3876  ;;  %v11077_v31 = vsub.f32 %v14226_v11, %v4105_v20  ;;  %v11080_v48 = vsub.f32 %v14228_v0, %v4105_v20  ;;  %v11083_v19 = vsub.f32 %v14230_v55, %v4105_v20  ;;  %v11090_v3 = vsub.f32 %v10590_v5, %v4105_v20  ;;  %v14233_v0 = vld [vmem:[#allocation22_spill] sm:$0xff]  ;;  %v14237_v55 = vld [vmem:[#allocation73_spill] sm:$0xff] }
 0x4e6   : > { %14223 = vst [vmem:[#allocation181_spill] sm:$0xff] %v11067_v61  ;;  %14225 = vst [vmem:[#allocation38_spill] sm:$0xff] %v11070_v23  ;;  %v4091_v13 = vmul.f32 0.0013020834, %v3884_v50  ;;  %v4506_v52 = vadd.f32 %v4505_v46, %v4315_v6  ;;  %v4409_v14 = vmul.f32 %v11067_v61, %v11067_v61  ;;  %v4410_v11 = vmul.f32 %v11070_v23, %v11070_v23  ;;  %v14235_v46 = vld [vmem:[#allocation72_spill] sm:$0xff]  ;;  %v14239_v61 = vld [vmem:[#allocation23_spill] sm:$0xff] }
 0x4e7   : > { %14227 = vst [vmem:[#allocation21_spill] sm:$0xff] %v11077_v31  ;;  %14229 = vst [vmem:[#allocation20_spill] sm:$0xff] %v11080_v48  ;;  %v11096_v53 = vsub.f32 %v14233_v0, %v11059_v36  ;;  %v11106_v29 = vsub.f32 %v14239_v61, %v11059_v36  ;;  %v4090_v5 = vmul.f32 0.0013020834, %v3877_v34  ;;  %v4411_v23 = vmul.f32 %v11077_v31, %v11077_v31  ;;  %v14241_v0 = vld [vmem:[#allocation142_spill] sm:$0xff] }
 0x4e8   : > { %14231 = vst [vmem:[#allocation162_spill] sm:$0xff] %v11083_v19  ;;  %14232 = vst [vmem:[#allocation106_spill] sm:$0xff] %v11090_v3  ;;  %v4507_v6 = vadd.f32 %v4506_v52, %v4316_v25  ;;  %v11099_v50 = vsub.f32 %v14235_v46, %v4091_v13  ;;  %v11102_v17 = vsub.f32 %v14237_v55, %v4091_v13  ;;  %v14243_v55 = vld [vmem:[#allocation150_spill] sm:$0xff] }
 0x4e9   : > { %14234 = vst [vmem:[#allocation179_spill] sm:$0xff] %v11096_v53  ;;  %14240 = vst [vmem:[#allocation73_spill] sm:$0xff] %v11106_v29  ;;  %v3891_v20 = vpop.xlane.xlu1 %3890  ;;  %v3996_v21 = vpop.xlane.xlu0 %3995  ;;  %v4617_v24 = vadd.f32 %v4410_v11, %v4409_v14  ;;  %v11111_v32 = vsub.f32 %v14241_v0, %v4091_v13  ;;  %v4412_v52 = vmul.f32 %v11080_v48, %v11080_v48 }
 0x4ea   : > { %14236 = vst [vmem:[#allocation22_spill] sm:$0xff] %v11099_v50  ;;  %14238 = vst [vmem:[#allocation72_spill] sm:$0xff] %v11102_v17  ;;  %v4508_v25 = vadd.f32 %v4507_v6, %v4317_v35  ;;  %v4413_v46 = vmul.f32 %v11083_v19, %v11083_v19  ;;  %v11118_v61 = vsub.f32 %v14243_v55, %v4091_v13 }
 0x4eb   : > { %14242 = vst [vmem:[#allocation23_spill] sm:$0xff] %v11111_v32  ;;  %v4414_v34 = vmul.f32 %v11090_v3, %v11090_v3  ;;  %v4618_v37 = vadd.f32 %v4617_v24, %v4411_v23  ;;  %v4325_v14 = vmul.f32 %v11099_v50, %v11099_v50  ;;  %v4326_v11 = vmul.f32 %v11102_v17, %v11102_v17  ;;  %v14247_v23 = vld [vmem:[#allocation52_spill] sm:$0xff]  ;;  %v14249_v50 = vld [vmem:[#allocation70_spill] sm:$0xff] }
 0x4ec   : > { %14244 = vst [vmem:[#allocation142_spill] sm:$0xff] %v11118_v61  ;;  %v4509_v35 = vadd.f32 %v4508_v25, %v4318_v1  ;;  %v11127_v6 = vsub.f32 %v10632_v7, %v4091_v13  ;;  %v11130_v0 = vsub.f32 %v10644_v58, %v4091_v13  ;;  %v4327_v55 = vmul.f32 %v11111_v32, %v11111_v32  ;;  %v14251_v13 = vld [vmem:[#allocation141_spill] sm:$0xff] }
 0x4ed   : > { %v4003_v19 = vpop.xlane.xlu1 %4002  ;;  %v3898_v48 = vpop.xlane.xlu0 %3897  ;;  %v4619_v3 = vadd.f32 %v4618_v37, %v4412_v52  ;;  %v4519_v24 = vadd.f32 %v4326_v11, %v4325_v14  ;;  %v11135_v31 = vsub.f32 %v14247_v23, %v4090_v5  ;;  %v11138_v43 = vsub.f32 %v14249_v50, %v4090_v5  ;;  %v14252_v37 = vld [vmem:[#allocation148_spill] sm:$0xff]  ;;  %v14254_v14 = vld [vmem:[#allocation154_spill] sm:$0xff] }
 0x4ee   : > { %14245 = vst [vmem:[#allocation150_spill] sm:$0xff] %v11127_v6  ;;  %14246 = vst [vmem:[#allocation185_spill] sm:$0xff] %v11130_v0  ;;  %v11140_v1 = vmul.f32 0.0013020834, %v3891_v20  ;;  %v4107_v7 = vmul.f32 0.0013020834, %v3996_v21  ;;  %4510 = vadd.xlane.f32.xlu0 %v4509_v35  ;;  %v4328_v58 = vmul.f32 %v11118_v61, %v11118_v61  ;;  %v11145_v25 = vsub.f32 %v14251_v13, %v4090_v5 }
 0x4ef   : > { %14248 = vst [vmem:[#allocation52_spill] sm:$0xff] %v11135_v31  ;;  %14250 = vst [vmem:[#allocation70_spill] sm:$0xff] %v11138_v43  ;;  %v4620_v32 = vadd.f32 %v4619_v3, %v4413_v46  ;;  %v4520_v17 = vadd.f32 %v4519_v24, %v4327_v55  ;;  %v11148_v52 = vsub.f32 %v14252_v37, %v4090_v5  ;;  %v11161_v3 = vmul.f32 0.0013020834, %v4003_v19  ;;  %v14256_v13 = vld [vmem:[#allocation42_spill] sm:$0xff] }
 0x4f0   : > { %v11151_v11 = vsub.f32 %v14254_v14, %v4090_v5  ;;  %v4329_v50 = vmul.f32 %v11127_v6, %v11127_v6  ;;  %v4330_v21 = vmul.f32 %v11130_v0, %v11130_v0  ;;  %v4319_v20 = vmul.f32 %v11135_v31, %v11135_v31  ;;  %v14258_v31 = vld [vmem:[#allocation167_spill] sm:$0xff] }
 0x4f1   : > { %14253 = vst [vmem:[#allocation141_spill] sm:$0xff] %v11148_v52  ;;  %v4320_v35 = vmul.f32 %v11138_v43, %v11138_v43  ;;  %v3905_v46 = vpop.xlane.xlu1 %3904  ;;  %v4010_v55 = vpop.xlane.xlu0 %4009  ;;  %v4621_v24 = vadd.f32 %v4620_v32, %v4414_v34  ;;  %v4521_v23 = vadd.f32 %v4520_v17, %v4328_v58  ;;  %v11164_v37 = vsub.f32 %v14256_v13, %v4090_v5  ;;  %v14259_v17 = vld [vmem:[#allocation87_spill] sm:$0xff]  ;;  %v14261_v34 = vld [vmem:[#allocation132_spill] sm:$0xff] }
 0x4f2   : > { %14255 = vst [vmem:[#allocation148_spill] sm:$0xff] %v11151_v11  ;;  %v11166_v14 = vmul.f32 0.0013020834, %v3898_v48  ;;  %v4321_v0 = vmul.f32 %v11145_v25, %v11145_v25  ;;  %v11172_v61 = vsub.f32 %v14258_v31, %v11059_v36  ;;  %v4322_v43 = vmul.f32 %v11148_v52, %v11148_v52  ;;  %v14268_v52 = vld [vmem:[#allocation168_spill] sm:$0xff] }
 0x4f3   : > { %14257 = vst [vmem:[#allocation154_spill] sm:$0xff] %v11164_v37  ;;  %v4512_v6 = vadd.f32 %v4320_v35, %v4319_v20  ;;  %4622 = vadd.xlane.f32.xlu0 %v4621_v24  ;;  %v4522_v19 = vadd.f32 %v4521_v23, %v4329_v50  ;;  %v4323_v32 = vmul.f32 %v11151_v11, %v11151_v11  ;;  %v11190_v20 = vmul.f32 0.0013020834, %v3905_v46 }
 0x4f4   : > { %v11180_v48 = vsub.f32 %v14259_v17, %v11059_v36  ;;  %v11184_v58 = vsub.f32 %v14261_v34, %v11059_v36  ;;  %v4415_v31 = vmul.f32 %v11096_v53, %v11096_v53  ;;  %v4416_v50 = vmul.f32 %v11106_v29, %v11106_v29  ;;  %v14265_v29 = vld [vmem:[#allocation25_spill] sm:$0xff] }
 0x4f5   : > { %v4513_v5 = vadd.f32 %v4512_v6, %v4321_v0  ;;  %v4017_v35 = vpop.xlane.xlu1 %4016  ;;  %v4523_v23 = vadd.f32 %v4522_v19, %v4330_v21  ;;  %v4324_v13 = vmul.f32 %v11164_v37, %v11164_v37  ;;  %v14263_v6 = vld [vmem:[#allocation161_spill] sm:$0xff]  ;;  %v11198_v17 = vmul.f32 0.0013020834, %v4010_v55  ;;  %v14267_v19 = vld [vmem:[#allocation24_spill] sm:$0xff] }
 0x4f6   : > { %14260 = vst [vmem:[#allocation42_spill] sm:$0xff] %v11180_v48  ;;  %14262 = vst [vmem:[#allocation167_spill] sm:$0xff] %v11184_v58  ;;  %v3912_v24 = vpop.xlane.xlu0 %3911  ;;  %v11196_v0 = vsub.f32 %v14263_v6, %v11059_v36  ;;  %v4417_v53 = vmul.f32 %v11172_v61, %v11172_v61  ;;  %v4624_v11 = vadd.f32 %v4416_v50, %v4415_v31  ;;  %v14269_v6 = vld [vmem:[#allocation105_spill] sm:$0xff]  ;;  %v11218_v50 = vmul.f32 0.0013020834, %v4017_v35 }
 0x4f7   : > { %v4514_v34 = vadd.f32 %v4513_v5, %v4322_v43  ;;  %4524 = vadd.xlane.f32.xlu0 %v4523_v23  ;;  %v4418_v46 = vmul.f32 %v11180_v48, %v11180_v48  ;;  %v11205_v21 = vsub.f32 %v14265_v29, %v4107_v7  ;;  %v11208_v37 = vsub.f32 %v14267_v19, %v4107_v7 }
 0x4f8   : > { %14264 = vst [vmem:[#allocation87_spill] sm:$0xff] %v11196_v0  ;;  %v11211_v36 = vsub.f32 %v14268_v52, %v4107_v7  ;;  %v4419_v43 = vmul.f32 %v11184_v58, %v11184_v58  ;;  %v4625_v5 = vadd.f32 %v4624_v11, %v4417_v53  ;;  %v11216_v31 = vsub.f32 %v14269_v6, %v4107_v7 }
 0x4f9   : > { %14266 = vst [vmem:[#allocation132_spill] sm:$0xff] %v11205_v21  ;;  %v4515_v55 = vadd.f32 %v4514_v34, %v4323_v32  ;;  %v4420_v29 = vmul.f32 %v11196_v0, %v11196_v0  ;;  %v4421_v19 = vmul.f32 %v11205_v21, %v11205_v21  ;;  %v4422_v52 = vmul.f32 %v11208_v37, %v11208_v37  ;;  %v14271_v21 = vld [vmem:[#allocation74_spill] sm:$0xff] }
 0x4fa   : > { %v3919_v23 = vpop.xlane.xlu1 %3918  ;;  %v11226_v32 = vmul.f32 0.0013020834, %v3912_v24  ;;  %v4024_v58 = vpop.xlane.xlu0 %4023  ;;  %v4626_v53 = vadd.f32 %v4625_v5, %v4418_v46  ;;  %v11229_v11 = vsub.f32 %v10634_v59, %v4107_v7  ;;  %v11232_v35 = vsub.f32 %v10660_v12, %v4107_v7  ;;  %v14273_v46 = vld [vmem:[#allocation75_spill] sm:$0xff]  ;;  %v14275_v12 = vld [vmem:[#allocation144_spill] sm:$0xff] }
 0x4fb   : > { %v4516_v34 = vadd.f32 %v4515_v55, %v4324_v13  ;;  %v4423_v6 = vmul.f32 %v11211_v36, %v11211_v36  ;;  %v4631_v0 = vadd.f32 %v4422_v52, %v4421_v19  ;;  %v11238_v48 = vsub.f32 %v14271_v21, %v11140_v1  ;;  %v14277_v19 = vld [vmem:[#allocation151_spill] sm:$0xff] }
 0x4fc   : > { %14270 = vst [vmem:[#allocation161_spill] sm:$0xff] %v11232_v35  ;;  %v4627_v24 = vadd.f32 %v4626_v53, %v4419_v43  ;;  %v4424_v13 = vmul.f32 %v11216_v31, %v11216_v31  ;;  %v11244_v59 = vsub.f32 %v14273_v46, %v11140_v1  ;;  %v11248_v7 = vsub.f32 %v14275_v12, %v11140_v1 }
 0x4fd   : > { %14272 = vst [vmem:[#allocation25_spill] sm:$0xff] %v11238_v48  ;;  %4517 = vadd.xlane.f32.xlu1 %v4516_v34  ;;  %v11250_v55 = vmul.f32 0.0013020834, %v3919_v23  ;;  %v4632_v5 = vadd.f32 %v4631_v0, %v4423_v6  ;;  %v11254_v21 = vsub.f32 %v14277_v19, %v11140_v1  ;;  %v4331_v43 = vmul.f32 %v11238_v48, %v11238_v48 }
 0x4fe   : > { %14274 = vst [vmem:[#allocation24_spill] sm:$0xff] %v11244_v59  ;;  %14276 = vst [vmem:[#allocation168_spill] sm:$0xff] %v11248_v7  ;;  %v11258_v52 = vmul.f32 0.0013020834, %v4024_v58  ;;  %v4628_v34 = vadd.f32 %v4627_v24, %v4420_v29  ;;  %v4425_v53 = vmul.f32 %v11229_v11, %v11229_v11  ;;  %v4031_v46 = vpop.xlane.xlu1 %4030  ;;  %v4332_v12 = vmul.f32 %v11244_v59, %v11244_v59  ;;  %v14280_v59 = vld [vmem:[#allocation76_spill] sm:$0xff] }
 0x4ff   : > { %v4426_v0 = vmul.f32 %v11232_v35, %v11232_v35  ;;  %v4633_v23 = vadd.f32 %v4632_v5, %v4424_v13  ;;  %v11268_v6 = vsub.f32 %v10665_v27, %v11140_v1  ;;  %v11272_v58 = vsub.f32 %v10677_v2, %v11140_v1  ;;  %v3926_v29 = vpop.xlane.xlu0 %3925  ;;  %v14282_v13 = vld [vmem:[#allocation77_spill] sm:$0xff] }
 0x500   : > { %v4333_v24 = vmul.f32 %v11248_v7, %v11248_v7  ;;  %v4526_v19 = vadd.f32 %v4332_v12, %v4331_v43  ;;  %v11278_v48 = vsub.f32 %v14280_v59, %v11166_v14  ;;  %v11282_v5 = vsub.f32 %v14282_v13, %v11166_v14  ;;  %v14284_v1 = vld [vmem:[#allocation145_spill] sm:$0xff]  ;;  %v14286_v43 = vld [vmem:[#allocation152_spill] sm:$0xff] }
 0x501   : > { %14278 = vst [vmem:[#allocation105_spill] sm:$0xff] %v11268_v6  ;;  %14279 = vst [vmem:[#allocation74_spill] sm:$0xff] %v11272_v58  ;;  %4629 = vadd.xlane.f32.xlu1 %v4628_v34  ;;  %v4634_v27 = vadd.f32 %v4633_v23, %v4425_v53  ;;  %v11284_v35 = vmul.f32 0.0013020834, %v4031_v46  ;;  %v4334_v2 = vmul.f32 %v11254_v21, %v11254_v21  ;;  %v11300_v23 = vmul.f32 0.0013020834, %v3926_v29 }
 0x502   : > { %14281 = vst [vmem:[#allocation75_spill] sm:$0xff] %v11278_v48  ;;  %14283 = vst [vmem:[#allocation144_spill] sm:$0xff] %v11282_v5  ;;  %v11290_v34 = vsub.f32 %v14284_v1, %v11166_v14  ;;  %v4527_v7 = vadd.f32 %v4526_v19, %v4333_v24  ;;  %v11294_v12 = vsub.f32 %v14286_v43, %v11166_v14  ;;  %v3933_v29 = vpop.xlane.xlu1 %3932 }
 0x503   : > { %v4337_v59 = vmul.f32 %v11278_v48, %v11278_v48  ;;  %v4338_v53 = vmul.f32 %v11282_v5, %v11282_v5  ;;  %v4635_v46 = vadd.f32 %v4634_v27, %v4426_v0  ;;  %v11304_v13 = vsub.f32 %v10697_v18, %v11166_v14  ;;  %v14290_v18 = vld [vmem:[#allocation27_spill] sm:$0xff] }
 0x504   : > { %14285 = vst [vmem:[#allocation151_spill] sm:$0xff] %v11290_v34  ;;  %14287 = vst [vmem:[#allocation76_spill] sm:$0xff] %v11294_v12  ;;  %v11308_v24 = vsub.f32 %v10708_v57, %v11166_v14  ;;  %v4335_v19 = vmul.f32 %v11268_v6, %v11268_v6  ;;  %v4528_v1 = vadd.f32 %v4527_v7, %v4334_v2  ;;  %v14292_v57 = vld [vmem:[#allocation26_spill] sm:$0xff]  ;;  %v14294_v5 = vld [vmem:[#allocation103_spill] sm:$0xff] }
 0x505   : > { %14288 = vst [vmem:[#allocation77_spill] sm:$0xff] %v11304_v13  ;;  %v4339_v43 = vmul.f32 %v11290_v34, %v11290_v34  ;;  %v4533_v48 = vadd.f32 %v4338_v53, %v4337_v59  ;;  %4636 = vadd.xlane.f32.xlu0 %v4635_v46  ;;  %v4336_v0 = vmul.f32 %v11272_v58, %v11272_v58  ;;  %v14295_v46 = vld [vmem:[#allocation117_spill] sm:$0xff] }
 0x506   : > { %14289 = vst [vmem:[#allocation145_spill] sm:$0xff] %v11308_v24  ;;  %v11318_v27 = vsub.f32 %v14290_v18, %v11161_v3  ;;  %v11322_v14 = vsub.f32 %v14292_v57, %v11161_v3  ;;  %v11326_v7 = vsub.f32 %v14294_v5, %v11161_v3  ;;  %v4529_v2 = vadd.f32 %v4528_v1, %v4335_v19 }
 0x507   : > { %v4340_v59 = vmul.f32 %v11294_v12, %v11294_v12  ;;  %v4534_v53 = vadd.f32 %v4533_v48, %v4339_v43  ;;  %v11332_v34 = vsub.f32 %v14295_v46, %v11161_v3  ;;  %v4341_v18 = vmul.f32 %v11304_v13, %v11304_v13  ;;  %v4038_v43 = vpop.xlane.xlu0 %4037 }
 0x508   : > { %14291 = vst [vmem:[#allocation152_spill] sm:$0xff] %v11318_v27  ;;  %14293 = vst [vmem:[#allocation27_spill] sm:$0xff] %v11322_v14  ;;  %v4342_v57 = vmul.f32 %v11308_v24, %v11308_v24  ;;  %v4427_v58 = vmul.f32 %v11318_v27, %v11318_v27  ;;  %v4428_v5 = vmul.f32 %v11322_v14, %v11322_v14  ;;  %v11342_v12 = vmul.f32 0.0013020834, %v3933_v29  ;;  %v14296_v24 = vld [vmem:[#allocation28_spill] sm:$0xff]  ;;  %v14298_v27 = vld [vmem:[#allocation31_spill] sm:$0xff] }
 0x509   : > { %v4530_v19 = vadd.f32 %v4529_v2, %v4336_v0  ;;  %v4535_v1 = vadd.f32 %v4534_v53, %v4340_v59  ;;  %v11346_v48 = vsub.f32 %v10662_v44, %v11161_v3  ;;  %v4429_v46 = vmul.f32 %v11326_v7, %v11326_v7  ;;  %v14301_v2 = vld [vmem:[#allocation110_spill] sm:$0xff] }
 0x50a   : > { %v4638_v13 = vadd.f32 %v4428_v5, %v4427_v58  ;;  %v11352_v6 = vsub.f32 %v14296_v24, %v11198_v17  ;;  %v11356_v14 = vsub.f32 %v14298_v27, %v11198_v17  ;;  %v11360_v29 = vsub.f32 %v10692_v28, %v11161_v3  ;;  %v14303_v24 = vld [vmem:[#allocation119_spill] sm:$0xff]  ;;  %v14305_v5 = vld [vmem:[#allocation133_spill] sm:$0xff] }
 0x50b   : > { %4531 = vadd.xlane.f32.xlu1 %v4530_v19  ;;  %v4536_v0 = vadd.f32 %v4535_v1, %v4341_v18  ;;  %v4430_v44 = vmul.f32 %v11332_v34, %v11332_v34  ;;  %v11366_v58 = vsub.f32 %v14301_v2, %v11198_v17  ;;  %v11370_v53 = vsub.f32 %v14303_v24, %v11198_v17 }
 0x50c   : > { %14297 = vst [vmem:[#allocation26_spill] sm:$0xff] %v11352_v6  ;;  %14299 = vst [vmem:[#allocation103_spill] sm:$0xff] %v11356_v14  ;;  %v4639_v59 = vadd.f32 %v4638_v13, %v4429_v46  ;;  %v4433_v27 = vmul.f32 %v11352_v6, %v11352_v6  ;;  %v4434_v18 = vmul.f32 %v11356_v14, %v11356_v14  ;;  %v11376_v3 = vmul.f32 0.0013020834, %v4038_v43  ;;  %v4045_v43 = vpop.xlane.xlu1 %4044  ;;  %v14312_v14 = vld [vmem:[#allocation147_spill] sm:$0xff] }
 0x50d   : > { %14300 = vst [vmem:[#allocation117_spill] sm:$0xff] %v11360_v29  ;;  %14302 = vst [vmem:[#allocation28_spill] sm:$0xff] %v11366_v58  ;;  %v4537_v28 = vadd.f32 %v4536_v0, %v4342_v57  ;;  %v11380_v19 = vsub.f32 %v14305_v5, %v11198_v17  ;;  %v11384_v13 = vsub.f32 %v10724_v40, %v11198_v17  ;;  %v14308_v0 = vld [vmem:[#allocation78_spill] sm:$0xff]  ;;  %v14310_v40 = vld [vmem:[#allocation79_spill] sm:$0xff] }
 0x50e   : > { %14304 = vst [vmem:[#allocation31_spill] sm:$0xff] %v11370_v53  ;;  %v4431_v1 = vmul.f32 %v11346_v48, %v11346_v48  ;;  %v4640_v46 = vadd.f32 %v4639_v59, %v4430_v44  ;;  %v4435_v2 = vmul.f32 %v11366_v58, %v11366_v58  ;;  %v4645_v24 = vadd.f32 %v4434_v18, %v4433_v27 }
 0x50f   : > { %14306 = vst [vmem:[#allocation110_spill] sm:$0xff] %v11380_v19  ;;  %14307 = vst [vmem:[#allocation119_spill] sm:$0xff] %v11384_v13  ;;  %4538 = vadd.xlane.f32.xlu0 %v4537_v28  ;;  %v4432_v57 = vmul.f32 %v11360_v29, %v11360_v29  ;;  %v11394_v5 = vsub.f32 %v14308_v0, %v11190_v20  ;;  %v11398_v17 = vsub.f32 %v14310_v40, %v11190_v20  ;;  %v14313_v28 = vld [vmem:[#allocation153_spill] sm:$0xff] }
 0x510   : > { %v11402_v44 = vsub.f32 %v14312_v14, %v11190_v20  ;;  %v4641_v59 = vadd.f32 %v4640_v46, %v4431_v1  ;;  %v4436_v27 = vmul.f32 %v11370_v53, %v11370_v53  ;;  %v4646_v18 = vadd.f32 %v4645_v24, %v4435_v2  ;;  %v3940_v24 = vpop.xlane.xlu0 %3939 }
 0x511   : > { %14309 = vst [vmem:[#allocation133_spill] sm:$0xff] %v11394_v5  ;;  %14311 = vst [vmem:[#allocation78_spill] sm:$0xff] %v11398_v17  ;;  %v11408_v58 = vsub.f32 %v14313_v28, %v11190_v20  ;;  %v4437_v0 = vmul.f32 %v11380_v19, %v11380_v19  ;;  %v4438_v40 = vmul.f32 %v11384_v13, %v11384_v13  ;;  %v11418_v53 = vmul.f32 0.0013020834, %v4045_v43  ;;  %v14314_v13 = vld [vmem:[#allocation80_spill] sm:$0xff] }
 0x512   : > { %v4343_v6 = vmul.f32 %v11394_v5, %v11394_v5  ;;  %v4344_v14 = vmul.f32 %v11398_v17, %v11398_v17  ;;  %v4642_v1 = vadd.f32 %v4641_v59, %v4432_v57  ;;  %v4647_v46 = vadd.f32 %v4646_v18, %v4436_v27  ;;  %v14316_v5 = vld [vmem:[#allocation81_spill] sm:$0xff] }
 0x513   : > { %v11422_v2 = vsub.f32 %v10726_v63, %v11190_v20  ;;  %v4345_v28 = vmul.f32 %v11402_v44, %v11402_v44  ;;  %v11428_v29 = vsub.f32 %v14314_v13, %v11226_v32  ;;  %v11432_v17 = vsub.f32 %v14316_v5, %v11226_v32  ;;  %v14318_v59 = vld [vmem:[#allocation149_spill] sm:$0xff]  ;;  %v14320_v13 = vld [vmem:[#allocation156_spill] sm:$0xff] }
 0x514   : > { %v4540_v19 = vadd.f32 %v4344_v14, %v4343_v6  ;;  %4643 = vadd.xlane.f32.xlu1 %v4642_v1  ;;  %v4648_v57 = vadd.f32 %v4647_v46, %v4437_v0  ;;  %v11436_v43 = vsub.f32 %v10738_v47, %v11190_v20  ;;  %v4346_v63 = vmul.f32 %v11408_v58, %v11408_v58 }
 0x515   : > { %14315 = vst [vmem:[#allocation79_spill] sm:$0xff] %v11428_v29  ;;  %14317 = vst [vmem:[#allocation147_spill] sm:$0xff] %v11432_v17  ;;  %v11442_v6 = vsub.f32 %v14318_v59, %v11226_v32  ;;  %v11446_v18 = vsub.f32 %v14320_v13, %v11226_v32  ;;  %v4349_v5 = vmul.f32 %v11428_v29, %v11428_v29  ;;  %v11452_v20 = vmul.f32 0.0013020834, %v3940_v24  ;;  %v3947_v24 = vpop.xlane.xlu1 %3946  ;;  %v14328_v13 = vld [vmem:[#allocation129_spill] sm:$0xff] }
 0x516   : > { %v4541_v27 = vadd.f32 %v4540_v19, %v4345_v28  ;;  %v4350_v0 = vmul.f32 %v11432_v17, %v11432_v17  ;;  %v4649_v47 = vadd.f32 %v4648_v57, %v4438_v40  ;;  %v11456_v14 = vsub.f32 %v10758_v9, %v11226_v32  ;;  %v14324_v9 = vld [vmem:[#allocation32_spill] sm:$0xff] }
 0x517   : > { %14319 = vst [vmem:[#allocation153_spill] sm:$0xff] %v11442_v6  ;;  %14321 = vst [vmem:[#allocation80_spill] sm:$0xff] %v11446_v18  ;;  %v11460_v19 = vsub.f32 %v10771_v62, %v11226_v32  ;;  %v4347_v1 = vmul.f32 %v11422_v2, %v11422_v2  ;;  %v4351_v28 = vmul.f32 %v11442_v6, %v11442_v6  ;;  %v14326_v62 = vld [vmem:[#allocation35_spill] sm:$0xff] }
 0x518   : > { %14322 = vst [vmem:[#allocation81_spill] sm:$0xff] %v11456_v14  ;;  %v4542_v46 = vadd.f32 %v4541_v27, %v4346_v63  ;;  %v4547_v59 = vadd.f32 %v4350_v0, %v4349_v5  ;;  %4650 = vadd.xlane.f32.xlu0 %v4649_v47  ;;  %v4348_v40 = vmul.f32 %v11436_v43, %v11436_v43  ;;  %v14329_v47 = vld [vmem:[#allocation128_spill] sm:$0xff] }
 0x519   : > { %14323 = vst [vmem:[#allocation149_spill] sm:$0xff] %v11460_v19  ;;  %v11470_v57 = vsub.f32 %v14324_v9, %v11218_v50  ;;  %v11474_v32 = vsub.f32 %v14326_v62, %v11218_v50  ;;  %v11478_v63 = vsub.f32 %v14328_v13, %v11218_v50  ;;  %v4352_v5 = vmul.f32 %v11446_v18, %v11446_v18 }
 0x51a   : > { %v4543_v27 = vadd.f32 %v4542_v46, %v4347_v1  ;;  %v4548_v0 = vadd.f32 %v4547_v59, %v4351_v28  ;;  %v11484_v6 = vsub.f32 %v14329_v47, %v11218_v50  ;;  %v4353_v9 = vmul.f32 %v11456_v14, %v11456_v14  ;;  %v4052_v59 = vpop.xlane.xlu0 %4051 }
 0x51b   : > { %14325 = vst [vmem:[#allocation156_spill] sm:$0xff] %v11470_v57  ;;  %14327 = vst [vmem:[#allocation32_spill] sm:$0xff] %v11474_v32  ;;  %v4354_v62 = vmul.f32 %v11460_v19, %v11460_v19  ;;  %v4439_v17 = vmul.f32 %v11470_v57, %v11470_v57  ;;  %v4440_v1 = vmul.f32 %v11474_v32, %v11474_v32  ;;  %v11494_v18 = vmul.f32 0.0013020834, %v3947_v24  ;;  %v14331_v19 = vld [vmem:[#allocation36_spill] sm:$0xff]  ;;  %v14333_v57 = vld [vmem:[#allocation39_spill] sm:$0xff] }
 0x51c   : > { %v4544_v46 = vadd.f32 %v4543_v27, %v4348_v40  ;;  %v4549_v13 = vadd.f32 %v4548_v0, %v4352_v5  ;;  %v11498_v28 = vsub.f32 %v10720_v15, %v11218_v50  ;;  %v4441_v47 = vmul.f32 %v11478_v63, %v11478_v63  ;;  %v14336_v27 = vld [vmem:[#allocation118_spill] sm:$0xff] }
 0x51d   : > { %v4652_v14 = vadd.f32 %v4440_v1, %v4439_v17  ;;  %v11504_v29 = vsub.f32 %v14331_v19, %v11258_v52  ;;  %v11508_v32 = vsub.f32 %v14333_v57, %v11258_v52  ;;  %v11512_v24 = vsub.f32 %v10752_v4, %v11218_v50  ;;  %v14338_v19 = vld [vmem:[#allocation124_spill] sm:$0xff] }
 0x51e   : > { %14330 = vst [vmem:[#allocation35_spill] sm:$0xff] %v11498_v28  ;;  %4545 = vadd.xlane.f32.xlu1 %v4544_v46  ;;  %v4550_v40 = vadd.f32 %v4549_v13, %v4353_v9  ;;  %v4442_v15 = vmul.f32 %v11484_v6, %v11484_v6  ;;  %v11518_v17 = vsub.f32 %v14336_v27, %v11258_v52  ;;  %v11528_v50 = vmul.f32 0.0013020834, %v4052_v59  ;;  %v14341_v46 = vld [vmem:[#allocation29_spill] sm:$0xff]  ;;  %v4059_v59 = vpop.xlane.xlu1 %4058 }
 0x51f   : > { %14332 = vst [vmem:[#allocation129_spill] sm:$0xff] %v11504_v29  ;;  %14334 = vst [vmem:[#allocation128_spill] sm:$0xff] %v11508_v32  ;;  %v4653_v5 = vadd.f32 %v4652_v14, %v4441_v47  ;;  %v11522_v0 = vsub.f32 %v14338_v19, %v11258_v52  ;;  %v4445_v57 = vmul.f32 %v11504_v29, %v11504_v29 }
 0x520   : > { %14335 = vst [vmem:[#allocation36_spill] sm:$0xff] %v11512_v24  ;;  %14337 = vst [vmem:[#allocation39_spill] sm:$0xff] %v11518_v17  ;;  %v4446_v9 = vmul.f32 %v11508_v32, %v11508_v32  ;;  %v4551_v4 = vadd.f32 %v4550_v40, %v4354_v62  ;;  %v11532_v1 = vsub.f32 %v10760_v8, %v11258_v52  ;;  %v14343_v8 = vld [vmem:[#allocation83_spill] sm:$0xff]  ;;  %v14347_v32 = vld [vmem:[#allocation158_spill] sm:$0xff] }
 0x521   : > { %14339 = vst [vmem:[#allocation118_spill] sm:$0xff] %v11522_v0  ;;  %v11536_v14 = vsub.f32 %v14341_v46, %v11258_v52  ;;  %v4443_v13 = vmul.f32 %v11498_v28, %v11498_v28  ;;  %v4654_v47 = vadd.f32 %v4653_v5, %v4442_v15  ;;  %v4447_v27 = vmul.f32 %v11518_v17, %v11518_v17  ;;  %v14345_v52 = vld [vmem:[#allocation84_spill] sm:$0xff] }
 0x522   : > { %14340 = vst [vmem:[#allocation124_spill] sm:$0xff] %v11532_v1  ;;  %v4659_v19 = vadd.f32 %v4446_v9, %v4445_v57  ;;  %4552 = vadd.xlane.f32.xlu0 %v4551_v4  ;;  %v4444_v62 = vmul.f32 %v11512_v24, %v11512_v24  ;;  %v11546_v40 = vsub.f32 %v14343_v8, %v11250_v55  ;;  %v14348_v4 = vld [vmem:[#allocation71_spill] sm:$0xff] }
 0x523   : > { %14342 = vst [vmem:[#allocation29_spill] sm:$0xff] %v11536_v14  ;;  %v11550_v46 = vsub.f32 %v14345_v52, %v11250_v55  ;;  %v11554_v15 = vsub.f32 %v14347_v32, %v11250_v55  ;;  %v4655_v5 = vadd.f32 %v4654_v47, %v4443_v13  ;;  %v4448_v57 = vmul.f32 %v11522_v0, %v11522_v0 }
 0x524   : > { %14344 = vst [vmem:[#allocation83_spill] sm:$0xff] %v11546_v40  ;;  %v4660_v9 = vadd.f32 %v4659_v19, %v4447_v27  ;;  %v11560_v17 = vsub.f32 %v14348_v4, %v11250_v55  ;;  %v4449_v8 = vmul.f32 %v11532_v1, %v11532_v1  ;;  %v4450_v52 = vmul.f32 %v11536_v14, %v11536_v14  ;;  %v14349_v27 = vld [vmem:[#allocation67_spill] sm:$0xff]  ;;  %v3954_v4 = vpop.xlane.xlu0 %3953  ;;  %v14351_v14 = vld [vmem:[#allocation85_spill] sm:$0xff] }
 0x525   : > { %14346 = vst [vmem:[#allocation84_spill] sm:$0xff] %v11550_v46  ;;  %v4355_v29 = vmul.f32 %v11546_v40, %v11546_v40  ;;  %v4356_v32 = vmul.f32 %v11550_v46, %v11550_v46  ;;  %v4656_v13 = vadd.f32 %v4655_v5, %v4444_v62  ;;  %v11570_v0 = vmul.f32 0.0013020834, %v4059_v59  ;;  %v14353_v40 = vld [vmem:[#allocation86_spill] sm:$0xff]  ;;  %v14355_v59 = vld [vmem:[#allocation136_spill] sm:$0xff] }
 0x526   : > { %v4661_v47 = vadd.f32 %v4660_v9, %v4448_v57  ;;  %v11574_v19 = vsub.f32 %v14349_v27, %v11250_v55  ;;  %v4357_v1 = vmul.f32 %v11554_v15, %v11554_v15  ;;  %v11580_v28 = vsub.f32 %v14351_v14, %v11300_v23  ;;  %v14357_v9 = vld [vmem:[#allocation33_spill] sm:$0xff]  ;;  %v14359_v14 = vld [vmem:[#allocation34_spill] sm:$0xff] }
 0x527   : > { %v4554_v24 = vadd.f32 %v4356_v32, %v4355_v29  ;;  %v11584_v46 = vsub.f32 %v14353_v40, %v11300_v23  ;;  %4657 = vadd.xlane.f32.xlu1 %v4656_v13  ;;  %v11588_v5 = vsub.f32 %v14355_v59, %v11250_v55  ;;  %v4358_v57 = vmul.f32 %v11560_v17, %v11560_v17 }
 0x528   : > { %14350 = vst [vmem:[#allocation158_spill] sm:$0xff] %v11574_v19  ;;  %14352 = vst [vmem:[#allocation71_spill] sm:$0xff] %v11580_v28  ;;  %v4662_v62 = vadd.f32 %v4661_v47, %v4449_v8  ;;  %v11594_v29 = vsub.f32 %v14357_v9, %v11300_v23  ;;  %v11598_v27 = vsub.f32 %v14359_v14, %v11300_v23  ;;  %v11604_v13 = vmul.f32 0.0013020834, %v3954_v4  ;;  %v3961_v4 = vpop.xlane.xlu1 %3960 }
 0x529   : > { %14354 = vst [vmem:[#allocation67_spill] sm:$0xff] %v11584_v46  ;;  %14356 = vst [vmem:[#allocation85_spill] sm:$0xff] %v11588_v5  ;;  %v4555_v32 = vadd.f32 %v4554_v24, %v4357_v1  ;;  %v4361_v40 = vmul.f32 %v11580_v28, %v11580_v28  ;;  %v4362_v8 = vmul.f32 %v11584_v46, %v11584_v46  ;;  %v14367_v46 = vld [vmem:[#allocation123_spill] sm:$0xff] }
 0x52a   : > { %14358 = vst [vmem:[#allocation86_spill] sm:$0xff] %v11594_v29  ;;  %14360 = vst [vmem:[#allocation136_spill] sm:$0xff] %v11598_v27  ;;  %v4663_v55 = vadd.f32 %v4662_v62, %v4450_v52  ;;  %v11608_v47 = vsub.f32 %v10819_v39, %v11300_v23  ;;  %v11612_v24 = vsub.f32 %v10831_v16, %v11300_v23  ;;  %v14363_v39 = vld [vmem:[#allocation40_spill] sm:$0xff]  ;;  %v14365_v16 = vld [vmem:[#allocation43_spill] sm:$0xff] }
 0x52b   : > { %v4359_v1 = vmul.f32 %v11574_v19, %v11574_v19  ;;  %v4556_v59 = vadd.f32 %v4555_v32, %v4358_v57  ;;  %v4363_v9 = vmul.f32 %v11594_v29, %v11594_v29  ;;  %v4561_v14 = vadd.f32 %v4362_v8, %v4361_v40 }
 0x52c   : > { %14361 = vst [vmem:[#allocation33_spill] sm:$0xff] %v11608_v47  ;;  %14362 = vst [vmem:[#allocation34_spill] sm:$0xff] %v11612_v24  ;;  %4664 = vadd.xlane.f32.xlu0 %v4663_v55  ;;  %v4360_v52 = vmul.f32 %v11588_v5, %v11588_v5  ;;  %v11622_v62 = vsub.f32 %v14363_v39, %v11284_v35  ;;  %v11626_v23 = vsub.f32 %v14365_v16, %v11284_v35  ;;  %v14368_v55 = vld [vmem:[#allocation126_spill] sm:$0xff] }
 0x52d   : > { %v11630_v57 = vsub.f32 %v14367_v46, %v11284_v35  ;;  %v4557_v32 = vadd.f32 %v4556_v59, %v4359_v1  ;;  %v4364_v40 = vmul.f32 %v11598_v27, %v11598_v27  ;;  %v4562_v8 = vadd.f32 %v4561_v14, %v4363_v9  ;;  %v14369_v9 = vld [vmem:[#allocation69_spill] sm:$0xff] }
 0x52e   : > { %14364 = vst [vmem:[#allocation40_spill] sm:$0xff] %v11622_v62  ;;  %14366 = vst [vmem:[#allocation43_spill] sm:$0xff] %v11626_v23  ;;  %v11636_v29 = vsub.f32 %v14368_v55, %v11284_v35  ;;  %v4365_v39 = vmul.f32 %v11608_v47, %v11608_v47  ;;  %v4366_v16 = vmul.f32 %v11612_v24, %v11612_v24  ;;  %v11646_v27 = vmul.f32 0.0013020834, %v3961_v4  ;;  %v4066_v55 = vpop.xlane.xlu0 %4065  ;;  %v14371_v24 = vld [vmem:[#allocation45_spill] sm:$0xff]  ;;  %v14375_v4 = vld [vmem:[#allocation184_spill] sm:$0xff] }
 0x52f   : > { %v4451_v28 = vmul.f32 %v11622_v62, %v11622_v62  ;;  %v4452_v46 = vmul.f32 %v11626_v23, %v11626_v23  ;;  %v4558_v1 = vadd.f32 %v4557_v32, %v4360_v52  ;;  %v4563_v59 = vadd.f32 %v4562_v8, %v4364_v40  ;;  %v14373_v62 = vld [vmem:[#allocation48_spill] sm:$0xff]  ;;  %v14377_v8 = vld [vmem:[#allocation173_spill] sm:$0xff] }
 0x530   : > { %v11650_v14 = vsub.f32 %v14369_v9, %v11284_v35  ;;  %v4453_v47 = vmul.f32 %v11630_v57, %v11630_v57  ;;  %v11656_v19 = vsub.f32 %v14371_v24, %v11376_v3  ;;  %v11660_v23 = vsub.f32 %v14373_v62, %v11376_v3  ;;  %v14379_v24 = vld [vmem:[#allocation127_spill] sm:$0xff] }
 0x531   : > { %v4666_v5 = vadd.f32 %v4452_v46, %v4451_v28  ;;  %4559 = vadd.xlane.f32.xlu1 %v4558_v1  ;;  %v4564_v52 = vadd.f32 %v4563_v59, %v4365_v39  ;;  %v11664_v32 = vsub.f32 %v14375_v4, %v11284_v35  ;;  %v4454_v40 = vmul.f32 %v11636_v29, %v11636_v29 }
 0x532   : > { %14370 = vst [vmem:[#allocation123_spill] sm:$0xff] %v11650_v14  ;;  %14372 = vst [vmem:[#allocation126_spill] sm:$0xff] %v11656_v19  ;;  %v11670_v28 = vsub.f32 %v14377_v8, %v11376_v3  ;;  %v11674_v9 = vsub.f32 %v14379_v24, %v11376_v3  ;;  %v4457_v62 = vmul.f32 %v11656_v19, %v11656_v19  ;;  %v11680_v1 = vmul.f32 0.0013020834, %v4066_v55  ;;  %v4073_v55 = vpop.xlane.xlu1 %4072 }
 0x533   : > { %14374 = vst [vmem:[#allocation69_spill] sm:$0xff] %v11660_v23  ;;  %14376 = vst [vmem:[#allocation45_spill] sm:$0xff] %v11664_v32  ;;  %v4667_v46 = vadd.f32 %v4666_v5, %v4453_v47  ;;  %v4458_v39 = vmul.f32 %v11660_v23, %v11660_v23  ;;  %v4565_v35 = vadd.f32 %v4564_v52, %v4366_v16  ;;  %v14387_v23 = vld [vmem:[#allocation37_spill] sm:$0xff] }
 0x534   : > { %14378 = vst [vmem:[#allocation48_spill] sm:$0xff] %v11670_v28  ;;  %14380 = vst [vmem:[#allocation184_spill] sm:$0xff] %v11674_v9  ;;  %v11684_v59 = vsub.f32 %v10821_v26, %v11376_v3  ;;  %v11688_v5 = vsub.f32 %v10848_v42, %v11376_v3  ;;  %v4455_v47 = vmul.f32 %v11650_v14, %v11650_v14  ;;  %v14383_v26 = vld [vmem:[#allocation89_spill] sm:$0xff]  ;;  %v14385_v42 = vld [vmem:[#allocation90_spill] sm:$0xff] }
 0x535   : > { %v4668_v4 = vadd.f32 %v4667_v46, %v4454_v40  ;;  %v4459_v8 = vmul.f32 %v11670_v28, %v11670_v28  ;;  %v4673_v24 = vadd.f32 %v4458_v39, %v4457_v62  ;;  %4566 = vadd.xlane.f32.xlu0 %v4565_v35  ;;  %v4456_v16 = vmul.f32 %v11664_v32, %v11664_v32  ;;  %v14388_v35 = vld [vmem:[#allocation109_spill] sm:$0xff] }
 0x536   : > { %14381 = vst [vmem:[#allocation173_spill] sm:$0xff] %v11684_v59  ;;  %14382 = vst [vmem:[#allocation127_spill] sm:$0xff] %v11688_v5  ;;  %v11698_v52 = vsub.f32 %v14383_v26, %v11342_v12  ;;  %v11702_v3 = vsub.f32 %v14385_v42, %v11342_v12  ;;  %v11706_v40 = vsub.f32 %v14387_v23, %v11342_v12 }
 0x537   : > { %v4669_v46 = vadd.f32 %v4668_v4, %v4455_v47  ;;  %v4460_v62 = vmul.f32 %v11674_v9, %v11674_v9  ;;  %v4674_v39 = vadd.f32 %v4673_v24, %v4459_v8  ;;  %v11712_v28 = vsub.f32 %v14388_v35, %v11342_v12  ;;  %v14389_v8 = vld [vmem:[#allocation41_spill] sm:$0xff]  ;;  %v3968_v35 = vpop.xlane.xlu0 %3967 }
 0x538   : > { %14384 = vst [vmem:[#allocation89_spill] sm:$0xff] %v11698_v52  ;;  %14386 = vst [vmem:[#allocation90_spill] sm:$0xff] %v11702_v3  ;;  %v4461_v26 = vmul.f32 %v11684_v59, %v11684_v59  ;;  %v4462_v42 = vmul.f32 %v11688_v5, %v11688_v5  ;;  %v4367_v19 = vmul.f32 %v11698_v52, %v11698_v52  ;;  %v11722_v9 = vmul.f32 0.0013020834, %v4073_v55  ;;  %v14391_v5 = vld [vmem:[#allocation91_spill] sm:$0xff]  ;;  %v14393_v52 = vld [vmem:[#allocation92_spill] sm:$0xff] }
 0x539   : > { %v4368_v23 = vmul.f32 %v11702_v3, %v11702_v3  ;;  %v4670_v47 = vadd.f32 %v4669_v46, %v4456_v16  ;;  %v4675_v4 = vadd.f32 %v4674_v39, %v4460_v62  ;;  %v11726_v24 = vsub.f32 %v14389_v8, %v11342_v12  ;;  %v14395_v55 = vld [vmem:[#allocation180_spill] sm:$0xff]  ;;  %v14397_v39 = vld [vmem:[#allocation107_spill] sm:$0xff] }
 0x53a   : > { %v4369_v59 = vmul.f32 %v11706_v40, %v11706_v40  ;;  %v11732_v14 = vsub.f32 %v14391_v5, %v11452_v20  ;;  %v11736_v3 = vsub.f32 %v14393_v52, %v11452_v20  ;;  %v11740_v46 = vsub.f32 %v14395_v55, %v11342_v12  ;;  %v14399_v5 = vld [vmem:[#allocation160_spill] sm:$0xff] }
 0x53b   : > { %14390 = vst [vmem:[#allocation37_spill] sm:$0xff] %v11726_v24  ;;  %v4568_v32 = vadd.f32 %v4368_v23, %v4367_v19  ;;  %4671 = vadd.xlane.f32.xlu1 %v4670_v47  ;;  %v4676_v16 = vadd.f32 %v4675_v4, %v4461_v26  ;;  %v4370_v62 = vmul.f32 %v11712_v28, %v11712_v28  ;;  %v11756_v47 = vmul.f32 0.0013020834, %v3968_v35  ;;  %v14403_v35 = vld [vmem:[#allocation49_spill] sm:$0xff] }
 0x53c   : > { %14392 = vst [vmem:[#allocation109_spill] sm:$0xff] %v11732_v14  ;;  %14394 = vst [vmem:[#allocation41_spill] sm:$0xff] %v11736_v3  ;;  %v11746_v19 = vsub.f32 %v14397_v39, %v11452_v20  ;;  %v11750_v8 = vsub.f32 %v14399_v5, %v11452_v20  ;;  %v4373_v52 = vmul.f32 %v11732_v14, %v11732_v14 }
 0x53d   : > { %14396 = vst [vmem:[#allocation91_spill] sm:$0xff] %v11740_v46  ;;  %v4569_v23 = vadd.f32 %v4568_v32, %v4369_v59  ;;  %v4374_v26 = vmul.f32 %v11736_v3, %v11736_v3  ;;  %v4677_v12 = vadd.f32 %v4676_v16, %v4462_v42  ;;  %v11760_v4 = vsub.f32 %v10879_v49, %v11452_v20  ;;  %v14405_v16 = vld [vmem:[#allocation50_spill] sm:$0xff] }
 0x53e   : > { %14398 = vst [vmem:[#allocation92_spill] sm:$0xff] %v11746_v19  ;;  %14400 = vst [vmem:[#allocation180_spill] sm:$0xff] %v11750_v8  ;;  %v11764_v32 = vsub.f32 %v10892_v38, %v11452_v20  ;;  %v4371_v59 = vmul.f32 %v11726_v24, %v11726_v24  ;;  %v4375_v39 = vmul.f32 %v11746_v19, %v11746_v19  ;;  %v14406_v20 = vld [vmem:[#allocation178_spill] sm:$0xff]  ;;  %v3975_v19 = vpop.xlane.xlu1 %3974 }
 0x53f   : > { %14401 = vst [vmem:[#allocation107_spill] sm:$0xff] %v11760_v4  ;;  %v4570_v55 = vadd.f32 %v4569_v23, %v4370_v62  ;;  %v4575_v5 = vadd.f32 %v4374_v26, %v4373_v52  ;;  %4678 = vadd.xlane.f32.xlu0 %v4677_v12  ;;  %v4372_v42 = vmul.f32 %v11740_v46, %v11740_v46  ;;  %v14407_v26 = vld [vmem:[#allocation182_spill] sm:$0xff] }
 0x540   : > { %14402 = vst [vmem:[#allocation160_spill] sm:$0xff] %v11764_v32  ;;  %v11774_v49 = vsub.f32 %v14403_v35, %v11418_v53  ;;  %v11778_v38 = vsub.f32 %v14405_v16, %v11418_v53  ;;  %v11782_v3 = vsub.f32 %v14406_v20, %v11418_v53  ;;  %v4376_v23 = vmul.f32 %v11750_v8, %v11750_v8 }
 0x541   : > { %v4571_v62 = vadd.f32 %v4570_v55, %v4371_v59  ;;  %v4576_v52 = vadd.f32 %v4575_v5, %v4375_v39  ;;  %v11788_v12 = vsub.f32 %v14407_v26, %v11418_v53  ;;  %v4377_v35 = vmul.f32 %v11760_v4, %v11760_v4  ;;  %v14408_v39 = vld [vmem:[#allocation68_spill] sm:$0xff]  ;;  %v14409_v26 = vld [vmem:[#allocation115_spill] sm:$0xff]  ;;  %v4080_v4 = vpop.xlane.xlu0 %4079 }
 0x542   : > { %14404 = vst [vmem:[#allocation49_spill] sm:$0xff] %v11774_v49  ;;  %v4378_v16 = vmul.f32 %v11764_v32, %v11764_v32  ;;  %v4463_v20 = vmul.f32 %v11774_v49, %v11774_v49  ;;  %v4464_v59 = vmul.f32 %v11778_v38, %v11778_v38  ;;  %v11800_v5 = vsub.f32 %v14408_v39, %v11418_v53  ;;  %v14411_v49 = vld [vmem:[#allocation53_spill] sm:$0xff]  ;;  %v14415_v39 = vld [vmem:[#allocation183_spill] sm:$0xff] }
 0x543   : > { %v4572_v55 = vadd.f32 %v4571_v62, %v4372_v42  ;;  %v4577_v8 = vadd.f32 %v4576_v52, %v4376_v23  ;;  %v11804_v14 = vsub.f32 %v14409_v26, %v11418_v53  ;;  %v4465_v32 = vmul.f32 %v11782_v3, %v11782_v3  ;;  %v14413_v42 = vld [vmem:[#allocation54_spill] sm:$0xff] }
 0x544   : > { %v4680_v46 = vadd.f32 %v4464_v59, %v4463_v20  ;;  %v11810_v24 = vsub.f32 %v14411_v49, %v11528_v50  ;;  %v11814_v62 = vsub.f32 %v14413_v42, %v11528_v50  ;;  %v11816_v52 = vmul.f32 0.0013020834, %v3975_v19  ;;  %v14417_v59 = vld [vmem:[#allocation82_spill] sm:$0xff] }
 0x545   : > { %14410 = vst [vmem:[#allocation50_spill] sm:$0xff] %v11804_v14  ;;  %4573 = vadd.xlane.f32.xlu1 %v4572_v55  ;;  %v4578_v23 = vadd.f32 %v4577_v8, %v4377_v35  ;;  %v4466_v53 = vmul.f32 %v11788_v12, %v11788_v12  ;;  %v11822_v26 = vsub.f32 %v14415_v39, %v11528_v50  ;;  %v11832_v35 = vmul.f32 0.0013020834, %v4080_v4 }
 0x546   : > { %14412 = vst [vmem:[#allocation178_spill] sm:$0xff] %v11810_v24  ;;  %14414 = vst [vmem:[#allocation182_spill] sm:$0xff] %v11814_v62  ;;  %v4681_v20 = vadd.f32 %v4680_v46, %v4465_v32  ;;  %v11826_v49 = vsub.f32 %v14417_v59, %v11528_v50  ;;  %v4469_v42 = vmul.f32 %v11810_v24, %v11810_v24 }
 0x547   : > { %14416 = vst [vmem:[#allocation68_spill] sm:$0xff] %v11822_v26  ;;  %v4470_v8 = vmul.f32 %v11814_v62, %v11814_v62  ;;  %v4579_v19 = vadd.f32 %v4578_v23, %v4378_v16  ;;  %v4467_v55 = vmul.f32 %v11800_v5, %v11800_v5  ;;  %v11838_v39 = vsub.f32 %v10881_v41, %v11528_v50  ;;  %v14420_v16 = vld [vmem:[#allocation93_spill] sm:$0xff]  ;;  %v14422_v41 = vld [vmem:[#allocation94_spill] sm:$0xff] }
 0x548   : > { %14418 = vst [vmem:[#allocation115_spill] sm:$0xff] %v11826_v49  ;;  %v4468_v46 = vmul.f32 %v11804_v14, %v11804_v14  ;;  %v4682_v32 = vadd.f32 %v4681_v20, %v4466_v53  ;;  %v4471_v59 = vmul.f32 %v11822_v26, %v11822_v26  ;;  %v11846_v4 = vsub.f32 %v10909_v33, %v11528_v50  ;;  %v14424_v14 = vld [vmem:[#allocation159_spill] sm:$0xff]  ;;  %v14425_v33 = vld [vmem:[#allocation44_spill] sm:$0xff] }
 0x549   : > { %14419 = vst [vmem:[#allocation53_spill] sm:$0xff] %v11838_v39  ;;  %v4687_v24 = vadd.f32 %v4470_v8, %v4469_v42  ;;  %4580 = vadd.xlane.f32.xlu0 %v4579_v19  ;;  %v11850_v23 = vsub.f32 %v14420_v16, %v11494_v18  ;;  %v11854_v62 = vsub.f32 %v14422_v41, %v11494_v18  ;;  %v14432_v26 = vld [vmem:[#allocation96_spill] sm:$0xff] }
 0x54a   : > { %v11858_v53 = vsub.f32 %v14424_v14, %v11494_v18  ;;  %v4683_v20 = vadd.f32 %v4682_v32, %v4467_v55  ;;  %v4472_v42 = vmul.f32 %v11826_v49, %v11826_v49  ;;  %v11864_v50 = vsub.f32 %v14425_v33, %v11494_v18  ;;  %v14430_v49 = vld [vmem:[#allocation95_spill] sm:$0xff] }
 0x54b   : > { %14421 = vst [vmem:[#allocation54_spill] sm:$0xff] %v11850_v23  ;;  %14423 = vst [vmem:[#allocation183_spill] sm:$0xff] %v11854_v62  ;;  %v4688_v8 = vadd.f32 %v4687_v24, %v4471_v59  ;;  %v4473_v19 = vmul.f32 %v11838_v39, %v11838_v39  ;;  %v11870_v16 = vsub.f32 %v10911_v22, %v11494_v18  ;;  %v14428_v24 = vld [vmem:[#allocation121_spill] sm:$0xff] }
 0x54c   : > { %14426 = vst [vmem:[#allocation82_spill] sm:$0xff] %v11864_v50  ;;  %v4379_v14 = vmul.f32 %v11850_v23, %v11850_v23  ;;  %v4380_v55 = vmul.f32 %v11854_v62, %v11854_v62  ;;  %v4684_v32 = vadd.f32 %v4683_v20, %v4468_v46  ;;  %v11878_v59 = vsub.f32 %v14428_v24, %v11494_v18  ;;  %v14434_v62 = vld [vmem:[#allocation30_spill] sm:$0xff] }
 0x54d   : > { %14427 = vst [vmem:[#allocation93_spill] sm:$0xff] %v11870_v16  ;;  %v4689_v41 = vadd.f32 %v4688_v8, %v4472_v42  ;;  %v4381_v33 = vmul.f32 %v11858_v53, %v11858_v53  ;;  %v11884_v22 = vsub.f32 %v14430_v49, %v11604_v13  ;;  %v11888_v23 = vsub.f32 %v14432_v26, %v11604_v13  ;;  %v14436_v8 = vld [vmem:[#allocation112_spill] sm:$0xff] }
 0x54e   : > { %14429 = vst [vmem:[#allocation94_spill] sm:$0xff] %v11878_v59  ;;  %v4582_v39 = vadd.f32 %v4380_v55, %v4379_v14  ;;  %v11892_v46 = vsub.f32 %v14434_v62, %v11604_v13  ;;  %4685 = vadd.xlane.f32.xlu1 %v4684_v32  ;;  %v4474_v18 = vmul.f32 %v11846_v4, %v11846_v4 }
 0x54f   : > { %14431 = vst [vmem:[#allocation159_spill] sm:$0xff] %v11884_v22  ;;  %14433 = vst [vmem:[#allocation44_spill] sm:$0xff] %v11888_v23  ;;  %v4690_v20 = vadd.f32 %v4689_v41, %v4473_v19  ;;  %v4382_v42 = vmul.f32 %v11864_v50, %v11864_v50  ;;  %v11900_v49 = vsub.f32 %v14436_v8, %v11604_v13 }
 0x550   : > { %14435 = vst [vmem:[#allocation121_spill] sm:$0xff] %v11892_v46  ;;  %v4383_v26 = vmul.f32 %v11870_v16, %v11870_v16  ;;  %v4583_v14 = vadd.f32 %v4582_v39, %v4381_v33  ;;  %v4385_v62 = vmul.f32 %v11884_v22, %v11884_v22  ;;  %v4386_v55 = vmul.f32 %v11888_v23, %v11888_v23  ;;  %v14439_v39 = vld [vmem:[#allocation55_spill] sm:$0xff]  ;;  %v14441_v22 = vld [vmem:[#allocation56_spill] sm:$0xff] }
 0x551   : > { %14437 = vst [vmem:[#allocation95_spill] sm:$0xff] %v11900_v49  ;;  %v4691_v32 = vadd.f32 %v4690_v20, %v4474_v18  ;;  %v4384_v19 = vmul.f32 %v11878_v59, %v11878_v59  ;;  %v11912_v41 = vsub.f32 %v10940_v30, %v11604_v13  ;;  %v4387_v24 = vmul.f32 %v11892_v46, %v11892_v46  ;;  %v14443_v18 = vld [vmem:[#allocation172_spill] sm:$0xff]  ;;  %v14445_v46 = vld [vmem:[#allocation155_spill] sm:$0xff] }
 0x552   : > { %v4584_v8 = vadd.f32 %v4583_v14, %v4382_v42  ;;  %v4589_v16 = vadd.f32 %v4386_v55, %v4385_v62  ;;  %v11918_v33 = vsub.f32 %v14439_v39, %v11570_v0  ;;  %v11922_v23 = vsub.f32 %v14441_v22, %v11570_v0  ;;  %v14447_v14 = vld [vmem:[#allocation157_spill] sm:$0xff] }
 0x553   : > { %14438 = vst [vmem:[#allocation96_spill] sm:$0xff] %v11912_v41  ;;  %4692 = vadd.xlane.f32.xlu0 %v4691_v32  ;;  %v11926_v20 = vsub.f32 %v14443_v18, %v11604_v13  ;;  %v4388_v30 = vmul.f32 %v11900_v49, %v11900_v49  ;;  %v11932_v42 = vsub.f32 %v14445_v46, %v11570_v0  ;;  %v14449_v18 = vld [vmem:[#allocation51_spill] sm:$0xff] }
 0x554   : > { %14440 = vst [vmem:[#allocation30_spill] sm:$0xff] %v11918_v33  ;;  %14442 = vst [vmem:[#allocation112_spill] sm:$0xff] %v11922_v23  ;;  %v11936_v62 = vsub.f32 %v14447_v14, %v11570_v0  ;;  %v4585_v55 = vadd.f32 %v4584_v8, %v4383_v26  ;;  %v4590_v39 = vadd.f32 %v4589_v16, %v4387_v24  ;;  %v14451_v46 = vld [vmem:[#allocation171_spill] sm:$0xff]  ;;  %v14453_v14 = vld [vmem:[#allocation57_spill] sm:$0xff] }
 0x555   : > { %14444 = vst [vmem:[#allocation55_spill] sm:$0xff] %v11926_v20  ;;  %14446 = vst [vmem:[#allocation56_spill] sm:$0xff] %v11932_v42  ;;  %v4475_v22 = vmul.f32 %v11918_v33, %v11918_v33  ;;  %v4476_v13 = vmul.f32 %v11922_v23, %v11922_v23  ;;  %v4389_v32 = vmul.f32 %v11912_v41, %v11912_v41  ;;  %v14455_v41 = vld [vmem:[#allocation58_spill] sm:$0xff] }
 0x556   : > { %14448 = vst [vmem:[#allocation172_spill] sm:$0xff] %v11936_v62  ;;  %v11946_v49 = vsub.f32 %v14449_v18, %v11570_v0  ;;  %v11950_v59 = vsub.f32 %v14451_v46, %v11570_v0  ;;  %v4477_v16 = vmul.f32 %v11932_v42, %v11932_v42  ;;  %v4586_v26 = vadd.f32 %v4585_v55, %v4384_v19  ;;  %v14457_v46 = vld [vmem:[#allocation66_spill] sm:$0xff] }
 0x557   : > { %v4591_v24 = vadd.f32 %v4590_v39, %v4388_v30  ;;  %v4694_v8 = vadd.f32 %v4476_v13, %v4475_v22  ;;  %v11956_v23 = vsub.f32 %v14453_v14, %v11680_v1  ;;  %v4390_v33 = vmul.f32 %v11926_v20, %v11926_v20  ;;  %v14459_v55 = vld [vmem:[#allocation134_spill] sm:$0xff]  ;;  %v14554_v20 = vld [vmem:[#allocation185_spill] sm:$0xff] }
 0x558   : > { %14450 = vst [vmem:[#allocation155_spill] sm:$0xff] %v11946_v49  ;;  %14452 = vst [vmem:[#allocation157_spill] sm:$0xff] %v11950_v59  ;;  %v4478_v18 = vmul.f32 %v11936_v62, %v11936_v62  ;;  %v11964_v0 = vsub.f32 %v14455_v41, %v11680_v1  ;;  %v11968_v42 = vsub.f32 %v14457_v46, %v11680_v1  ;;  %4587 = vadd.xlane.f32.xlu1 %v4586_v26  ;;  %v14553_v62 = vld [vmem:[#allocation150_spill] sm:$0xff] }
 0x559   : > { %14454 = vst [vmem:[#allocation51_spill] sm:$0xff] %v11956_v23  ;;  %v4592_v19 = vadd.f32 %v4591_v24, %v4389_v32  ;;  %v4695_v30 = vadd.f32 %v4694_v8, %v4477_v16  ;;  %v11972_v39 = vsub.f32 %v14459_v55, %v11680_v1  ;;  %v4481_v22 = vmul.f32 %v11956_v23, %v11956_v23  ;;  %v14463_v8 = vld [vmem:[#allocation97_spill] sm:$0xff] }
 0x55a   : > { %14456 = vst [vmem:[#allocation171_spill] sm:$0xff] %v11964_v0  ;;  %14458 = vst [vmem:[#allocation57_spill] sm:$0xff] %v11968_v42  ;;  %v4479_v13 = vmul.f32 %v11946_v49, %v11946_v49  ;;  %v4480_v41 = vmul.f32 %v11950_v59, %v11950_v59  ;;  %v11982_v14 = vsub.f32 %v10942_v60, %v11680_v1  ;;  %v14465_v60 = vld [vmem:[#allocation98_spill] sm:$0xff] }
 0x55b   : > { %14460 = vst [vmem:[#allocation58_spill] sm:$0xff] %v11972_v39  ;;  %v4482_v32 = vmul.f32 %v11964_v0, %v11964_v0  ;;  %v4593_v16 = vadd.f32 %v4592_v19, %v4390_v33  ;;  %v4696_v26 = vadd.f32 %v4695_v30, %v4478_v18  ;;  %v11988_v24 = vsub.f32 %v10968_v56, %v11680_v1  ;;  %v14467_v0 = vld [vmem:[#allocation108_spill] sm:$0xff]  ;;  %v14469_v1 = vld [vmem:[#allocation113_spill] sm:$0xff] }
 0x55c   : > { %14461 = vst [vmem:[#allocation66_spill] sm:$0xff] %v11982_v14  ;;  %v11992_v46 = vsub.f32 %v14463_v8, %v11646_v27  ;;  %v4483_v55 = vmul.f32 %v11968_v42, %v11968_v42  ;;  %v11998_v59 = vsub.f32 %v14465_v60, %v11646_v27  ;;  %v12002_v33 = vsub.f32 %v14467_v0, %v11646_v27  ;;  %v14471_v8 = vld [vmem:[#allocation122_spill] sm:$0xff] }
 0x55d   : > { %14462 = vst [vmem:[#allocation134_spill] sm:$0xff] %v11988_v24  ;;  %v4701_v23 = vadd.f32 %v4482_v32, %v4481_v22  ;;  %4594 = vadd.xlane.f32.xlu0 %v4593_v16  ;;  %v4697_v18 = vadd.f32 %v4696_v26, %v4479_v13  ;;  %v4484_v56 = vmul.f32 %v11972_v39, %v11972_v39  ;;  %v14473_v26 = vld [vmem:[#allocation165_spill] sm:$0xff] }
 0x55e   : > { %14464 = vst [vmem:[#allocation97_spill] sm:$0xff] %v11992_v46  ;;  %14466 = vst [vmem:[#allocation98_spill] sm:$0xff] %v11998_v59  ;;  %v12008_v19 = vsub.f32 %v14469_v1, %v11646_v27  ;;  %v4391_v30 = vmul.f32 %v11992_v46, %v11992_v46  ;;  %v4485_v22 = vmul.f32 %v11982_v14, %v11982_v14  ;;  %v14475_v46 = vld [vmem:[#allocation99_spill] sm:$0xff] }
 0x55f   : > { %14468 = vst [vmem:[#allocation108_spill] sm:$0xff] %v12002_v33  ;;  %v4702_v32 = vadd.f32 %v4701_v23, %v4483_v55  ;;  %v12016_v0 = vsub.f32 %v14471_v8, %v11646_v27  ;;  %v4392_v13 = vmul.f32 %v11998_v59, %v11998_v59  ;;  %v4698_v16 = vadd.f32 %v4697_v18, %v4480_v41  ;;  %v14477_v8 = vld [vmem:[#allocation100_spill] sm:$0xff]  ;;  %v14479_v59 = vld [vmem:[#allocation111_spill] sm:$0xff] }
 0x560   : > { %14470 = vst [vmem:[#allocation113_spill] sm:$0xff] %v12008_v19  ;;  %v12022_v60 = vsub.f32 %v14473_v26, %v11646_v27  ;;  %v4393_v1 = vmul.f32 %v12002_v33, %v12002_v33  ;;  %v12028_v39 = vsub.f32 %v14475_v46, %v11756_v47  ;;  %v12032_v14 = vsub.f32 %v14477_v8, %v11756_v47  ;;  %v14481_v46 = vld [vmem:[#allocation88_spill] sm:$0xff]  ;;  %v14542_v33 = vld [vmem:[#allocation146_spill] sm:$0xff] }
 0x561   : > { %14472 = vst [vmem:[#allocation122_spill] sm:$0xff] %v12016_v0  ;;  %v4703_v23 = vadd.f32 %v4702_v32, %v4484_v56  ;;  %v4596_v55 = vadd.f32 %v4392_v13, %v4391_v30  ;;  %v12036_v41 = vsub.f32 %v14479_v59, %v11756_v47  ;;  %4699 = vadd.xlane.f32.xlu1 %v4698_v16 }
 0x562   : > { %14474 = vst [vmem:[#allocation165_spill] sm:$0xff] %v12022_v60  ;;  %14476 = vst [vmem:[#allocation99_spill] sm:$0xff] %v12028_v39  ;;  %v4486_v27 = vmul.f32 %v11988_v24, %v11988_v24  ;;  %v4394_v18 = vmul.f32 %v12008_v19, %v12008_v19  ;;  %v12044_v26 = vsub.f32 %v14481_v46, %v11756_v47 }
 0x563   : > { %14478 = vst [vmem:[#allocation100_spill] sm:$0xff] %v12032_v14  ;;  %14480 = vst [vmem:[#allocation111_spill] sm:$0xff] %v12036_v41  ;;  %v4397_v56 = vmul.f32 %v12028_v39, %v12028_v39  ;;  %v4704_v30 = vadd.f32 %v4703_v23, %v4485_v22  ;;  %v4395_v32 = vmul.f32 %v12016_v0, %v12016_v0  ;;  %v14484_v39 = vld [vmem:[#allocation60_spill] sm:$0xff] }
 0x564   : > { %14482 = vst [vmem:[#allocation88_spill] sm:$0xff] %v12044_v26  ;;  %v4597_v59 = vadd.f32 %v4596_v55, %v4393_v1  ;;  %v4398_v13 = vmul.f32 %v12032_v14, %v12032_v14  ;;  %v4396_v16 = vmul.f32 %v12022_v60, %v12022_v60  ;;  %v12056_v8 = vsub.f32 %v10997_v51, %v11756_v47  ;;  %v14486_v55 = vld [vmem:[#allocation61_spill] sm:$0xff] }
 0x565   : > { %v4399_v46 = vmul.f32 %v12036_v41, %v12036_v41  ;;  %v12062_v22 = vsub.f32 %v14484_v39, %v11722_v9  ;;  %v4705_v23 = vadd.f32 %v4704_v30, %v4486_v27  ;;  %v12066_v14 = vsub.f32 %v14486_v55, %v11722_v9  ;;  %v14489_v41 = vld [vmem:[#allocation120_spill] sm:$0xff] }
 0x566   : > { %14483 = vst [vmem:[#allocation186_spill] sm:$0xff] %v12056_v8  ;;  %v4598_v0 = vadd.f32 %v4597_v59, %v4394_v18  ;;  %v4603_v1 = vadd.f32 %v4398_v13, %v4397_v56  ;;  %v12070_v60 = vsub.f32 %v11009_v45, %v11756_v47  ;;  %v4400_v51 = vmul.f32 %v12044_v26, %v12044_v26  ;;  %v14491_v39 = vld [vmem:[#allocation104_spill] sm:$0xff]  ;;  %v4087_v18 = vpop.xlane.xlu1 %4086 }
 0x567   : > { %14485 = vst [vmem:[#allocation60_spill] sm:$0xff] %v12062_v22  ;;  %14487 = vst [vmem:[#allocation61_spill] sm:$0xff] %v12066_v14  ;;  %v12076_v19 = vsub.f32 %v14489_v41, %v11722_v9  ;;  %v12080_v27 = vsub.f32 %v14491_v39, %v11722_v9  ;;  %4706 = vadd.xlane.f32.xlu0 %v4705_v23  ;;  %v4487_v59 = vmul.f32 %v12062_v22, %v12062_v22  ;;  %v14493_v41 = vld [vmem:[#allocation164_spill] sm:$0xff] }
 0x568   : > { %14488 = vst [vmem:[#allocation187_spill] sm:$0xff] %v12070_v60  ;;  %v4599_v56 = vadd.f32 %v4598_v0, %v4395_v32  ;;  %v4604_v30 = vadd.f32 %v4603_v1, %v4399_v46  ;;  %v4488_v45 = vmul.f32 %v12066_v14, %v12066_v14  ;;  %v4401_v47 = vmul.f32 %v12056_v8, %v12056_v8  ;;  %v14496_v1 = vld [vmem:[#allocation130_spill] sm:$0xff] }
 0x569   : > { %14490 = vst [vmem:[#allocation120_spill] sm:$0xff] %v12076_v19  ;;  %14492 = vst [vmem:[#allocation104_spill] sm:$0xff] %v12080_v27  ;;  %v12090_v13 = vsub.f32 %v14493_v41, %v11722_v9  ;;  %v12094_v55 = vsub.f32 %v10992_v54, %v11722_v9  ;;  %v4489_v0 = vmul.f32 %v12076_v19, %v12076_v19  ;;  %v4120_v14 = vmul.f32 0.0013020834, %v4087_v18  ;;  %v14498_v41 = vld [vmem:[#allocation131_spill] sm:$0xff]  ;;  %v14500_v54 = vld [vmem:[#allocation137_spill] sm:$0xff] }
 0x56a   : > { %v4600_v32 = vadd.f32 %v4599_v56, %v4396_v16  ;;  %v4605_v46 = vadd.f32 %v4604_v30, %v4400_v51  ;;  %v4708_v23 = vadd.f32 %v4488_v45, %v4487_v59  ;;  %v12100_v39 = vsub.f32 %v14496_v1, %v11832_v35  ;;  %v14502_v59 = vld [vmem:[#allocation163_spill] sm:$0xff] }
 0x56b   : > { %14494 = vst [vmem:[#allocation164_spill] sm:$0xff] %v12090_v13  ;;  %14495 = vst [vmem:[#allocation188_spill] sm:$0xff] %v12094_v55  ;;  %v4402_v22 = vmul.f32 %v12070_v60, %v12070_v60  ;;  %v12106_v8 = vsub.f32 %v14498_v41, %v11832_v35  ;;  %v12110_v9 = vsub.f32 %v14500_v54, %v11832_v35  ;;  %v14540_v19 = vld [vmem:[#allocation47_spill] sm:$0xff] }
 0x56c   : > { %14497 = vst [vmem:[#allocation130_spill] sm:$0xff] %v12100_v39  ;;  %4601 = vadd.xlane.f32.xlu1 %v4600_v32  ;;  %v4606_v16 = vadd.f32 %v4605_v46, %v4401_v47  ;;  %v4490_v51 = vmul.f32 %v12080_v27, %v12080_v27  ;;  %v4709_v56 = vadd.f32 %v4708_v23, %v4489_v0  ;;  %v14505_v23 = vld [vmem:[#allocation101_spill] sm:$0xff] }
 0x56d   : > { %14499 = vst [vmem:[#allocation131_spill] sm:$0xff] %v12106_v8  ;;  %14501 = vst [vmem:[#allocation137_spill] sm:$0xff] %v12110_v9  ;;  %v4493_v18 = vmul.f32 %v12100_v39, %v12100_v39  ;;  %v4491_v30 = vmul.f32 %v12090_v13, %v12090_v13  ;;  %v12120_v45 = vsub.f32 %v14502_v59, %v11832_v35  ;;  %v14507_v39 = vld [vmem:[#allocation102_spill] sm:$0xff] }
 0x56e   : > { %v12124_v1 = vsub.f32 %v10999_v10, %v11832_v35  ;;  %v4494_v47 = vmul.f32 %v12106_v8, %v12106_v8  ;;  %v4607_v32 = vadd.f32 %v4606_v16, %v4402_v22  ;;  %v4492_v0 = vmul.f32 %v12094_v55, %v12094_v55  ;;  %v14509_v13 = vld [vmem:[#allocation114_spill] sm:$0xff]  ;;  %v14519_v55 = vld [vmem:[#allocation65_spill] sm:$0xff] }
 0x56f   : > { %14503 = vst [vmem:[#allocation163_spill] sm:$0xff] %v12120_v45  ;;  %v4710_v46 = vadd.f32 %v4709_v56, %v4490_v51  ;;  %v12132_v41 = vsub.f32 %v14505_v23, %v11816_v52  ;;  %v4495_v54 = vmul.f32 %v12110_v9, %v12110_v9  ;;  %v12138_v10 = vsub.f32 %v14507_v39, %v11816_v52  ;;  %v14511_v16 = vld [vmem:[#allocation174_spill] sm:$0xff] }
 0x570   : > { %14504 = vst [vmem:[#allocation189_spill] sm:$0xff] %v12124_v1  ;;  %v4715_v59 = vadd.f32 %v4494_v47, %v4493_v18  ;;  %v12142_v8 = vsub.f32 %v14509_v13, %v11816_v52  ;;  %4608 = vadd.xlane.f32.xlu0 %v4607_v32  ;;  %v12146_v51 = vsub.f32 %v14511_v16, %v11832_v35  ;;  %v14513_v56 = vld [vmem:[#allocation170_spill] sm:$0xff] }
 0x571   : > { %14506 = vst [vmem:[#allocation101_spill] sm:$0xff] %v12132_v41  ;;  %14508 = vst [vmem:[#allocation102_spill] sm:$0xff] %v12138_v10  ;;  %v4711_v22 = vadd.f32 %v4710_v46, %v4491_v30  ;;  %v12150_v23 = vsub.f32 %v14513_v56, %v11816_v52  ;;  %v4403_v18 = vmul.f32 %v12132_v41, %v12132_v41  ;;  %v14515_v35 = vld [vmem:[#allocation166_spill] sm:$0xff]  ;;  %v14517_v56 = vld [vmem:[#allocation64_spill] sm:$0xff] }
 0x572   : > { %14510 = vst [vmem:[#allocation114_spill] sm:$0xff] %v12142_v8  ;;  %14512 = vst [vmem:[#allocation174_spill] sm:$0xff] %v12146_v51  ;;  %v4496_v39 = vmul.f32 %v12120_v45, %v12120_v45  ;;  %v4497_v13 = vmul.f32 %v12124_v1, %v12124_v1  ;;  %v4716_v47 = vadd.f32 %v4715_v59, %v4495_v54  ;;  %v14521_v54 = vld [vmem:[#allocation138_spill] sm:$0xff] }
 0x573   : > { %14514 = vst [vmem:[#allocation170_spill] sm:$0xff] %v12150_v23  ;;  %v4404_v30 = vmul.f32 %v12138_v10, %v12138_v10  ;;  %v4712_v32 = vadd.f32 %v4711_v22, %v4492_v0  ;;  %v12162_v46 = vsub.f32 %v14515_v35, %v11816_v52  ;;  %v4405_v16 = vmul.f32 %v12142_v8, %v12142_v8  ;;  %v14523_v22 = vld [vmem:[#allocation140_spill] sm:$0xff]  ;;  %v14527_v8 = vld [vmem:[#allocation177_spill] sm:$0xff]  ;;  %v14539_v1 = vld [vmem:[#allocation46_spill] sm:$0xff] }
 0x574   : > { %v12167_v41 = vsub.f32 %v14517_v56, %v4120_v14  ;;  %v4717_v9 = vadd.f32 %v4716_v47, %v4496_v39  ;;  %v12170_v27 = vsub.f32 %v14519_v55, %v4120_v14  ;;  %v12173_v59 = vsub.f32 %v14521_v54, %v4120_v14  ;;  %v14525_v47 = vld [vmem:[#allocation175_spill] sm:$0xff] }
 0x575   : > { %14516 = vst [vmem:[#allocation166_spill] sm:$0xff] %v12162_v46  ;;  %v4610_v45 = vadd.f32 %v4404_v30, %v4403_v18  ;;  %4713 = vadd.xlane.f32.xlu1 %v4712_v32  ;;  %v4498_v0 = vmul.f32 %v12146_v51, %v12146_v51  ;;  %v12179_v35 = vsub.f32 %v14523_v22, %v11816_v52 }
 0x576   : > { %14518 = vst [vmem:[#allocation64_spill] sm:$0xff] %v12167_v41  ;;  %14520 = vst [vmem:[#allocation65_spill] sm:$0xff] %v12170_v27  ;;  %v4406_v56 = vmul.f32 %v12150_v23, %v12150_v23  ;;  %v4499_v18 = vmul.f32 %v12167_v41, %v12167_v41  ;;  %v4718_v39 = vadd.f32 %v4717_v9, %v4497_v13  ;;  %v14529_v13 = vld [vmem:[#allocation176_spill] sm:$0xff] }
 0x577   : > { %14522 = vst [vmem:[#allocation138_spill] sm:$0xff] %v12173_v59  ;;  %14524 = vst [vmem:[#allocation140_spill] sm:$0xff] %v12179_v35  ;;  %v4611_v55 = vadd.f32 %v4610_v45, %v4405_v16  ;;  %v12186_v30 = vsub.f32 %v14525_v47, %v4120_v14  ;;  %v4500_v32 = vmul.f32 %v12170_v27, %v12170_v27 }
 0x578   : > { %v4407_v54 = vmul.f32 %v12162_v46, %v12162_v46  ;;  %v12193_v52 = vsub.f32 %v14527_v8, %v4120_v14  ;;  %v4719_v22 = vadd.f32 %v4718_v39, %v4498_v0  ;;  %v4501_v23 = vmul.f32 %v12173_v59, %v12173_v59 }
 0x579   : > { %14526 = vst [vmem:[#allocation175_spill] sm:$0xff] %v12186_v30  ;;  %v4612_v10 = vadd.f32 %v4611_v55, %v4406_v56  ;;  %v4722_v41 = vadd.f32 %v4500_v32, %v4499_v18  ;;  %v4408_v9 = vmul.f32 %v12179_v35, %v12179_v35  ;;  %v12200_v16 = vsub.f32 %v14529_v13, %v4120_v14  ;;  %v14537_v35 = vld [vmem:[#allocation116_spill] sm:$0xff] }
 0x57a   : > { %14528 = vst [vmem:[#allocation177_spill] sm:$0xff] %v12193_v52  ;;  %4720 = vadd.xlane.f32.xlu0 %v4719_v22  ;;  %v4502_v47 = vmul.f32 %v12186_v30, %v12186_v30  ;;  %v4503_v0 = vmul.f32 %v12193_v52, %v12193_v52 }
 0x57b   : > { %v4613_v45 = vadd.f32 %v4612_v10, %v4407_v54  ;;  %14530 = vst [vmem:[#allocation176_spill] sm:$0xff] %v12200_v16  ;;  %v4723_v27 = vadd.f32 %v4722_v41, %v4501_v23  ;;  %v4504_v18 = vmul.f32 %v12200_v16, %v12200_v16  ;;  %v4511_v10 = vpop.xlane.xlu0 %4510  ;;  %v5017_v41 = vld [vmem:[#allocation10] sm:$0x3f] }
 0x57c   : > { %v4729_v32 = vmul.f32 0.0013020834, %v4511_v10  ;;  %v14532_v16 = vld [vmem:[#allocation63_spill] sm:$0xff] }
 0x57d   : > { %v4614_v8 = vadd.f32 %v4613_v45, %v4408_v9  ;;  %v4724_v56 = vadd.f32 %v4723_v27, %v4502_v47  ;;  %v5241_v45 = vld [vmem:[#allocation11] sm:$0x3f]  ;;  %v14531_v27 = vld [vmem:[#allocation62_spill] sm:$0xff] }
 0x57e   : > { %v4761_v14 = vadd.f32 1e-05, %v4729_v32  ;;  %v12209_v47 = vrot.slane %v5017_v41, %v14531_v27  ;;  %v14535_v10 = vld [vmem:[#allocation135_spill] sm:$0xff] }
 0x57f   : > { %4615 = vadd.xlane.f32.xlu1 %v4614_v8  ;;  %v4725_v39 = vadd.f32 %v4724_v56, %v4503_v0  ;;  %v12212_v0 = vrot.slane %v5017_v41, %v14532_v16  ;;  %v14533_v56 = vld [vmem:[#allocation59_spill] sm:$0xff]  ;;  %v12221_v32 = vrot.slane %v5017_v41, %v14535_v10  ;;  %v12239_v59 = vrot.slane %v5241_v45, %v14535_v10 }
 0x580   : > { %7115 = vrsqrt.f32 %v4761_v14  ;;  %v4623_v54 = vpop.xlane.xlu0 %4622  ;;  %v14536_v14 = vld [vmem:[#allocation143_spill] sm:$0xff]  ;;  %v12233_v52 = vrot.slane %v5241_v45, %v14533_v56 }
 0x581   : > { %v4726_v55 = vadd.f32 %v4725_v39, %v4504_v18  ;;  %v4745_v22 = vmul.f32 0.0013020834, %v4623_v54  ;;  %v12215_v18 = vrot.slane %v5017_v41, %v14533_v56  ;;  %v14534_v39 = vld [vmem:[#allocation125_spill] sm:$0xff]  ;;  %v12224_v54 = vrot.slane %v5017_v41, %v14536_v14  ;;  %v14541_v56 = vld [vmem:[#allocation139_spill] sm:$0xff] }
 0x582   : > { %v12236_v30 = vrot.slane %v5241_v45, %v14534_v39 }
 0x583   : > { %4727 = vadd.xlane.f32.xlu1 %v4726_v55  ;;  %v4777_v13 = vadd.f32 1e-05, %v4745_v22  ;;  %v12218_v55 = vrot.slane %v5017_v41, %v14534_v39  ;;  %v12227_v22 = vrot.slane %v5241_v45, %v14531_v27  ;;  %v14538_v27 = vld [vmem:[#allocation169_spill] sm:$0xff] }
 0x584   : > { %v4525_v23 = vpop.xlane.xlu0 %4524 }
 0x585   : > { %7117 = vrsqrt.f32 %v4777_v13  ;;  %v4731_v9 = vmul.f32 0.0013020834, %v4525_v23  ;;  %v12230_v13 = vrot.slane %v5241_v45, %v14532_v16 }
 0x587   : > { %v4763_v8 = vadd.f32 1e-05, %v4731_v9 }
 0x589   : > { %7119 = vrsqrt.f32 %v4763_v8  ;;  %v12246_v8 = vrot.slane %v5241_v45, %v14536_v14 }
 0x58a   : > { %v4518_v23 = vpop.xlane.xlu1 %4517  ;;  %v7116_v9 = vpop.eup %7115 }
 0x58b   : > { %v4730_v41 = vmul.f32 0.0013020834, %v4518_v23  ;;  %v4825_v46 = vmul.f32 %v7116_v9, %v14537_v35  ;;  %v4826_v51 = vmul.f32 %v7116_v9, %v14538_v27  ;;  %v4827_v16 = vmul.f32 %v7116_v9, %v14539_v1 }
 0x58c   : > { %v4828_v60 = vmul.f32 %v7116_v9, %v14540_v19  ;;  %v4829_v26 = vmul.f32 %v7116_v9, %v14541_v56  ;;  %v4830_v39 = vmul.f32 %v7116_v9, %v14542_v33 }
 0x58d   : > { %v4762_v24 = vadd.f32 1e-05, %v4730_v41  ;;  %v5049_v10 = vmul.f32 %v12209_v47, %v4825_v46  ;;  %v5050_v23 = vmul.f32 %v12212_v0, %v4826_v51  ;;  %v5051_v35 = vmul.f32 %v12215_v18, %v4827_v16  ;;  %v14543_v16 = vld [vmem:[#allocation181_spill] sm:$0xff] }
 0x58e   : > { %v5052_v27 = vmul.f32 %v12218_v55, %v4828_v60  ;;  %v4630_v1 = vpop.xlane.xlu1 %4629  ;;  %v5053_v19 = vmul.f32 %v12221_v32, %v4829_v26  ;;  %v5054_v45 = vmul.f32 %v12224_v54, %v4830_v39  ;;  %v14544_v26 = vld [vmem:[#allocation38_spill] sm:$0xff] }
 0x58f   : > { %7121 = vrsqrt.f32 %v4762_v24  ;;  %v4746_v14 = vmul.f32 0.0013020834, %v4630_v1  ;;  %v7118_v56 = vpop.eup %7117  ;;  %v5273_v33 = vadd.f32 %v12227_v22, %v5049_v10  ;;  %v5274_v9 = vadd.f32 %v12230_v13, %v5050_v23  ;;  %v14545_v24 = vld [vmem:[#allocation21_spill] sm:$0xff]  ;;  %v14546_v10 = vld [vmem:[#allocation20_spill] sm:$0xff]  ;;  %v14548_v1 = vld [vmem:[#allocation106_spill] sm:$0xff] }
 0x590   : > { %v5275_v46 = vadd.f32 %v12233_v52, %v5051_v35  ;;  %v5276_v51 = vadd.f32 %v12236_v30, %v5052_v27  ;;  %v5277_v41 = vadd.f32 %v12239_v59, %v5053_v19  ;;  %v5278_v60 = vadd.f32 %v12246_v8, %v5054_v45  ;;  %v14547_v35 = vld [vmem:[#allocation162_spill] sm:$0xff] }
 0x591   : > { %v4921_v42 = vmul.f32 %v7118_v56, %v14543_v16  ;;  %v4922_v49 = vmul.f32 %v7118_v56, %v14544_v26  ;;  %5465 = vst [vmem:[%s12265_s27] sm:$0xff] %v5273_v33  ;;  %5466 = vst [vmem:[%s12265_s27 + $0x8] sm:$0xff] %v5274_v9  ;;  %v4923_v39 = vmul.f32 %v7118_v56, %v14545_v24  ;;  %v4778_v26 = vadd.f32 1e-05, %v4746_v14  ;;  %v14550_v14 = vld [vmem:[#allocation72_spill] sm:$0xff] }
 0x592   : > { %5467 = vst [vmem:[%s12265_s27 + $0x10] sm:$0xff] %v5275_v46  ;;  %5468 = vst [vmem:[%s12265_s27 + $0x18] sm:$0xff] %v5276_v51  ;;  %v4924_v23 = vmul.f32 %v7118_v56, %v14546_v10  ;;  %v4925_v27 = vmul.f32 %v7118_v56, %v14547_v35  ;;  %v4926_v19 = vmul.f32 %v7118_v56, %v14548_v1  ;;  %v4637_v10 = vpop.xlane.xlu0 %4636  ;;  %v14551_v1 = vld [vmem:[#allocation23_spill] sm:$0xff] }
 0x593   : > { %5469 = vst [vmem:[%s12265_s27 + $0x20] sm:$0xff] %v5277_v41  ;;  %5470 = vst [vmem:[%s12265_s27 + $0x28] sm:$0xff] %v5278_v60  ;;  %v5145_v45 = vmul.f32 %v12209_v47, %v4921_v42  ;;  %v5146_v16 = vmul.f32 %v12212_v0, %v4922_v49  ;;  %v7120_v33 = vpop.eup %7119  ;;  %v5147_v9 = vmul.f32 %v12215_v18, %v4923_v39  ;;  %v14549_v41 = vld [vmem:[#allocation22_spill] sm:$0xff]  ;;  %7123 = vrsqrt.f32 %v4778_v26 }
 0x594   : > { %v5148_v46 = vmul.f32 %v12218_v55, %v4924_v23  ;;  %v5149_v51 = vmul.f32 %v12221_v32, %v4925_v27  ;;  %v5150_v24 = vmul.f32 %v12224_v54, %v4926_v19  ;;  %v4837_v49 = vmul.f32 %v7120_v33, %v14549_v41 }
 0x595   : > { %v5369_v56 = vadd.f32 %v12227_v22, %v5145_v45  ;;  %v5370_v42 = vadd.f32 %v12230_v13, %v5146_v16  ;;  %v4838_v60 = vmul.f32 %v7120_v33, %v14550_v14  ;;  %v5371_v39 = vadd.f32 %v12233_v52, %v5147_v9  ;;  %v14552_v45 = vld [vmem:[#allocation142_spill] sm:$0xff] }
 0x596   : > { %v5372_v23 = vadd.f32 %v12236_v30, %v5148_v46  ;;  %v5373_v35 = vadd.f32 %v12239_v59, %v5149_v51  ;;  %v5374_v27 = vadd.f32 %v12246_v8, %v5150_v24  ;;  %v4839_v19 = vmul.f32 %v7120_v33, %v14551_v1 }
 0x597   : > { %5561 = vst [vmem:[%s12265_s27 + $0x300] sm:$0xff] %v5369_v56  ;;  %5562 = vst [vmem:[%s12265_s27 + $0x308] sm:$0xff] %v5370_v42  ;;  %v4840_v16 = vmul.f32 %v7120_v33, %v14552_v45  ;;  %v4841_v41 = vmul.f32 %v7120_v33, %v14553_v62  ;;  %v4842_v50 = vmul.f32 %v7120_v33, %v14554_v20  ;;  %v4747_v51 = vmul.f32 0.0013020834, %v4637_v10  ;;  %v14555_v20 = vld [vmem:[#allocation52_spill] sm:$0xff] }
 0x598   : > { %5563 = vst [vmem:[%s12265_s27 + $0x310] sm:$0xff] %v5371_v39  ;;  %5564 = vst [vmem:[%s12265_s27 + $0x318] sm:$0xff] %v5372_v23  ;;  %v5061_v9 = vmul.f32 %v12209_v47, %v4837_v49  ;;  %v5062_v46 = vmul.f32 %v12212_v0, %v4838_v60  ;;  %v5063_v56 = vmul.f32 %v12215_v18, %v4839_v19  ;;  %v14556_v39 = vld [vmem:[#allocation70_spill] sm:$0xff]  ;;  %v14558_v60 = vld [vmem:[#allocation148_spill] sm:$0xff] }
 0x599   : > { %5565 = vst [vmem:[%s12265_s27 + $0x320] sm:$0xff] %v5373_v35  ;;  %5566 = vst [vmem:[%s12265_s27 + $0x328] sm:$0xff] %v5374_v27  ;;  %v7122_v24 = vpop.eup %7121  ;;  %v5064_v42 = vmul.f32 %v12218_v55, %v4840_v16  ;;  %v5065_v14 = vmul.f32 %v12221_v32, %v4841_v41  ;;  %v5066_v62 = vmul.f32 %v12224_v54, %v4842_v50  ;;  %v14557_v35 = vld [vmem:[#allocation141_spill] sm:$0xff]  ;;  %v14559_v27 = vld [vmem:[#allocation154_spill] sm:$0xff]  ;;  %v4532_v16 = vpop.xlane.xlu1 %4531 }
 0x59a   : > { %v4831_v33 = vmul.f32 %v7122_v24, %v14555_v20  ;;  %v4832_v23 = vmul.f32 %v7122_v24, %v14556_v39  ;;  %v4833_v49 = vmul.f32 %v7122_v24, %v11145_v25  ;;  %v4834_v26 = vmul.f32 %v7122_v24, %v14557_v35 }
 0x59b   : > { %v4835_v10 = vmul.f32 %v7122_v24, %v14558_v60  ;;  %v4836_v1 = vmul.f32 %v7122_v24, %v14559_v27  ;;  %v5285_v19 = vadd.f32 %v12227_v22, %v5061_v9  ;;  %v5286_v45 = vadd.f32 %v12230_v13, %v5062_v46 }
 0x59c   : > { %v5055_v50 = vmul.f32 %v12209_v47, %v4831_v33  ;;  %v5056_v41 = vmul.f32 %v12212_v0, %v4832_v23  ;;  %v5057_v20 = vmul.f32 %v12215_v18, %v4833_v49  ;;  %v5058_v25 = vmul.f32 %v12218_v55, %v4834_v26  ;;  %v4539_v24 = vpop.xlane.xlu0 %4538 }
 0x59d   : > { %v5059_v39 = vmul.f32 %v12221_v32, %v4835_v10  ;;  %v5060_v35 = vmul.f32 %v12224_v54, %v4836_v1  ;;  %v5287_v9 = vadd.f32 %v12233_v52, %v5063_v56  ;;  %v5288_v46 = vadd.f32 %v12236_v30, %v5064_v42  ;;  %5477 = vst [vmem:[%s12265_s27 + $0x60] sm:$0xff] %v5285_v19 }
 0x59e   : > { %5478 = vst [vmem:[%s12265_s27 + $0x68] sm:$0xff] %v5286_v45  ;;  %v5279_v33 = vadd.f32 %v12227_v22, %v5055_v50  ;;  %v5280_v23 = vadd.f32 %v12230_v13, %v5056_v41  ;;  %v5281_v49 = vadd.f32 %v12233_v52, %v5057_v20  ;;  %v5282_v26 = vadd.f32 %v12236_v30, %v5058_v25  ;;  %v7124_v50 = vpop.eup %7123  ;;  %v14560_v20 = vld [vmem:[#allocation179_spill] sm:$0xff]  ;;  %v14561_v25 = vld [vmem:[#allocation73_spill] sm:$0xff] }
 0x59f   : > { %v5283_v56 = vadd.f32 %v12239_v59, %v5059_v39  ;;  %v5284_v42 = vadd.f32 %v12246_v8, %v5060_v35  ;;  %v5289_v60 = vadd.f32 %v12239_v59, %v5065_v14  ;;  %v5290_v10 = vadd.f32 %v12246_v8, %v5066_v62  ;;  %5479 = vst [vmem:[%s12265_s27 + $0x70] sm:$0xff] %v5287_v9  ;;  %v14562_v9 = vld [vmem:[#allocation42_spill] sm:$0xff] }
 0x5a0   : > { %5480 = vst [vmem:[%s12265_s27 + $0x78] sm:$0xff] %v5288_v46  ;;  %5471 = vst [vmem:[%s12265_s27 + $0x30] sm:$0xff] %v5279_v33  ;;  %v4779_v27 = vadd.f32 1e-05, %v4747_v51  ;;  %v4732_v1 = vmul.f32 0.0013020834, %v4532_v16  ;;  %v4927_v62 = vmul.f32 %v7124_v50, %v14560_v20  ;;  %v4928_v39 = vmul.f32 %v7124_v50, %v14561_v25 }
 0x5a1   : > { %5472 = vst [vmem:[%s12265_s27 + $0x38] sm:$0xff] %v5280_v23  ;;  %5473 = vst [vmem:[%s12265_s27 + $0x40] sm:$0xff] %v5281_v49  ;;  %v4733_v19 = vmul.f32 0.0013020834, %v4539_v24  ;;  %v4644_v45 = vpop.xlane.xlu1 %4643  ;;  %v4929_v35 = vmul.f32 %v7124_v50, %v11172_v61  ;;  %v4930_v46 = vmul.f32 %v7124_v50, %v14562_v9  ;;  %v14563_v51 = vld [vmem:[#allocation167_spill] sm:$0xff]  ;;  %v14565_v9 = vld [vmem:[#allocation132_spill] sm:$0xff] }
 0x5a2   : > { %5474 = vst [vmem:[%s12265_s27 + $0x48] sm:$0xff] %v5282_v26  ;;  %5475 = vst [vmem:[%s12265_s27 + $0x50] sm:$0xff] %v5283_v56  ;;  %7125 = vrsqrt.f32 %v4779_v27  ;;  %v4764_v41 = vadd.f32 1e-05, %v4732_v1  ;;  %v4931_v16 = vmul.f32 %v7124_v50, %v14563_v51  ;;  %v14564_v24 = vld [vmem:[#allocation87_spill] sm:$0xff]  ;;  %v5151_v49 = vmul.f32 %v12209_v47, %v4927_v62 }
 0x5a3   : > { %5476 = vst [vmem:[%s12265_s27 + $0x58] sm:$0xff] %v5284_v42  ;;  %5481 = vst [vmem:[%s12265_s27 + $0x80] sm:$0xff] %v5289_v60  ;;  %v4765_v14 = vadd.f32 1e-05, %v4733_v19  ;;  %v4932_v33 = vmul.f32 %v7124_v50, %v14564_v24  ;;  %v4748_v23 = vmul.f32 0.0013020834, %v4644_v45  ;;  %v5152_v26 = vmul.f32 %v12212_v0, %v4928_v39 }
 0x5a4   : > { %5482 = vst [vmem:[%s12265_s27 + $0x88] sm:$0xff] %v5290_v10  ;;  %7127 = vrsqrt.f32 %v4764_v41  ;;  %v5153_v56 = vmul.f32 %v12215_v18, %v4929_v35  ;;  %v5154_v42 = vmul.f32 %v12218_v55, %v4930_v46  ;;  %v5155_v60 = vmul.f32 %v12221_v32, %v4931_v16 }
 0x5a5   : > { %v4651_v61 = vpop.xlane.xlu0 %4650  ;;  %v5156_v10 = vmul.f32 %v12224_v54, %v4932_v33  ;;  %7129 = vrsqrt.f32 %v4765_v14  ;;  %v5375_v1 = vadd.f32 %v12227_v22, %v5151_v49  ;;  %v5376_v19 = vadd.f32 %v12230_v13, %v5152_v26  ;;  %v14566_v49 = vld [vmem:[#allocation161_spill] sm:$0xff] }
 0x5a6   : > { %v4749_v27 = vmul.f32 0.0013020834, %v4651_v61  ;;  %v5377_v45 = vadd.f32 %v12233_v52, %v5153_v56  ;;  %v5378_v50 = vadd.f32 %v12236_v30, %v5154_v42  ;;  %v5379_v41 = vadd.f32 %v12239_v59, %v5155_v60 }
 0x5a7   : > { %v5380_v20 = vadd.f32 %v12246_v8, %v5156_v10  ;;  %v4780_v62 = vadd.f32 1e-05, %v4748_v23  ;;  %5567 = vst [vmem:[%s12265_s27 + $0x330] sm:$0xff] %v5375_v1  ;;  %5568 = vst [vmem:[%s12265_s27 + $0x338] sm:$0xff] %v5376_v19  ;;  %v14567_v10 = vld [vmem:[#allocation25_spill] sm:$0xff]  ;;  %v14568_v1 = vld [vmem:[#allocation24_spill] sm:$0xff] }
 0x5a8   : > { %5569 = vst [vmem:[%s12265_s27 + $0x340] sm:$0xff] %v5377_v45  ;;  %5570 = vst [vmem:[%s12265_s27 + $0x348] sm:$0xff] %v5378_v50  ;;  %v4781_v14 = vadd.f32 1e-05, %v4749_v27 }
 0x5a9   : > { %5571 = vst [vmem:[%s12265_s27 + $0x350] sm:$0xff] %v5379_v41  ;;  %5572 = vst [vmem:[%s12265_s27 + $0x358] sm:$0xff] %v5380_v20  ;;  %7131 = vrsqrt.f32 %v4780_v62 }
 0x5aa   : > { %7133 = vrsqrt.f32 %v4781_v14 }
 0x5ab   : > { %v4546_v25 = vpop.xlane.xlu1 %4545 }
 0x5ac   : > { %v4734_v39 = vmul.f32 0.0013020834, %v4546_v25  ;;  %v7126_v35 = vpop.eup %7125  ;;  %v14569_v25 = vld [vmem:[#allocation168_spill] sm:$0xff] }
 0x5ad   : > { %v4933_v46 = vmul.f32 %v7126_v35, %v14565_v9  ;;  %v4934_v51 = vmul.f32 %v7126_v35, %v11208_v37  ;;  %v4935_v16 = vmul.f32 %v7126_v35, %v11211_v36  ;;  %v4936_v24 = vmul.f32 %v7126_v35, %v11216_v31  ;;  %v14570_v9 = vld [vmem:[#allocation105_spill] sm:$0xff] }
 0x5ae   : > { %v7128_v33 = vpop.eup %7127  ;;  %v4937_v23 = vmul.f32 %v7126_v35, %v11229_v11  ;;  %v4938_v26 = vmul.f32 %v7126_v35, %v14566_v49  ;;  %v12373_v56 = vadd.f32 1e-05, %v4734_v39 }
 0x5af   : > { %v5157_v42 = vmul.f32 %v12209_v47, %v4933_v46  ;;  %v5158_v61 = vmul.f32 %v12212_v0, %v4934_v51  ;;  %v5159_v60 = vmul.f32 %v12215_v18, %v4935_v16  ;;  %v5160_v37 = vmul.f32 %v12218_v55, %v4936_v24  ;;  %v7130_v36 = vpop.eup %7129  ;;  %v14571_v51 = vld [vmem:[#allocation74_spill] sm:$0xff] }
 0x5b0   : > { %v5161_v31 = vmul.f32 %v12221_v32, %v4937_v23  ;;  %v5162_v11 = vmul.f32 %v12224_v54, %v4938_v26  ;;  %v4843_v27 = vmul.f32 %v7128_v33, %v14567_v10  ;;  %v4844_v19 = vmul.f32 %v7128_v33, %v14568_v1 }
 0x5b1   : > { %v5381_v45 = vadd.f32 %v12227_v22, %v5157_v42  ;;  %v5382_v50 = vadd.f32 %v12230_v13, %v5158_v61  ;;  %v5383_v41 = vadd.f32 %v12233_v52, %v5159_v60  ;;  %v5384_v20 = vadd.f32 %v12236_v30, %v5160_v37  ;;  %v14573_v61 = vld [vmem:[#allocation144_spill] sm:$0xff] }
 0x5b2   : > { %v5385_v62 = vadd.f32 %v12239_v59, %v5161_v31  ;;  %v5386_v14 = vadd.f32 %v12246_v8, %v5162_v11  ;;  %v4845_v39 = vmul.f32 %v7128_v33, %v14569_v25  ;;  %v4846_v35 = vmul.f32 %v7128_v33, %v11254_v21  ;;  %v14572_v21 = vld [vmem:[#allocation75_spill] sm:$0xff]  ;;  %v14576_v25 = vld [vmem:[#allocation77_spill] sm:$0xff] }
 0x5b3   : > { %5573 = vst [vmem:[%s12265_s27 + $0x360] sm:$0xff] %v5381_v45  ;;  %5574 = vst [vmem:[%s12265_s27 + $0x368] sm:$0xff] %v5382_v50  ;;  %v4847_v46 = vmul.f32 %v7128_v33, %v14570_v9  ;;  %v4848_v16 = vmul.f32 %v7128_v33, %v14571_v51  ;;  %v5067_v24 = vmul.f32 %v12209_v47, %v4843_v27  ;;  %v7132_v10 = vpop.eup %7131  ;;  %v14575_v50 = vld [vmem:[#allocation76_spill] sm:$0xff]  ;;  %7135 = vrsqrt.f32 %v12373_v56 }
 0x5b4   : > { %5575 = vst [vmem:[%s12265_s27 + $0x370] sm:$0xff] %v5383_v41  ;;  %5576 = vst [vmem:[%s12265_s27 + $0x378] sm:$0xff] %v5384_v20  ;;  %v5068_v23 = vmul.f32 %v12212_v0, %v4844_v19  ;;  %v5069_v49 = vmul.f32 %v12215_v18, %v4845_v39  ;;  %v5070_v26 = vmul.f32 %v12218_v55, %v4846_v35  ;;  %v14574_v19 = vld [vmem:[#allocation151_spill] sm:$0xff]  ;;  %v12413_v20 = vpop.xlane.xlu0 %4552  ;;  %v14577_v35 = vld [vmem:[#allocation145_spill] sm:$0xff] }
 0x5b5   : > { %5577 = vst [vmem:[%s12265_s27 + $0x380] sm:$0xff] %v5385_v62  ;;  %5578 = vst [vmem:[%s12265_s27 + $0x388] sm:$0xff] %v5386_v14  ;;  %v4849_v42 = vmul.f32 %v7130_v36, %v14572_v21  ;;  %v4850_v60 = vmul.f32 %v7130_v36, %v14573_v61  ;;  %v5071_v37 = vmul.f32 %v12221_v32, %v4847_v46  ;;  %v7134_v46 = vpop.eup %7133  ;;  %v14579_v61 = vld [vmem:[#allocation27_spill] sm:$0xff] }
 0x5b6   : > { %v5072_v33 = vmul.f32 %v12224_v54, %v4848_v16  ;;  %v5291_v31 = vadd.f32 %v12227_v22, %v5067_v24  ;;  %v5292_v11 = vadd.f32 %v12230_v13, %v5068_v23  ;;  %v5293_v27 = vadd.f32 %v12233_v52, %v5069_v49 }
 0x5b7   : > { %v5294_v1 = vadd.f32 %v12236_v30, %v5070_v26  ;;  %v4851_v45 = vmul.f32 %v7130_v36, %v14574_v19  ;;  %v4852_v41 = vmul.f32 %v7130_v36, %v14575_v50  ;;  %v5295_v62 = vadd.f32 %v12239_v59, %v5071_v37  ;;  %v14578_v26 = vld [vmem:[#allocation152_spill] sm:$0xff]  ;;  %v4658_v37 = vpop.xlane.xlu1 %4657 }
 0x5b8   : > { %v5296_v14 = vadd.f32 %v12246_v8, %v5072_v33  ;;  %5483 = vst [vmem:[%s12265_s27 + $0x90] sm:$0xff] %v5291_v31  ;;  %5484 = vst [vmem:[%s12265_s27 + $0x98] sm:$0xff] %v5292_v11  ;;  %v4853_v39 = vmul.f32 %v7130_v36, %v14576_v25  ;;  %v4854_v9 = vmul.f32 %v7130_v36, %v14577_v35  ;;  %v14581_v35 = vld [vmem:[#allocation26_spill] sm:$0xff] }
 0x5b9   : > { %5485 = vst [vmem:[%s12265_s27 + $0xa0] sm:$0xff] %v5293_v27  ;;  %5486 = vst [vmem:[%s12265_s27 + $0xa8] sm:$0xff] %v5294_v1  ;;  %v5073_v51 = vmul.f32 %v12209_v47, %v4849_v42  ;;  %v5074_v16 = vmul.f32 %v12212_v0, %v4850_v60  ;;  %v5075_v24 = vmul.f32 %v12215_v18, %v4851_v45 }
 0x5ba   : > { %v5076_v23 = vmul.f32 %v12218_v55, %v4852_v41  ;;  %5487 = vst [vmem:[%s12265_s27 + $0xb0] sm:$0xff] %v5295_v62  ;;  %5488 = vst [vmem:[%s12265_s27 + $0xb8] sm:$0xff] %v5296_v14  ;;  %v5077_v49 = vmul.f32 %v12221_v32, %v4853_v39  ;;  %v5078_v36 = vmul.f32 %v12224_v54, %v4854_v9  ;;  %v14580_v41 = vld [vmem:[#allocation117_spill] sm:$0xff]  ;;  %v4665_v39 = vpop.xlane.xlu0 %4664 }
 0x5bb   : > { %v4939_v21 = vmul.f32 %v7132_v10, %v14578_v26  ;;  %v4940_v42 = vmul.f32 %v7132_v10, %v14579_v61  ;;  %v5297_v60 = vadd.f32 %v12227_v22, %v5073_v51  ;;  %v5298_v33 = vadd.f32 %v12230_v13, %v5074_v16  ;;  %v14582_v51 = vld [vmem:[#allocation103_spill] sm:$0xff]  ;;  %v14583_v26 = vld [vmem:[#allocation28_spill] sm:$0xff] }
 0x5bc   : > { %v5299_v31 = vadd.f32 %v12233_v52, %v5075_v24  ;;  %v5300_v11 = vadd.f32 %v12236_v30, %v5076_v23  ;;  %v5301_v27 = vadd.f32 %v12239_v59, %v5077_v49  ;;  %v5302_v1 = vadd.f32 %v12246_v8, %v5078_v36  ;;  %v14584_v61 = vld [vmem:[#allocation31_spill] sm:$0xff] }
 0x5bd   : > { %v4941_v19 = vmul.f32 %v7132_v10, %v11326_v7  ;;  %v4942_v45 = vmul.f32 %v7132_v10, %v11332_v34  ;;  %5489 = vst [vmem:[%s12265_s27 + $0xc0] sm:$0xff] %v5297_v60  ;;  %5490 = vst [vmem:[%s12265_s27 + $0xc8] sm:$0xff] %v5298_v33  ;;  %v4943_v50 = vmul.f32 %v7132_v10, %v11346_v48  ;;  %v4751_v56 = vmul.f32 0.0013020834, %v4665_v39 }
 0x5be   : > { %5491 = vst [vmem:[%s12265_s27 + $0xd0] sm:$0xff] %v5299_v31  ;;  %5492 = vst [vmem:[%s12265_s27 + $0xd8] sm:$0xff] %v5300_v11  ;;  %v4944_v62 = vmul.f32 %v7132_v10, %v14580_v41  ;;  %v5163_v14 = vmul.f32 %v12209_v47, %v4939_v21  ;;  %v5164_v25 = vmul.f32 %v12212_v0, %v4940_v42  ;;  %v4560_v60 = vpop.xlane.xlu1 %4559  ;;  %v14585_v11 = vld [vmem:[#allocation110_spill] sm:$0xff] }
 0x5bf   : > { %5493 = vst [vmem:[%s12265_s27 + $0xe0] sm:$0xff] %v5301_v27  ;;  %5494 = vst [vmem:[%s12265_s27 + $0xe8] sm:$0xff] %v5302_v1  ;;  %v5165_v7 = vmul.f32 %v12215_v18, %v4941_v19  ;;  %v5166_v34 = vmul.f32 %v12218_v55, %v4942_v45  ;;  %v4945_v9 = vmul.f32 %v7134_v46, %v14581_v35  ;;  %v14586_v1 = vld [vmem:[#allocation119_spill] sm:$0xff] }
 0x5c0   : > { %v4946_v16 = vmul.f32 %v7134_v46, %v14582_v51  ;;  %v5167_v48 = vmul.f32 %v12221_v32, %v4943_v50  ;;  %v5168_v10 = vmul.f32 %v12224_v54, %v4944_v62  ;;  %v5387_v24 = vadd.f32 %v12227_v22, %v5163_v14 }
 0x5c1   : > { %v5388_v23 = vadd.f32 %v12230_v13, %v5164_v25  ;;  %v5389_v49 = vadd.f32 %v12233_v52, %v5165_v7  ;;  %v5390_v36 = vadd.f32 %v12236_v30, %v5166_v34  ;;  %v4947_v21 = vmul.f32 %v7134_v46, %v14583_v26 }
 0x5c2   : > { %v4948_v42 = vmul.f32 %v7134_v46, %v14584_v61  ;;  %v5391_v33 = vadd.f32 %v12239_v59, %v5167_v48  ;;  %v5392_v31 = vadd.f32 %v12246_v8, %v5168_v10  ;;  %5579 = vst [vmem:[%s12265_s27 + $0x390] sm:$0xff] %v5387_v24  ;;  %v4949_v27 = vmul.f32 %v7134_v46, %v14585_v11  ;;  %v4567_v7 = vpop.xlane.xlu0 %4566  ;;  %v7136_v11 = vpop.eup %7135 }
 0x5c3   : > { %5580 = vst [vmem:[%s12265_s27 + $0x398] sm:$0xff] %v5388_v23  ;;  %v4950_v19 = vmul.f32 %v7134_v46, %v14586_v1  ;;  %5581 = vst [vmem:[%s12265_s27 + $0x3a0] sm:$0xff] %v5389_v49  ;;  %v5169_v45 = vmul.f32 %v12209_v47, %v4945_v9  ;;  %v5170_v50 = vmul.f32 %v12212_v0, %v4946_v16  ;;  %v4735_v25 = vmul.f32 0.0013020834, %v12413_v20  ;;  %v14588_v1 = vld [vmem:[#allocation78_spill] sm:$0xff] }
 0x5c4   : > { %5582 = vst [vmem:[%s12265_s27 + $0x3a8] sm:$0xff] %v5390_v36  ;;  %v5171_v41 = vmul.f32 %v12215_v18, %v4947_v21  ;;  %v5172_v62 = vmul.f32 %v12218_v55, %v4948_v42  ;;  %5583 = vst [vmem:[%s12265_s27 + $0x3b0] sm:$0xff] %v5391_v33  ;;  %v5173_v14 = vmul.f32 %v12221_v32, %v4949_v27  ;;  %v4750_v24 = vmul.f32 0.0013020834, %v4658_v37 }
 0x5c5   : > { %5584 = vst [vmem:[%s12265_s27 + $0x3b8] sm:$0xff] %v5392_v31  ;;  %v5174_v46 = vmul.f32 %v12224_v54, %v4950_v19  ;;  %v5393_v34 = vadd.f32 %v12227_v22, %v5169_v45  ;;  %v5394_v35 = vadd.f32 %v12230_v13, %v5170_v50  ;;  %v4767_v10 = vadd.f32 1e-05, %v4735_v25 }
 0x5c6   : > { %v5395_v9 = vadd.f32 %v12233_v52, %v5171_v41  ;;  %v5396_v51 = vadd.f32 %v12236_v30, %v5172_v62  ;;  %v5397_v16 = vadd.f32 %v12239_v59, %v5173_v14  ;;  %v4736_v20 = vmul.f32 0.0013020834, %v4560_v60  ;;  %v14587_v60 = vld [vmem:[#allocation133_spill] sm:$0xff] }
 0x5c7   : > { %v5398_v48 = vadd.f32 %v12246_v8, %v5174_v46  ;;  %5585 = vst [vmem:[%s12265_s27 + $0x3c0] sm:$0xff] %v5393_v34  ;;  %5586 = vst [vmem:[%s12265_s27 + $0x3c8] sm:$0xff] %v5394_v35  ;;  %v4737_v23 = vmul.f32 0.0013020834, %v4567_v7  ;;  %7137 = vrsqrt.f32 %v4767_v10  ;;  %v4782_v36 = vadd.f32 1e-05, %v4750_v24 }
 0x5c8   : > { %5587 = vst [vmem:[%s12265_s27 + $0x3d0] sm:$0xff] %v5395_v9  ;;  %5588 = vst [vmem:[%s12265_s27 + $0x3d8] sm:$0xff] %v5396_v51  ;;  %v4672_v49 = vpop.xlane.xlu1 %4671  ;;  %v4783_v21 = vadd.f32 1e-05, %v4751_v56  ;;  %v4768_v61 = vadd.f32 1e-05, %v4736_v20  ;;  %v4855_v27 = vmul.f32 %v7136_v11, %v14587_v60  ;;  %v4856_v19 = vmul.f32 %v7136_v11, %v14588_v1 }
 0x5c9   : > { %5589 = vst [vmem:[%s12265_s27 + $0x3e0] sm:$0xff] %v5397_v16  ;;  %5590 = vst [vmem:[%s12265_s27 + $0x3e8] sm:$0xff] %v5398_v48  ;;  %v4752_v26 = vmul.f32 0.0013020834, %v4672_v49  ;;  %7139 = vrsqrt.f32 %v4782_v36  ;;  %v4769_v42 = vadd.f32 1e-05, %v4737_v23  ;;  %v4857_v45 = vmul.f32 %v7136_v11, %v11402_v44 }
 0x5ca   : > { %7141 = vrsqrt.f32 %v4783_v21  ;;  %v4858_v50 = vmul.f32 %v7136_v11, %v11408_v58  ;;  %v4859_v41 = vmul.f32 %v7136_v11, %v11422_v2  ;;  %v4860_v62 = vmul.f32 %v7136_v11, %v11436_v43  ;;  %v14589_v56 = vld [vmem:[#allocation79_spill] sm:$0xff]  ;;  %v14591_v36 = vld [vmem:[#allocation153_spill] sm:$0xff]  ;;  %v14592_v21 = vld [vmem:[#allocation80_spill] sm:$0xff] }
 0x5cb   : > { %v4784_v37 = vadd.f32 1e-05, %v4752_v26  ;;  %7143 = vrsqrt.f32 %v4768_v61  ;;  %v5079_v46 = vmul.f32 %v12209_v47, %v4855_v27  ;;  %v5080_v25 = vmul.f32 %v12212_v0, %v4856_v19  ;;  %v14590_v23 = vld [vmem:[#allocation147_spill] sm:$0xff]  ;;  %v14595_v27 = vld [vmem:[#allocation156_spill] sm:$0xff] }
 0x5cc   : > { %v4679_v33 = vpop.xlane.xlu0 %4678  ;;  %7145 = vrsqrt.f32 %v4769_v42  ;;  %v5081_v7 = vmul.f32 %v12215_v18, %v4857_v45  ;;  %v5082_v34 = vmul.f32 %v12218_v55, %v4858_v50  ;;  %v5083_v58 = vmul.f32 %v12221_v32, %v4859_v41  ;;  %v14593_v42 = vld [vmem:[#allocation81_spill] sm:$0xff]  ;;  %v14596_v19 = vld [vmem:[#allocation32_spill] sm:$0xff] }
 0x5cd   : > { %v4753_v31 = vmul.f32 0.0013020834, %v4679_v33  ;;  %7147 = vrsqrt.f32 %v4784_v37  ;;  %v5084_v44 = vmul.f32 %v12224_v54, %v4860_v62  ;;  %v5303_v43 = vadd.f32 %v12227_v22, %v5079_v46  ;;  %v14594_v37 = vld [vmem:[#allocation149_spill] sm:$0xff] }
 0x5ce   : > { %v5304_v9 = vadd.f32 %v12230_v13, %v5080_v25  ;;  %v5305_v51 = vadd.f32 %v12233_v52, %v5081_v7  ;;  %v5306_v16 = vadd.f32 %v12236_v30, %v5082_v34  ;;  %v5307_v10 = vadd.f32 %v12239_v59, %v5083_v58 }
 0x5cf   : > { %v4785_v39 = vadd.f32 1e-05, %v4753_v31  ;;  %v5308_v24 = vadd.f32 %v12246_v8, %v5084_v44  ;;  %5495 = vst [vmem:[%s12265_s27 + $0xf0] sm:$0xff] %v5303_v43 }
 0x5d0   : > { %5496 = vst [vmem:[%s12265_s27 + $0xf8] sm:$0xff] %v5304_v9  ;;  %5497 = vst [vmem:[%s12265_s27 + $0x100] sm:$0xff] %v5305_v51 }
 0x5d1   : > { %v7138_v35 = vpop.eup %7137  ;;  %7149 = vrsqrt.f32 %v4785_v39  ;;  %5498 = vst [vmem:[%s12265_s27 + $0x108] sm:$0xff] %v5306_v16  ;;  %5499 = vst [vmem:[%s12265_s27 + $0x110] sm:$0xff] %v5307_v10  ;;  %v14597_v10 = vld [vmem:[#allocation35_spill] sm:$0xff] }
 0x5d2   : > { %v4574_v14 = vpop.xlane.xlu1 %4573  ;;  %v4861_v20 = vmul.f32 %v7138_v35, %v14589_v56  ;;  %v4862_v49 = vmul.f32 %v7138_v35, %v14590_v23  ;;  %v4863_v26 = vmul.f32 %v7138_v35, %v14591_v36  ;;  %v4864_v61 = vmul.f32 %v7138_v35, %v14592_v21  ;;  %5500 = vst [vmem:[%s12265_s27 + $0x118] sm:$0xff] %v5308_v24  ;;  %v14598_v56 = vld [vmem:[#allocation36_spill] sm:$0xff]  ;;  %v14599_v36 = vld [vmem:[#allocation129_spill] sm:$0xff] }
 0x5d3   : > { %v12505_v2 = vmul.f32 0.0013020834, %v4574_v14  ;;  %v7140_v48 = vpop.eup %7139  ;;  %v4865_v33 = vmul.f32 %v7138_v35, %v14593_v42  ;;  %v4866_v31 = vmul.f32 %v7138_v35, %v14594_v37  ;;  %v14600_v21 = vld [vmem:[#allocation128_spill] sm:$0xff] }
 0x5d4   : > { %v7142_v11 = vpop.eup %7141  ;;  %v5085_v39 = vmul.f32 %v12209_v47, %v4861_v20  ;;  %v5086_v60 = vmul.f32 %v12212_v0, %v4862_v49  ;;  %v4951_v1 = vmul.f32 %v7140_v48, %v14595_v27  ;;  %v4952_v45 = vmul.f32 %v7140_v48, %v14596_v19  ;;  %v14601_v27 = vld [vmem:[#allocation39_spill] sm:$0xff]  ;;  %v14602_v19 = vld [vmem:[#allocation118_spill] sm:$0xff] }
 0x5d5   : > { %v12529_v50 = vpop.eup %7143  ;;  %v5087_v41 = vmul.f32 %v12215_v18, %v4863_v26  ;;  %v5088_v62 = vmul.f32 %v12218_v55, %v4864_v61  ;;  %v5089_v14 = vmul.f32 %v12221_v32, %v4865_v33  ;;  %v5090_v46 = vmul.f32 %v12224_v54, %v4866_v31 }
 0x5d6   : > { %v12535_v25 = vpop.eup %7145  ;;  %v5309_v7 = vadd.f32 %v12227_v22, %v5085_v39  ;;  %v5310_v34 = vadd.f32 %v12230_v13, %v5086_v60  ;;  %v4953_v35 = vmul.f32 %v7140_v48, %v11478_v63  ;;  %v4954_v58 = vmul.f32 %v7140_v48, %v11484_v6 }
 0x5d7   : > { %v5311_v44 = vadd.f32 %v12233_v52, %v5087_v41  ;;  %v5312_v43 = vadd.f32 %v12236_v30, %v5088_v62  ;;  %v5313_v9 = vadd.f32 %v12239_v59, %v5089_v14  ;;  %v5314_v51 = vadd.f32 %v12246_v8, %v5090_v46  ;;  %v12545_v16 = vpop.eup %7147  ;;  %v14603_v14 = vld [vmem:[#allocation124_spill] sm:$0xff] }
 0x5d8   : > { %5501 = vst [vmem:[%s12265_s27 + $0x120] sm:$0xff] %v5309_v7  ;;  %5502 = vst [vmem:[%s12265_s27 + $0x128] sm:$0xff] %v5310_v34  ;;  %v4955_v24 = vmul.f32 %v7140_v48, %v14597_v10  ;;  %v4956_v20 = vmul.f32 %v7140_v48, %v14598_v56  ;;  %v5175_v63 = vmul.f32 %v12209_v47, %v4951_v1  ;;  %v14604_v7 = vld [vmem:[#allocation29_spill] sm:$0xff]  ;;  %v14605_v10 = vld [vmem:[#allocation83_spill] sm:$0xff] }
 0x5d9   : > { %v5176_v6 = vmul.f32 %v12212_v0, %v4952_v45  ;;  %5503 = vst [vmem:[%s12265_s27 + $0x130] sm:$0xff] %v5311_v44  ;;  %5504 = vst [vmem:[%s12265_s27 + $0x138] sm:$0xff] %v5312_v43  ;;  %v5177_v23 = vmul.f32 %v12215_v18, %v4953_v35  ;;  %v5178_v49 = vmul.f32 %v12218_v55, %v4954_v58  ;;  %v14606_v56 = vld [vmem:[#allocation84_spill] sm:$0xff] }
 0x5da   : > { %5505 = vst [vmem:[%s12265_s27 + $0x140] sm:$0xff] %v5313_v9  ;;  %5506 = vst [vmem:[%s12265_s27 + $0x148] sm:$0xff] %v5314_v51  ;;  %v4957_v26 = vmul.f32 %v7142_v11, %v14599_v36  ;;  %v4958_v61 = vmul.f32 %v7142_v11, %v14600_v21  ;;  %v5179_v42 = vmul.f32 %v12221_v32, %v4955_v24  ;;  %v12583_v9 = vpop.xlane.xlu0 %4580 }
 0x5db   : > { %v12561_v48 = vpop.eup %7149  ;;  %v5180_v33 = vmul.f32 %v12224_v54, %v4956_v20  ;;  %v5399_v37 = vadd.f32 %v12227_v22, %v5175_v63  ;;  %v5400_v31 = vadd.f32 %v12230_v13, %v5176_v6  ;;  %v5401_v39 = vadd.f32 %v12233_v52, %v5177_v23 }
 0x5dc   : > { %v5402_v60 = vadd.f32 %v12236_v30, %v5178_v49  ;;  %v4959_v1 = vmul.f32 %v7142_v11, %v14601_v27  ;;  %v4960_v45 = vmul.f32 %v7142_v11, %v14602_v19  ;;  %v5403_v41 = vadd.f32 %v12239_v59, %v5179_v42  ;;  %v14607_v42 = vld [vmem:[#allocation158_spill] sm:$0xff]  ;;  %v12613_v27 = vpop.xlane.xlu1 %4685 }
 0x5dd   : > { %v5404_v62 = vadd.f32 %v12246_v8, %v5180_v33  ;;  %5591 = vst [vmem:[%s12265_s27 + $0x3f0] sm:$0xff] %v5399_v37  ;;  %5592 = vst [vmem:[%s12265_s27 + $0x3f8] sm:$0xff] %v5400_v31  ;;  %v4961_v46 = vmul.f32 %v7142_v11, %v14603_v14  ;;  %v4962_v34 = vmul.f32 %v7142_v11, %v14604_v7  ;;  %v14608_v37 = vld [vmem:[#allocation85_spill] sm:$0xff] }
 0x5de   : > { %5593 = vst [vmem:[%s12265_s27 + $0x400] sm:$0xff] %v5401_v39  ;;  %5594 = vst [vmem:[%s12265_s27 + $0x408] sm:$0xff] %v5402_v60  ;;  %v5181_v35 = vmul.f32 %v12209_v47, %v4957_v26  ;;  %v5182_v58 = vmul.f32 %v12212_v0, %v4958_v61  ;;  %v5183_v44 = vmul.f32 %v12215_v18, %v4959_v1  ;;  %v14609_v1 = vld [vmem:[#allocation71_spill] sm:$0xff] }
 0x5df   : > { %v5184_v43 = vmul.f32 %v12218_v55, %v4960_v45  ;;  %5595 = vst [vmem:[%s12265_s27 + $0x410] sm:$0xff] %v5403_v41  ;;  %5596 = vst [vmem:[%s12265_s27 + $0x418] sm:$0xff] %v5404_v62  ;;  %v5185_v11 = vmul.f32 %v12221_v32, %v4961_v46  ;;  %v5186_v51 = vmul.f32 %v12224_v54, %v4962_v34  ;;  %v14610_v45 = vld [vmem:[#allocation67_spill] sm:$0xff] }
 0x5e0   : > { %v4867_v24 = vmul.f32 %v12529_v50, %v14605_v10  ;;  %v4868_v20 = vmul.f32 %v12529_v50, %v14606_v56  ;;  %v5405_v63 = vadd.f32 %v12227_v22, %v5181_v35  ;;  %v5406_v6 = vadd.f32 %v12230_v13, %v5182_v58  ;;  %v12627_v7 = vpop.xlane.xlu0 %4692  ;;  %v14611_v58 = vld [vmem:[#allocation86_spill] sm:$0xff] }
 0x5e1   : > { %v5407_v23 = vadd.f32 %v12233_v52, %v5183_v44  ;;  %v5408_v49 = vadd.f32 %v12236_v30, %v5184_v43  ;;  %v5409_v36 = vadd.f32 %v12239_v59, %v5185_v11  ;;  %v5410_v26 = vadd.f32 %v12246_v8, %v5186_v51  ;;  %v14612_v43 = vld [vmem:[#allocation136_spill] sm:$0xff] }
 0x5e2   : > { %v4869_v21 = vmul.f32 %v12529_v50, %v11554_v15  ;;  %v4870_v61 = vmul.f32 %v12529_v50, %v11560_v17  ;;  %5597 = vst [vmem:[%s12265_s27 + $0x420] sm:$0xff] %v5405_v63  ;;  %5598 = vst [vmem:[%s12265_s27 + $0x428] sm:$0xff] %v5406_v6  ;;  %v4871_v33 = vmul.f32 %v12529_v50, %v14607_v42  ;;  %v14616_v42 = vld [vmem:[#allocation43_spill] sm:$0xff] }
 0x5e3   : > { %5599 = vst [vmem:[%s12265_s27 + $0x430] sm:$0xff] %v5407_v23  ;;  %5600 = vst [vmem:[%s12265_s27 + $0x438] sm:$0xff] %v5408_v49  ;;  %v4872_v31 = vmul.f32 %v12529_v50, %v14608_v37  ;;  %v5091_v39 = vmul.f32 %v12209_v47, %v4867_v24  ;;  %v5092_v60 = vmul.f32 %v12212_v0, %v4868_v20  ;;  %v14613_v24 = vld [vmem:[#allocation33_spill] sm:$0xff]  ;;  %v14614_v20 = vld [vmem:[#allocation34_spill] sm:$0xff] }
 0x5e4   : > { %5601 = vst [vmem:[%s12265_s27 + $0x440] sm:$0xff] %v5409_v36  ;;  %5602 = vst [vmem:[%s12265_s27 + $0x448] sm:$0xff] %v5410_v26  ;;  %v5093_v17 = vmul.f32 %v12215_v18, %v4869_v21  ;;  %v5094_v15 = vmul.f32 %v12218_v55, %v4870_v61  ;;  %v4873_v19 = vmul.f32 %v12535_v25, %v14609_v1 }
 0x5e5   : > { %v4874_v50 = vmul.f32 %v12535_v25, %v14610_v45  ;;  %v5095_v41 = vmul.f32 %v12221_v32, %v4871_v33  ;;  %v5096_v62 = vmul.f32 %v12224_v54, %v4872_v31  ;;  %v5315_v14 = vadd.f32 %v12227_v22, %v5091_v39  ;;  %v12657_v37 = vpop.xlane.xlu1 %4587 }
 0x5e6   : > { %v5316_v46 = vadd.f32 %v12230_v13, %v5092_v60  ;;  %v5317_v34 = vadd.f32 %v12233_v52, %v5093_v17  ;;  %v5318_v35 = vadd.f32 %v12236_v30, %v5094_v15  ;;  %v4875_v44 = vmul.f32 %v12535_v25, %v14611_v58  ;;  %v14619_v58 = vld [vmem:[#allocation126_spill] sm:$0xff] }
 0x5e7   : > { %v4876_v11 = vmul.f32 %v12535_v25, %v14612_v43  ;;  %v5319_v51 = vadd.f32 %v12239_v59, %v5095_v41  ;;  %v5320_v10 = vadd.f32 %v12246_v8, %v5096_v62  ;;  %5507 = vst [vmem:[%s12265_s27 + $0x150] sm:$0xff] %v5315_v14  ;;  %v4877_v56 = vmul.f32 %v12535_v25, %v14613_v24  ;;  %v14617_v41 = vld [vmem:[#allocation123_spill] sm:$0xff]  ;;  %v14618_v14 = vld [vmem:[#allocation45_spill] sm:$0xff] }
 0x5e8   : > { %5508 = vst [vmem:[%s12265_s27 + $0x158] sm:$0xff] %v5316_v46  ;;  %v4878_v63 = vmul.f32 %v12535_v25, %v14614_v20  ;;  %5509 = vst [vmem:[%s12265_s27 + $0x160] sm:$0xff] %v5317_v34  ;;  %v5097_v6 = vmul.f32 %v12209_v47, %v4873_v19  ;;  %v5098_v23 = vmul.f32 %v12212_v0, %v4874_v50  ;;  %v14615_v25 = vld [vmem:[#allocation40_spill] sm:$0xff]  ;;  %v14620_v43 = vld [vmem:[#allocation69_spill] sm:$0xff] }
 0x5e9   : > { %5510 = vst [vmem:[%s12265_s27 + $0x168] sm:$0xff] %v5318_v35  ;;  %v5099_v49 = vmul.f32 %v12215_v18, %v4875_v44  ;;  %v5100_v36 = vmul.f32 %v12218_v55, %v4876_v11  ;;  %5511 = vst [vmem:[%s12265_s27 + $0x170] sm:$0xff] %v5319_v51  ;;  %v5101_v26 = vmul.f32 %v12221_v32, %v4877_v56 }
 0x5ea   : > { %5512 = vst [vmem:[%s12265_s27 + $0x178] sm:$0xff] %v5320_v10  ;;  %v5102_v21 = vmul.f32 %v12224_v54, %v4878_v63  ;;  %v4963_v61 = vmul.f32 %v12545_v16, %v14615_v25  ;;  %v4964_v33 = vmul.f32 %v12545_v16, %v14616_v42  ;;  %v5321_v31 = vadd.f32 %v12227_v22, %v5097_v6  ;;  %v4595_v50 = vpop.xlane.xlu0 %4594  ;;  %v14621_v63 = vld [vmem:[#allocation48_spill] sm:$0xff]  ;;  %v14623_v25 = vld [vmem:[#allocation173_spill] sm:$0xff]  ;;  %v14624_v42 = vld [vmem:[#allocation127_spill] sm:$0xff] }
 0x5eb   : > { %v5322_v39 = vadd.f32 %v12230_v13, %v5098_v23  ;;  %v5323_v60 = vadd.f32 %v12233_v52, %v5099_v49  ;;  %v5324_v17 = vadd.f32 %v12236_v30, %v5100_v36  ;;  %v5325_v15 = vadd.f32 %v12239_v59, %v5101_v26  ;;  %v14622_v23 = vld [vmem:[#allocation184_spill] sm:$0xff] }
 0x5ec   : > { %v5326_v1 = vadd.f32 %v12246_v8, %v5102_v21  ;;  %v4965_v19 = vmul.f32 %v12545_v16, %v11630_v57  ;;  %v4966_v45 = vmul.f32 %v12545_v16, %v11636_v29  ;;  %5513 = vst [vmem:[%s12265_s27 + $0x180] sm:$0xff] %v5321_v31  ;;  %v4967_v62 = vmul.f32 %v12545_v16, %v14617_v41 }
 0x5ed   : > { %5514 = vst [vmem:[%s12265_s27 + $0x188] sm:$0xff] %v5322_v39  ;;  %5515 = vst [vmem:[%s12265_s27 + $0x190] sm:$0xff] %v5323_v60  ;;  %v4968_v46 = vmul.f32 %v12545_v16, %v14618_v14  ;;  %v5187_v34 = vmul.f32 %v12209_v47, %v4963_v61  ;;  %v5188_v35 = vmul.f32 %v12212_v0, %v4964_v33 }
 0x5ee   : > { %5516 = vst [vmem:[%s12265_s27 + $0x198] sm:$0xff] %v5324_v17  ;;  %5517 = vst [vmem:[%s12265_s27 + $0x1a0] sm:$0xff] %v5325_v15  ;;  %v5189_v29 = vmul.f32 %v12215_v18, %v4965_v19  ;;  %v5190_v57 = vmul.f32 %v12218_v55, %v4966_v45  ;;  %v4969_v44 = vmul.f32 %v12561_v48, %v14619_v58  ;;  %v4700_v36 = vpop.xlane.xlu1 %4699  ;;  %v4770_v19 = vadd.f32 1e-05, %v12505_v2 }
 0x5ef   : > { %5518 = vst [vmem:[%s12265_s27 + $0x1a8] sm:$0xff] %v5326_v1  ;;  %v4970_v11 = vmul.f32 %v12561_v48, %v14620_v43  ;;  %v5191_v16 = vmul.f32 %v12221_v32, %v4967_v62  ;;  %v5192_v51 = vmul.f32 %v12224_v54, %v4968_v46  ;;  %v5411_v10 = vadd.f32 %v12227_v22, %v5187_v34 }
 0x5f0   : > { %v5412_v24 = vadd.f32 %v12230_v13, %v5188_v35  ;;  %v5413_v56 = vadd.f32 %v12233_v52, %v5189_v29  ;;  %v5414_v20 = vadd.f32 %v12236_v30, %v5190_v57  ;;  %v4971_v6 = vmul.f32 %v12561_v48, %v14621_v63 }
 0x5f1   : > { %v4972_v49 = vmul.f32 %v12561_v48, %v14622_v23  ;;  %v5415_v26 = vadd.f32 %v12239_v59, %v5191_v16  ;;  %v5416_v21 = vadd.f32 %v12246_v8, %v5192_v51  ;;  %5603 = vst [vmem:[%s12265_s27 + $0x450] sm:$0xff] %v5411_v10  ;;  %v4973_v61 = vmul.f32 %v12561_v48, %v14623_v25 }
 0x5f2   : > { %5604 = vst [vmem:[%s12265_s27 + $0x458] sm:$0xff] %v5412_v24  ;;  %v4974_v33 = vmul.f32 %v12561_v48, %v14624_v42  ;;  %5605 = vst [vmem:[%s12265_s27 + $0x460] sm:$0xff] %v5413_v56  ;;  %v5193_v31 = vmul.f32 %v12209_v47, %v4969_v44  ;;  %v5194_v39 = vmul.f32 %v12212_v0, %v4970_v11  ;;  %v4739_v45 = vmul.f32 0.0013020834, %v12583_v9 }
 0x5f3   : > { %5606 = vst [vmem:[%s12265_s27 + $0x468] sm:$0xff] %v5414_v20  ;;  %v5195_v60 = vmul.f32 %v12215_v18, %v4971_v6  ;;  %v5196_v17 = vmul.f32 %v12218_v55, %v4972_v49  ;;  %5607 = vst [vmem:[%s12265_s27 + $0x470] sm:$0xff] %v5415_v26  ;;  %v5197_v1 = vmul.f32 %v12221_v32, %v4973_v61  ;;  %7151 = vrsqrt.f32 %v4770_v19 }
 0x5f4   : > { %v4707_v15 = vpop.xlane.xlu0 %4706  ;;  %5608 = vst [vmem:[%s12265_s27 + $0x478] sm:$0xff] %v5416_v21  ;;  %v5198_v48 = vmul.f32 %v12224_v54, %v4974_v33  ;;  %v5417_v41 = vadd.f32 %v12227_v22, %v5193_v31  ;;  %v5418_v62 = vadd.f32 %v12230_v13, %v5194_v39  ;;  %v4771_v29 = vadd.f32 1e-05, %v4739_v45  ;;  %v14626_v21 = vld [vmem:[#allocation90_spill] sm:$0xff]  ;;  %v14627_v31 = vld [vmem:[#allocation37_spill] sm:$0xff] }
 0x5f5   : > { %v5419_v14 = vadd.f32 %v12233_v52, %v5195_v60  ;;  %v5420_v46 = vadd.f32 %v12236_v30, %v5196_v17  ;;  %v5421_v34 = vadd.f32 %v12239_v59, %v5197_v1  ;;  %v4754_v2 = vmul.f32 0.0013020834, %v12613_v27  ;;  %v14628_v60 = vld [vmem:[#allocation91_spill] sm:$0xff] }
 0x5f6   : > { %v5422_v35 = vadd.f32 %v12246_v8, %v5198_v48  ;;  %5609 = vst [vmem:[%s12265_s27 + $0x480] sm:$0xff] %v5417_v41  ;;  %5610 = vst [vmem:[%s12265_s27 + $0x488] sm:$0xff] %v5418_v62  ;;  %v4755_v9 = vmul.f32 0.0013020834, %v12627_v7  ;;  %v4740_v57 = vmul.f32 0.0013020834, %v12657_v37  ;;  %7153 = vrsqrt.f32 %v4771_v29 }
 0x5f7   : > { %5611 = vst [vmem:[%s12265_s27 + $0x490] sm:$0xff] %v5419_v14  ;;  %5612 = vst [vmem:[%s12265_s27 + $0x498] sm:$0xff] %v5420_v46  ;;  %v4741_v44 = vmul.f32 0.0013020834, %v4595_v50  ;;  %v4756_v43 = vmul.f32 0.0013020834, %v4700_v36 }
 0x5f8   : > { %5613 = vst [vmem:[%s12265_s27 + $0x4a0] sm:$0xff] %v5421_v34  ;;  %5614 = vst [vmem:[%s12265_s27 + $0x4a8] sm:$0xff] %v5422_v35  ;;  %v4757_v11 = vmul.f32 0.0013020834, %v4707_v15  ;;  %v4786_v16 = vadd.f32 1e-05, %v4754_v2 }
 0x5f9   : > { %v4602_v58 = vpop.xlane.xlu1 %4601  ;;  %v4787_v51 = vadd.f32 1e-05, %v4755_v9  ;;  %v4772_v10 = vadd.f32 1e-05, %v4740_v57  ;;  %v4773_v56 = vadd.f32 1e-05, %v4741_v44 }
 0x5fa   : > { %7155 = vrsqrt.f32 %v4786_v16  ;;  %v4788_v20 = vadd.f32 1e-05, %v4756_v43  ;;  %v4742_v63 = vmul.f32 0.0013020834, %v4602_v58  ;;  %v4789_v27 = vadd.f32 1e-05, %v4757_v11 }
 0x5fb   : > { %7157 = vrsqrt.f32 %v4787_v51  ;;  %v14625_v36 = vld [vmem:[#allocation89_spill] sm:$0xff]  ;;  %v14631_v43 = vld [vmem:[#allocation92_spill] sm:$0xff] }
 0x5fc   : > { %7159 = vrsqrt.f32 %v4772_v10  ;;  %v4774_v6 = vadd.f32 1e-05, %v4742_v63  ;;  %v14629_v41 = vld [vmem:[#allocation109_spill] sm:$0xff]  ;;  %v14632_v16 = vld [vmem:[#allocation180_spill] sm:$0xff] }
 0x5fd   : > { %v4609_v24 = vpop.xlane.xlu0 %4608  ;;  %7161 = vrsqrt.f32 %v4773_v56  ;;  %v7152_v50 = vpop.eup %7151  ;;  %v14630_v14 = vld [vmem:[#allocation41_spill] sm:$0xff] }
 0x5fe   : > { %v4743_v7 = vmul.f32 0.0013020834, %v4609_v24  ;;  %7163 = vrsqrt.f32 %v4788_v20  ;;  %v4879_v26 = vmul.f32 %v7152_v50, %v14625_v36  ;;  %v4880_v25 = vmul.f32 %v7152_v50, %v14626_v21  ;;  %v14633_v24 = vld [vmem:[#allocation107_spill] sm:$0xff]  ;;  %v14634_v20 = vld [vmem:[#allocation160_spill] sm:$0xff] }
 0x5ff   : > { %7165 = vrsqrt.f32 %v4789_v27  ;;  %v4881_v61 = vmul.f32 %v7152_v50, %v11706_v40  ;;  %v4882_v42 = vmul.f32 %v7152_v50, %v11712_v28  ;;  %v4883_v39 = vmul.f32 %v7152_v50, %v14627_v31 }
 0x600   : > { %v12732_v49 = vadd.f32 1e-05, %v4743_v7  ;;  %v7154_v33 = vpop.eup %7153  ;;  %v4884_v17 = vmul.f32 %v7152_v50, %v14628_v60  ;;  %7167 = vrsqrt.f32 %v4774_v6  ;;  %v5103_v1 = vmul.f32 %v12209_v47, %v4879_v26  ;;  %v14635_v50 = vld [vmem:[#allocation49_spill] sm:$0xff] }
 0x601   : > { %v5104_v48 = vmul.f32 %v12212_v0, %v4880_v25  ;;  %v5105_v19 = vmul.f32 %v12215_v18, %v4881_v61  ;;  %v5106_v45 = vmul.f32 %v12218_v55, %v4882_v42  ;;  %v5107_v40 = vmul.f32 %v12221_v32, %v4883_v39 }
 0x602   : > { %v4714_v37 = vpop.xlane.xlu1 %4713  ;;  %v5108_v28 = vmul.f32 %v12224_v54, %v4884_v17  ;;  %v4885_v62 = vmul.f32 %v7154_v33, %v14629_v41  ;;  %v4886_v46 = vmul.f32 %v7154_v33, %v14630_v14  ;;  %v5327_v35 = vadd.f32 %v12227_v22, %v5103_v1 }
 0x603   : > { %v4758_v23 = vmul.f32 0.0013020834, %v4714_v37  ;;  %v5328_v29 = vadd.f32 %v12230_v13, %v5104_v48  ;;  %v5329_v2 = vadd.f32 %v12233_v52, %v5105_v19  ;;  %v5330_v9 = vadd.f32 %v12236_v30, %v5106_v45  ;;  %v14636_v45 = vld [vmem:[#allocation50_spill] sm:$0xff] }
 0x604   : > { %v7156_v34 = vpop.eup %7155  ;;  %v5331_v58 = vadd.f32 %v12239_v59, %v5107_v40  ;;  %v5332_v44 = vadd.f32 %v12246_v8, %v5108_v28  ;;  %v4887_v11 = vmul.f32 %v7154_v33, %v14631_v43  ;;  %v4888_v51 = vmul.f32 %v7154_v33, %v14632_v16  ;;  %5519 = vst [vmem:[%s12265_s27 + $0x1b0] sm:$0xff] %v5327_v35  ;;  %v14638_v35 = vld [vmem:[#allocation182_spill] sm:$0xff]  ;;  %v14639_v16 = vld [vmem:[#allocation68_spill] sm:$0xff] }
 0x605   : > { %v12740_v15 = vadd.f32 1e-05, %v4758_v23  ;;  %v12754_v57 = vpop.eup %7157  ;;  %5520 = vst [vmem:[%s12265_s27 + $0x1b8] sm:$0xff] %v5328_v29  ;;  %5521 = vst [vmem:[%s12265_s27 + $0x1c0] sm:$0xff] %v5329_v2  ;;  %v4889_v56 = vmul.f32 %v7154_v33, %v14633_v24  ;;  %v4890_v63 = vmul.f32 %v7154_v33, %v14634_v20  ;;  %v5109_v27 = vmul.f32 %v12209_v47, %v4885_v62  ;;  %v14640_v24 = vld [vmem:[#allocation115_spill] sm:$0xff]  ;;  %v14641_v20 = vld [vmem:[#allocation53_spill] sm:$0xff] }
 0x606   : > { %v12760_v10 = vpop.eup %7159  ;;  %5522 = vst [vmem:[%s12265_s27 + $0x1c8] sm:$0xff] %v5330_v9  ;;  %v5110_v7 = vmul.f32 %v12212_v0, %v4886_v46  ;;  %5523 = vst [vmem:[%s12265_s27 + $0x1d0] sm:$0xff] %v5331_v58  ;;  %v5111_v6 = vmul.f32 %v12215_v18, %v4887_v11  ;;  %v5112_v23 = vmul.f32 %v12218_v55, %v4888_v51  ;;  %v14637_v46 = vld [vmem:[#allocation178_spill] sm:$0xff]  ;;  %7169 = vrsqrt.f32 %v12732_v49 }
 0x607   : > { %v12770_v37 = vpop.eup %7161  ;;  %5524 = vst [vmem:[%s12265_s27 + $0x1d8] sm:$0xff] %v5332_v44  ;;  %v4975_v36 = vmul.f32 %v7156_v34, %v14635_v50  ;;  %v4976_v26 = vmul.f32 %v7156_v34, %v11778_v38  ;;  %v5113_v25 = vmul.f32 %v12221_v32, %v4889_v56  ;;  %v5114_v61 = vmul.f32 %v12224_v54, %v4890_v63 }
 0x608   : > { %v12778_v21 = vpop.eup %7163  ;;  %v5333_v42 = vadd.f32 %v12227_v22, %v5109_v27  ;;  %v5334_v33 = vadd.f32 %v12230_v13, %v5110_v7  ;;  %v5335_v39 = vadd.f32 %v12233_v52, %v5111_v6  ;;  %v5336_v60 = vadd.f32 %v12236_v30, %v5112_v23 }
 0x609   : > { %v12784_v31 = vpop.eup %7165  ;;  %v4977_v38 = vmul.f32 %v7156_v34, %v11782_v3  ;;  %v4978_v17 = vmul.f32 %v7156_v34, %v11788_v12  ;;  %v5337_v1 = vadd.f32 %v12239_v59, %v5113_v25  ;;  %v5338_v48 = vadd.f32 %v12246_v8, %v5114_v61  ;;  %v14643_v25 = vld [vmem:[#allocation183_spill] sm:$0xff] }
 0x60a   : > { %5525 = vst [vmem:[%s12265_s27 + $0x1e0] sm:$0xff] %v5333_v42  ;;  %5526 = vst [vmem:[%s12265_s27 + $0x1e8] sm:$0xff] %v5334_v33  ;;  %v4979_v19 = vmul.f32 %v7156_v34, %v11800_v5  ;;  %v4980_v40 = vmul.f32 %v7156_v34, %v14636_v45  ;;  %v12796_v28 = vpop.eup %7167  ;;  %v5199_v41 = vmul.f32 %v12209_v47, %v4975_v36  ;;  %v14642_v36 = vld [vmem:[#allocation54_spill] sm:$0xff]  ;;  %v14645_v45 = vld [vmem:[#allocation93_spill] sm:$0xff]  ;;  %7171 = vrsqrt.f32 %v12740_v15 }
 0x60b   : > { %5527 = vst [vmem:[%s12265_s27 + $0x1f0] sm:$0xff] %v5335_v39  ;;  %5528 = vst [vmem:[%s12265_s27 + $0x1f8] sm:$0xff] %v5336_v60  ;;  %v5200_v3 = vmul.f32 %v12212_v0, %v4976_v26  ;;  %v5201_v12 = vmul.f32 %v12215_v18, %v4977_v38  ;;  %v5202_v62 = vmul.f32 %v12218_v55, %v4978_v17  ;;  %v14644_v17 = vld [vmem:[#allocation82_spill] sm:$0xff] }
 0x60c   : > { %5529 = vst [vmem:[%s12265_s27 + $0x200] sm:$0xff] %v5337_v1  ;;  %5530 = vst [vmem:[%s12265_s27 + $0x208] sm:$0xff] %v5338_v48  ;;  %v5203_v5 = vmul.f32 %v12221_v32, %v4979_v19  ;;  %v5204_v14 = vmul.f32 %v12224_v54, %v4980_v40  ;;  %v4981_v34 = vmul.f32 %v12754_v57, %v14637_v46  ;;  %v14647_v46 = vld [vmem:[#allocation159_spill] sm:$0xff] }
 0x60d   : > { %v4982_v29 = vmul.f32 %v12754_v57, %v14638_v35  ;;  %v5423_v2 = vadd.f32 %v12227_v22, %v5199_v41  ;;  %v5424_v9 = vadd.f32 %v12230_v13, %v5200_v3  ;;  %v5425_v58 = vadd.f32 %v12233_v52, %v5201_v12  ;;  %v14646_v41 = vld [vmem:[#allocation94_spill] sm:$0xff]  ;;  %v14648_v35 = vld [vmem:[#allocation44_spill] sm:$0xff] }
 0x60e   : > { %v5426_v44 = vadd.f32 %v12236_v30, %v5202_v62  ;;  %v5427_v43 = vadd.f32 %v12239_v59, %v5203_v5  ;;  %v5428_v11 = vadd.f32 %v12246_v8, %v5204_v14  ;;  %v4983_v51 = vmul.f32 %v12754_v57, %v14639_v16  ;;  %v14649_v16 = vld [vmem:[#allocation121_spill] sm:$0xff] }
 0x60f   : > { %v4984_v56 = vmul.f32 %v12754_v57, %v14640_v24  ;;  %5615 = vst [vmem:[%s12265_s27 + $0x4b0] sm:$0xff] %v5423_v2  ;;  %5616 = vst [vmem:[%s12265_s27 + $0x4b8] sm:$0xff] %v5424_v9  ;;  %v4985_v63 = vmul.f32 %v12754_v57, %v14641_v20  ;;  %v4986_v27 = vmul.f32 %v12754_v57, %v11846_v4  ;;  %v14650_v24 = vld [vmem:[#allocation95_spill] sm:$0xff]  ;;  %v14651_v20 = vld [vmem:[#allocation96_spill] sm:$0xff] }
 0x610   : > { %5617 = vst [vmem:[%s12265_s27 + $0x4c0] sm:$0xff] %v5425_v58  ;;  %5618 = vst [vmem:[%s12265_s27 + $0x4c8] sm:$0xff] %v5426_v44  ;;  %v5205_v7 = vmul.f32 %v12209_v47, %v4981_v34  ;;  %v5206_v6 = vmul.f32 %v12212_v0, %v4982_v29  ;;  %v5207_v23 = vmul.f32 %v12215_v18, %v4983_v51 }
 0x611   : > { %5619 = vst [vmem:[%s12265_s27 + $0x4d0] sm:$0xff] %v5427_v43  ;;  %5620 = vst [vmem:[%s12265_s27 + $0x4d8] sm:$0xff] %v5428_v11  ;;  %v5208_v50 = vmul.f32 %v12218_v55, %v4984_v56  ;;  %v4891_v26 = vmul.f32 %v12760_v10, %v14642_v36  ;;  %v4892_v61 = vmul.f32 %v12760_v10, %v14643_v25 }
 0x612   : > { %v5209_v4 = vmul.f32 %v12221_v32, %v4985_v63  ;;  %v5210_v57 = vmul.f32 %v12224_v54, %v4986_v27  ;;  %v5429_v42 = vadd.f32 %v12227_v22, %v5205_v7  ;;  %v5430_v33 = vadd.f32 %v12230_v13, %v5206_v6  ;;  %v14652_v27 = vld [vmem:[#allocation55_spill] sm:$0xff] }
 0x613   : > { %v5431_v39 = vadd.f32 %v12233_v52, %v5207_v23  ;;  %v5432_v60 = vadd.f32 %v12236_v30, %v5208_v50  ;;  %v4893_v38 = vmul.f32 %v12760_v10, %v11858_v53  ;;  %v4894_v1 = vmul.f32 %v12760_v10, %v14644_v17 }
 0x614   : > { %v5433_v48 = vadd.f32 %v12239_v59, %v5209_v4  ;;  %v5434_v19 = vadd.f32 %v12246_v8, %v5210_v57  ;;  %5621 = vst [vmem:[%s12265_s27 + $0x4e0] sm:$0xff] %v5429_v42  ;;  %5622 = vst [vmem:[%s12265_s27 + $0x4e8] sm:$0xff] %v5430_v33  ;;  %v4895_v40 = vmul.f32 %v12760_v10, %v14645_v45 }
 0x615   : > { %v4896_v3 = vmul.f32 %v12760_v10, %v14646_v41  ;;  %5623 = vst [vmem:[%s12265_s27 + $0x4f0] sm:$0xff] %v5431_v39  ;;  %5624 = vst [vmem:[%s12265_s27 + $0x4f8] sm:$0xff] %v5432_v60  ;;  %v5115_v12 = vmul.f32 %v12209_v47, %v4891_v26  ;;  %v5116_v53 = vmul.f32 %v12212_v0, %v4892_v61  ;;  %v14653_v26 = vld [vmem:[#allocation30_spill] sm:$0xff]  ;;  %v14654_v61 = vld [vmem:[#allocation112_spill] sm:$0xff] }
 0x616   : > { %v5117_v62 = vmul.f32 %v12215_v18, %v4893_v38  ;;  %v5118_v5 = vmul.f32 %v12218_v55, %v4894_v1  ;;  %5625 = vst [vmem:[%s12265_s27 + $0x500] sm:$0xff] %v5433_v48  ;;  %5626 = vst [vmem:[%s12265_s27 + $0x508] sm:$0xff] %v5434_v19  ;;  %v5119_v14 = vmul.f32 %v12221_v32, %v4895_v40  ;;  %v14655_v38 = vld [vmem:[#allocation56_spill] sm:$0xff]  ;;  %v14657_v40 = vld [vmem:[#allocation155_spill] sm:$0xff] }
 0x617   : > { %v5120_v10 = vmul.f32 %v12224_v54, %v4896_v3  ;;  %v4897_v34 = vmul.f32 %v12770_v37, %v14647_v46  ;;  %v4898_v29 = vmul.f32 %v12770_v37, %v14648_v35  ;;  %v5339_v2 = vadd.f32 %v12227_v22, %v5115_v12  ;;  %v14656_v1 = vld [vmem:[#allocation172_spill] sm:$0xff]  ;;  %v14658_v3 = vld [vmem:[#allocation157_spill] sm:$0xff]  ;;  %v14659_v46 = vld [vmem:[#allocation51_spill] sm:$0xff] }
 0x618   : > { %v5340_v9 = vadd.f32 %v12230_v13, %v5116_v53  ;;  %v5341_v58 = vadd.f32 %v12233_v52, %v5117_v62  ;;  %v5342_v44 = vadd.f32 %v12236_v30, %v5118_v5  ;;  %v5343_v43 = vadd.f32 %v12239_v59, %v5119_v14  ;;  %v14660_v35 = vld [vmem:[#allocation171_spill] sm:$0xff] }
 0x619   : > { %v5344_v11 = vadd.f32 %v12246_v8, %v5120_v10  ;;  %v4899_v51 = vmul.f32 %v12770_v37, %v14649_v16  ;;  %v4900_v56 = vmul.f32 %v12770_v37, %v14650_v24  ;;  %5531 = vst [vmem:[%s12265_s27 + $0x210] sm:$0xff] %v5339_v2  ;;  %v4901_v63 = vmul.f32 %v12770_v37, %v14651_v20  ;;  %v14661_v16 = vld [vmem:[#allocation57_spill] sm:$0xff]  ;;  %v14662_v24 = vld [vmem:[#allocation58_spill] sm:$0xff] }
 0x61a   : > { %5532 = vst [vmem:[%s12265_s27 + $0x218] sm:$0xff] %v5340_v9  ;;  %5533 = vst [vmem:[%s12265_s27 + $0x220] sm:$0xff] %v5341_v58  ;;  %v4902_v7 = vmul.f32 %v12770_v37, %v14652_v27  ;;  %v5121_v6 = vmul.f32 %v12209_v47, %v4897_v34  ;;  %v5122_v23 = vmul.f32 %v12212_v0, %v4898_v29  ;;  %v14663_v20 = vld [vmem:[#allocation66_spill] sm:$0xff] }
 0x61b   : > { %5534 = vst [vmem:[%s12265_s27 + $0x228] sm:$0xff] %v5342_v44  ;;  %5535 = vst [vmem:[%s12265_s27 + $0x230] sm:$0xff] %v5343_v43  ;;  %v5123_v50 = vmul.f32 %v12215_v18, %v4899_v51  ;;  %v5124_v36 = vmul.f32 %v12218_v55, %v4900_v56  ;;  %v4987_v25 = vmul.f32 %v12778_v21, %v14653_v26  ;;  %v14664_v27 = vld [vmem:[#allocation134_spill] sm:$0xff]  ;;  %v14665_v26 = vld [vmem:[#allocation97_spill] sm:$0xff] }
 0x61c   : > { %5536 = vst [vmem:[%s12265_s27 + $0x238] sm:$0xff] %v5344_v11  ;;  %v4988_v4 = vmul.f32 %v12778_v21, %v14654_v61  ;;  %v5125_v37 = vmul.f32 %v12221_v32, %v4901_v63  ;;  %v5126_v57 = vmul.f32 %v12224_v54, %v4902_v7  ;;  %v5345_v42 = vadd.f32 %v12227_v22, %v5121_v6  ;;  %v14666_v61 = vld [vmem:[#allocation98_spill] sm:$0xff] }
 0x61d   : > { %v5346_v33 = vadd.f32 %v12230_v13, %v5122_v23  ;;  %v5347_v39 = vadd.f32 %v12233_v52, %v5123_v50  ;;  %v5348_v60 = vadd.f32 %v12236_v30, %v5124_v36  ;;  %v4989_v17 = vmul.f32 %v12778_v21, %v14655_v38  ;;  %v14667_v38 = vld [vmem:[#allocation108_spill] sm:$0xff] }
 0x61e   : > { %v4990_v48 = vmul.f32 %v12778_v21, %v14656_v1  ;;  %v5349_v19 = vadd.f32 %v12239_v59, %v5125_v37  ;;  %v5350_v45 = vadd.f32 %v12246_v8, %v5126_v57  ;;  %5537 = vst [vmem:[%s12265_s27 + $0x240] sm:$0xff] %v5345_v42  ;;  %v4991_v41 = vmul.f32 %v12778_v21, %v14657_v40  ;;  %v4616_v37 = vpop.xlane.xlu1 %4615  ;;  %v14668_v1 = vld [vmem:[#allocation113_spill] sm:$0xff] }
 0x61f   : > { %5538 = vst [vmem:[%s12265_s27 + $0x248] sm:$0xff] %v5346_v33  ;;  %v4992_v12 = vmul.f32 %v12778_v21, %v14658_v3  ;;  %5539 = vst [vmem:[%s12265_s27 + $0x250] sm:$0xff] %v5347_v39  ;;  %v5211_v53 = vmul.f32 %v12209_v47, %v4987_v25  ;;  %v5212_v62 = vmul.f32 %v12212_v0, %v4988_v4  ;;  %v4744_v49 = vmul.f32 0.0013020834, %v4616_v37 }
 0x620   : > { %5540 = vst [vmem:[%s12265_s27 + $0x258] sm:$0xff] %v5348_v60  ;;  %v5213_v5 = vmul.f32 %v12215_v18, %v4989_v17  ;;  %v5214_v14 = vmul.f32 %v12218_v55, %v4990_v48  ;;  %5541 = vst [vmem:[%s12265_s27 + $0x260] sm:$0xff] %v5349_v19  ;;  %v5215_v10 = vmul.f32 %v12221_v32, %v4991_v41  ;;  %v4721_v19 = vpop.xlane.xlu0 %4720  ;;  %v14669_v41 = vld [vmem:[#allocation122_spill] sm:$0xff] }
 0x621   : > { %5542 = vst [vmem:[%s12265_s27 + $0x268] sm:$0xff] %v5350_v45  ;;  %v5216_v21 = vmul.f32 %v12224_v54, %v4992_v12  ;;  %v4993_v34 = vmul.f32 %v12784_v31, %v14659_v46  ;;  %v4994_v29 = vmul.f32 %v12784_v31, %v14660_v35  ;;  %v5435_v2 = vadd.f32 %v12227_v22, %v5211_v53  ;;  %v14670_v12 = vld [vmem:[#allocation165_spill] sm:$0xff] }
 0x622   : > { %v5436_v9 = vadd.f32 %v12230_v13, %v5212_v62  ;;  %v5437_v58 = vadd.f32 %v12233_v52, %v5213_v5  ;;  %v5438_v44 = vadd.f32 %v12236_v30, %v5214_v14  ;;  %v5439_v43 = vadd.f32 %v12239_v59, %v5215_v10 }
 0x623   : > { %v5440_v11 = vadd.f32 %v12246_v8, %v5216_v21  ;;  %v4995_v51 = vmul.f32 %v12784_v31, %v14661_v16  ;;  %v4996_v56 = vmul.f32 %v12784_v31, %v14662_v24  ;;  %5627 = vst [vmem:[%s12265_s27 + $0x510] sm:$0xff] %v5435_v2  ;;  %v4997_v63 = vmul.f32 %v12784_v31, %v14663_v20  ;;  %v7170_v24 = vpop.eup %7169 }
 0x624   : > { %5628 = vst [vmem:[%s12265_s27 + $0x518] sm:$0xff] %v5436_v9  ;;  %5629 = vst [vmem:[%s12265_s27 + $0x520] sm:$0xff] %v5437_v58  ;;  %v4998_v7 = vmul.f32 %v12784_v31, %v14664_v27  ;;  %v5217_v6 = vmul.f32 %v12209_v47, %v4993_v34  ;;  %v5218_v23 = vmul.f32 %v12212_v0, %v4994_v29  ;;  %v4759_v46 = vmul.f32 0.0013020834, %v4721_v19  ;;  %v4728_v9 = vpop.xlane.xlu1 %4727 }
 0x625   : > { %5630 = vst [vmem:[%s12265_s27 + $0x528] sm:$0xff] %v5438_v44  ;;  %5631 = vst [vmem:[%s12265_s27 + $0x530] sm:$0xff] %v5439_v43  ;;  %v5219_v50 = vmul.f32 %v12215_v18, %v4995_v51  ;;  %v5220_v36 = vmul.f32 %v12218_v55, %v4996_v56  ;;  %v4903_v25 = vmul.f32 %v12796_v28, %v14665_v26  ;;  %v4776_v16 = vadd.f32 1e-05, %v4744_v49  ;;  %v14671_v56 = vld [vmem:[#allocation99_spill] sm:$0xff] }
 0x626   : > { %5632 = vst [vmem:[%s12265_s27 + $0x538] sm:$0xff] %v5440_v11  ;;  %v4904_v4 = vmul.f32 %v12796_v28, %v14666_v61  ;;  %v5221_v31 = vmul.f32 %v12221_v32, %v4997_v63  ;;  %v5222_v57 = vmul.f32 %v12224_v54, %v4998_v7  ;;  %v5441_v42 = vadd.f32 %v12227_v22, %v5217_v6  ;;  %v14672_v63 = vld [vmem:[#allocation100_spill] sm:$0xff]  ;;  %v14673_v7 = vld [vmem:[#allocation111_spill] sm:$0xff] }
 0x627   : > { %v5442_v33 = vadd.f32 %v12230_v13, %v5218_v23  ;;  %v5443_v39 = vadd.f32 %v12233_v52, %v5219_v50  ;;  %v5444_v60 = vadd.f32 %v12236_v30, %v5220_v36  ;;  %v4905_v17 = vmul.f32 %v12796_v28, %v14667_v38  ;;  %v14674_v6 = vld [vmem:[#allocation88_spill] sm:$0xff]  ;;  %v7172_v50 = vpop.eup %7171  ;;  %v14675_v36 = vld [vmem:[#allocation186_spill] sm:$0xff]  ;;  %v14678_v38 = vld [vmem:[#allocation61_spill] sm:$0xff] }
 0x628   : > { %v4906_v48 = vmul.f32 %v12796_v28, %v14668_v1  ;;  %v5445_v45 = vadd.f32 %v12239_v59, %v5221_v31  ;;  %v5446_v40 = vadd.f32 %v12246_v8, %v5222_v57  ;;  %5633 = vst [vmem:[%s12265_s27 + $0x540] sm:$0xff] %v5441_v42  ;;  %v4907_v3 = vmul.f32 %v12796_v28, %v14669_v41 }
 0x629   : > { %5634 = vst [vmem:[%s12265_s27 + $0x548] sm:$0xff] %v5442_v33  ;;  %v4908_v53 = vmul.f32 %v12796_v28, %v14670_v12  ;;  %5635 = vst [vmem:[%s12265_s27 + $0x550] sm:$0xff] %v5443_v39  ;;  %v5127_v62 = vmul.f32 %v12209_v47, %v4903_v25  ;;  %v5128_v5 = vmul.f32 %v12212_v0, %v4904_v4  ;;  %v4791_v43 = vadd.f32 1e-05, %v4759_v46  ;;  %v14676_v25 = vld [vmem:[#allocation187_spill] sm:$0xff]  ;;  %v14677_v39 = vld [vmem:[#allocation60_spill] sm:$0xff] }
 0x62a   : > { %5636 = vst [vmem:[%s12265_s27 + $0x558] sm:$0xff] %v5444_v60  ;;  %v5129_v14 = vmul.f32 %v12215_v18, %v4905_v17  ;;  %v5130_v10 = vmul.f32 %v12218_v55, %v4906_v48  ;;  %5637 = vst [vmem:[%s12265_s27 + $0x560] sm:$0xff] %v5445_v45  ;;  %v5131_v21 = vmul.f32 %v12221_v32, %v4907_v3  ;;  %v4760_v11 = vmul.f32 0.0013020834, %v4728_v9  ;;  %v14679_v12 = vld [vmem:[#allocation120_spill] sm:$0xff] }
 0x62b   : > { %5638 = vst [vmem:[%s12265_s27 + $0x568] sm:$0xff] %v5446_v40  ;;  %v5132_v28 = vmul.f32 %v12224_v54, %v4908_v53  ;;  %v5351_v34 = vadd.f32 %v12227_v22, %v5127_v62  ;;  %v5352_v35 = vadd.f32 %v12230_v13, %v5128_v5  ;;  %7173 = vrsqrt.f32 %v4791_v43  ;;  %v14680_v62 = vld [vmem:[#allocation104_spill] sm:$0xff] }
 0x62c   : > { %v5353_v29 = vadd.f32 %v12233_v52, %v5129_v14  ;;  %v5354_v2 = vadd.f32 %v12236_v30, %v5130_v10  ;;  %v5355_v58 = vadd.f32 %v12239_v59, %v5131_v21  ;;  %v4792_v51 = vadd.f32 1e-05, %v4760_v11  ;;  %v14681_v14 = vld [vmem:[#allocation164_spill] sm:$0xff] }
 0x62d   : > { %v5356_v44 = vadd.f32 %v12246_v8, %v5132_v28  ;;  %5543 = vst [vmem:[%s12265_s27 + $0x270] sm:$0xff] %v5351_v34  ;;  %5544 = vst [vmem:[%s12265_s27 + $0x278] sm:$0xff] %v5352_v35  ;;  %7175 = vrsqrt.f32 %v4776_v16  ;;  %v4909_v20 = vmul.f32 %v7170_v24, %v14671_v56  ;;  %v4910_v27 = vmul.f32 %v7170_v24, %v14672_v63  ;;  %v14682_v21 = vld [vmem:[#allocation188_spill] sm:$0xff] }
 0x62e   : > { %5545 = vst [vmem:[%s12265_s27 + $0x280] sm:$0xff] %v5353_v29  ;;  %5546 = vst [vmem:[%s12265_s27 + $0x288] sm:$0xff] %v5354_v2  ;;  %v4911_v15 = vmul.f32 %v7170_v24, %v14673_v7  ;;  %v4912_v23 = vmul.f32 %v7170_v24, %v14674_v6  ;;  %v4913_v26 = vmul.f32 %v7170_v24, %v14675_v36  ;;  %7177 = vrsqrt.f32 %v4792_v51  ;;  %v14683_v2 = vld [vmem:[#allocation130_spill] sm:$0xff] }
 0x62f   : > { %5547 = vst [vmem:[%s12265_s27 + $0x290] sm:$0xff] %v5355_v58  ;;  %5548 = vst [vmem:[%s12265_s27 + $0x298] sm:$0xff] %v5356_v44  ;;  %v4914_v61 = vmul.f32 %v7170_v24, %v14676_v25  ;;  %v5133_v4 = vmul.f32 %v12209_v47, %v4909_v20  ;;  %v5134_v37 = vmul.f32 %v12212_v0, %v4910_v27  ;;  %v14684_v58 = vld [vmem:[#allocation131_spill] sm:$0xff]  ;;  %v14685_v20 = vld [vmem:[#allocation137_spill] sm:$0xff] }
 0x630   : > { %v5135_v31 = vmul.f32 %v12215_v18, %v4911_v15  ;;  %v5136_v57 = vmul.f32 %v12218_v55, %v4912_v23  ;;  %v5137_v42 = vmul.f32 %v12221_v32, %v4913_v26  ;;  %v4999_v60 = vmul.f32 %v7172_v50, %v14677_v39  ;;  %v14686_v27 = vld [vmem:[#allocation163_spill] sm:$0xff]  ;;  %v14687_v23 = vld [vmem:[#allocation189_spill] sm:$0xff]  ;;  %v14688_v36 = vld [vmem:[#allocation174_spill] sm:$0xff] }
 0x631   : > { %v5138_v33 = vmul.f32 %v12224_v54, %v4914_v61  ;;  %v5000_v17 = vmul.f32 %v7172_v50, %v14678_v38  ;;  %v5357_v48 = vadd.f32 %v12227_v22, %v5133_v4  ;;  %v5358_v19 = vadd.f32 %v12230_v13, %v5134_v37 }
 0x632   : > { %v5359_v45 = vadd.f32 %v12233_v52, %v5135_v31  ;;  %v5360_v40 = vadd.f32 %v12236_v30, %v5136_v57  ;;  %v5361_v41 = vadd.f32 %v12239_v59, %v5137_v42  ;;  %v5001_v53 = vmul.f32 %v7172_v50, %v14679_v12  ;;  %v14692_v12 = vld [vmem:[#allocation170_spill] sm:$0xff] }
 0x633   : > { %v5362_v3 = vadd.f32 %v12246_v8, %v5138_v33  ;;  %v5002_v5 = vmul.f32 %v7172_v50, %v14680_v62  ;;  %5549 = vst [vmem:[%s12265_s27 + $0x2a0] sm:$0xff] %v5357_v48  ;;  %5550 = vst [vmem:[%s12265_s27 + $0x2a8] sm:$0xff] %v5358_v19  ;;  %v5003_v10 = vmul.f32 %v7172_v50, %v14681_v14  ;;  %v14689_v33 = vld [vmem:[#allocation101_spill] sm:$0xff]  ;;  %v14693_v62 = vld [vmem:[#allocation166_spill] sm:$0xff] }
 0x634   : > { %5551 = vst [vmem:[%s12265_s27 + $0x2b0] sm:$0xff] %v5359_v45  ;;  %5552 = vst [vmem:[%s12265_s27 + $0x2b8] sm:$0xff] %v5360_v40  ;;  %v5004_v28 = vmul.f32 %v7172_v50, %v14682_v21  ;;  %v5223_v46 = vmul.f32 %v12209_v47, %v4999_v60  ;;  %v5224_v34 = vmul.f32 %v12212_v0, %v5000_v17  ;;  %v14690_v60 = vld [vmem:[#allocation102_spill] sm:$0xff]  ;;  %v14694_v14 = vld [vmem:[#allocation140_spill] sm:$0xff] }
 0x635   : > { %v7174_v1 = vpop.eup %7173  ;;  %5553 = vst [vmem:[%s12265_s27 + $0x2c0] sm:$0xff] %v5361_v41  ;;  %5554 = vst [vmem:[%s12265_s27 + $0x2c8] sm:$0xff] %v5362_v3  ;;  %v5225_v35 = vmul.f32 %v12215_v18, %v5001_v53  ;;  %v5226_v29 = vmul.f32 %v12218_v55, %v5002_v5  ;;  %v5227_v43 = vmul.f32 %v12221_v32, %v5003_v10  ;;  %v14691_v41 = vld [vmem:[#allocation114_spill] sm:$0xff] }
 0x636   : > { %v5005_v9 = vmul.f32 %v7174_v1, %v14683_v2  ;;  %v5006_v44 = vmul.f32 %v7174_v1, %v14684_v58  ;;  %v5228_v49 = vmul.f32 %v12224_v54, %v5004_v28  ;;  %v5447_v11 = vadd.f32 %v12227_v22, %v5223_v46  ;;  %v14696_v2 = vld [vmem:[#allocation65_spill] sm:$0xff] }
 0x637   : > { %v5448_v16 = vadd.f32 %v12230_v13, %v5224_v34  ;;  %v7176_v51 = vpop.eup %7175  ;;  %v5449_v24 = vadd.f32 %v12233_v52, %v5225_v35  ;;  %v5450_v56 = vadd.f32 %v12236_v30, %v5226_v29  ;;  %v5007_v63 = vmul.f32 %v7174_v1, %v14685_v20  ;;  %v14695_v35 = vld [vmem:[#allocation64_spill] sm:$0xff] }
 0x638   : > { %v5008_v7 = vmul.f32 %v7174_v1, %v14686_v27  ;;  %v5451_v15 = vadd.f32 %v12239_v59, %v5227_v43  ;;  %v5452_v6 = vadd.f32 %v12246_v8, %v5228_v49  ;;  %5639 = vst [vmem:[%s12265_s27 + $0x570] sm:$0xff] %v5447_v11  ;;  %v5009_v50 = vmul.f32 %v7174_v1, %v14687_v23  ;;  %v7178_v25 = vpop.eup %7177 }
 0x639   : > { %5640 = vst [vmem:[%s12265_s27 + $0x578] sm:$0xff] %v5448_v16  ;;  %v5010_v26 = vmul.f32 %v7174_v1, %v14688_v36  ;;  %5641 = vst [vmem:[%s12265_s27 + $0x580] sm:$0xff] %v5449_v24  ;;  %v5229_v61 = vmul.f32 %v12209_v47, %v5005_v9  ;;  %v5230_v4 = vmul.f32 %v12212_v0, %v5006_v44 }
 0x63a   : > { %5642 = vst [vmem:[%s12265_s27 + $0x588] sm:$0xff] %v5450_v56  ;;  %v5231_v37 = vmul.f32 %v12215_v18, %v5007_v63  ;;  %v5232_v31 = vmul.f32 %v12218_v55, %v5008_v7  ;;  %5643 = vst [vmem:[%s12265_s27 + $0x590] sm:$0xff] %v5451_v15  ;;  %v5233_v57 = vmul.f32 %v12221_v32, %v5009_v50  ;;  %v14698_v56 = vld [vmem:[#allocation175_spill] sm:$0xff]  ;;  %v14699_v7 = vld [vmem:[#allocation177_spill] sm:$0xff] }
 0x63b   : > { %5644 = vst [vmem:[%s12265_s27 + $0x598] sm:$0xff] %v5452_v6  ;;  %v5234_v42 = vmul.f32 %v12224_v54, %v5010_v26  ;;  %v4915_v39 = vmul.f32 %v7176_v51, %v14689_v33  ;;  %v4916_v38 = vmul.f32 %v7176_v51, %v14690_v60  ;;  %v5453_v17 = vadd.f32 %v12227_v22, %v5229_v61  ;;  %v14700_v6 = vld [vmem:[#allocation176_spill] sm:$0xff] }
 0x63c   : > { %v5454_v1 = vadd.f32 %v12230_v13, %v5230_v4  ;;  %v5455_v48 = vadd.f32 %v12233_v52, %v5231_v37  ;;  %v5456_v19 = vadd.f32 %v12236_v30, %v5232_v31  ;;  %v5457_v45 = vadd.f32 %v12239_v59, %v5233_v57 }
 0x63d   : > { %v5458_v40 = vadd.f32 %v12246_v8, %v5234_v42  ;;  %v4917_v3 = vmul.f32 %v7176_v51, %v14691_v41  ;;  %v4918_v53 = vmul.f32 %v7176_v51, %v14692_v12  ;;  %5645 = vst [vmem:[%s12265_s27 + $0x5a0] sm:$0xff] %v5453_v17  ;;  %v4919_v5 = vmul.f32 %v7176_v51, %v14693_v62 }
 0x63e   : > { %5646 = vst [vmem:[%s12265_s27 + $0x5a8] sm:$0xff] %v5454_v1  ;;  %5647 = vst [vmem:[%s12265_s27 + $0x5b0] sm:$0xff] %v5455_v48  ;;  %v4920_v10 = vmul.f32 %v7176_v51, %v14694_v14  ;;  %v5139_v21 = vmul.f32 %v12209_v47, %v4915_v39  ;;  %v5140_v28 = vmul.f32 %v12212_v0, %v4916_v38  ;;  %v14697_v51 = vld [vmem:[#allocation138_spill] sm:$0xff] }
 0x63f   : > { %5648 = vst [vmem:[%s12265_s27 + $0x5b8] sm:$0xff] %v5456_v19  ;;  %5649 = vst [vmem:[%s12265_s27 + $0x5c0] sm:$0xff] %v5457_v45  ;;  %v5141_v46 = vmul.f32 %v12215_v18, %v4917_v3  ;;  %v5142_v34 = vmul.f32 %v12218_v55, %v4918_v53  ;;  %v5011_v29 = vmul.f32 %v7178_v25, %v14695_v35 }
 0x640   : > { %5650 = vst [vmem:[%s12265_s27 + $0x5c8] sm:$0xff] %v5458_v40  ;;  %v5012_v9 = vmul.f32 %v7178_v25, %v14696_v2  ;;  %v5143_v58 = vmul.f32 %v12221_v32, %v4919_v5  ;;  %v5144_v44 = vmul.f32 %v12224_v54, %v4920_v10  ;;  %v5363_v43 = vadd.f32 %v12227_v22, %v5139_v21 }
 0x641   : > { %v5364_v49 = vadd.f32 %v12230_v13, %v5140_v28  ;;  %v5365_v11 = vadd.f32 %v12233_v52, %v5141_v46  ;;  %v5366_v16 = vadd.f32 %v12236_v30, %v5142_v34  ;;  %v5013_v24 = vmul.f32 %v7178_v25, %v14697_v51 }
 0x642   : > { %v5014_v20 = vmul.f32 %v7178_v25, %v14698_v56  ;;  %v5367_v63 = vadd.f32 %v12239_v59, %v5143_v58  ;;  %v5368_v27 = vadd.f32 %v12246_v8, %v5144_v44  ;;  %5555 = vst [vmem:[%s12265_s27 + $0x2d0] sm:$0xff] %v5363_v43  ;;  %v5015_v15 = vmul.f32 %v7178_v25, %v14699_v7 }
 0x643   : > { %5556 = vst [vmem:[%s12265_s27 + $0x2d8] sm:$0xff] %v5364_v49  ;;  %v5016_v23 = vmul.f32 %v7178_v25, %v14700_v6  ;;  %5557 = vst [vmem:[%s12265_s27 + $0x2e0] sm:$0xff] %v5365_v11  ;;  %v5235_v50 = vmul.f32 %v12209_v47, %v5011_v29  ;;  %v5236_v36 = vmul.f32 %v12212_v0, %v5012_v9 }
 0x644   : > { %5558 = vst [vmem:[%s12265_s27 + $0x2e8] sm:$0xff] %v5366_v16  ;;  %v5237_v26 = vmul.f32 %v12215_v18, %v5013_v24  ;;  %v5238_v61 = vmul.f32 %v12218_v55, %v5014_v20  ;;  %5559 = vst [vmem:[%s12265_s27 + $0x2f0] sm:$0xff] %v5367_v63  ;;  %v5239_v25 = vmul.f32 %v12221_v32, %v5015_v15 }
 0x645   : > { %5560 = vst [vmem:[%s12265_s27 + $0x2f8] sm:$0xff] %v5368_v27  ;;  %v5240_v47 = vmul.f32 %v12224_v54, %v5016_v23  ;;  %v5459_v0 = vadd.f32 %v12227_v22, %v5235_v50  ;;  %v5460_v4 = vadd.f32 %v12230_v13, %v5236_v36 }
 0x646   : > { %v5461_v18 = vadd.f32 %v12233_v52, %v5237_v26  ;;  %v5462_v55 = vadd.f32 %v12236_v30, %v5238_v61  ;;  %v5463_v37 = vadd.f32 %v12239_v59, %v5239_v25 }
 0x647   : > { %v5464_v32 = vadd.f32 %v12246_v8, %v5240_v47  ;;  %5651 = vst [vmem:[%s12265_s27 + $0x5d0] sm:$0xff] %v5459_v0  ;;  %5652 = vst [vmem:[%s12265_s27 + $0x5d8] sm:$0xff] %v5460_v4 }
 0x648   : > { %5653 = vst [vmem:[%s12265_s27 + $0x5e0] sm:$0xff] %v5461_v18  ;;  %5654 = vst [vmem:[%s12265_s27 + $0x5e8] sm:$0xff] %v5462_v55 }
 0x649   : > { %5655 = vst [vmem:[%s12265_s27 + $0x5f0] sm:$0xff] %v5463_v37  ;;  %5656 = vst [vmem:[%s12265_s27 + $0x5f8] sm:$0xff] %v5464_v32 }
 0x64a   : > { %7573 = shalt.err (!%p7570_p4)
}
 0x64b   : > { %s7574_s7 = scalar_lea.hbm %s13119_s13, 24576  ;;  %s7578_s8 = scalar_lea.hbm %s13179_s6, 49152 }
 0x64c   : > { %p7575_p11 = scmp.ne.s32.totalorder %s13119_s13, %s7574_s7  ;;  %p7579_p1 = scmp.lt.u32.totalorder %s13119_s13, %s13179_s6 }
 0x64d   : > { %p7580_p2 = scmp.lt.u32.totalorder %s7578_s8, %s7574_s7  ;;  %p7582_p0 = scmp.lt.u32.totalorder %s7574_s7, %s13119_s13 }
 0x64e   : > { %p7576_p7 = pnand %p7575_p11, %p7852_p10 }
 0x64f   : > { %p7581_p13 = por %p7580_p2, %p7579_p1 }
 0x650   : > { %p7577_p12 = pneg %p7576_p7 }
 0x651   : > { %p7583_p6 = por %p7582_p0, %p7581_p13 }
 0x653   : > { %p7584_p8 = pnand %p7583_p6, %p7577_p12 }
 0x655   : > { %7587 = shalt.err (!%p7584_p8)
}
 0x656   : > { %s7653_s30 = smov 768   ;;  %s7654_s27 = smov 48  }
 0x657   : > { %7039 = dma.vmem_to_hbm [thread:$0]  (%p7852_p10), %s13123_s25, 24576, %s13119_s13, %s5658_s26, %s7653_s30, %s7653_s30, %s7654_s27  }
 0x658 PF: > { %s5687_s19 = sand.u32 1, %s7630_s21   ;;  %p14701_p3 = scmp.ne.s32.totalorder %s13574_s28, 0 }
 0x659   : > { %p14702_p5 = scmp.ge.s32.totalorder %s7642_s24, 2  ;;  %s5688_s17 = scalar_lea.sflag [#allocation4], %s5687_s19 }
 0x65b   : > { %p7062_p9 = pnand %p14702_p5, %p14701_p3 }
 0x65d   : > { %7625 = dma.done.wait (!%p7062_p9), %s5688_s17, 24576  }
 0x65e   : > { %7627 = vsyncadd (!%p7062_p9), %s5688_s17, 4294942720  ;;  %p24_p4 = scmp.ge.s32.totalorder %s7842_s18, 4   ;;  %s14703_s21 = smov %s7634_s22 }
 0x65f   : > { %s14704_s22 = smov %s7638_s23  ;;  %s14705_s23 = smov %s7858_s16 }
 0x660   : > { %s14706_s24 = smov %s7842_s18  ;;  %26 = sbr.rel (!%p24_p4) target bundleno = 13 (0xd), region = 118 }
 0x667   :  { %5693 = vsyncpa [#allocation3], 1 }
 0x668   :  { %5695 = vsyncpa [#allocation3 + $0x1], 1 }
 0x669   :  { %5696 = vsyncpa [#allocation6], 1 }
 0x66a   :  { %5697 = vsyncpa [#allocation9], 1 }
 0x66b   :  { %5699 = vsyncpa [#allocation9 + $0x1], 1 }
 0x66c   :  { %5700 = vsyncpa [#allocation12], 1 }
 0x66d   :  { %5701 = vsyncpa [#allocation4], 1 }
 0x66e   :  { %5703 = vsyncpa [#allocation4 + $0x1], 1 }

</bundles_post_ra>
